<compile_context>
chip_gen: v7x
topology: tpu7x:2x2x1
jax: 0.10.0
libtpu: 0.0.40
codegen_flags: <defaults>
</compile_context>

<pallas_src>
import jax
import jax.numpy as jnp
from jax.experimental import pallas as pl
from jax.experimental.pallas import tpu as pltpu

KP = 34      # keypoints (module default kp=34)
DIM = 3      # coordinate dim (module default dim=3)
HID = 256    # hidden_dim (module default 256)


def _transform_net_kernel(
    x_ref,
    w1_ref, b1_ref, w2_ref, b2_ref, w3_ref, b3_ref,
    fw1_ref, fb1_ref, fw2_ref, fb2_ref, fw3_ref, fb3_ref,
    out_ref,
):
  """One grid step processes TB batch elements (BN pre-folded into w/b)."""
  tb, kpp, dim = x_ref.shape

  def lin_relu(h, w_ref, b_ref):
    # (possibly bf16) operands -> MXU, f32 accumulation; bias+ReLU in f32.
    h = jnp.dot(h.astype(w_ref.dtype), w_ref[...],
                preferred_element_type=jnp.float32)
    return jnp.maximum(h + b_ref[...], 0.0)

  # ---- Layer 1 (K = dim = 3): three broadcast FMAs on the VPU, f32 --------
  # Avoids feeding a lane-sparse (M, 3) operand through the MXU.
  x = x_ref[...].reshape(tb * kpp, dim)          # kpp % 8 == 0 -> no-op cast
  h = b1_ref[...]                                # (1, 64), broadcasts to (M, 64)
  for d in range(dim):                           # static, fully unrolled
    h = h + x[:, d:d + 1] * w1_ref[d:d + 1, :]
  h = jnp.maximum(h, 0.0)                        # (TB*KPP, 64)

  # ---- conv2 / conv3 as matmuls with M = TB*KPP rows -----------------------
  h = lin_relu(h, w2_ref, b2_ref)                # (TB*KPP, 128)
  h = lin_relu(h, w3_ref, b3_ref)                # (TB*KPP, HID)

  # ---- MaxPool2d((KP, 1)): max over keypoints.  Padded rows duplicate real
  # keypoints, so the max over KPP rows equals the max over KP rows.
  # Split reduce: VPU vreg-vs-vreg maxima over the kpp//8 groups, then one
  # 8-deep sublane reduce.
  hid = h.shape[-1]
  h3 = h.reshape(tb, kpp, hid)
  g = h3[:, 0:8, :]
  for i in range(1, kpp // 8):                   # static, aligned slices
    g = jnp.maximum(g, h3[:, 8 * i:8 * (i + 1), :])
  g = jnp.max(g, axis=1)                         # (TB, HID)

  # ---- FC head with M = TB -------------------------------------------------
  g = lin_relu(g, fw1_ref, fb1_ref)              # (TB, HID//2)
  g = lin_relu(g, fw2_ref, fb2_ref)              # (TB, HID//4)
  y = jnp.dot(g.astype(fw3_ref.dtype), fw3_ref[...],
              preferred_element_type=jnp.float32)
  out_ref[...] = y + fb3_ref[...]                # fb3 already includes +I


def _fold_params(params, matmul_dtype=jnp.bfloat16):
  """Fold eval-mode BatchNorm (scale s, shift t) into the preceding layer.

  MXU-bound weights (conv2/conv3/fc1/fc2/fc3) are cast to `matmul_dtype`;
  biases and the VPU layer-1 weights stay f32.
  """
  (w1, b1, s1, t1, w2, b2, s2, t2, w3, b3, s3, t3,
   fw1, fb1, s4, t4, fw2, fb2, s5, t5, fw3, fb3, eye_flat) = params

  def fold(w, b, s, t):
    return w * s, b * s + t          # (Cin,Cout)*(1,Cout) ; (1,Cout)

  w1f, b1f = fold(w1, b1, s1, t1)
  w2f, b2f = fold(w2, b2, s2, t2)
  w3f, b3f = fold(w3, b3, s3, t3)
  fw1f, fb1f = fold(fw1, fb1, s4, t4)
  fw2f, fb2f = fold(fw2, fb2, s5, t5)
  fb3f = fb3 + eye_flat

  cast = lambda w: w.astype(matmul_dtype)
  return (w1f, b1f,                              # layer 1 stays f32 (VPU)
          cast(w2f), b2f, cast(w3f), b3f,
          cast(fw1f), fb1f, cast(fw2f), fb2f, cast(fw3), fb3f)


def transform_net(x, params, *, tb=None, matmul_dtype=jnp.bfloat16):
  """x: (B, KP, DIM) float32 -> (B, DIM, DIM) float32 (eval-mode BN)."""
  B, kp, dim = x.shape
  folded = _fold_params(params, matmul_dtype)

  # Pad keypoints up to a multiple of 8 by replicating leading keypoints:
  # keeps in-kernel reshapes tile-aligned and leaves the max-pool unchanged.
  kpp = ((kp + 7) // 8) * 8
  if kpp != kp:
    x = jnp.concatenate([x, x[:, : kpp - kp]], axis=1)

  # Per-step batch tile: a multiple of 32 (exact 256-row MXU passes on
  # v6e/v7x with kpp=40, and a multiple of v5e's 128-row granularity), capped
  # at 128 so the live activation set stays within v5e's 16 MiB scoped-VMEM
  # default (and well under v7x's 64 MiB physical VMEM).  Large B therefore
  # yields >= 2 grid steps, keeping both v7x TensorCores busy via the
  # "parallel" grid axis.
  if tb is None:
    tb = min(128, ((B + 31) // 32) * 32)
  b_pad = pl.cdiv(B, tb) * tb
  if b_pad != B:
    x = jnp.concatenate([x, jnp.zeros((b_pad - B, kpp, dim), x.dtype)], axis=0)

  def const_spec(p):
    # Grid-invariant parameter: constant block index -> fetched once.
    return pl.BlockSpec(p.shape, lambda b, _n=p.ndim: (0,) * _n)

  in_specs = [pl.BlockSpec((tb, kpp, dim), lambda b: (b, 0, 0))]
  in_specs += [const_spec(p) for p in folded]

  hid = folded[4].shape[1]
  flops = 2 * b_pad * (
      kpp * (dim * 64 + 64 * 128 + 128 * hid)
      + hid * (hid // 2) + (hid // 2) * (hid // 4) + (hid // 4) * dim * dim)
  bytes_accessed = (
      int(x.size) * x.dtype.itemsize
      + sum(int(p.size) * p.dtype.itemsize for p in folded)
      + b_pad * dim * dim * 4)
  cost = pl.CostEstimate(flops=flops, transcendentals=0,
                         bytes_accessed=bytes_accessed)

  out = pl.pallas_call(
      _transform_net_kernel,
      out_shape=jax.ShapeDtypeStruct((b_pad, dim * dim), jnp.float32),
      grid=(b_pad // tb,),
      in_specs=in_specs,
      out_specs=pl.BlockSpec((tb, dim * dim), lambda b: (b, 0)),
      compiler_params=pltpu.CompilerParams(
          dimension_semantics=("parallel",)),
      cost_estimate=cost,
  )(x, *folded)
  return out[:B].reshape(B, dim, dim)


def init_params(key, kp=KP, dim=DIM, hid=HID):
  """Deterministic synthetic parameters (conv/linear weights + BN stats)."""
  eps = 1e-5
  keys = iter(jax.random.split(key, 32))

  def lin(shape):
    fan_in = float(shape[0])
    w = jax.random.normal(next(keys), shape, jnp.float32) / jnp.sqrt(fan_in)
    b = 0.1 * jax.random.normal(next(keys), (1, shape[1]), jnp.float32)
    return w, b

  def bn(c):
    gamma = 1.0 + 0.1 * jax.random.normal(next(keys), (1, c), jnp.float32)
    beta = 0.1 * jax.random.normal(next(keys), (1, c), jnp.float32)
    mean = 0.1 * jax.random.normal(next(keys), (1, c), jnp.float32)
    var = 1.0 + 0.1 * jnp.abs(jax.random.normal(next(keys), (1, c), jnp.float32))
    scale = gamma / jnp.sqrt(var + eps)
    shift = beta - mean * scale
    return scale, shift

  w1, b1 = lin((dim, 64));              s1, t1 = bn(64)         # cnn1 + norm1
  w2, b2 = lin((64, 128));              s2, t2 = bn(128)        # cnn2 + norm2
  w3, b3 = lin((128, hid));             s3, t3 = bn(hid)        # cnn3 + norm3
  fw1, fb1 = lin((hid, hid // 2));      s4, t4 = bn(hid // 2)   # fc1 + norm4
  fw2, fb2 = lin((hid // 2, hid // 4)); s5, t5 = bn(hid // 4)   # fc2 + norm5
  fw3, fb3 = lin((hid // 4, dim * dim))                         # fc3
  eye_flat = jnp.eye(dim, dtype=jnp.float32).reshape(1, dim * dim)
  return (w1, b1, s1, t1, w2, b2, s2, t2, w3, b3, s3, t3,
          fw1, fb1, s4, t4, fw2, fb2, s5, t5, fw3, fb3, eye_flat)


def transform_net_ref(x, params):
  """Pure-JAX f32 reference (unfolded BN) for correctness check."""
  (w1, b1, s1, t1, w2, b2, s2, t2, w3, b3, s3, t3,
   fw1, fb1, s4, t4, fw2, fb2, s5, t5, fw3, fb3, eye_flat) = params

  def lbr(h, w, b, s, t):
    h = h @ w + b
    return jnp.maximum(h * s + t, 0.0)

  h = lbr(x, w1, b1, s1, t1)
  h = lbr(h, w2, b2, s2, t2)
  h = lbr(h, w3, b3, s3, t3)
  g = jnp.max(h, axis=1)
  g = lbr(g, fw1, fb1, s4, t4)
  g = lbr(g, fw2, fb2, s5, t5)
  y = g @ fw3 + fb3 + eye_flat
  return y.reshape(x.shape[0], DIM, DIM)


if __name__ == "__main__":
  key = jax.random.PRNGKey(0)
  k_x, k_p = jax.random.split(key)
  B = 2
  x = jax.random.normal(k_x, (B, KP, DIM), jnp.float32)
  params = init_params(k_p)
  ref = transform_net_ref(x, params)

  # Exact f32 path: tight agreement with the unfolded-BN reference.
  out_f32 = jax.block_until_ready(
      transform_net(x, params, matmul_dtype=jnp.float32))
  assert out_f32.shape == (B, DIM, DIM)
  assert bool(jnp.allclose(out_f32, ref, atol=5e-4, rtol=5e-4)), \
      "f32 mismatch vs reference"

  # Default bf16-MXU path: tolerance loosened for bf16 operand rounding.
  out_bf16 = jax.block_until_ready(transform_net(x, params))
  assert out_bf16.shape == (B, DIM, DIM)
  assert bool(jnp.allclose(out_bf16, ref, atol=5e-2, rtol=5e-2)), \
      "bf16 mismatch vs reference"

  print("KERNEL_OK")
</pallas_src>

<mosaic_0001>
module attributes {stable_mosaic.version = 11 : i64} {
  func.func @_transform_net_kernel(%arg0: i32, %arg1: memref<32x40x3xf32, #tpu.memory_space<vmem>>, %arg2: memref<3x64xf32, #tpu.memory_space<vmem>>, %arg3: memref<1x64xf32, #tpu.memory_space<vmem>>, %arg4: memref<64x128xf32, #tpu.memory_space<vmem>>, %arg5: memref<1x128xf32, #tpu.memory_space<vmem>>, %arg6: memref<128x256xf32, #tpu.memory_space<vmem>>, %arg7: memref<1x256xf32, #tpu.memory_space<vmem>>, %arg8: memref<256x128xf32, #tpu.memory_space<vmem>>, %arg9: memref<1x128xf32, #tpu.memory_space<vmem>>, %arg10: memref<128x64xf32, #tpu.memory_space<vmem>>, %arg11: memref<1x64xf32, #tpu.memory_space<vmem>>, %arg12: memref<64x9xf32, #tpu.memory_space<vmem>>, %arg13: memref<1x9xf32, #tpu.memory_space<vmem>>, %arg14: memref<32x9xf32, #tpu.memory_space<vmem>>) attributes {dimension_semantics = [#tpu.dimension_semantics<parallel>], iteration_bounds = array<i64: 1>, scalar_prefetch = 0 : i64, scratch_operands = 0 : i64, tpu.core_type = #tpu.core_type<tc>, window_params = [{transform_indices = @transform_0, window_bounds = array<i64: 32, 40, 3>}, {pipeline_mode = #tpu.pipeline_mode<synchronous>, transform_indices = @transform_1, window_bounds = array<i64: 3, 64>}, {pipeline_mode = #tpu.pipeline_mode<synchronous>, transform_indices = @transform_2, window_bounds = array<i64: 1, 64>}, {pipeline_mode = #tpu.pipeline_mode<synchronous>, transform_indices = @transform_3, window_bounds = array<i64: 64, 128>}, {pipeline_mode = #tpu.pipeline_mode<synchronous>, transform_indices = @transform_4, window_bounds = array<i64: 1, 128>}, {pipeline_mode = #tpu.pipeline_mode<synchronous>, transform_indices = @transform_5, window_bounds = array<i64: 128, 256>}, {pipeline_mode = #tpu.pipeline_mode<synchronous>, transform_indices = @transform_6, window_bounds = array<i64: 1, 256>}, {pipeline_mode = #tpu.pipeline_mode<synchronous>, transform_indices = @transform_7, window_bounds = array<i64: 256, 128>}, {pipeline_mode = #tpu.pipeline_mode<synchronous>, transform_indices = @transform_8, window_bounds = array<i64: 1, 128>}, {pipeline_mode = #tpu.pipeline_mode<synchronous>, transform_indices = @transform_9, window_bounds = array<i64: 128, 64>}, {pipeline_mode = #tpu.pipeline_mode<synchronous>, transform_indices = @transform_10, window_bounds = array<i64: 1, 64>}, {pipeline_mode = #tpu.pipeline_mode<synchronous>, transform_indices = @transform_11, window_bounds = array<i64: 64, 9>}, {pipeline_mode = #tpu.pipeline_mode<synchronous>, transform_indices = @transform_12, window_bounds = array<i64: 1, 9>}, {transform_indices = @transform_13, window_bounds = array<i64: 32, 9>}]} {
    %c0 = arith.constant 0 : index
    %c0_0 = arith.constant 0 : index
    %c0_1 = arith.constant 0 : index
    %0 = vector.load %arg1[%c0, %c0_0, %c0_1] : memref<32x40x3xf32, #tpu.memory_space<vmem>>, vector<32x40x3xf32>
    %1 = vector.shape_cast %0 : vector<32x40x3xf32> to vector<1280x3xf32>
    %c0_2 = arith.constant 0 : index
    %c0_3 = arith.constant 0 : index
    %2 = vector.load %arg3[%c0_2, %c0_3] : memref<1x64xf32, #tpu.memory_space<vmem>>, vector<1x64xf32>
    %3 = vector.extract_strided_slice %1 {offsets = [0, 0], sizes = [1280, 1], strides = [1, 1]} : vector<1280x3xf32> to vector<1280x1xf32>
    %c0_4 = arith.constant 0 : index
    %c0_5 = arith.constant 0 : index
    %4 = vector.load %arg2[%c0_4, %c0_5] : memref<3x64xf32, #tpu.memory_space<vmem>>, vector<1x64xf32>
    %5 = vector.broadcast %3 : vector<1280x1xf32> to vector<1280x64xf32>
    %6 = vector.broadcast %4 : vector<1x64xf32> to vector<1280x64xf32>
    %7 = arith.mulf %5, %6 : vector<1280x64xf32>
    %8 = vector.broadcast %2 : vector<1x64xf32> to vector<1280x64xf32>
    %9 = arith.addf %8, %7 : vector<1280x64xf32>
    %10 = vector.extract_strided_slice %1 {offsets = [0, 1], sizes = [1280, 1], strides = [1, 1]} : vector<1280x3xf32> to vector<1280x1xf32>
    %c1 = arith.constant 1 : index
    %c0_6 = arith.constant 0 : index
    %11 = vector.load %arg2[%c1, %c0_6] : memref<3x64xf32, #tpu.memory_space<vmem>>, vector<1x64xf32>
    %12 = vector.broadcast %10 : vector<1280x1xf32> to vector<1280x64xf32>
    %13 = vector.broadcast %11 : vector<1x64xf32> to vector<1280x64xf32>
    %14 = arith.mulf %12, %13 : vector<1280x64xf32>
    %15 = arith.addf %9, %14 : vector<1280x64xf32>
    %16 = vector.extract_strided_slice %1 {offsets = [0, 2], sizes = [1280, 1], strides = [1, 1]} : vector<1280x3xf32> to vector<1280x1xf32>
    %c2 = arith.constant 2 : index
    %c0_7 = arith.constant 0 : index
    %17 = vector.load %arg2[%c2, %c0_7] : memref<3x64xf32, #tpu.memory_space<vmem>>, vector<1x64xf32>
    %18 = vector.broadcast %16 : vector<1280x1xf32> to vector<1280x64xf32>
    %19 = vector.broadcast %17 : vector<1x64xf32> to vector<1280x64xf32>
    %20 = arith.mulf %18, %19 : vector<1280x64xf32>
    %21 = arith.addf %15, %20 : vector<1280x64xf32>
    %cst = arith.constant 0.000000e+00 : f32
    %22 = vector.broadcast %cst : f32 to vector<1280x64xf32>
    %23 = arith.maximumf %21, %22 : vector<1280x64xf32>
    %c0_8 = arith.constant 0 : index
    %c0_9 = arith.constant 0 : index
    %24 = vector.load %arg4[%c0_8, %c0_9] : memref<64x128xf32, #tpu.memory_space<vmem>>, vector<64x128xf32>
    %cst_10 = arith.constant dense<0.000000e+00> : vector<1280x128xf32>
    %25 = tpu.matmul %23, %24, %cst_10 {dimension_numbers = #tpu.dot_dimension_numbers<[1], [0], [0], [1], [0, 0, 1, 1], [], []>} : vector<1280x64xf32>, vector<64x128xf32>, vector<1280x128xf32> -> vector<1280x128xf32>
    %c0_11 = arith.constant 0 : index
    %c0_12 = arith.constant 0 : index
    %26 = vector.load %arg5[%c0_11, %c0_12] : memref<1x128xf32, #tpu.memory_space<vmem>>, vector<1x128xf32>
    %27 = vector.broadcast %26 : vector<1x128xf32> to vector<1280x128xf32>
    %28 = arith.addf %25, %27 : vector<1280x128xf32>
    %cst_13 = arith.constant 0.000000e+00 : f32
    %29 = vector.broadcast %cst_13 : f32 to vector<1280x128xf32>
    %30 = arith.maximumf %28, %29 : vector<1280x128xf32>
    %c0_14 = arith.constant 0 : index
    %c0_15 = arith.constant 0 : index
    %31 = vector.load %arg6[%c0_14, %c0_15] : memref<128x256xf32, #tpu.memory_space<vmem>>, vector<128x256xf32>
    %cst_16 = arith.constant dense<0.000000e+00> : vector<1280x256xf32>
    %32 = tpu.matmul %30, %31, %cst_16 {dimension_numbers = #tpu.dot_dimension_numbers<[1], [0], [0], [1], [0, 0, 1, 1], [], []>} : vector<1280x128xf32>, vector<128x256xf32>, vector<1280x256xf32> -> vector<1280x256xf32>
    %c0_17 = arith.constant 0 : index
    %c0_18 = arith.constant 0 : index
    %33 = vector.load %arg7[%c0_17, %c0_18] : memref<1x256xf32, #tpu.memory_space<vmem>>, vector<1x256xf32>
    %34 = vector.broadcast %33 : vector<1x256xf32> to vector<1280x256xf32>
    %35 = arith.addf %32, %34 : vector<1280x256xf32>
    %cst_19 = arith.constant 0.000000e+00 : f32
    %36 = vector.broadcast %cst_19 : f32 to vector<1280x256xf32>
    %37 = arith.maximumf %35, %36 : vector<1280x256xf32>
    %38 = vector.shape_cast %37 : vector<1280x256xf32> to vector<32x40x256xf32>
    %39 = vector.extract_strided_slice %38 {offsets = [0, 0, 0], sizes = [32, 8, 256], strides = [1, 1, 1]} : vector<32x40x256xf32> to vector<32x8x256xf32>
    %40 = vector.extract_strided_slice %38 {offsets = [0, 8, 0], sizes = [32, 8, 256], strides = [1, 1, 1]} : vector<32x40x256xf32> to vector<32x8x256xf32>
    %41 = arith.maximumf %39, %40 : vector<32x8x256xf32>
    %42 = vector.extract_strided_slice %38 {offsets = [0, 16, 0], sizes = [32, 8, 256], strides = [1, 1, 1]} : vector<32x40x256xf32> to vector<32x8x256xf32>
    %43 = arith.maximumf %41, %42 : vector<32x8x256xf32>
    %44 = vector.extract_strided_slice %38 {offsets = [0, 24, 0], sizes = [32, 8, 256], strides = [1, 1, 1]} : vector<32x40x256xf32> to vector<32x8x256xf32>
    %45 = arith.maximumf %43, %44 : vector<32x8x256xf32>
    %46 = vector.extract_strided_slice %38 {offsets = [0, 32, 0], sizes = [32, 8, 256], strides = [1, 1, 1]} : vector<32x40x256xf32> to vector<32x8x256xf32>
    %47 = arith.maximumf %45, %46 : vector<32x8x256xf32>
    %cst_20 = arith.constant dense<0xFF800000> : vector<32x256xf32>
    %48 = vector.multi_reduction <maximumf>, %47, %cst_20 [1] : vector<32x8x256xf32> to vector<32x256xf32>
    %c0_21 = arith.constant 0 : index
    %c0_22 = arith.constant 0 : index
    %49 = vector.load %arg8[%c0_21, %c0_22] : memref<256x128xf32, #tpu.memory_space<vmem>>, vector<256x128xf32>
    %cst_23 = arith.constant dense<0.000000e+00> : vector<32x128xf32>
    %50 = tpu.matmul %48, %49, %cst_23 {dimension_numbers = #tpu.dot_dimension_numbers<[1], [0], [0], [1], [0, 0, 1, 1], [], []>} : vector<32x256xf32>, vector<256x128xf32>, vector<32x128xf32> -> vector<32x128xf32>
    %c0_24 = arith.constant 0 : index
    %c0_25 = arith.constant 0 : index
    %51 = vector.load %arg9[%c0_24, %c0_25] : memref<1x128xf32, #tpu.memory_space<vmem>>, vector<1x128xf32>
    %52 = vector.broadcast %51 : vector<1x128xf32> to vector<32x128xf32>
    %53 = arith.addf %50, %52 : vector<32x128xf32>
    %cst_26 = arith.constant 0.000000e+00 : f32
    %54 = vector.broadcast %cst_26 : f32 to vector<32x128xf32>
    %55 = arith.maximumf %53, %54 : vector<32x128xf32>
    %c0_27 = arith.constant 0 : index
    %c0_28 = arith.constant 0 : index
    %56 = vector.load %arg10[%c0_27, %c0_28] : memref<128x64xf32, #tpu.memory_space<vmem>>, vector<128x64xf32>
    %cst_29 = arith.constant dense<0.000000e+00> : vector<32x64xf32>
    %57 = tpu.matmul %55, %56, %cst_29 {dimension_numbers = #tpu.dot_dimension_numbers<[1], [0], [0], [1], [0, 0, 1, 1], [], []>} : vector<32x128xf32>, vector<128x64xf32>, vector<32x64xf32> -> vector<32x64xf32>
    %c0_30 = arith.constant 0 : index
    %c0_31 = arith.constant 0 : index
    %58 = vector.load %arg11[%c0_30, %c0_31] : memref<1x64xf32, #tpu.memory_space<vmem>>, vector<1x64xf32>
    %59 = vector.broadcast %58 : vector<1x64xf32> to vector<32x64xf32>
    %60 = arith.addf %57, %59 : vector<32x64xf32>
    %cst_32 = arith.constant 0.000000e+00 : f32
    %61 = vector.broadcast %cst_32 : f32 to vector<32x64xf32>
    %62 = arith.maximumf %60, %61 : vector<32x64xf32>
    %c0_33 = arith.constant 0 : index
    %c0_34 = arith.constant 0 : index
    %63 = vector.load %arg12[%c0_33, %c0_34] : memref<64x9xf32, #tpu.memory_space<vmem>>, vector<64x9xf32>
    %cst_35 = arith.constant dense<0.000000e+00> : vector<32x9xf32>
    %64 = tpu.matmul %62, %63, %cst_35 {dimension_numbers = #tpu.dot_dimension_numbers<[1], [0], [0], [1], [0, 0, 1, 1], [], []>} : vector<32x64xf32>, vector<64x9xf32>, vector<32x9xf32> -> vector<32x9xf32>
    %c0_36 = arith.constant 0 : index
    %c0_37 = arith.constant 0 : index
    %65 = vector.load %arg13[%c0_36, %c0_37] : memref<1x9xf32, #tpu.memory_space<vmem>>, vector<1x9xf32>
    %66 = vector.broadcast %65 : vector<1x9xf32> to vector<32x9xf32>
    %67 = arith.addf %64, %66 : vector<32x9xf32>
    %c0_38 = arith.constant 0 : index
    %c0_39 = arith.constant 0 : index
    %68 = vector.load %arg14[%c0_38, %c0_39] : memref<32x9xf32, #tpu.memory_space<vmem>>, vector<32x9xf32>
    tpu.vector_store %arg14[%c0_38, %c0_39], %67 {strides = array<i32>} : memref<32x9xf32, #tpu.memory_space<vmem>>, vector<32x9xf32>,
    return
  }
  func.func @transform_0(%arg0: i32) -> (i32, i32, i32) {
    %c0_i32 = arith.constant 0 : i32
    %c0_i32_0 = arith.constant 0 : i32
    %c0_i32_1 = arith.constant 0 : i32
    return %arg0, %c0_i32, %c0_i32_0 : i32, i32, i32
  }
  func.func @transform_1(%arg0: i32) -> (i32, i32) {
    %c0_i32 = arith.constant 0 : i32
    %c0_i32_0 = arith.constant 0 : i32
    %c0_i32_1 = arith.constant 0 : i32
    return %c0_i32, %c0_i32_0 : i32, i32
  }
  func.func @transform_2(%arg0: i32) -> (i32, i32) {
    %c0_i32 = arith.constant 0 : i32
    %c0_i32_0 = arith.constant 0 : i32
    %c0_i32_1 = arith.constant 0 : i32
    return %c0_i32, %c0_i32_0 : i32, i32
  }
  func.func @transform_3(%arg0: i32) -> (i32, i32) {
    %c0_i32 = arith.constant 0 : i32
    %c0_i32_0 = arith.constant 0 : i32
    %c0_i32_1 = arith.constant 0 : i32
    return %c0_i32, %c0_i32_0 : i32, i32
  }
  func.func @transform_4(%arg0: i32) -> (i32, i32) {
    %c0_i32 = arith.constant 0 : i32
    %c0_i32_0 = arith.constant 0 : i32
    %c0_i32_1 = arith.constant 0 : i32
    return %c0_i32, %c0_i32_0 : i32, i32
  }
  func.func @transform_5(%arg0: i32) -> (i32, i32) {
    %c0_i32 = arith.constant 0 : i32
    %c0_i32_0 = arith.constant 0 : i32
    %c0_i32_1 = arith.constant 0 : i32
    return %c0_i32, %c0_i32_0 : i32, i32
  }
  func.func @transform_6(%arg0: i32) -> (i32, i32) {
    %c0_i32 = arith.constant 0 : i32
    %c0_i32_0 = arith.constant 0 : i32
    %c0_i32_1 = arith.constant 0 : i32
    return %c0_i32, %c0_i32_0 : i32, i32
  }
  func.func @transform_7(%arg0: i32) -> (i32, i32) {
    %c0_i32 = arith.constant 0 : i32
    %c0_i32_0 = arith.constant 0 : i32
    %c0_i32_1 = arith.constant 0 : i32
    return %c0_i32, %c0_i32_0 : i32, i32
  }
  func.func @transform_8(%arg0: i32) -> (i32, i32) {
    %c0_i32 = arith.constant 0 : i32
    %c0_i32_0 = arith.constant 0 : i32
    %c0_i32_1 = arith.constant 0 : i32
    return %c0_i32, %c0_i32_0 : i32, i32
  }
  func.func @transform_9(%arg0: i32) -> (i32, i32) {
    %c0_i32 = arith.constant 0 : i32
    %c0_i32_0 = arith.constant 0 : i32
    %c0_i32_1 = arith.constant 0 : i32
    return %c0_i32, %c0_i32_0 : i32, i32
  }
  func.func @transform_10(%arg0: i32) -> (i32, i32) {
    %c0_i32 = arith.constant 0 : i32
    %c0_i32_0 = arith.constant 0 : i32
    %c0_i32_1 = arith.constant 0 : i32
    return %c0_i32, %c0_i32_0 : i32, i32
  }
  func.func @transform_11(%arg0: i32) -> (i32, i32) {
    %c0_i32 = arith.constant 0 : i32
    %c0_i32_0 = arith.constant 0 : i32
    %c0_i32_1 = arith.constant 0 : i32
    return %c0_i32, %c0_i32_0 : i32, i32
  }
  func.func @transform_12(%arg0: i32) -> (i32, i32) {
    %c0_i32 = arith.constant 0 : i32
    %c0_i32_0 = arith.constant 0 : i32
    %c0_i32_1 = arith.constant 0 : i32
    return %c0_i32, %c0_i32_0 : i32, i32
  }
  func.func @transform_13(%arg0: i32) -> (i32, i32) {
    %c0_i32 = arith.constant 0 : i32
    %c0_i32_0 = arith.constant 0 : i32
    return %arg0, %c0_i32 : i32, i32
  }
}

</mosaic_0001>

<bundles_post_ra>
// kernel: tpu_custom_call.1
= control target key start
LH: loop header
LB: loop body
LE: loop exit
PB: predicated region body
PF: predicated region fallthrough
CT: control target
= control target key end

     0   :  { %v12870_v0 = vmov 0   ;;  %v12874_v46 = vmov 1   ;;  %v12872_v47 = vmov 2   ;;  %vm3441_vm0 = vcmask 523264   ;;  %s12856_s0 = inlined_call_operand.vmem [shape: f32[32,40,3], index: 0, kind: input, shape index: {}]   ;;  %s12857_s3 = inlined_call_operand.vmem [shape: f32[64,128], index: 3, kind: input, shape index: {}]   ;;  %s12858_s1 = inlined_call_operand.vmem [shape: f32[3,64], index: 1, kind: input, shape index: {}]   ;;  %s12859_s2 = inlined_call_operand.vmem [shape: f32[1,64], index: 2, kind: input, shape index: {}]   ;;  %s12860_s5 = inlined_call_operand.vmem [shape: f32[128,256], index: 5, kind: input, shape index: {}]   ;;  %s12861_s4 = inlined_call_operand.vmem [shape: f32[1,128], index: 4, kind: input, shape index: {}]   ;;  %s12862_s6 = inlined_call_operand.vmem [shape: f32[1,256], index: 6, kind: input, shape index: {}]   ;;  %s12863_s7 = inlined_call_operand.vmem [shape: f32[256,128], index: 7, kind: input, shape index: {}]   ;;  %s12864_s9 = inlined_call_operand.vmem [shape: f32[128,64], index: 9, kind: input, shape index: {}]   ;;  %s12865_s11 = inlined_call_operand.vmem [shape: f32[64,9], index: 11, kind: input, shape index: {}]   ;;  %s12866_s8 = inlined_call_operand.vmem [shape: f32[1,128], index: 8, kind: input, shape index: {}]   ;;  %s12867_s10 = inlined_call_operand.vmem [shape: f32[1,64], index: 10, kind: input, shape index: {}]   ;;  %s12868_s12 = inlined_call_operand.vmem [shape: f32[1,9], index: 12, kind: input, shape index: {}]   ;;  %s12869_s13 = inlined_call_operand.vmem [shape: f32[32,9], index: 13, kind: output, shape index: {}]  }
   0x1   :  { %8353 = vset.pattern.permute.xlu1 %v12870_v0  ;;  %8352 = vset.pattern.permute.xlu0 %v12870_v0  ;;  %v8738_v1 = vld [vmem:[%s12856_s0 + $0x10] sm:$0xff]  ;;  %v8743_v2 = vld [vmem:[%s12856_s0] sm:$0xff]  ;;  %v8750_v3 = vld [vmem:[%s12856_s0 + $0x18] sm:$0xff]  ;;  %vm7079_vm1 = vcmask 1041409   ;;  %vm7081_vm2 = vcmask 1042434   ;;  %vm7083_vm3 = vcmask 1043459  }
   0x2   :  { %218 = vperm.xlu1 %8353, %v8738_v1   ;;  %208 = vperm.xlu0 %8352, %v8743_v2   ;;  %v8755_v4 = vld [vmem:[%s12856_s0 + $0x8] sm:$0xff]  ;;  %v8767_v6 = vld [vmem:[%s12856_s0 + $0x20] sm:$0xff]  ;;  %v8774_v7 = vld [vmem:[%s12856_s0 + $0x38] sm:$0xff]  ;;  %vm7085_vm4 = vcmask 1044484   ;;  %vm7087_vm5 = vcmask 1045509   ;;  %vm7089_vm6 = vcmask 1046534  }
   0x3   :  { %v8762_v5 = vld [vmem:[%s12856_s0 + $0x28] sm:$0xff]  ;;  %v8779_v8 = vld [vmem:[%s12856_s0 + $0x30] sm:$0xff]  ;;  %v8791_v10 = vld [vmem:[%s12856_s0 + $0x40] sm:$0xff]  ;;  %vm7091_vm7 = vcmask 1047559   ;;  %vm7463_vm8 = vcmask 72704  }
   0x4   :  { %v8786_v9 = vld [vmem:[%s12856_s0 + $0x48] sm:$0xff]  ;;  %v8798_v11 = vld [vmem:[%s12856_s0 + $0x58] sm:$0xff]  ;;  %v8803_v12 = vld [vmem:[%s12856_s0 + $0x50] sm:$0xff] }
   0x5   :  { %v8810_v13 = vld [vmem:[%s12856_s0 + $0x68] sm:$0xff]  ;;  %v8815_v14 = vld [vmem:[%s12856_s0 + $0x60] sm:$0xff]  ;;  %v8822_v15 = vld [vmem:[%s12856_s0 + $0x78] sm:$0xff] }
   0x6   :  { %223 = vperm.xlu1 %8353, %v8750_v3   ;;  %213 = vperm.xlu0 %8352, %v8755_v4   ;;  %v8827_v16 = vld [vmem:[%s12856_s0 + $0x70] sm:$0xff]  ;;  %v8834_v17 = vld [vmem:[%s12856_s0 + $0x88] sm:$0xff]  ;;  %v8839_v18 = vld [vmem:[%s12856_s0 + $0x80] sm:$0xff] }
   0x7   :  { %v8846_v19 = vld [vmem:[%s12856_s0 + $0x98] sm:$0xff]  ;;  %v8851_v20 = vld [vmem:[%s12856_s0 + $0x90] sm:$0xff]  ;;  %v8858_v21 = vld [vmem:[%s12856_s0 + $0xa8] sm:$0xff] }
   0x8   :  { %v8863_v22 = vld [vmem:[%s12856_s0 + $0xa0] sm:$0xff]  ;;  %v8870_v23 = vld [vmem:[%s12856_s0 + $0xb8] sm:$0xff]  ;;  %v8875_v24 = vld [vmem:[%s12856_s0 + $0xb0] sm:$0xff] }
   0x9   :  { %v8882_v25 = vld [vmem:[%s12856_s0 + $0xc8] sm:$0xff]  ;;  %v8887_v26 = vld [vmem:[%s12856_s0 + $0xc0] sm:$0xff]  ;;  %v8894_v27 = vld [vmem:[%s12856_s0 + $0xd8] sm:$0xff] }
   0xa   :  { %233 = vperm.xlu1 %8353, %v8762_v5   ;;  %228 = vperm.xlu0 %8352, %v8767_v6   ;;  %v8899_v28 = vld [vmem:[%s12856_s0 + $0xd0] sm:$0xff]  ;;  %v8906_v29 = vld [vmem:[%s12856_s0 + $0xe8] sm:$0xff]  ;;  %v8911_v30 = vld [vmem:[%s12856_s0 + $0xe0] sm:$0xff] }
   0xb   :  { %v8918_v31 = vld [vmem:[%s12856_s0 + $0xf8] sm:$0xff]  ;;  %v8923_v32 = vld [vmem:[%s12856_s0 + $0xf0] sm:$0xff]  ;;  %v8930_v33 = vld [vmem:[%s12856_s0 + $0x108] sm:$0xff] }
   0xc   :  { %v8935_v34 = vld [vmem:[%s12856_s0 + $0x100] sm:$0xff]  ;;  %v8942_v35 = vld [vmem:[%s12856_s0 + $0x118] sm:$0xff]  ;;  %v8947_v36 = vld [vmem:[%s12856_s0 + $0x110] sm:$0xff] }
   0xd   :  { %v8954_v37 = vld [vmem:[%s12856_s0 + $0x128] sm:$0xff]  ;;  %v8959_v38 = vld [vmem:[%s12856_s0 + $0x120] sm:$0xff]  ;;  %v8966_v39 = vld [vmem:[%s12856_s0 + $0x138] sm:$0xff] }
   0xe   :  { %243 = vperm.xlu1 %8353, %v8774_v7   ;;  %238 = vperm.xlu0 %8352, %v8779_v8   ;;  %v8971_v40 = vld [vmem:[%s12856_s0 + $0x130] sm:$0xff]  ;;  %v8978_v41 = vld [vmem:[%s12856_s0 + $0x148] sm:$0xff]  ;;  %v8983_v42 = vld [vmem:[%s12856_s0 + $0x140] sm:$0xff] }
   0xf   :  { %v8990_v43 = vld [vmem:[%s12856_s0 + $0x158] sm:$0xff]  ;;  %v8995_v44 = vld [vmem:[%s12856_s0 + $0x150] sm:$0xff]  ;;  %v9002_v45 = vld [vmem:[%s12856_s0 + $0x160] sm:$0xff] }
  0x10   :  { %12895 = vst [vmem:[#allocation2_spill] sm:$0xff] %v8990_v43  ;;  %v3426_v48 = vld [vmem:[%s12857_s3] sm:$0xff]  ;;  %v3427_v49 = vld [vmem:[%s12857_s3 + $0x8] sm:$0xff]  ;;  %v3428_v53 = vld [vmem:[%s12857_s3 + $0x10] sm:$0xff] }
  0x11   :  { %v8204_v50 = vpack.c.bf16 %v3427_v49, %v3426_v48  ;;  %v3429_v54 = vld [vmem:[%s12857_s3 + $0x18] sm:$0xff]  ;;  %v3430_v58 = vld [vmem:[%s12857_s3 + $0x20] sm:$0xff]  ;;  %v3431_v59 = vld [vmem:[%s12857_s3 + $0x28] sm:$0xff] }
  0x12   :  { %253 = vperm.xlu1 %8353, %v8786_v9   ;;  %248 = vperm.xlu0 %8352, %v8791_v10   ;;  %v8208_v55 = vpack.c.bf16 %v3429_v54, %v3428_v53  ;;  %v8212_v60 = vpack.c.bf16 %v3431_v59, %v3430_v58  ;;  %v3432_v63 = vld [vmem:[%s12857_s3 + $0x30] sm:$0xff] }
  0x13   :  { %8205 = vmatprep.subr.bf16.mxu0 %v8204_v50 }
  0x14   :  { %8207 = vmatpush3.bf16.msra.mxu0 %v8204_v50 }
  0x15   :  { %8209 = vmatprep.subr.bf16.mxu0 %v8208_v55 }
  0x16   :  { %263 = vperm.xlu1 %8353, %v8798_v11   ;;  %258 = vperm.xlu0 %8352, %v8803_v12  }
  0x18   :  { %8211 = vmatpush3.bf16.msra.mxu0 %v8208_v55 }
  0x19   :  { %8213 = vmatprep.subr.bf16.mxu0 %v8212_v60 }
  0x1a   :  { %273 = vperm.xlu1 %8353, %v8810_v13   ;;  %268 = vperm.xlu0 %8352, %v8815_v14  }
  0x1c   :  { %8215 = vmatpush3.bf16.msra.mxu0 %v8212_v60 }
  0x1e   :  { %283 = vperm.xlu1 %8353, %v8822_v15   ;;  %278 = vperm.xlu0 %8352, %v8827_v16  }
  0x22   :  { %293 = vperm.xlu1 %8353, %v8834_v17   ;;  %288 = vperm.xlu0 %8352, %v8839_v18  }
  0x26   :  { %303 = vperm.xlu1 %8353, %v8846_v19   ;;  %298 = vperm.xlu0 %8352, %v8851_v20  }
  0x2a   :  { %313 = vperm.xlu1 %8353, %v8858_v21   ;;  %308 = vperm.xlu0 %8352, %v8863_v22  }
  0x2e   :  { %323 = vperm.xlu1 %8353, %v8870_v23   ;;  %318 = vperm.xlu0 %8352, %v8875_v24  }
  0x32   :  { %333 = vperm.xlu1 %8353, %v8882_v25   ;;  %328 = vperm.xlu0 %8352, %v8887_v26  }
  0x36   :  { %343 = vperm.xlu1 %8353, %v8894_v27   ;;  %338 = vperm.xlu0 %8352, %v8899_v28  }
  0x3a   :  { %353 = vperm.xlu1 %8353, %v8906_v29   ;;  %348 = vperm.xlu0 %8352, %v8911_v30  }
  0x3e   :  { %363 = vperm.xlu1 %8353, %v8918_v31   ;;  %358 = vperm.xlu0 %8352, %v8923_v32  }
  0x42   :  { %373 = vperm.xlu1 %8353, %v8930_v33   ;;  %368 = vperm.xlu0 %8352, %v8935_v34  }
  0x46   :  { %383 = vperm.xlu1 %8353, %v8942_v35   ;;  %378 = vperm.xlu0 %8352, %v8947_v36  }
  0x4a   :  { %393 = vperm.xlu1 %8353, %v8954_v37   ;;  %388 = vperm.xlu0 %8352, %v8959_v38  }
  0x4e   :  { %403 = vperm.xlu1 %8353, %v8966_v39   ;;  %398 = vperm.xlu0 %8352, %v8971_v40  }
  0x52   :  { %413 = vperm.xlu1 %8353, %v8978_v41   ;;  %408 = vperm.xlu0 %8352, %v8983_v42  }
  0x56   :  { %423 = vperm.xlu1 %8353, %v8990_v43   ;;  %418 = vperm.xlu0 %8352, %v8995_v44  }
  0x5a   :  { %8354 = vset.pattern.permute.xlu1 %v12874_v46  ;;  %428 = vperm.xlu0 %8352, %v9002_v45  }
  0x5b   :  { %1338 = vperm.xlu1 %8354, %v8743_v2  }
  0x5e   :  { %8357 = vset.pattern.permute.xlu0 %v12872_v47 }
  0x5f   :  { %8355 = vset.pattern.permute.xlu1 %v12872_v47  ;;  %2311 = vperm.xlu0 %8357, %v8738_v1  }
  0x60   :  { %2303 = vperm.xlu1 %8355, %v8743_v2   ;;  %v3433_v2 = vld [vmem:[%s12857_s3 + $0x38] sm:$0xff] }
  0x63   :  { %2327 = vperm.xlu0 %8357, %v8779_v8  }
  0x64   :  { %2307 = vperm.xlu1 %8355, %v8755_v4  }
  0x67   :  { %2343 = vperm.xlu0 %8357, %v8803_v12  }
  0x68   :  { %8356 = vset.pattern.permute.xlu1 %v12874_v46 }
  0x69   :  { %1350 = vperm.xlu1 %8356, %v8750_v3  }
  0x6b   :  { %2359 = vperm.xlu0 %8357, %v8827_v16  }
  0x6d   :  { %8358 = vset.pattern.permute.xlu1 %v12872_v47 }
  0x6e   :  { %2315 = vperm.xlu1 %8358, %v8750_v3   ;;  %v8216_v3 = vpack.c.bf16 %v3433_v2, %v3432_v63 }
  0x6f   :  { %2375 = vperm.xlu0 %8357, %v8851_v20  }
  0x70   :  { %8217 = vmatprep.subr.bf16.mxu0 %v8216_v3 }
  0x71   :  { %8219 = vmatpush3.bf16.msra.mxu0 %v8216_v3 }
  0x72   :  { %8359 = vset.pattern.permute.xlu1 %v12874_v46 }
  0x73   :  { %1354 = vperm.xlu1 %8359, %v8767_v6   ;;  %2391 = vperm.xlu0 %8357, %v8875_v24  }
  0x77   :  { %8360 = vset.pattern.permute.xlu1 %v12872_v47  ;;  %2407 = vperm.xlu0 %8357, %v8899_v28  }
  0x78   :  { %2319 = vperm.xlu1 %8360, %v8767_v6  }
  0x7b   :  { %2423 = vperm.xlu0 %8357, %v8923_v32  }
  0x7c   :  { %2323 = vperm.xlu1 %8360, %v8762_v5  }
  0x7f   :  { %2439 = vperm.xlu0 %8357, %v8947_v36  }
  0x80   :  { %8361 = vset.pattern.permute.xlu1 %v12874_v46 }
  0x81   :  { %v9036_v51 = vpop.permute.xlu1 %218  ;;  %1366 = vperm.xlu1 %8361, %v8774_v7   ;;  %v9039_v52 = vpop.permute.xlu0 %208 }
  0x83   :  { %2455 = vperm.xlu0 %8357, %v8971_v40  }
  0x85   :  { %v9048_v56 = vpop.permute.xlu1 %223  ;;  %8362 = vset.pattern.permute.xlu1 %v12872_v47  ;;  %v9051_v57 = vpop.permute.xlu0 %213 }
  0x86   :  { %2331 = vperm.xlu1 %8362, %v8774_v7  }
  0x87   :  { %8394 = vset.pattern.permute.xlu0 %v12874_v46 }
  0x88   :  { %1342 = vperm.xlu0 %8394, %v8755_v4  }
  0x89   :  { %v9062_v61 = vpop.permute.xlu1 %233  ;;  %v9064_v62 = vpop.permute.xlu0 %228 }
  0x8a   :  { %8363 = vset.pattern.permute.xlu1 %v12874_v46 }
  0x8b   :  { %1370 = vperm.xlu1 %8363, %v8791_v10  }
  0x8c   :  { %1346 = vperm.xlu0 %8394, %v8738_v1  }
  0x8d   :  { %v9075_v4 = vpop.permute.xlu1 %243  ;;  %v9077_v6 = vpop.permute.xlu0 %238 }
  0x8f   :  { %8364 = vset.pattern.permute.xlu1 %v12872_v47 }
  0x90   :  { %2335 = vperm.xlu1 %8364, %v8791_v10   ;;  %1358 = vperm.xlu0 %8394, %v8762_v5  }
  0x91   :  { %v9082_v7 = vpop.permute.xlu1 %253  ;;  %v9084_v48 = vpop.permute.xlu0 %248 }
  0x94   :  { %2339 = vperm.xlu1 %8364, %v8786_v9   ;;  %1362 = vperm.xlu0 %8394, %v8779_v8  }
  0x95   :  { %v9088_v1 = vpop.permute.xlu1 %263  ;;  %v9090_v49 = vpop.permute.xlu0 %258 }
  0x98   :  { %8365 = vset.pattern.permute.xlu1 %v12874_v46  ;;  %1374 = vperm.xlu0 %8394, %v8786_v9  }
  0x99   :  { %v9094_v50 = vpop.permute.xlu1 %273  ;;  %1382 = vperm.xlu1 %8365, %v8798_v11   ;;  %v9097_v5 = vpop.permute.xlu0 %268 }
  0x9c   :  { %1378 = vperm.xlu0 %8394, %v8803_v12  }
  0x9d   :  { %v9100_v10 = vpop.permute.xlu1 %283  ;;  %8366 = vset.pattern.permute.xlu1 %v12872_v47  ;;  %v9103_v8 = vpop.permute.xlu0 %278 }
  0x9e   :  { %2347 = vperm.xlu1 %8366, %v8798_v11  }
  0xa0   :  { %1390 = vperm.xlu0 %8394, %v8810_v13  }
  0xa1   :  { %v9107_v53 = vpop.permute.xlu1 %293  ;;  %v9109_v9 = vpop.permute.xlu0 %288 }
  0xa2   :  { %8367 = vset.pattern.permute.xlu1 %v12874_v46 }
  0xa3   :  { %1386 = vperm.xlu1 %8367, %v8815_v14  }
  0xa4   :  { %1394 = vperm.xlu0 %8394, %v8827_v16  }
  0xa5   :  { %v9114_v12 = vpop.permute.xlu1 %303  ;;  %v9116_v54 = vpop.permute.xlu0 %298 }
  0xa7   :  { %8368 = vset.pattern.permute.xlu1 %v12872_v47 }
  0xa8   :  { %2351 = vperm.xlu1 %8368, %v8815_v14   ;;  %1406 = vperm.xlu0 %8394, %v8834_v17  }
  0xa9   :  { %v9121_v11 = vpop.permute.xlu1 %313  ;;  %v9123_v55 = vpop.permute.xlu0 %308 }
  0xaa   :  { %12896 = vst [vmem:[#allocation3_spill] sm:$0xff] %v9121_v11 }
  0xac   :  { %2355 = vperm.xlu1 %8368, %v8810_v13   ;;  %1410 = vperm.xlu0 %8394, %v8851_v20  }
  0xad   :  { %v9127_v58 = vpop.permute.xlu1 %323  ;;  %v9129_v16 = vpop.permute.xlu0 %318 }
  0xae   :  { %12897 = vst [vmem:[#allocation4_spill] sm:$0xff] %v9127_v58 }
  0xb0   :  { %8369 = vset.pattern.permute.xlu1 %v12874_v46  ;;  %1422 = vperm.xlu0 %8394, %v8858_v21  }
  0xb1   :  { %v9133_v59 = vpop.permute.xlu1 %333  ;;  %1398 = vperm.xlu1 %8369, %v8822_v15   ;;  %v9136_v14 = vpop.permute.xlu0 %328 }
  0xb2   :  { %12898 = vst [vmem:[#allocation5_spill] sm:$0xff] %v9133_v59  ;;  %12899 = vst [vmem:[#allocation6_spill] sm:$0xff] %v9136_v14 }
  0xb4   :  { %1426 = vperm.xlu0 %8394, %v8875_v24  }
  0xb5   :  { %v9139_v60 = vpop.permute.xlu1 %343  ;;  %8370 = vset.pattern.permute.xlu1 %v12872_v47  ;;  %v9142_v13 = vpop.permute.xlu0 %338 }
  0xb6   :  { %12900 = vst [vmem:[#allocation7_spill] sm:$0xff] %v9139_v60  ;;  %12901 = vst [vmem:[#allocation8_spill] sm:$0xff] %v9142_v13  ;;  %2363 = vperm.xlu1 %8370, %v8822_v15  }
  0xb8   :  { %1438 = vperm.xlu0 %8394, %v8882_v25  }
  0xb9   :  { %v9146_v20 = vpop.permute.xlu1 %353  ;;  %v9148_v63 = vpop.permute.xlu0 %348 }
  0xba   :  { %12902 = vst [vmem:[#allocation9_spill] sm:$0xff] %v9146_v20  ;;  %12903 = vst [vmem:[#allocation10_spill] sm:$0xff] %v9148_v63  ;;  %8371 = vset.pattern.permute.xlu1 %v12874_v46  ;;  %v100_v63 = vld [vmem:[%s12856_s0 + $0x1c0] sm:$0xff] }
  0xbb   :  { %1402 = vperm.xlu1 %8371, %v8839_v18  }
  0xbc   :  { %1442 = vperm.xlu0 %8394, %v8899_v28  }
  0xbd   :  { %v9153_v24 = vpop.permute.xlu1 %363  ;;  %v9155_v2 = vpop.permute.xlu0 %358 }
  0xbe   :  { %12904 = vst [vmem:[#allocation11_spill] sm:$0xff] %v9153_v24  ;;  %12905 = vst [vmem:[#allocation12_spill] sm:$0xff] %v9155_v2 }
  0xbf   :  { %8372 = vset.pattern.permute.xlu1 %v12872_v47 }
  0xc0   :  { %2367 = vperm.xlu1 %8372, %v8839_v18   ;;  %1454 = vperm.xlu0 %8394, %v8906_v29  }
  0xc1   :  { %v9160_v15 = vpop.permute.xlu1 %373  ;;  %v9162_v3 = vpop.permute.xlu0 %368 }
  0xc2   :  { %12906 = vst [vmem:[#allocation13_spill] sm:$0xff] %v9160_v15  ;;  %12907 = vst [vmem:[#allocation14_spill] sm:$0xff] %v9162_v3 }
  0xc4   :  { %2371 = vperm.xlu1 %8372, %v8834_v17   ;;  %1458 = vperm.xlu0 %8394, %v8923_v32   ;;  %v12913_v17 = vmov 2  }
  0xc5   :  { %v9166_v0 = vpop.permute.xlu1 %383  ;;  %v9168_v28 = vpop.permute.xlu0 %378 }
  0xc6   :  { %12908 = vst [vmem:[#allocation15_spill] sm:$0xff] %v9166_v0  ;;  %12909 = vst [vmem:[#allocation16_spill] sm:$0xff] %v9168_v28 }
  0xc8   :  { %8373 = vset.pattern.permute.xlu1 %v12874_v46  ;;  %1470 = vperm.xlu0 %8394, %v8930_v33  }
  0xc9   :  { %v9172_v47 = vpop.permute.xlu1 %393  ;;  %1414 = vperm.xlu1 %8373, %v8846_v19   ;;  %v9175_v18 = vpop.permute.xlu0 %388 }
  0xca   :  { %12910 = vst [vmem:[#allocation17_spill] sm:$0xff] %v9172_v47  ;;  %12911 = vst [vmem:[#allocation18_spill] sm:$0xff] %v9175_v18  ;;  %v12917_v47 = vmov 1  }
  0xcc   :  { %1474 = vperm.xlu0 %8394, %v8947_v36  }
  0xcd   :  { %v9178_v15 = vpop.permute.xlu1 %403  ;;  %8374 = vset.pattern.permute.xlu1 %v12913_v17  ;;  %v9181_v32 = vpop.permute.xlu0 %398 }
  0xce   :  { %12912 = vst [vmem:[#allocation19_spill] sm:$0xff] %v9178_v15  ;;  %12914 = vst [vmem:[#allocation20_spill] sm:$0xff] %v9181_v32  ;;  %2379 = vperm.xlu1 %8374, %v8846_v19   ;;  %v9199_v19 = vld [vmem:[%s12858_s1] ss:$0 sm:$0xff] }
  0xcf   :  { %v1015_v58 = vmul.f32 %v9199_v19, %v9062_v61  ;;  %v1017_v61 = vmul.f32 %v9199_v19, %v9075_v4 }
  0xd0   :  { %1486 = vperm.xlu0 %8394, %v8954_v37  }
  0xd1   :  { %v9185_v46 = vpop.permute.xlu1 %413  ;;  %v9187_v0 = vpop.permute.xlu0 %408 }
  0xd2   :  { %12915 = vst [vmem:[#allocation21_spill] sm:$0xff] %v9185_v46  ;;  %12916 = vst [vmem:[#allocation22_spill] sm:$0xff] %v9187_v0  ;;  %8375 = vset.pattern.permute.xlu1 %v12917_v47  ;;  %v1010_v46 = vmul.f32 %v9199_v19, %v9039_v52 }
  0xd3   :  { %1418 = vperm.xlu1 %8375, %v8863_v22  }
  0xd4   :  { %1490 = vperm.xlu0 %8394, %v8971_v40   ;;  %v9209_v40 = vld [vmem:[%s12858_s1 + $0x1] ss:$0 sm:$0xff] }
  0xd5   :  { %v9192_v36 = vpop.permute.xlu1 %423  ;;  %v9194_v15 = vpop.permute.xlu0 %418 }
  0xd6   :  { %12918 = vst [vmem:[#allocation23_spill] sm:$0xff] %v9192_v36  ;;  %12919 = vst [vmem:[#allocation24_spill] sm:$0xff] %v9194_v15  ;;  %v9216_v15 = vld [vmem:[%s12859_s2] ss:$0 sm:$0xff] }
  0xd7   :  { %8376 = vset.pattern.permute.xlu1 %v12913_v17  ;;  %v1176_v18 = vadd.f32 %v9216_v15, %v1010_v46 }
  0xd8   :  { %2383 = vperm.xlu1 %8376, %v8863_v22   ;;  %1502 = vperm.xlu0 %8394, %v8978_v41   ;;  %v9225_v22 = vld [vmem:[%s12858_s1 + $0x2] ss:$0 sm:$0xff] }
  0xd9   :  { %v9211_v36 = vpop.permute.xlu0 %428 }
  0xda   :  { %12920 = vst [vmem:[#allocation25_spill] sm:$0xff] %v9211_v36  ;;  %v1339_v0 = vpop.permute.xlu1 %1338 }
  0xdb   :  { %v1981_v52 = vmul.f32 %v9209_v40, %v1339_v0  ;;  %v9236_v0 = vld [vmem:[%s12856_s0 + $0x170] sm:$0xff] }
  0xdc   :  { %2387 = vperm.xlu1 %8376, %v8858_v21   ;;  %1506 = vperm.xlu0 %8394, %v8995_v44   ;;  %12921 = vst [vmem:[#allocation26_spill] sm:$0xff] %v9236_v0 }
  0xdd   :  { %v2141_v3 = vadd.f32 %v1981_v52, %v1176_v18 }
  0xde   :  { %v9227_v36 = vpop.permute.xlu0 %2311 }
  0xdf   :  { %v2304_v32 = vpop.permute.xlu1 %2303 }
  0xe0   :  { %v2946_v28 = vmul.f32 %v9225_v22, %v2304_v32  ;;  %8377 = vset.pattern.permute.xlu1 %v12917_v47  ;;  %1514 = vperm.xlu0 %8394, %v9002_v45   ;;  %v9245_v45 = vld [vmem:[%s12856_s0 + $0x180] sm:$0xff] }
  0xe1   :  { %1430 = vperm.xlu1 %8377, %v8870_v23   ;;  %12922 = vst [vmem:[#allocation27_spill] sm:$0xff] %v9245_v45 }
  0xe2   :  { %v9238_v21 = vpop.permute.xlu0 %2327  ;;  %v3106_v46 = vadd.f32 %v2946_v28, %v2141_v3  ;;  %v9255_v3 = vld [vmem:[%s12856_s0 + $0x190] sm:$0xff] }
  0xe3   :  { %v2308_v24 = vpop.permute.xlu1 %2307  ;;  %12923 = vst [vmem:[#allocation28_spill] sm:$0xff] %v9255_v3 }
  0xe4   :  { %v3266_v20 = vmax.f32 %v3106_v46, 0.0  ;;  %1522 = vperm.xlu0 %8394, %v9236_v0   ;;  %v9275_v46 = vld [vmem:[%s12856_s0 + $0x1b0] sm:$0xff] }
  0xe5   :  { %8378 = vset.pattern.permute.xlu1 %v12913_v17  ;;  %12925 = vst [vmem:[#allocation30_spill] sm:$0xff] %v9275_v46 }
  0xe6   :  { %2395 = vperm.xlu1 %8378, %v8870_v23   ;;  %7904 = vmatprep.mubr.msk.f32.mxu0 %vm3441_vm0, %v3266_v20  ;;  %v9249_v18 = vpop.permute.xlu0 %2343  ;;  %v9265_v20 = vld [vmem:[%s12856_s0 + $0x1a0] sm:$0xff] }
  0xe7   :  { %12924 = vst [vmem:[#allocation29_spill] sm:$0xff] %v9265_v20 }
  0xe8   :  { %v1351_v32 = vpop.permute.xlu1 %1350  ;;  %1530 = vperm.xlu0 %8394, %v9245_v45  }
  0xea   :  { %8379 = vset.pattern.permute.xlu1 %v12917_v47  ;;  %v9258_v28 = vpop.permute.xlu0 %2359 }
  0xeb   :  { %1434 = vperm.xlu1 %8379, %v8887_v26  }
  0xec   :  { %1538 = vperm.xlu0 %8394, %v9255_v3  }
  0xed   :  { %v2316_v23 = vpop.permute.xlu1 %2315 }
  0xee   :  { %v9267_v52 = vpop.permute.xlu0 %2375  ;;  %v2949_v43 = vmul.f32 %v9225_v22, %v2316_v23 }
  0xef   :  { %8380 = vset.pattern.permute.xlu1 %v12913_v17 }
  0xf0   :  { %2399 = vperm.xlu1 %8380, %v8887_v26   ;;  %1546 = vperm.xlu0 %8394, %v9265_v20   ;;  %v102_v20 = vld [vmem:[%s12856_s0 + $0x1d0] sm:$0xff] }
  0xf2   :  { %v1355_v3 = vpop.permute.xlu1 %1354  ;;  %v9277_v45 = vpop.permute.xlu0 %2391 }
  0xf3   :  { %12926 = vst [vmem:[#allocation31_spill] sm:$0xff] %v9277_v45  ;;  %v1985_v14 = vmul.f32 %v9209_v40, %v1355_v3 }
  0xf4   :  { %2403 = vperm.xlu1 %8380, %v8882_v25   ;;  %1554 = vperm.xlu0 %8394, %v9275_v46  }
  0xf6   :  { %v9284_v2 = vpop.permute.xlu0 %2407 }
  0xf7   :  { %12927 = vst [vmem:[#allocation32_spill] sm:$0xff] %v9284_v2  ;;  %v2320_v26 = vpop.permute.xlu1 %2319 }
  0xf8   :  { %8381 = vset.pattern.permute.xlu1 %v12917_v47  ;;  %1562 = vperm.xlu0 %8394, %v100_v63   ;;  %v1011_v63 = vmul.f32 %v9199_v19, %v9051_v57  ;;  %v1012_v57 = vmul.f32 %v9199_v19, %v9036_v51 }
  0xf9   :  { %1446 = vperm.xlu1 %8381, %v8894_v27  }
  0xfa   :  { %v9291_v60 = vpop.permute.xlu0 %2423 }
  0xfb   :  { %12928 = vst [vmem:[#allocation33_spill] sm:$0xff] %v9291_v60  ;;  %v9293_v25 = vpop.permute.xlu1 %2323 }
  0xfc   :  { %1570 = vperm.xlu0 %8394, %v102_v20  }
  0xfd   :  { %8382 = vset.pattern.permute.xlu1 %v12913_v17 }
  0xfe   :  { %2411 = vperm.xlu1 %8382, %v8894_v27   ;;  %v9297_v46 = vpop.permute.xlu0 %2439  ;;  %v9310_v27 = vld [vmem:[%s12856_s0 + $0x168] sm:$0xff] }
  0xff   :  { %12929 = vst [vmem:[#allocation34_spill] sm:$0xff] %v9297_v46  ;;  %12931 = vst [vmem:[#allocation36_spill] sm:$0xff] %v9310_v27  ;;  %v1177_v46 = vadd.f32 %v9216_v15, %v1011_v63  ;;  %v9326_v63 = vld [vmem:[%s12856_s0 + $0x178] sm:$0xff] }
 0x100   :  { %v1367_v0 = vpop.permute.xlu1 %1366  ;;  %8422 = vset.pattern.permute.xlu0 %v12913_v17  ;;  %12932 = vst [vmem:[#allocation37_spill] sm:$0xff] %v9326_v63 }
 0x101   :  { %2471 = vperm.xlu0 %8422, %v8995_v44   ;;  %v1014_v44 = vmul.f32 %v9199_v19, %v9064_v62  ;;  %v1984_v62 = vmul.f32 %v9209_v40, %v1351_v32 }
 0x102   :  { %8383 = vset.pattern.permute.xlu1 %v12917_v47  ;;  %v9304_v60 = vpop.permute.xlu0 %2455 }
 0x103   :  { %12930 = vst [vmem:[#allocation35_spill] sm:$0xff] %v9304_v60  ;;  %1450 = vperm.xlu1 %8383, %v8911_v30   ;;  %v1013_v60 = vmul.f32 %v9199_v19, %v9048_v56  ;;  %v1180_v51 = vadd.f32 %v9216_v15, %v1014_v44  ;;  %v2947_v56 = vmul.f32 %v9225_v22, %v2308_v24 }
 0x104   :  { %v2950_v44 = vmul.f32 %v9225_v22, %v2320_v26  ;;  %v1181_v26 = vadd.f32 %v9216_v15, %v1015_v58 }
 0x105   :  { %v2332_v20 = vpop.permute.xlu1 %2331  ;;  %2483 = vperm.xlu0 %8422, %v9310_v27  }
 0x107   :  { %8384 = vset.pattern.permute.xlu1 %v12913_v17  ;;  %v1343_v2 = vpop.permute.xlu0 %1342 }
 0x108   :  { %v1982_v59 = vmul.f32 %v9209_v40, %v1343_v2  ;;  %2415 = vperm.xlu1 %8384, %v8911_v30   ;;  %v1178_v2 = vadd.f32 %v9216_v15, %v1012_v57  ;;  %v1179_v30 = vadd.f32 %v9216_v15, %v1013_v60  ;;  %v1016_v60 = vmul.f32 %v9199_v19, %v9077_v6 }
 0x109   :  { %2491 = vperm.xlu0 %8422, %v9326_v63   ;;  %v2948_v63 = vmul.f32 %v9225_v22, %v9227_v36  ;;  %v1018_v36 = vmul.f32 %v9199_v19, %v9084_v48  ;;  %v1183_v6 = vadd.f32 %v9216_v15, %v1017_v61 }
 0x10a   :  { %v2142_v13 = vadd.f32 %v1982_v59, %v1177_v46  ;;  %v1371_v27 = vpop.permute.xlu1 %1370  ;;  %v9346_v59 = vld [vmem:[%s12856_s0 + $0x188] sm:$0xff]  ;;  %v2144_v23 = vadd.f32 %v1984_v62, %v1179_v30  ;;  %v1182_v48 = vadd.f32 %v9216_v15, %v1016_v60  ;;  %v1988_v62 = vmul.f32 %v9209_v40, %v1367_v0 }
 0x10b   :  { %v1347_v32 = vpop.permute.xlu0 %1346  ;;  %v1989_v58 = vmul.f32 %v9209_v40, %v1371_v27  ;;  %v2952_v30 = vmul.f32 %v9225_v22, %v9238_v21 }
 0x10c   :  { %v3107_v24 = vadd.f32 %v2947_v56, %v2142_v13  ;;  %v1983_v3 = vmul.f32 %v9209_v40, %v1347_v32  ;;  %2419 = vperm.xlu1 %8384, %v8906_v29   ;;  %v2145_v13 = vadd.f32 %v1985_v14, %v1180_v51  ;;  %v3109_v57 = vadd.f32 %v2949_v43, %v2144_v23 }
 0x10d   :  { %2499 = vperm.xlu0 %8422, %v9346_v59   ;;  %v1184_v14 = vadd.f32 %v9216_v15, %v1018_v36  ;;  %v2951_v43 = vmul.f32 %v9225_v22, %v9293_v25 }
 0x10e   :  { %v3267_v46 = vmax.f32 %v3107_v24, 0.0  ;;  %v2143_v29 = vadd.f32 %v1983_v3, %v1178_v2  ;;  %v3110_v45 = vadd.f32 %v2950_v44, %v2145_v13  ;;  %v1019_v2 = vmul.f32 %v9199_v19, %v9082_v7 }
 0x10f   :  { %v2336_v56 = vpop.permute.xlu1 %2335  ;;  %v1359_v32 = vpop.permute.xlu0 %1358  ;;  %v3269_v44 = vmax.f32 %v3109_v57, 0.0  ;;  %v2953_v24 = vmul.f32 %v9225_v22, %v2332_v20  ;;  %v2148_v7 = vadd.f32 %v1988_v62, %v1183_v6  ;;  %v2149_v21 = vadd.f32 %v1989_v58, %v1184_v14  ;;  %v9395_v62 = vld [vmem:[%s12856_s0 + $0x198] sm:$0xff] }
 0x110   :  { %v3108_v11 = vadd.f32 %v2948_v63, %v2143_v29  ;;  %v1986_v4 = vmul.f32 %v9209_v40, %v1359_v32  ;;  %8385 = vset.pattern.permute.xlu1 %v12917_v47  ;;  %7905 = vmatmul.mubr.msk.f32.vlgmr.msra.gmra.mrb[0].mxu0 %vm3441_vm0, %v3267_v46  ;;  %v3270_v61 = vmax.f32 %v3110_v45, 0.0  ;;  %v2954_v60 = vmul.f32 %v9225_v22, %v2336_v56 }
 0x111   :  { %1462 = vperm.xlu1 %8385, %v8918_v31   ;;  %v1021_v45 = vmul.f32 %v9199_v19, %v9088_v1  ;;  %v3113_v23 = vadd.f32 %v2953_v24, %v2148_v7  ;;  %v1185_v46 = vadd.f32 %v9216_v15, %v1019_v2  ;;  %2507 = vperm.xlu0 %8422, %v9395_v62  }
 0x112   :  { %v3268_v63 = vmax.f32 %v3108_v11, 0.0  ;;  %v2146_v51 = vadd.f32 %v1986_v4, %v1181_v26  ;;  %v1020_v11 = vmul.f32 %v9199_v19, %v9090_v49  ;;  %v3114_v49 = vadd.f32 %v2954_v60, %v2149_v21 }
 0x113   :  { %v2340_v3 = vpop.permute.xlu1 %2339  ;;  %v1363_v0 = vpop.permute.xlu0 %1362  ;;  %v1187_v1 = vadd.f32 %v9216_v15, %v1021_v45 }
 0x114   :  { %v3111_v36 = vadd.f32 %v2951_v43, %v2146_v51  ;;  %v1987_v25 = vmul.f32 %v9209_v40, %v1363_v0  ;;  %7907 = vmatprep.mubr.msk.f32.mxu0 %vm3441_vm0, %v3268_v63  ;;  %v1186_v56 = vadd.f32 %v9216_v15, %v1020_v11  ;;  %v2956_v43 = vmul.f32 %v9225_v22, %v9249_v18 }
 0x115   :  { %8386 = vset.pattern.permute.xlu1 %v12913_v17  ;;  %7908 = vmatmul.mubr.msk.f32.gmra.mrb[2].mxu0 %vm3441_vm0, %v3269_v44  ;;  %v3274_v58 = vmax.f32 %v3114_v49, 0.0  ;;  %v1024_v18 = vmul.f32 %v9199_v19, %v9103_v8 }
 0x116   :  { %v3271_v27 = vmax.f32 %v3111_v36, 0.0  ;;  %v2147_v20 = vadd.f32 %v1987_v25, %v1182_v48  ;;  %2427 = vperm.xlu1 %8386, %v8918_v31   ;;  %7910 = vmatprep.mubr.msk.f32.mxu0 %vm3441_vm0, %v3270_v61  ;;  %v2955_v31 = vmul.f32 %v9225_v22, %v2340_v3  ;;  %v3273_v48 = vmax.f32 %v3113_v23, 0.0 }
 0x117   :  { %v1375_v13 = vpop.permute.xlu0 %1374  ;;  %v1022_v61 = vmul.f32 %v9199_v19, %v9097_v5  ;;  %v1190_v21 = vadd.f32 %v9216_v15, %v1024_v18  ;;  %v2960_v5 = vmul.f32 %v9225_v22, %v9258_v28 }
 0x118   :  { %v3112_v29 = vadd.f32 %v2952_v30, %v2147_v20  ;;  %v1990_v26 = vmul.f32 %v9209_v40, %v1375_v13  ;;  %v1383_v57 = vpop.permute.xlu1 %1382 }
 0x119   :  { %7911 = vmatmul.mubr.msk.f32.gmra.mrb[4].mxu0 %vm3441_vm0, %v3271_v27  ;;  %v1992_v6 = vmul.f32 %v9209_v40, %v1383_v57  ;;  %v1188_v8 = vadd.f32 %v9216_v15, %v1022_v61 }
 0x11a   :  { %v3272_v32 = vmax.f32 %v3112_v29, 0.0  ;;  %v2150_v4 = vadd.f32 %v1990_v26, %v1185_v46  ;;  %8387 = vset.pattern.permute.xlu1 %v12917_v47 }
 0x11b   :  { %1466 = vperm.xlu1 %8387, %v8935_v34   ;;  %v1379_v14 = vpop.permute.xlu0 %1378  ;;  %v2152_v44 = vadd.f32 %v1992_v6, %v1187_v1  ;;  %v1025_v1 = vmul.f32 %v9199_v19, %v9100_v10  ;;  %v1028_v10 = vmul.f32 %v9199_v19, %v9116_v54 }
 0x11c   :  { %v3115_v63 = vadd.f32 %v2955_v31, %v2150_v4  ;;  %v1991_v51 = vmul.f32 %v9209_v40, %v1379_v14  ;;  %7913 = vmatprep.mubr.msk.f32.mxu0 %vm3441_vm0, %v3272_v32  ;;  %v9435_v4 = vld [vmem:[%s12856_s0 + $0x1a8] sm:$0xff] }
 0x11d   :  { %v2348_v2 = vpop.permute.xlu1 %2347  ;;  %7914 = vmatmul.mubr.msk.f32.gmra.mrb[6].mxu0 %vm3441_vm0, %v3273_v48  ;;  %2515 = vperm.xlu0 %8422, %v9435_v4  }
 0x11e   :  { %v3275_v30 = vmax.f32 %v3115_v63, 0.0  ;;  %v2151_v24 = vadd.f32 %v1991_v51, %v1186_v56  ;;  %v2957_v3 = vmul.f32 %v9225_v22, %v2348_v2  ;;  %7916 = vmatprep.mubr.msk.f32.mxu0 %vm3441_vm0, %v3274_v58 }
 0x11f   :  { %8388 = vset.pattern.permute.xlu1 %v12913_v17  ;;  %v1391_v0 = vpop.permute.xlu0 %1390 }
 0x120   :  { %v3116_v60 = vadd.f32 %v2956_v43, %v2151_v24  ;;  %v3117_v36 = vadd.f32 %v2957_v3, %v2152_v44  ;;  %2431 = vperm.xlu1 %8388, %v8935_v34   ;;  %v1023_v34 = vmul.f32 %v9199_v19, %v9094_v50  ;;  %v1994_v46 = vmul.f32 %v9209_v40, %v1391_v0 }
 0x121   :  { %7917 = vmatmul.mubr.msk.f32.gmra.mrb[8].mxu0 %vm3441_vm0, %v3275_v30  ;;  %v1026_v30 = vmul.f32 %v9199_v19, %v9109_v9  ;;  %v1194_v0 = vadd.f32 %v9216_v15, %v1028_v10  ;;  %v1027_v9 = vmul.f32 %v9199_v19, %v9107_v53 }
 0x122   :  { %v3276_v25 = vmax.f32 %v3116_v60, 0.0  ;;  %v3277_v11 = vmax.f32 %v3117_v36, 0.0  ;;  %v1387_v7 = vpop.permute.xlu1 %1386 }
 0x123   :  { %v1395_v27 = vpop.permute.xlu0 %1394  ;;  %v1993_v20 = vmul.f32 %v9209_v40, %v1387_v7  ;;  %v1192_v60 = vadd.f32 %v9216_v15, %v1026_v30  ;;  %v1193_v53 = vadd.f32 %v9216_v15, %v1027_v9  ;;  %v9524_v30 = vld [vmem:[%s12856_s0 + $0x1f8] sm:$0xff] }
 0x124   :  { %v1995_v45 = vmul.f32 %v9209_v40, %v1395_v27  ;;  %2435 = vperm.xlu1 %8388, %v8930_v33   ;;  %7919 = vmatprep.mubr.msk.f32.mxu0 %vm3441_vm0, %v3276_v25  ;;  %v1189_v33 = vadd.f32 %v9216_v15, %v1023_v34 }
 0x125   :  { %7920 = vmatmul.mubr.msk.f32.gmra.mrb[10].mxu0 %vm3441_vm0, %v3277_v11  ;;  %v2153_v49 = vadd.f32 %v1993_v20, %v1188_v8 }
 0x126   :  { %v2155_v23 = vadd.f32 %v1995_v45, %v1190_v21  ;;  %v2154_v50 = vadd.f32 %v1994_v46, %v1189_v33 }
 0x127   :  { %v2352_v13 = vpop.permute.xlu1 %2351  ;;  %v1407_v58 = vpop.permute.xlu0 %1406 }
 0x128   :  { %v2958_v29 = vmul.f32 %v9225_v22, %v2352_v13  ;;  %8389 = vset.pattern.permute.xlu1 %v12917_v47  ;;  %v3120_v57 = vadd.f32 %v2960_v5, %v2155_v23  ;;  %v1998_v11 = vmul.f32 %v9209_v40, %v1407_v58  ;;  %v1029_v13 = vmul.f32 %v9199_v19, %v9114_v12 }
 0x129   :  { %1478 = vperm.xlu1 %8389, %v8942_v35  }
 0x12a   :  { %v3118_v26 = vadd.f32 %v2958_v29, %v2153_v49  ;;  %v3280_v6 = vmax.f32 %v3120_v57, 0.0  ;;  %v2158_v20 = vadd.f32 %v1998_v11, %v1193_v53  ;;  %v1195_v33 = vadd.f32 %v9216_v15, %v1029_v13 }
 0x12b   :  { %v2356_v56 = vpop.permute.xlu1 %2355  ;;  %v1411_v24 = vpop.permute.xlu0 %1410 }
 0x12c   :  { %v3278_v31 = vmax.f32 %v3118_v26, 0.0  ;;  %v2959_v28 = vmul.f32 %v9225_v22, %v2356_v56  ;;  %v1999_v61 = vmul.f32 %v9209_v40, %v1411_v24 }
 0x12d   :  { %8390 = vset.pattern.permute.xlu1 %v12913_v17 }
 0x12e   :  { %v3119_v32 = vadd.f32 %v2959_v28, %v2154_v50  ;;  %2443 = vperm.xlu1 %8390, %v8942_v35   ;;  %7922 = vmatprep.mubr.msk.f32.mxu0 %vm3441_vm0, %v3278_v31  ;;  %v1191_v35 = vadd.f32 %v9216_v15, %v1025_v1  ;;  %v2159_v54 = vadd.f32 %v1999_v61, %v1194_v0  ;;  %v9499_v31 = vld [vmem:[%s12856_s0 + $0x1d8] sm:$0xff] }
 0x12f   :  { %v1423_v12 = vpop.permute.xlu0 %1422  ;;  %v1032_v50 = vmul.f32 %v9199_v19, %v9129_v16  ;;  %v1030_v28 = vmul.f32 %v9199_v19, %v9123_v55 }
 0x130   :  { %v3279_v48 = vmax.f32 %v3119_v32, 0.0  ;;  %v1399_v14 = vpop.permute.xlu1 %1398 }
 0x131   :  { %v1996_v43 = vmul.f32 %v9209_v40, %v1399_v14  ;;  %v1198_v16 = vadd.f32 %v9216_v15, %v1032_v50 }
 0x132   :  { %8391 = vset.pattern.permute.xlu1 %v12917_v47  ;;  %7923 = vmatmul.mubr.msk.f32.gmra.mrb[12].mxu0 %vm3441_vm0, %v3279_v48 }
 0x133   :  { %1482 = vperm.xlu1 %8391, %v8959_v38   ;;  %7925 = vmatprep.mubr.msk.f32.mxu0 %vm3441_vm0, %v3280_v6  ;;  %v2156_v51 = vadd.f32 %v1996_v43, %v1191_v35  ;;  %v1427_v6 = vpop.permute.xlu0 %1426  ;;  %v9510_v43 = vld [vmem:[%s12856_s0 + $0x1e8] sm:$0xff]  ;;  %v1196_v35 = vadd.f32 %v9216_v15, %v1030_v28 }
 0x134   :  { %v2003_v14 = vmul.f32 %v9209_v40, %v1427_v6 }
 0x135   :  { %v2364_v63 = vpop.permute.xlu1 %2363 }
 0x136   :  { %v2961_v2 = vmul.f32 %v9225_v22, %v2364_v63  ;;  %v12934_v63 = vld [vmem:[#allocation31_spill] sm:$0xff] }
 0x137   :  { %8392 = vset.pattern.permute.xlu1 %v12913_v17 }
 0x138   :  { %v3121_v44 = vadd.f32 %v2961_v2, %v2156_v51  ;;  %2447 = vperm.xlu1 %8392, %v8959_v38   ;;  %v2964_v38 = vmul.f32 %v9225_v22, %v9267_v52  ;;  %v2968_v51 = vmul.f32 %v9225_v22, %v12934_v63  ;;  %v2163_v2 = vadd.f32 %v2003_v14, %v1198_v16  ;;  %v12942_v63 = vld [vmem:[#allocation32_spill] sm:$0xff] }
 0x13a   :  { %v3281_v3 = vmax.f32 %v3121_v44, 0.0  ;;  %v1403_v18 = vpop.permute.xlu1 %1402  ;;  %v3124_v52 = vadd.f32 %v2964_v38, %v2159_v54  ;;  %v2002_v44 = vmul.f32 %v9209_v40, %v1423_v12  ;;  %v3128_v61 = vadd.f32 %v2968_v51, %v2163_v2  ;;  %v115_v12 = vld [vmem:[%s12856_s0 + $0x238] sm:$0xff] }
 0x13b   :  { %v1997_v36 = vmul.f32 %v9209_v40, %v1403_v18  ;;  %v2972_v51 = vmul.f32 %v9225_v22, %v12942_v63  ;;  %v12950_v63 = vld [vmem:[#allocation33_spill] sm:$0xff] }
 0x13c   :  { %2451 = vperm.xlu1 %8392, %v8954_v37   ;;  %7926 = vmatmul.mubr.msk.f32.gmra.mrb[14].mxu0 %vm3441_vm0, %v3281_v3  ;;  %v9470_v37 = vld [vmem:[%s12856_s0 + $0x1b8] sm:$0xff]  ;;  %v3284_v23 = vmax.f32 %v3124_v52, 0.0  ;;  %v12935_v3 = vld [vmem:[#allocation2_spill] sm:$0xff]  ;;  %v3288_v11 = vmax.f32 %v3128_v61, 0.0 }
 0x13d   :  { %v2157_v7 = vadd.f32 %v1997_v36, %v1192_v60  ;;  %2523 = vperm.xlu0 %8422, %v9470_v37   ;;  %v109_v36 = vld [vmem:[%s12856_s0 + $0x208] sm:$0xff]  ;;  %v12943_v61 = vld [vmem:[#allocation26_spill] sm:$0xff] }
 0x13f   :  { %v2368_v25 = vpop.permute.xlu1 %2367 }
 0x140   :  { %v2962_v21 = vmul.f32 %v9225_v22, %v2368_v25  ;;  %8393 = vset.pattern.permute.xlu1 %v12917_v47 }
 0x141   :  { %1494 = vperm.xlu1 %8393, %v8966_v39  }
 0x142   :  { %v3122_v27 = vadd.f32 %v2962_v21, %v2157_v7  ;;  %v111_v7 = vld [vmem:[%s12856_s0 + $0x218] sm:$0xff]  ;;  %v12936_v21 = vld [vmem:[#allocation4_spill] sm:$0xff] }
 0x143   :  { %v2372_v8 = vpop.permute.xlu1 %2371  ;;  %v1033_v53 = vmul.f32 %v9199_v19, %v12936_v21  ;;  %v12944_v21 = vld [vmem:[#allocation37_spill] sm:$0xff] }
 0x144   :  { %v3282_v45 = vmax.f32 %v3122_v27, 0.0  ;;  %v2963_v34 = vmul.f32 %v9225_v22, %v2372_v8  ;;  %v1439_v8 = vpop.permute.xlu0 %1438 }
 0x145   :  { %8395 = vset.pattern.permute.xlu1 %v12913_v17 }
 0x146   :  { %v3123_v5 = vadd.f32 %v2963_v34, %v2158_v20  ;;  %2459 = vperm.xlu1 %8395, %v8966_v39   ;;  %7928 = vmatprep.mubr.msk.f32.mxu0 %vm3441_vm0, %v3282_v45  ;;  %v9488_v39 = vld [vmem:[%s12856_s0 + $0x1c8] sm:$0xff]  ;;  %v12937_v45 = vmov 0   ;;  %v12938_v34 = vld [vmem:[#allocation36_spill] sm:$0xff] }
 0x147   :  { %2531 = vperm.xlu0 %8422, %v9488_v39  }
 0x148   :  { %v3283_v46 = vmax.f32 %v3123_v5, 0.0  ;;  %v1415_v49 = vpop.permute.xlu1 %1414  ;;  %v113_v5 = vld [vmem:[%s12856_s0 + $0x228] sm:$0xff] }
 0x149   :  { %v2000_v29 = vmul.f32 %v9209_v40, %v1415_v49 }
 0x14a   :  { %8396 = vset.pattern.permute.xlu1 %v12917_v47  ;;  %7929 = vmatmul.mubr.msk.f32.gmra.mrb[16].mxu0 %vm3441_vm0, %v3283_v46 }
 0x14b   :  { %1498 = vperm.xlu1 %8396, %v8983_v42   ;;  %7931 = vmatprep.mubr.msk.f32.mxu0 %vm3441_vm0, %v3284_v23  ;;  %v2160_v57 = vadd.f32 %v2000_v29, %v1195_v33  ;;  %v1199_v23 = vadd.f32 %v9216_v15, %v1033_v53  ;;  %v12939_v29 = vld [vmem:[#allocation8_spill] sm:$0xff] }
 0x14c   :  { %2539 = vperm.xlu0 %8422, %v9499_v31   ;;  %v1036_v33 = vmul.f32 %v9199_v19, %v12939_v29 }
 0x14d   :  { %v2380_v26 = vpop.permute.xlu1 %2379 }
 0x14e   :  { %v2965_v56 = vmul.f32 %v9225_v22, %v2380_v26  ;;  %v12940_v26 = vld [vmem:[#allocation6_spill] sm:$0xff]  ;;  %v1202_v6 = vadd.f32 %v9216_v15, %v1036_v33  ;;  %v12946_v33 = vld [vmem:[#allocation12_spill] sm:$0xff] }
 0x14f   :  { %8397 = vset.pattern.permute.xlu1 %v12913_v17 }
 0x150   :  { %v3125_v32 = vadd.f32 %v2965_v56, %v2160_v57  ;;  %2463 = vperm.xlu1 %8397, %v8983_v42   ;;  %2547 = vperm.xlu0 %8422, %v9510_v43   ;;  %v12933_v42 = vld [vmem:[#allocation3_spill] sm:$0xff]  ;;  %v1034_v57 = vmul.f32 %v9199_v19, %v12940_v26  ;;  %v1443_v56 = vpop.permute.xlu0 %1442  ;;  %v12947_v26 = vld [vmem:[#allocation10_spill] sm:$0xff] }
 0x151   :  { %v1031_v58 = vmul.f32 %v9199_v19, %v12933_v42 }
 0x152   :  { %v3285_v1 = vmax.f32 %v3125_v32, 0.0  ;;  %v1419_v48 = vpop.permute.xlu1 %1418  ;;  %v1200_v16 = vadd.f32 %v9216_v15, %v1034_v57  ;;  %v1038_v57 = vmul.f32 %v9199_v19, %v12947_v26  ;;  %v12954_v26 = vld [vmem:[#allocation28_spill] sm:$0xff] }
 0x153   :  { %v2001_v55 = vmul.f32 %v9209_v40, %v1419_v48  ;;  %v1197_v18 = vadd.f32 %v9216_v15, %v1031_v58  ;;  %v117_v48 = vld [vmem:[%s12856_s0 + $0x248] sm:$0xff] }
 0x154   :  { %2467 = vperm.xlu1 %8397, %v8978_v41   ;;  %7932 = vmatmul.mubr.msk.f32.gmra.mrb[18].mxu0 %vm3441_vm0, %v3285_v1  ;;  %v2007_v1 = vmul.f32 %v9209_v40, %v1443_v56  ;;  %v1455_v58 = vpop.permute.xlu0 %1454 }
 0x155   :  { %v2161_v41 = vadd.f32 %v2001_v55, %v1196_v35  ;;  %2555 = vperm.xlu0 %8422, %v9524_v30   ;;  %v2162_v9 = vadd.f32 %v2002_v44, %v1197_v18  ;;  %v8585_v35 = vld [vmem:[%s12856_s0 + $0x160] sm:$0xff]  ;;  %v12941_v55 = vld [vmem:[#allocation5_spill] sm:$0xff] }
 0x156   :  { %v1035_v42 = vmul.f32 %v9199_v19, %v12941_v55  ;;  %v2167_v2 = vadd.f32 %v2007_v1, %v1202_v6  ;;  %v119_v44 = vld [vmem:[%s12856_s0 + $0x258] sm:$0xff] }
 0x157   :  { %v2384_v10 = vpop.permute.xlu1 %2383 }
 0x158   :  { %v2966_v24 = vmul.f32 %v9225_v22, %v2384_v10  ;;  %8398 = vset.pattern.permute.xlu1 %v12917_v47  ;;  %v1201_v18 = vadd.f32 %v9216_v15, %v1035_v42 }
 0x159   :  { %1510 = vperm.xlu1 %8398, %v12935_v3   ;;  %2563 = vperm.xlu0 %8422, %v109_v36  }
 0x15a   :  { %v3126_v0 = vadd.f32 %v2966_v24, %v2161_v41  ;;  %v2006_v41 = vmul.f32 %v9209_v40, %v1439_v8 }
 0x15b   :  { %v2388_v60 = vpop.permute.xlu1 %2387 }
 0x15c   :  { %v3286_v38 = vmax.f32 %v3126_v0, 0.0  ;;  %v2967_v54 = vmul.f32 %v9225_v22, %v2388_v60  ;;  %v3132_v60 = vadd.f32 %v2972_v51, %v2167_v2  ;;  %v2976_v51 = vmul.f32 %v9225_v22, %v12950_v63 }
 0x15d   :  { %8399 = vset.pattern.permute.xlu1 %v12913_v17  ;;  %2571 = vperm.xlu0 %8422, %v111_v7  }
 0x15e   :  { %v3127_v25 = vadd.f32 %v2967_v54, %v2162_v9  ;;  %2475 = vperm.xlu1 %8399, %v12935_v3   ;;  %7934 = vmatprep.mubr.msk.f32.mxu0 %vm3441_vm0, %v3286_v38  ;;  %v121_v9 = vld [vmem:[%s12856_s0 + $0x268] sm:$0xff]  ;;  %v2166_v38 = vadd.f32 %v2006_v41, %v1201_v18  ;;  %v1459_v54 = vpop.permute.xlu0 %1458  ;;  %v3292_v53 = vmax.f32 %v3132_v60, 0.0 }
 0x15f   :  { %v2011_v1 = vmul.f32 %v9209_v40, %v1459_v54 }
 0x160   :  { %v3287_v27 = vmax.f32 %v3127_v25, 0.0  ;;  %v1431_v52 = vpop.permute.xlu1 %1430 }
 0x161   :  { %v2004_v20 = vmul.f32 %v9209_v40, %v1431_v52  ;;  %2579 = vperm.xlu0 %8422, %v113_v5  }
 0x162   :  { %8400 = vset.pattern.permute.xlu1 %v12937_v45  ;;  %7935 = vmatmul.mubr.msk.f32.gmra.mrb[20].mxu0 %vm3441_vm0, %v3287_v27  ;;  %v12945_v27 = vld [vmem:[#allocation7_spill] sm:$0xff] }
 0x163   :  { %433 = vperm.xlu1 %8400, %v12938_v34   ;;  %7937 = vmatprep.mubr.msk.f32.mxu0 %vm3441_vm0, %v3288_v11  ;;  %v2164_v46 = vadd.f32 %v2004_v20, %v1199_v23  ;;  %v1037_v52 = vmul.f32 %v9199_v19, %v12945_v27  ;;  %v9606_v23 = vld [vmem:[%s12856_s0 + $0x1e0] sm:$0xff] }
 0x165   :  { %v2396_v13 = vpop.permute.xlu1 %2395  ;;  %2587 = vperm.xlu0 %8422, %v115_v12   ;;  %v1040_v12 = vmul.f32 %v9199_v19, %v12946_v33 }
 0x166   :  { %v2969_v49 = vmul.f32 %v9225_v22, %v2396_v13  ;;  %v1203_v13 = vadd.f32 %v9216_v15, %v1037_v52 }
 0x167   :  { %8401 = vset.pattern.permute.xlu1 %v12917_v47  ;;  %v1206_v6 = vadd.f32 %v9216_v15, %v1040_v12 }
 0x168   :  { %v3129_v50 = vadd.f32 %v2969_v49, %v2164_v46  ;;  %1518 = vperm.xlu1 %8401, %v12938_v34   ;;  %v9596_v34 = vpop.permute.xlu0 %1470 }
 0x169   :  { %2595 = vperm.xlu0 %8422, %v117_v48   ;;  %v1204_v48 = vadd.f32 %v9216_v15, %v1038_v57  ;;  %v2171_v2 = vadd.f32 %v2011_v1, %v1206_v6 }
 0x16a   :  { %v3289_v28 = vmax.f32 %v3129_v50, 0.0  ;;  %v1435_v32 = vpop.permute.xlu1 %1434 }
 0x16b   :  { %v2005_v14 = vmul.f32 %v9209_v40, %v1435_v32 }
 0x16c   :  { %8402 = vset.pattern.permute.xlu1 %v12913_v17  ;;  %7938 = vmatmul.mubr.msk.f32.gmra.mrb[22].mxu0 %vm3441_vm0, %v3289_v28  ;;  %v1475_v56 = vpop.permute.xlu0 %1474 }
 0x16d   :  { %2479 = vperm.xlu1 %8402, %v8585_v35   ;;  %v2165_v24 = vadd.f32 %v2005_v14, %v1200_v16  ;;  %2603 = vperm.xlu0 %8422, %v119_v44   ;;  %v12948_v14 = vld [vmem:[#allocation27_spill] sm:$0xff]  ;;  %v12949_v35 = vld [vmem:[#allocation9_spill] sm:$0xff]  ;;  %v2010_v44 = vmul.f32 %v9209_v40, %v1455_v58 }
 0x16e   :  { %v1039_v55 = vmul.f32 %v9199_v19, %v12949_v35  ;;  %v12956_v35 = vld [vmem:[#allocation34_spill] sm:$0xff] }
 0x16f   :  { %v2400_v10 = vpop.permute.xlu1 %2399 }
 0x170   :  { %v2970_v3 = vmul.f32 %v9225_v22, %v2400_v10  ;;  %v9626_v42 = vpop.permute.xlu0 %1486  ;;  %v1205_v18 = vadd.f32 %v9216_v15, %v1039_v55  ;;  %v2980_v55 = vmul.f32 %v9225_v22, %v12956_v35  ;;  %v9749_v35 = vld [vmem:[%s12858_s1 + $0x2] ss:$0 sm:$0xff] }
 0x171   :  { %8403 = vset.pattern.permute.xlu1 %v12937_v45  ;;  %2611 = vperm.xlu0 %8422, %v121_v9  }
 0x172   :  { %v3130_v0 = vadd.f32 %v2970_v3, %v2165_v24  ;;  %438 = vperm.xlu1 %8403, %v12943_v61   ;;  %v9636_v3 = vld [vmem:[%s12856_s0 + $0x1f0] sm:$0xff] }
 0x173   :  { %v2404_v36 = vpop.permute.xlu1 %2403 }
 0x174   :  { %v3290_v25 = vmax.f32 %v3130_v0, 0.0  ;;  %v2971_v11 = vmul.f32 %v9225_v22, %v2404_v36  ;;  %v2170_v36 = vadd.f32 %v2010_v44, %v1205_v18  ;;  %v9640_v9 = vpop.permute.xlu0 %1490 }
 0x175   :  { %8452 = vset.pattern.permute.xlu0 %v12917_v47 }
 0x176   :  { %v3131_v7 = vadd.f32 %v2971_v11, %v2166_v38  ;;  %443 = vperm.xlu1 %8403, %v12944_v21   ;;  %7940 = vmatprep.mubr.msk.f32.mxu0 %vm3441_vm0, %v3290_v25  ;;  %v12951_v11 = vld [vmem:[#allocation11_spill] sm:$0xff] }
 0x177   :  { %1578 = vperm.xlu0 %8452, %v9606_v23  }
 0x178   :  { %v3291_v8 = vmax.f32 %v3131_v7, 0.0  ;;  %v1447_v20 = vpop.permute.xlu1 %1446  ;;  %v1041_v7 = vmul.f32 %v9199_v19, %v12951_v11  ;;  %v9648_v27 = vpop.permute.xlu0 %1502 }
 0x179   :  { %v2008_v5 = vmul.f32 %v9209_v40, %v1447_v20 }
 0x17a   :  { %8404 = vset.pattern.permute.xlu1 %v12917_v47  ;;  %7941 = vmatmul.mubr.msk.f32.gmra.mrb[24].mxu0 %vm3441_vm0, %v3291_v8 }
 0x17b   :  { %1526 = vperm.xlu1 %8404, %v12944_v21   ;;  %7943 = vmatprep.mubr.msk.f32.mxu0 %vm3441_vm0, %v3292_v53  ;;  %v2168_v49 = vadd.f32 %v2008_v5, %v1203_v13 }
 0x17c   :  { %1586 = vperm.xlu0 %8452, %v9636_v3   ;;  %v9657_v13 = vpop.permute.xlu0 %1506 }
 0x17d   :  { %v2412_v46 = vpop.permute.xlu1 %2411 }
 0x17e   :  { %v2973_v29 = vmul.f32 %v9225_v22, %v2412_v46  ;;  %v12952_v46 = vld [vmem:[#allocation16_spill] sm:$0xff] }
 0x17f   :  { %8405 = vset.pattern.permute.xlu1 %v12913_v17 }
 0x180   :  { %v3133_v50 = vadd.f32 %v2973_v29, %v2168_v49  ;;  %2487 = vperm.xlu1 %8405, %v12943_v61   ;;  %v3136_v61 = vadd.f32 %v2976_v51, %v2171_v2  ;;  %v1044_v49 = vmul.f32 %v9199_v19, %v12952_v46  ;;  %v12953_v29 = vld [vmem:[#allocation14_spill] sm:$0xff]  ;;  %v2014_v2 = vmul.f32 %v9209_v40, %v9596_v34 }
 0x181   :  { %v1042_v33 = vmul.f32 %v9199_v19, %v12953_v29 }
 0x182   :  { %v3293_v28 = vmax.f32 %v3133_v50, 0.0  ;;  %v1451_v32 = vpop.permute.xlu1 %1450  ;;  %v3296_v25 = vmax.f32 %v3136_v61, 0.0 }
 0x183   :  { %v2009_v16 = vmul.f32 %v9209_v40, %v1451_v32  ;;  %v2015_v32 = vmul.f32 %v9209_v40, %v1475_v56  ;;  %v1208_v6 = vadd.f32 %v9216_v15, %v1042_v33 }
 0x184   :  { %8406 = vset.pattern.permute.xlu1 %v12937_v45  ;;  %7944 = vmatmul.mubr.msk.f32.gmra.mrb[26].mxu0 %vm3441_vm0, %v3293_v28  ;;  %v1210_v28 = vadd.f32 %v9216_v15, %v1044_v49  ;;  %v12960_v49 = vld [vmem:[#allocation18_spill] sm:$0xff] }
 0x185   :  { %448 = vperm.xlu1 %8406, %v12948_v14   ;;  %v2169_v41 = vadd.f32 %v2009_v16, %v1204_v48  ;;  %v9671_v48 = vpop.permute.xlu0 %1514  ;;  %v9676_v16 = vld [vmem:[%s12856_s0 + $0x200] sm:$0xff] }
 0x186   :  { %1594 = vperm.xlu0 %8452, %v9676_v16   ;;  %v2175_v63 = vadd.f32 %v2015_v32, %v1210_v28 }
 0x187   :  { %v2416_v10 = vpop.permute.xlu1 %2415 }
 0x188   :  { %v2974_v24 = vmul.f32 %v9225_v22, %v2416_v10 }
 0x189   :  { %453 = vperm.xlu1 %8406, %v9346_v59   ;;  %v9689_v18 = vpop.permute.xlu0 %1522 }
 0x18a   :  { %v3134_v0 = vadd.f32 %v2974_v24, %v2169_v41 }
 0x18b   :  { %v2420_v60 = vpop.permute.xlu1 %2419 }
 0x18c   :  { %v3294_v58 = vmax.f32 %v3134_v0, 0.0  ;;  %v2975_v38 = vmul.f32 %v9225_v22, %v2420_v60  ;;  %v3140_v0 = vadd.f32 %v2980_v55, %v2175_v63 }
 0x18d   :  { %8407 = vset.pattern.permute.xlu1 %v12917_v47 }
 0x18e   :  { %v3135_v54 = vadd.f32 %v2975_v38, %v2170_v36  ;;  %1534 = vperm.xlu1 %8407, %v9346_v59   ;;  %7946 = vmatprep.mubr.msk.f32.mxu0 %vm3441_vm0, %v3294_v58  ;;  %v1207_v59 = vadd.f32 %v9216_v15, %v1041_v7  ;;  %v3300_v38 = vmax.f32 %v3140_v0, 0.0  ;;  %v9697_v7 = vpop.permute.xlu0 %1530 }
 0x190   :  { %v3295_v21 = vmax.f32 %v3135_v54, 0.0  ;;  %v1463_v53 = vpop.permute.xlu1 %1462 }
 0x191   :  { %v2012_v52 = vmul.f32 %v9209_v40, %v1463_v53  ;;  %v12958_v53 = vld [vmem:[#allocation29_spill] sm:$0xff] }
 0x192   :  { %8408 = vset.pattern.permute.xlu1 %v12913_v17  ;;  %7947 = vmatmul.mubr.msk.f32.gmra.mrb[28].mxu0 %vm3441_vm0, %v3295_v21 }
 0x193   :  { %2495 = vperm.xlu1 %8408, %v12948_v14   ;;  %7949 = vmatprep.mubr.msk.f32.mxu0 %vm3441_vm0, %v3296_v25  ;;  %v2172_v20 = vadd.f32 %v2012_v52, %v1207_v59  ;;  %v12955_v14 = vld [vmem:[#allocation13_spill] sm:$0xff] }
 0x194   :  { %v1043_v56 = vmul.f32 %v9199_v19, %v12955_v14  ;;  %v12961_v14 = vld [vmem:[#allocation17_spill] sm:$0xff] }
 0x195   :  { %v2428_v8 = vpop.permute.xlu1 %2427 }
 0x196   :  { %v2977_v5 = vmul.f32 %v9225_v22, %v2428_v8  ;;  %v1209_v41 = vadd.f32 %v9216_v15, %v1043_v56 }
 0x197   :  { %8409 = vset.pattern.permute.xlu1 %v12937_v45 }
 0x198   :  { %v3137_v12 = vadd.f32 %v2977_v5, %v2172_v20  ;;  %458 = vperm.xlu1 %8409, %v12954_v26   ;;  %v2174_v60 = vadd.f32 %v2014_v2, %v1209_v41  ;;  %v9706_v20 = vpop.permute.xlu0 %1538  ;;  %v12959_v5 = vld [vmem:[#allocation20_spill] sm:$0xff] }
 0x19a   :  { %v3297_v57 = vmax.f32 %v3137_v12, 0.0  ;;  %v1467_v50 = vpop.permute.xlu1 %1466 }
 0x19b   :  { %v2013_v1 = vmul.f32 %v9209_v40, %v1467_v50  ;;  %v9733_v50 = vld [vmem:[%s12858_s1 + $0x1] ss:$0 sm:$0xff] }
 0x19c   :  { %463 = vperm.xlu1 %8409, %v9395_v62   ;;  %7950 = vmatmul.mubr.msk.f32.gmra.mrb[30].mxu0 %vm3441_vm0, %v3297_v57  ;;  %v2019_v28 = vmul.f32 %v9733_v50, %v9640_v9  ;;  %v12962_v9 = vld [vmem:[#allocation35_spill] sm:$0xff] }
 0x19d   :  { %v2173_v10 = vadd.f32 %v2013_v1, %v1208_v6  ;;  %v9742_v1 = vpop.permute.xlu0 %1546  ;;  %v2984_v55 = vmul.f32 %v9749_v35, %v12962_v9 }
 0x19f   :  { %v2432_v51 = vpop.permute.xlu1 %2431 }
 0x1a0   :  { %v2978_v44 = vmul.f32 %v9225_v22, %v2432_v51  ;;  %8410 = vset.pattern.permute.xlu1 %v12917_v47 }
 0x1a1   :  { %1542 = vperm.xlu1 %8410, %v9395_v62   ;;  %v12957_v62 = vld [vmem:[#allocation15_spill] sm:$0xff] }
 0x1a2   :  { %v3138_v24 = vadd.f32 %v2978_v44, %v2173_v10  ;;  %v1045_v54 = vmul.f32 %v9199_v19, %v12957_v62  ;;  %v12964_v62 = vld [vmem:[#allocation19_spill] sm:$0xff] }
 0x1a3   :  { %v2436_v61 = vpop.permute.xlu1 %2435 }
 0x1a4   :  { %v3298_v36 = vmax.f32 %v3138_v24, 0.0  ;;  %v2979_v58 = vmul.f32 %v9225_v22, %v2436_v61  ;;  %v1211_v52 = vadd.f32 %v9216_v15, %v1045_v54  ;;  %v9719_v15 = vld [vmem:[%s12856_s0 + $0x210] sm:$0xff]  ;;  %v9759_v24 = vpop.permute.xlu0 %1554 }
 0x1a5   :  { %8411 = vset.pattern.permute.xlu1 %v12913_v17  ;;  %1602 = vperm.xlu0 %8452, %v9719_v15  }
 0x1a6   :  { %v3139_v34 = vadd.f32 %v2979_v58, %v2174_v60  ;;  %2503 = vperm.xlu1 %8411, %v12954_v26   ;;  %7952 = vmatprep.mubr.msk.f32.mxu0 %vm3441_vm0, %v3298_v36  ;;  %v9727_v26 = vld [vmem:[%s12859_s2] ss:$0 sm:$0xff] }
 0x1a8   :  { %v3299_v25 = vmax.f32 %v3139_v34, 0.0  ;;  %v1479_v11 = vpop.permute.xlu1 %1478  ;;  %v12963_v34 = vld [vmem:[#allocation30_spill] sm:$0xff] }
 0x1a9   :  { %v2016_v21 = vmul.f32 %v9209_v40, %v1479_v11  ;;  %v9711_v40 = vld [vmem:[%s12858_s1] ss:$0 sm:$0xff] }
 0x1aa   :  { %8412 = vset.pattern.permute.xlu1 %v12937_v45  ;;  %7953 = vmatmul.mubr.msk.f32.gmra.mrb[32].mxu0 %vm3441_vm0, %v3299_v25  ;;  %v1048_v46 = vmul.f32 %v9711_v40, %v12959_v5  ;;  %v1047_v56 = vmul.f32 %v9711_v40, %v12961_v14  ;;  %v1049_v54 = vmul.f32 %v9711_v40, %v12964_v62 }
 0x1ab   :  { %468 = vperm.xlu1 %8412, %v12958_v53   ;;  %7955 = vmatprep.mubr.msk.f32.mxu0 %vm3441_vm0, %v3300_v38  ;;  %v2176_v8 = vadd.f32 %v2016_v21, %v1211_v52  ;;  %v9767_v21 = vpop.permute.xlu0 %1562  ;;  %v9775_v52 = vld [vmem:[%s12856_s0 + $0x220] sm:$0xff] }
 0x1ac   :  { %v1214_v57 = vadd.f32 %v9727_v26, %v1048_v46  ;;  %v1213_v44 = vadd.f32 %v9727_v26, %v1047_v56  ;;  %1610 = vperm.xlu0 %8452, %v9775_v52  }
 0x1ad   :  { %v2444_v59 = vpop.permute.xlu1 %2443 }
 0x1ae   :  { %v2981_v19 = vmul.f32 %v9225_v22, %v2444_v59  ;;  %v1046_v22 = vmul.f32 %v9711_v40, %v12960_v49  ;;  %v2179_v63 = vadd.f32 %v2019_v28, %v1214_v57  ;;  %v1215_v59 = vadd.f32 %v9727_v26, %v1049_v54  ;;  %v12965_v49 = vld [vmem:[#allocation24_spill] sm:$0xff]  ;;  %v12968_v54 = vld [vmem:[#allocation23_spill] sm:$0xff] }
 0x1af   :  { %473 = vperm.xlu1 %8412, %v9435_v4   ;;  %v9782_v46 = vpop.permute.xlu0 %1570 }
 0x1b0   :  { %v3141_v29 = vadd.f32 %v2981_v19, %v2176_v8  ;;  %v1212_v32 = vadd.f32 %v9727_v26, %v1046_v22  ;;  %v3144_v0 = vadd.f32 %v2984_v55, %v2179_v63  ;;  %v1052_v22 = vmul.f32 %v9711_v40, %v12965_v49  ;;  %v12967_v55 = vld [vmem:[#allocation21_spill] sm:$0xff] }
 0x1b1   :  { %v1051_v63 = vmul.f32 %v9711_v40, %v12967_v55 }
 0x1b2   :  { %v3301_v33 = vmax.f32 %v3141_v29, 0.0  ;;  %v1483_v12 = vpop.permute.xlu1 %1482  ;;  %v3304_v38 = vmax.f32 %v3144_v0, 0.0  ;;  %v12966_v29 = vld [vmem:[#allocation22_spill] sm:$0xff] }
 0x1b3   :  { %8413 = vset.pattern.permute.xlu1 %v12917_v47  ;;  %v2017_v6 = vmul.f32 %v9733_v50, %v1483_v12  ;;  %v2472_v9 = vpop.permute.xlu0 %2471  ;;  %v1217_v0 = vadd.f32 %v9727_v26, %v1051_v63 }
 0x1b4   :  { %1550 = vperm.xlu1 %8413, %v9435_v4   ;;  %7956 = vmatmul.mubr.msk.f32.gmra.mrb[34].mxu0 %vm3441_vm0, %v3301_v33  ;;  %v2018_v4 = vmul.f32 %v9733_v50, %v9626_v42  ;;  %v1050_v33 = vmul.f32 %v9711_v40, %v12966_v29 }
 0x1b5   :  { %v2177_v2 = vadd.f32 %v2017_v6, %v1212_v32  ;;  %v1218_v32 = vadd.f32 %v9727_v26, %v1052_v22  ;;  %v2023_v6 = vmul.f32 %v9733_v50, %v9657_v13  ;;  %v2988_v13 = vmul.f32 %v9749_v35, %v2472_v9 }
 0x1b6   :  { %v2178_v60 = vadd.f32 %v2018_v4, %v1213_v44  ;;  %v1216_v14 = vadd.f32 %v9727_v26, %v1050_v33 }
 0x1b7   :  { %v2448_v51 = vpop.permute.xlu1 %2447  ;;  %v2484_v9 = vpop.permute.xlu0 %2483 }
 0x1b8   :  { %v2982_v10 = vmul.f32 %v9749_v35, %v2448_v51  ;;  %8414 = vset.pattern.permute.xlu1 %v12913_v17  ;;  %v2183_v51 = vadd.f32 %v2023_v6, %v1218_v32  ;;  %v8592_v32 = vld [vmem:[%s12856_s0 + $0x1d0] sm:$0xff] }
 0x1b9   :  { %2511 = vperm.xlu1 %8414, %v12958_v53  }
 0x1ba   :  { %v3142_v41 = vadd.f32 %v2982_v10, %v2177_v2  ;;  %v2022_v2 = vmul.f32 %v9733_v50, %v9648_v27  ;;  %v9815_v27 = vld [vmem:[%s12856_s0 + $0x230] sm:$0xff] }
 0x1bb   :  { %v2452_v61 = vpop.permute.xlu1 %2451  ;;  %1618 = vperm.xlu0 %8452, %v9815_v27  }
 0x1bc   :  { %v3302_v36 = vmax.f32 %v3142_v41, 0.0  ;;  %v2983_v58 = vmul.f32 %v9749_v35, %v2452_v61  ;;  %v8591_v41 = vld [vmem:[%s12856_s0 + $0x1c0] sm:$0xff] }
 0x1bd   :  { %8415 = vset.pattern.permute.xlu1 %v12937_v45 }
 0x1be   :  { %v3143_v42 = vadd.f32 %v2983_v58, %v2178_v60  ;;  %478 = vperm.xlu1 %8415, %v12963_v34   ;;  %7958 = vmatprep.mubr.msk.f32.mxu0 %vm3441_vm0, %v3302_v36  ;;  %v3148_v36 = vadd.f32 %v2988_v13, %v2183_v51  ;;  %v2182_v58 = vadd.f32 %v2022_v2, %v1217_v0  ;;  %v4950_v2 = vld [vmem:[%s12860_s5 + $0x18] sm:$0xff]  ;;  %v4947_v0 = vld [vmem:[%s12860_s5] sm:$0xff] }
 0x1c0   :  { %v3303_v25 = vmax.f32 %v3143_v42, 0.0  ;;  %v1495_v11 = vpop.permute.xlu1 %1494  ;;  %v3308_v62 = vmax.f32 %v3148_v36, 0.0 }
 0x1c1   :  { %v2020_v53 = vmul.f32 %v9733_v50, %v1495_v11 }
 0x1c2   :  { %483 = vperm.xlu1 %8415, %v9470_v37   ;;  %7959 = vmatmul.mubr.msk.f32.gmra.mrb[36].mxu0 %vm3441_vm0, %v3303_v25  ;;  %v1053_v25 = vmul.f32 %v9711_v40, %v12968_v54  ;;  %v4954_v54 = vld [vmem:[%s12860_s5 + $0x38] sm:$0xff] }
 0x1c3   :  { %7961 = vmatprep.mubr.msk.f32.mxu0 %vm3441_vm0, %v3304_v38  ;;  %v2180_v19 = vadd.f32 %v2020_v53, %v1215_v59 }
 0x1c5   :  { %v2460_v8 = vpop.permute.xlu1 %2459 }
 0x1c6   :  { %v2985_v5 = vmul.f32 %v9749_v35, %v2460_v8  ;;  %8416 = vset.pattern.permute.xlu1 %v12917_v47  ;;  %v1219_v8 = vadd.f32 %v9727_v26, %v1053_v25 }
 0x1c7   :  { %1558 = vperm.xlu1 %8416, %v9470_v37   ;;  %v8590_v37 = vld [vmem:[%s12856_s0 + $0x1b0] sm:$0xff] }
 0x1c8   :  { %v3145_v12 = vadd.f32 %v2985_v5, %v2180_v19 }
 0x1ca   :  { %v3305_v57 = vmax.f32 %v3145_v12, 0.0  ;;  %v1499_v28 = vpop.permute.xlu1 %1498  ;;  %v12969_v12 = vld [vmem:[#allocation25_spill] sm:$0xff] }
 0x1cb   :  { %8417 = vset.pattern.permute.xlu1 %v12913_v17  ;;  %v2021_v56 = vmul.f32 %v9733_v50, %v1499_v28 }
 0x1cc   :  { %2519 = vperm.xlu1 %8417, %v8590_v37   ;;  %7962 = vmatmul.mubr.msk.f32.gmra.mrb[38].mxu0 %vm3441_vm0, %v3305_v57  ;;  %v1054_v57 = vmul.f32 %v9711_v40, %v12969_v12 }
 0x1cd   :  { %v2181_v10 = vadd.f32 %v2021_v56, %v1216_v14  ;;  %v2025_v56 = vmul.f32 %v9733_v50, %v9671_v48  ;;  %v4948_v48 = vld [vmem:[%s12860_s5 + $0x8] sm:$0xff] }
 0x1ce   :  { %v1220_v14 = vadd.f32 %v9727_v26, %v1054_v57 }
 0x1cf   :  { %v2464_v4 = vpop.permute.xlu1 %2463 }
 0x1d0   :  { %v2986_v44 = vmul.f32 %v9749_v35, %v2464_v4  ;;  %8418 = vset.pattern.permute.xlu1 %v12937_v45  ;;  %v9852_v4 = vld [vmem:[%s12856_s0 + $0x240] sm:$0xff] }
 0x1d1   :  { %488 = vperm.xlu1 %8418, %v8591_v41   ;;  %1626 = vperm.xlu0 %8452, %v9852_v4  }
 0x1d2   :  { %v3146_v61 = vadd.f32 %v2986_v44, %v2181_v10  ;;  %v2991_v44 = vmul.f32 %v9749_v35, %v2484_v9 }
 0x1d3   :  { %v2468_v60 = vpop.permute.xlu1 %2467 }
 0x1d4   :  { %v3306_v42 = vmax.f32 %v3146_v61, 0.0  ;;  %v2987_v34 = vmul.f32 %v9749_v35, %v2468_v60  ;;  %v4949_v61 = vld [vmem:[%s12860_s5 + $0x10] sm:$0xff]  ;;  %v2185_v60 = vadd.f32 %v2025_v56, %v1220_v14 }
 0x1d5   :  { %493 = vperm.xlu1 %8418, %v9488_v39   ;;  %v8222_v36 = vpack.c.bf16 %v4949_v61, %v4947_v0  ;;  %v4957_v14 = vld [vmem:[%s12860_s5 + $0x50] sm:$0xff] }
 0x1d6   :  { %v3147_v38 = vadd.f32 %v2987_v34, %v2182_v58  ;;  %7964 = vmatprep.mubr.msk.f32.mxu0 %vm3441_vm0, %v3306_v42 }
 0x1d8   :  { %v3307_v11 = vmax.f32 %v3147_v38, 0.0  ;;  %v1511_v53 = vpop.permute.xlu1 %1510 }
 0x1d9   :  { %8419 = vset.pattern.permute.xlu1 %v12917_v47  ;;  %v2024_v59 = vmul.f32 %v9733_v50, %v1511_v53  ;;  %v4951_v53 = vld [vmem:[%s12860_s5 + $0x20] sm:$0xff] }
 0x1da   :  { %1566 = vperm.xlu1 %8419, %v9488_v39   ;;  %7965 = vmatmul.mubr.msk.f32.gmra.mrb[40].mxu0 %vm3441_vm0, %v3307_v11 }
 0x1db   :  { %7967 = vmatprep.mubr.msk.f32.mxu0 %vm3441_vm0, %v3308_v62  ;;  %v2184_v5 = vadd.f32 %v2024_v59, %v1219_v8  ;;  %v4952_v62 = vld [vmem:[%s12860_s5 + $0x28] sm:$0xff] }
 0x1dc   :  { %v8224_v11 = vpack.c.bf16 %v4954_v54, %v4952_v62  ;;  %v2492_v62 = vpop.permute.xlu0 %2491 }
 0x1dd   :  { %v2476_v19 = vpop.permute.xlu1 %2475 }
 0x1de   :  { %v2989_v49 = vmul.f32 %v9749_v35, %v2476_v19  ;;  %8420 = vset.pattern.permute.xlu1 %v12913_v17 }
 0x1df   :  { %2527 = vperm.xlu1 %8420, %v8591_v41   ;;  %v8220_v41 = vpack.c.bf16 %v4950_v2, %v4948_v48  ;;  %v4959_v2 = vld [vmem:[%s12860_s5 + $0x60] sm:$0xff] }
 0x1e0   :  { %v3149_v22 = vadd.f32 %v2989_v49, %v2184_v5 }
 0x1e1   :  { %8332 = vmatprep.subr.bf16.mxu1 %v8220_v41  ;;  %8221 = vmatprep.subr.bf16.mxu0 %v8220_v41 }
 0x1e2   :  { %v3309_v29 = vmax.f32 %v3149_v22, 0.0  ;;  %v434_v33 = vpop.permute.xlu1 %433  ;;  %8340 = vmatpush1.bf16.msra.mxu1 %v8222_v36  ;;  %8223 = vmatpush1.bf16.msra.mxu0 %v8222_v36  ;;  %v4964_v36 = vld [vmem:[%s12860_s5 + $0x88] sm:$0xff] }
 0x1e3   :  { %8421 = vset.pattern.permute.xlu1 %v12937_v45  ;;  %v9832_v39 = vpop.f32.mrb[0].mxu0  ;;  %v1055_v28 = vmul.f32 %v9711_v40, %v434_v33  ;;  %8333 = vmatprep.subr.bf16.mxu1 %v8224_v11  ;;  %v4958_v33 = vld [vmem:[%s12860_s5 + $0x58] sm:$0xff] }
 0x1e4   :  { %498 = vperm.xlu1 %8421, %v8592_v32   ;;  %v9838_v6 = vpop.f32.mrb[1].mxu0  ;;  %7968 = vmatmul.mubr.msk.f32.gmra.mrb[42].mxu0 %vm3441_vm0, %v3309_v29  ;;  %v4956_v29 = vld [vmem:[%s12860_s5 + $0x48] sm:$0xff] }
 0x1e5   :  { %v1221_v55 = vadd.f32 %v9727_v26, %v1055_v28  ;;  %8225 = vmatprep.subr.bf16.mxu0 %v8224_v11  ;;  %v8228_v57 = vpack.c.bf16 %v4958_v33, %v4956_v29  ;;  %v4955_v28 = vld [vmem:[%s12860_s5 + $0x40] sm:$0xff]  ;;  %v4965_v11 = vld [vmem:[%s12860_s5 + $0x90] sm:$0xff]  ;;  %v2993_v33 = vmul.f32 %v9749_v35, %v2492_v62 }
 0x1e6   :  { %v8230_v56 = vpack.c.bf16 %v4957_v14, %v4955_v28  ;;  %v4969_v14 = vld [vmem:[%s12860_s5 + $0xb0] sm:$0xff] }
 0x1e7   :  { %v1519_v37 = vpop.permute.xlu1 %1518 }
 0x1e8   :  { %v2026_v63 = vmul.f32 %v9733_v50, %v1519_v37  ;;  %503 = vperm.xlu1 %8421, %v9499_v31   ;;  %v9847_v51 = vpop.f32.mrb[2].mxu0 }
 0x1e9   :  { %v9854_v13 = vpop.f32.mrb[3].mxu0 }
 0x1ea   :  { %v2186_v10 = vadd.f32 %v2026_v63, %v1221_v55  ;;  %v4960_v55 = vld [vmem:[%s12860_s5 + $0x68] sm:$0xff]  ;;  %v4962_v63 = vld [vmem:[%s12860_s5 + $0x78] sm:$0xff] }
 0x1eb   :  { %v8232_v48 = vpack.c.bf16 %v4962_v63, %v4960_v55 }
 0x1ec   :  { %8423 = vset.pattern.permute.xlu1 %v12917_v47  ;;  %v2480_v58 = vpop.permute.xlu1 %2479  ;;  %v9871_v42 = vpop.f32.mrb[4].mxu0  ;;  %v3151_v25 = vadd.f32 %v2991_v44, %v2186_v10  ;;  %v4961_v10 = vld [vmem:[%s12860_s5 + $0x70] sm:$0xff] }
 0x1ed   :  { %v2990_v34 = vmul.f32 %v9749_v35, %v2480_v58  ;;  %1574 = vperm.xlu1 %8423, %v9499_v31   ;;  %v9875_v38 = vpop.f32.mrb[5].mxu0  ;;  %v4953_v31 = vld [vmem:[%s12860_s5 + $0x30] sm:$0xff]  ;;  %v8234_v41 = vpack.c.bf16 %v4961_v10, %v4959_v2  ;;  %v4966_v58 = vld [vmem:[%s12860_s5 + $0x98] sm:$0xff]  ;;  %v4972_v2 = vld [vmem:[%s12860_s5 + $0xc8] sm:$0xff] }
 0x1ee   :  { %v8226_v8 = vpack.c.bf16 %v4953_v31, %v4951_v53  ;;  %v3311_v12 = vmax.f32 %v3151_v25, 0.0  ;;  %v8236_v54 = vpack.c.bf16 %v4966_v58, %v4964_v36  ;;  %v4963_v25 = vld [vmem:[%s12860_s5 + $0x80] sm:$0xff]  ;;  %v4974_v10 = vld [vmem:[%s12860_s5 + $0xd8] sm:$0xff] }
 0x1ef   :  { %v3150_v59 = vadd.f32 %v2990_v34, %v2185_v60  ;;  %v9987_v36 = vld [vmem:[%s12856_s0 + $0x260] sm:$0xff] }
 0x1f0   :  { %v9889_v19 = vpop.f32.mrb[6].mxu0  ;;  %8341 = vmatpush1.bf16.msra.mxu1 %v8226_v8  ;;  %8227 = vmatpush1.bf16.msra.mxu0 %v8226_v8  ;;  %v8238_v8 = vpack.c.bf16 %v4965_v11, %v4963_v25  ;;  %v4976_v11 = vld [vmem:[%s12860_s5 + $0xe8] sm:$0xff] }
 0x1f1   :  { %v3310_v5 = vmax.f32 %v3150_v59, 0.0  ;;  %8424 = vset.pattern.permute.xlu1 %v12913_v17  ;;  %v439_v49 = vpop.permute.xlu1 %438  ;;  %v9892_v22 = vpop.f32.mrb[7].mxu0  ;;  %8334 = vmatprep.subr.bf16.mxu1 %v8228_v57  ;;  %v9950_v59 = vld [vmem:[%s12856_s0 + $0x250] sm:$0xff] }
 0x1f2   :  { %2535 = vperm.xlu1 %8424, %v8592_v32   ;;  %8229 = vmatprep.subr.bf16.mxu0 %v8228_v57  ;;  %v1056_v0 = vmul.f32 %v9711_v40, %v439_v49  ;;  %v4970_v57 = vld [vmem:[%s12860_s5 + $0xb8] sm:$0xff] }
 0x1f3   :  { %7970 = vmatprep.mubr.msk.f32.mxu0 %vm3441_vm0, %v3310_v5  ;;  %v2027_v5 = vmul.f32 %v9733_v50, %v9689_v18  ;;  %1634 = vperm.xlu0 %8452, %v9950_v59   ;;  %v4967_v18 = vld [vmem:[%s12860_s5 + $0xa0] sm:$0xff] }
 0x1f4   :  { %v9907_v37 = vpop.f32.mrb[8].mxu0  ;;  %7971 = vmatmul.mubr.msk.f32.gmra.mrb[44].mxu0 %vm3441_vm0, %v3311_v12  ;;  %8342 = vmatpush1.bf16.msra.mxu1 %v8230_v56  ;;  %v1222_v49 = vadd.f32 %v9727_v26, %v1056_v0  ;;  %v4968_v12 = vld [vmem:[%s12860_s5 + $0xa8] sm:$0xff]  ;;  %v4971_v0 = vld [vmem:[%s12860_s5 + $0xc0] sm:$0xff] }
 0x1f5   :  { %v444_v9 = vpop.permute.xlu1 %443  ;;  %v9910_v32 = vpop.f32.mrb[9].mxu0  ;;  %8231 = vmatpush1.bf16.msra.mxu0 %v8230_v56  ;;  %8335 = vmatprep.subr.bf16.mxu1 %v8232_v48  ;;  %v8240_v28 = vpack.c.bf16 %v4970_v57, %v4968_v12 }
 0x1f6   :  { %8425 = vset.pattern.permute.xlu1 %v12937_v45  ;;  %v1057_v44 = vmul.f32 %v9711_v40, %v444_v9  ;;  %8233 = vmatprep.subr.bf16.mxu0 %v8232_v48  ;;  %v8242_v9 = vpack.c.bf16 %v4969_v14, %v4967_v18  ;;  %v2187_v55 = vadd.f32 %v2027_v5, %v1222_v49  ;;  %v4977_v5 = vld [vmem:[%s12860_s5 + $0xf0] sm:$0xff]  ;;  %v10024_v18 = vld [vmem:[%s12856_s0 + $0x280] sm:$0xff] }
 0x1f7   :  { %508 = vperm.xlu1 %8425, %v9606_v23   ;;  %1642 = vperm.xlu0 %8452, %v9987_v36   ;;  %v10013_v49 = vld [vmem:[%s12856_s0 + $0x270] sm:$0xff] }
 0x1f8   :  { %v9928_v61 = vpop.f32.mrb[10].mxu0  ;;  %8343 = vmatpush1.bf16.msra.mxu1 %v8234_v41  ;;  %v1223_v53 = vadd.f32 %v9727_v26, %v1057_v44 }
 0x1f9   :  { %12970 = vst [vmem:[#allocation3_spill] sm:$0xff] %v9928_v61  ;;  %v9930_v60 = vpop.f32.mrb[11].mxu0  ;;  %8235 = vmatpush1.bf16.msra.mxu0 %v8234_v41  ;;  %8336 = vmatprep.subr.bf16.mxu1 %v8236_v54  ;;  %v8244_v41 = vpack.c.bf16 %v4974_v10, %v4972_v2  ;;  %v10038_v10 = vld [vmem:[%s12856_s0 + $0x290] sm:$0xff] }
 0x1fa   :  { %v1527_v34 = vpop.permute.xlu1 %1526  ;;  %8237 = vmatprep.subr.bf16.mxu0 %v8236_v54 }
 0x1fb   :  { %v2028_v31 = vmul.f32 %v9733_v50, %v1527_v34  ;;  %513 = vperm.xlu1 %8425, %v9510_v43   ;;  %1650 = vperm.xlu0 %8452, %v10013_v49  }
 0x1fc   :  { %8344 = vmatpush1.bf16.msra.mxu1 %v8238_v8 }
 0x1fd   :  { %v2188_v29 = vadd.f32 %v2028_v31, %v1223_v53  ;;  %8239 = vmatpush1.bf16.msra.mxu0 %v8238_v8  ;;  %8337 = vmatprep.subr.bf16.mxu1 %v8240_v28  ;;  %v4978_v53 = vld [vmem:[%s12860_s5 + $0xf8] sm:$0xff] }
 0x1fe   :  { %8241 = vmatprep.subr.bf16.mxu0 %v8240_v28  ;;  %v8248_v8 = vpack.c.bf16 %v4978_v53, %v4976_v11  ;;  %v12891_v28 = vmov 0.0  }
 0x1ff   :  { %8426 = vset.pattern.permute.xlu1 %v12917_v47  ;;  %v2488_v56 = vpop.permute.xlu1 %2487  ;;  %v3153_v48 = vadd.f32 %v2993_v33, %v2188_v29  ;;  %5265 = vmatprep.mubr.f32.mxu1 %v12891_v28 }
 0x200   :  { %v2992_v63 = vmul.f32 %v9749_v35, %v2488_v56  ;;  %1582 = vperm.xlu1 %8426, %v9510_v43   ;;  %8345 = vmatpush1.bf16.msra.mxu1 %v8242_v9  ;;  %v4973_v43 = vld [vmem:[%s12860_s5 + $0xd0] sm:$0xff]  ;;  %v2500_v56 = vpop.permute.xlu0 %2499 }
 0x201   :  { %v8246_v58 = vpack.c.bf16 %v4973_v43, %v4971_v0  ;;  %8243 = vmatpush1.bf16.msra.mxu0 %v8242_v9  ;;  %8338 = vmatprep.subr.bf16.mxu1 %v8244_v41  ;;  %v3313_v54 = vmax.f32 %v3153_v48, 0.0 }
 0x202   :  { %v3152_v44 = vadd.f32 %v2992_v63, %v2187_v55  ;;  %8245 = vmatprep.subr.bf16.mxu0 %v8244_v41  ;;  %1658 = vperm.xlu0 %8452, %v10024_v18   ;;  %v2029_v63 = vmul.f32 %v9733_v50, %v9697_v7  ;;  %v2995_v41 = vmul.f32 %v9749_v35, %v2500_v56 }
 0x204   :  { %v3312_v34 = vmax.f32 %v3152_v44, 0.0  ;;  %8427 = vset.pattern.permute.xlu1 %v12913_v17  ;;  %v449_v62 = vpop.permute.xlu1 %448  ;;  %8346 = vmatpush1.bf16.msra.mxu1 %v8246_v58  ;;  %v2508_v56 = vpop.permute.xlu0 %2507 }
 0x205   :  { %2543 = vperm.xlu1 %8427, %v9606_v23   ;;  %v9991_v25 = vpop.f32.mrb[12].mxu0  ;;  %v4975_v23 = vld [vmem:[%s12860_s5 + $0xe0] sm:$0xff]  ;;  %8339 = vmatprep.subr.bf16.mxu1 %v8248_v8  ;;  %v1058_v57 = vmul.f32 %v9711_v40, %v449_v62 }
 0x206   :  { %12971 = vst [vmem:[#allocation31_spill] sm:$0xff] %v9991_v25  ;;  %v10000_v31 = vpop.f32.mrb[13].mxu0  ;;  %7973 = vmatprep.mubr.msk.f32.mxu0 %vm3441_vm0, %v3312_v34  ;;  %v8250_v29 = vpack.c.bf16 %v4977_v5, %v4975_v23  ;;  %8247 = vmatpush1.bf16.msra.mxu0 %v8246_v58  ;;  %v10050_v34 = vld [vmem:[%s12856_s0 + $0x2a0] sm:$0xff] }
 0x207   :  { %12972 = vst [vmem:[#allocation2_spill] sm:$0xff] %v10000_v31  ;;  %7974 = vmatmul.mubr.msk.f32.gmra.mrb[46].mxu0 %vm3441_vm0, %v3313_v54  ;;  %8249 = vmatprep.subr.bf16.mxu0 %v8248_v8  ;;  %v1224_v48 = vadd.f32 %v9727_v26, %v1058_v57  ;;  %v10057_v8 = vld [vmem:[%s12856_s0 + $0x2b0] sm:$0xff]  ;;  %v10066_v5 = vld [vmem:[%s12856_s0 + $0x2c0] sm:$0xff] }
 0x208   :  { %v454_v33 = vpop.permute.xlu1 %453  ;;  %8347 = vmatpush1.bf16.msra.mxu1 %v8250_v29  ;;  %1666 = vperm.xlu0 %8452, %v10038_v10   ;;  %v134_v57 = vld [vmem:[%s12856_s0 + $0x2d0] sm:$0xff] }
 0x209   :  { %8428 = vset.pattern.permute.xlu1 %v12937_v45  ;;  %v1059_v12 = vmul.f32 %v9711_v40, %v454_v33  ;;  %v2189_v7 = vadd.f32 %v2029_v63, %v1224_v48  ;;  %v8593_v63 = vld [vmem:[%s12856_s0 + $0x208] sm:$0xff]  ;;  %v2031_v48 = vmul.f32 %v9733_v50, %v9706_v20  ;;  %v138_v20 = vld [vmem:[%s12856_s0 + $0x2f0] sm:$0xff] }
 0x20a   :  { %518 = vperm.xlu1 %8428, %v9636_v3   ;;  %8251 = vmatpush1.bf16.msra.mxu0 %v8250_v29 }
 0x20b   :  { %v1225_v9 = vadd.f32 %v9727_v26, %v1059_v12 }
 0x20c   :  { %1674 = vperm.xlu0 %8452, %v10050_v34  }
 0x20d   :  { %v1535_v14 = vpop.permute.xlu1 %1534 }
 0x20e   :  { %v2030_v55 = vmul.f32 %v9733_v50, %v1535_v14  ;;  %523 = vperm.xlu1 %8428, %v9524_v30  }
 0x20f   :  { %v10033_v2 = vpop.f32.mrb[14].mxu0 }
 0x210   :  { %12973 = vst [vmem:[#allocation4_spill] sm:$0xff] %v10033_v2  ;;  %v2190_v44 = vadd.f32 %v2030_v55, %v1225_v9  ;;  %v10041_v0 = vpop.f32.mrb[15].mxu0  ;;  %1682 = vperm.xlu0 %8452, %v10057_v8  }
 0x211   :  { %12974 = vst [vmem:[#allocation36_spill] sm:$0xff] %v10041_v0 }
 0x212   :  { %8429 = vset.pattern.permute.xlu1 %v12917_v47  ;;  %v2496_v43 = vpop.permute.xlu1 %2495  ;;  %v3155_v62 = vadd.f32 %v2995_v41, %v2190_v44 }
 0x213   :  { %v2994_v58 = vmul.f32 %v9749_v35, %v2496_v43  ;;  %1590 = vperm.xlu1 %8429, %v9524_v30   ;;  %v2997_v43 = vmul.f32 %v9749_v35, %v2508_v56 }
 0x214   :  { %v3315_v23 = vmax.f32 %v3155_v62, 0.0  ;;  %1690 = vperm.xlu0 %8452, %v10066_v5  }
 0x215   :  { %v3154_v54 = vadd.f32 %v2994_v58, %v2189_v7  ;;  %v136_v7 = vld [vmem:[%s12856_s0 + $0x2e0] sm:$0xff] }
 0x217   :  { %v3314_v11 = vmax.f32 %v3154_v54, 0.0  ;;  %8430 = vset.pattern.permute.xlu1 %v12913_v17  ;;  %v459_v53 = vpop.permute.xlu1 %458 }
 0x218   :  { %2551 = vperm.xlu1 %8430, %v9636_v3   ;;  %v1060_v3 = vmul.f32 %v9711_v40, %v459_v53  ;;  %1698 = vperm.xlu0 %8452, %v134_v57  }
 0x219   :  { %7976 = vmatprep.mubr.msk.f32.mxu0 %vm3441_vm0, %v3314_v11 }
 0x21a   :  { %7977 = vmatmul.mubr.msk.f32.gmra.mrb[48].mxu0 %vm3441_vm0, %v3315_v23  ;;  %v1226_v44 = vadd.f32 %v9727_v26, %v1060_v3 }
 0x21b   :  { %v464_v30 = vpop.permute.xlu1 %463 }
 0x21c   :  { %8431 = vset.pattern.permute.xlu1 %v12937_v45  ;;  %v1061_v29 = vmul.f32 %v9711_v40, %v464_v30  ;;  %1706 = vperm.xlu0 %8452, %v136_v7   ;;  %v2191_v62 = vadd.f32 %v2031_v48, %v1226_v44 }
 0x21d   :  { %528 = vperm.xlu1 %8431, %v9676_v16   ;;  %v10071_v33 = vpop.f32.mrb[16].mxu0 }
 0x21e   :  { %12975 = vst [vmem:[#allocation8_spill] sm:$0xff] %v10071_v33  ;;  %v10075_v12 = vpop.f32.mrb[17].mxu0  ;;  %v1227_v9 = vadd.f32 %v9727_v26, %v1061_v29 }
 0x21f   :  { %12976 = vst [vmem:[#allocation6_spill] sm:$0xff] %v10075_v12 }
 0x220   :  { %v1543_v14 = vpop.permute.xlu1 %1542  ;;  %1714 = vperm.xlu0 %8452, %v138_v20  }
 0x221   :  { %v2032_v55 = vmul.f32 %v9733_v50, %v1543_v14  ;;  %533 = vperm.xlu1 %8431, %v8593_v63   ;;  %v10108_v14 = vld [vmem:[%s12856_s0 + $0x278] sm:$0xff] }
 0x223   :  { %v2192_v41 = vadd.f32 %v2032_v55, %v1227_v9  ;;  %v2516_v55 = vpop.permute.xlu0 %2515 }
 0x224   :  { %8478 = vset.pattern.permute.xlu0 %v12913_v17 }
 0x225   :  { %8432 = vset.pattern.permute.xlu1 %v12917_v47  ;;  %v2504_v58 = vpop.permute.xlu1 %2503  ;;  %v3157_v11 = vadd.f32 %v2997_v43, %v2192_v41  ;;  %2619 = vperm.xlu0 %8478, %v10108_v14   ;;  %v8594_v41 = vld [vmem:[%s12856_s0 + $0x218] sm:$0xff]  ;;  %v2033_v43 = vmul.f32 %v9733_v50, %v9742_v1 }
 0x226   :  { %v2996_v54 = vmul.f32 %v9749_v35, %v2504_v58  ;;  %1598 = vperm.xlu1 %8432, %v8593_v63  }
 0x227   :  { %v10094_v53 = vpop.f32.mrb[18].mxu0  ;;  %v3317_v57 = vmax.f32 %v3157_v11, 0.0  ;;  %v2524_v20 = vpop.permute.xlu0 %2523 }
 0x228   :  { %12977 = vst [vmem:[#allocation5_spill] sm:$0xff] %v10094_v53  ;;  %v3156_v23 = vadd.f32 %v2996_v54, %v2191_v62  ;;  %v10099_v30 = vpop.f32.mrb[19].mxu0  ;;  %v2999_v54 = vmul.f32 %v9749_v35, %v2516_v55 }
 0x229   :  { %12978 = vst [vmem:[#allocation32_spill] sm:$0xff] %v10099_v30 }
 0x22a   :  { %v3316_v29 = vmax.f32 %v3156_v23, 0.0  ;;  %8433 = vset.pattern.permute.xlu1 %v12913_v17  ;;  %v469_v3 = vpop.permute.xlu1 %468 }
 0x22b   :  { %2559 = vperm.xlu1 %8433, %v9676_v16   ;;  %v1062_v16 = vmul.f32 %v9711_v40, %v469_v3 }
 0x22c   :  { %7979 = vmatprep.mubr.msk.f32.mxu0 %vm3441_vm0, %v3316_v29  ;;  %v10133_v29 = vld [vmem:[%s12856_s0 + $0x288] sm:$0xff] }
 0x22d   :  { %7980 = vmatmul.mubr.msk.f32.gmra.mrb[50].mxu0 %vm3441_vm0, %v3317_v57  ;;  %v1228_v7 = vadd.f32 %v9727_v26, %v1062_v16  ;;  %2627 = vperm.xlu0 %8478, %v10133_v29  }
 0x22e   :  { %v474_v56 = vpop.permute.xlu1 %473 }
 0x22f   :  { %8434 = vset.pattern.permute.xlu1 %v12937_v45  ;;  %v1063_v9 = vmul.f32 %v9711_v40, %v474_v56  ;;  %v2193_v3 = vadd.f32 %v2033_v43, %v1228_v7 }
 0x230   :  { %538 = vperm.xlu1 %8434, %v9719_v15  }
 0x231   :  { %v1229_v48 = vadd.f32 %v9727_v26, %v1063_v9  ;;  %v2532_v9 = vpop.permute.xlu0 %2531 }
 0x233   :  { %v1551_v63 = vpop.permute.xlu1 %1550 }
 0x234   :  { %v2034_v44 = vmul.f32 %v9733_v50, %v1551_v63  ;;  %543 = vperm.xlu1 %8434, %v8594_v41  }
 0x235   :  { %v10124_v58 = vpop.f32.mrb[20].mxu0  ;;  %v10146_v43 = vpop.permute.xlu0 %2539 }
 0x236   :  { %12979 = vst [vmem:[#allocation26_spill] sm:$0xff] %v10124_v58  ;;  %v2194_v62 = vadd.f32 %v2034_v44, %v1229_v48  ;;  %v10127_v11 = vpop.f32.mrb[21].mxu0 }
 0x237   :  { %12980 = vst [vmem:[#allocation37_spill] sm:$0xff] %v10127_v11 }
 0x238   :  { %8435 = vset.pattern.permute.xlu1 %v12917_v47  ;;  %v2512_v23 = vpop.permute.xlu1 %2511  ;;  %v3159_v57 = vadd.f32 %v2999_v54, %v2194_v62 }
 0x239   :  { %v2998_v1 = vmul.f32 %v9749_v35, %v2512_v23  ;;  %1606 = vperm.xlu1 %8435, %v8594_v41  }
 0x23a   :  { %v3319_v63 = vmax.f32 %v3159_v57, 0.0 }
 0x23b   :  { %v3158_v56 = vadd.f32 %v2998_v1, %v2193_v3  ;;  %v8595_v3 = vld [vmem:[%s12856_s0 + $0x228] sm:$0xff]  ;;  %v2035_v1 = vmul.f32 %v9733_v50, %v9759_v24 }
 0x23d   :  { %v3318_v16 = vmax.f32 %v3158_v56, 0.0  ;;  %8436 = vset.pattern.permute.xlu1 %v12913_v17  ;;  %v479_v55 = vpop.permute.xlu1 %478  ;;  %v10159_v56 = vpop.permute.xlu0 %2547 }
 0x23e   :  { %2567 = vperm.xlu1 %8436, %v9719_v15   ;;  %v1064_v62 = vmul.f32 %v9711_v40, %v479_v55  ;;  %v3001_v55 = vmul.f32 %v9749_v35, %v2524_v20 }
 0x23f   :  { %v10139_v48 = vpop.f32.mrb[22].mxu0  ;;  %7982 = vmatprep.mubr.msk.f32.mxu0 %vm3441_vm0, %v3318_v16 }
 0x240   :  { %12981 = vst [vmem:[#allocation7_spill] sm:$0xff] %v10139_v48  ;;  %v10142_v44 = vpop.f32.mrb[23].mxu0  ;;  %7983 = vmatmul.mubr.msk.f32.gmra.mrb[52].mxu0 %vm3441_vm0, %v3319_v63  ;;  %v1230_v57 = vadd.f32 %v9727_v26, %v1064_v62 }
 0x241   :  { %12982 = vst [vmem:[#allocation12_spill] sm:$0xff] %v10142_v44  ;;  %v484_v41 = vpop.permute.xlu1 %483  ;;  %v10174_v20 = vpop.permute.xlu0 %2555 }
 0x242   :  { %8437 = vset.pattern.permute.xlu1 %v12937_v45  ;;  %v1065_v7 = vmul.f32 %v9711_v40, %v484_v41  ;;  %v10166_v41 = vld [vmem:[%s12856_s0 + $0x298] sm:$0xff] }
 0x243   :  { %548 = vperm.xlu1 %8437, %v9775_v52   ;;  %2635 = vperm.xlu0 %8478, %v10166_v41  }
 0x244   :  { %v1231_v54 = vadd.f32 %v9727_v26, %v1065_v7  ;;  %v2195_v7 = vadd.f32 %v2035_v1, %v1230_v57 }
 0x245   :  { %v10180_v1 = vpop.permute.xlu0 %2563 }
 0x246   :  { %v1559_v15 = vpop.permute.xlu1 %1558 }
 0x247   :  { %v2036_v23 = vmul.f32 %v9733_v50, %v1559_v15  ;;  %553 = vperm.xlu1 %8437, %v8595_v3  }
 0x249   :  { %v2196_v16 = vadd.f32 %v2036_v23, %v1231_v54 }
 0x24b   :  { %8438 = vset.pattern.permute.xlu1 %v12917_v47  ;;  %v2520_v63 = vpop.permute.xlu1 %2519  ;;  %v3161_v24 = vadd.f32 %v3001_v55, %v2196_v16 }
 0x24c   :  { %v3000_v15 = vmul.f32 %v9749_v35, %v2520_v63  ;;  %1614 = vperm.xlu1 %8438, %v8595_v3  }
 0x24d   :  { %v10170_v62 = vpop.f32.mrb[24].mxu0  ;;  %v3321_v44 = vmax.f32 %v3161_v24, 0.0  ;;  %v2037_v24 = vmul.f32 %v9733_v50, %v9767_v21 }
 0x24e   :  { %12983 = vst [vmem:[#allocation10_spill] sm:$0xff] %v10170_v62  ;;  %v3160_v54 = vadd.f32 %v3000_v15, %v2195_v7  ;;  %v10172_v23 = vpop.f32.mrb[25].mxu0  ;;  %v8596_v7 = vld [vmem:[%s12856_s0 + $0x238] sm:$0xff]  ;;  %v10195_v15 = vpop.permute.xlu0 %2571 }
 0x24f   :  { %12984 = vst [vmem:[#allocation27_spill] sm:$0xff] %v10172_v23 }
 0x250   :  { %v3320_v28 = vmax.f32 %v3160_v54, 0.0  ;;  %8439 = vset.pattern.permute.xlu1 %v12913_v17  ;;  %v489_v48 = vpop.permute.xlu1 %488  ;;  %v3003_v54 = vmul.f32 %v9749_v35, %v2532_v9 }
 0x251   :  { %2575 = vperm.xlu1 %8439, %v9775_v52   ;;  %v1066_v16 = vmul.f32 %v9711_v40, %v489_v48 }
 0x252   :  { %7985 = vmatprep.mubr.msk.f32.mxu0 %vm3441_vm0, %v3320_v28  ;;  %v10209_v62 = vpop.permute.xlu0 %2579 }
 0x253   :  { %7986 = vmatmul.mubr.msk.f32.gmra.mrb[54].mxu0 %vm3441_vm0, %v3321_v44  ;;  %v1232_v48 = vadd.f32 %v9727_v26, %v1066_v16 }
 0x254   :  { %v494_v3 = vpop.permute.xlu1 %493 }
 0x255   :  { %8440 = vset.pattern.permute.xlu1 %v12937_v45  ;;  %v1067_v57 = vmul.f32 %v9711_v40, %v494_v3 }
 0x256   :  { %558 = vperm.xlu1 %8440, %v9815_v27  }
 0x257   :  { %v10186_v55 = vpop.f32.mrb[26].mxu0  ;;  %v1233_v28 = vadd.f32 %v9727_v26, %v1067_v57 }
 0x258   :  { %12985 = vst [vmem:[#allocation9_spill] sm:$0xff] %v10186_v55  ;;  %v10188_v63 = vpop.f32.mrb[27].mxu0  ;;  %v2197_v55 = vadd.f32 %v2037_v24, %v1232_v48 }
 0x259   :  { %12986 = vst [vmem:[#allocation33_spill] sm:$0xff] %v10188_v63  ;;  %v1567_v52 = vpop.permute.xlu1 %1566 }
 0x25a   :  { %v2038_v44 = vmul.f32 %v9733_v50, %v1567_v52  ;;  %563 = vperm.xlu1 %8440, %v8596_v7   ;;  %v10205_v52 = vld [vmem:[%s12856_s0 + $0x2a8] sm:$0xff] }
 0x25b   :  { %2643 = vperm.xlu0 %8478, %v10205_v52  }
 0x25c   :  { %v2198_v3 = vadd.f32 %v2038_v44, %v1233_v28 }
 0x25e   :  { %8441 = vset.pattern.permute.xlu1 %v12917_v47  ;;  %v2528_v57 = vpop.permute.xlu1 %2527  ;;  %v3163_v21 = vadd.f32 %v3003_v54, %v2198_v3 }
 0x25f   :  { %v3002_v63 = vmul.f32 %v9749_v35, %v2528_v57  ;;  %1622 = vperm.xlu1 %8441, %v8596_v7   ;;  %v10219_v7 = vpop.permute.xlu0 %2587 }
 0x260   :  { %v3323_v44 = vmax.f32 %v3163_v21, 0.0  ;;  %v8597_v21 = vld [vmem:[%s12856_s0 + $0x248] sm:$0xff] }
 0x261   :  { %v3162_v16 = vadd.f32 %v3002_v63, %v2197_v55 }
 0x263   :  { %v3322_v9 = vmax.f32 %v3162_v16, 0.0  ;;  %8442 = vset.pattern.permute.xlu1 %v12913_v17  ;;  %v499_v28 = vpop.permute.xlu1 %498  ;;  %v10225_v54 = vpop.permute.xlu0 %2595  ;;  %v2039_v16 = vmul.f32 %v9733_v50, %v9782_v46 }
 0x264   :  { %2583 = vperm.xlu1 %8442, %v9815_v27   ;;  %v1068_v63 = vmul.f32 %v9711_v40, %v499_v28  ;;  %v3005_v28 = vmul.f32 %v9749_v35, %v10146_v43 }
 0x265   :  { %v10213_v23 = vpop.f32.mrb[28].mxu0  ;;  %7988 = vmatprep.mubr.msk.f32.mxu0 %vm3441_vm0, %v3322_v9 }
 0x266   :  { %12987 = vst [vmem:[#allocation11_spill] sm:$0xff] %v10213_v23  ;;  %v10216_v24 = vpop.f32.mrb[29].mxu0  ;;  %7989 = vmatmul.mubr.msk.f32.gmra.mrb[56].mxu0 %vm3441_vm0, %v3323_v44  ;;  %v1234_v9 = vadd.f32 %v9727_v26, %v1068_v63 }
 0x267   :  { %12988 = vst [vmem:[#allocation16_spill] sm:$0xff] %v10216_v24  ;;  %v504_v48 = vpop.permute.xlu1 %503  ;;  %v10247_v24 = vpop.permute.xlu0 %2603 }
 0x268   :  { %8443 = vset.pattern.permute.xlu1 %v12937_v45  ;;  %v1069_v55 = vmul.f32 %v9711_v40, %v504_v48  ;;  %v2199_v46 = vadd.f32 %v2039_v16, %v1234_v9 }
 0x269   :  { %568 = vperm.xlu1 %8443, %v9852_v4  }
 0x26a   :  { %v1235_v3 = vadd.f32 %v9727_v26, %v1069_v55 }
 0x26b   :  { %v10253_v58 = vpop.permute.xlu0 %2611 }
 0x26c   :  { %v1575_v27 = vpop.permute.xlu1 %1574 }
 0x26d   :  { %v2040_v57 = vmul.f32 %v9733_v50, %v1575_v27  ;;  %573 = vperm.xlu1 %8443, %v8597_v21   ;;  %v10245_v27 = vld [vmem:[%s12856_s0 + $0x2b8] sm:$0xff] }
 0x26e   :  { %2651 = vperm.xlu0 %8478, %v10245_v27  }
 0x26f   :  { %v2200_v44 = vadd.f32 %v2040_v57, %v1235_v3  ;;  %v10237_v48 = vpop.f32.mrb[30].mxu0 }
 0x270   :  { %12989 = vst [vmem:[#allocation14_spill] sm:$0xff] %v10237_v48  ;;  %v10239_v23 = vpop.f32.mrb[31].mxu0 }
 0x271   :  { %12990 = vst [vmem:[#allocation28_spill] sm:$0xff] %v10239_v23  ;;  %8444 = vset.pattern.permute.xlu1 %v12917_v47  ;;  %v2536_v55 = vpop.permute.xlu1 %2535  ;;  %v3165_v43 = vadd.f32 %v3005_v28, %v2200_v44  ;;  %v1579_v44 = vpop.permute.xlu0 %1578 }
 0x272   :  { %v3004_v63 = vmul.f32 %v9749_v35, %v2536_v55  ;;  %1630 = vperm.xlu1 %8444, %v8597_v21  }
 0x273   :  { %v3325_v23 = vmax.f32 %v3165_v43, 0.0 }
 0x274   :  { %v3164_v3 = vadd.f32 %v3004_v63, %v2199_v46 }
 0x276   :  { %v3324_v57 = vmax.f32 %v3164_v3, 0.0  ;;  %8445 = vset.pattern.permute.xlu1 %v12913_v17  ;;  %v509_v48 = vpop.permute.xlu1 %508  ;;  %v2041_v3 = vmul.f32 %v9733_v50, %v1579_v44 }
 0x277   :  { %2591 = vperm.xlu1 %8445, %v9852_v4   ;;  %v1070_v9 = vmul.f32 %v9711_v40, %v509_v48 }
 0x278   :  { %7991 = vmatprep.mubr.msk.f32.mxu0 %vm3441_vm0, %v3324_v57 }
 0x279   :  { %7992 = vmatmul.mubr.msk.f32.gmra.mrb[58].mxu0 %vm3441_vm0, %v3325_v23  ;;  %v8598_v23 = vld [vmem:[%s12856_s0 + $0x258] sm:$0xff]  ;;  %v1236_v43 = vadd.f32 %v9727_v26, %v1070_v9 }
 0x27a   :  { %v514_v16 = vpop.permute.xlu1 %513 }
 0x27b   :  { %8446 = vset.pattern.permute.xlu1 %v12937_v45  ;;  %v1071_v21 = vmul.f32 %v9711_v40, %v514_v16  ;;  %v3007_v40 = vmul.f32 %v9749_v35, %v10159_v56  ;;  %v10278_v16 = vld [vmem:[%s12856_s0 + $0x2c8] sm:$0xff] }
 0x27c   :  { %578 = vperm.xlu1 %8446, %v9950_v59   ;;  %2659 = vperm.xlu0 %8478, %v10278_v16  }
 0x27d   :  { %v10261_v28 = vpop.f32.mrb[32].mxu0  ;;  %v1237_v46 = vadd.f32 %v9727_v26, %v1071_v21  ;;  %v2201_v21 = vadd.f32 %v2041_v3, %v1236_v43 }
 0x27e   :  { %12991 = vst [vmem:[#allocation13_spill] sm:$0xff] %v10261_v28  ;;  %v10263_v55 = vpop.f32.mrb[33].mxu0 }
 0x27f   :  { %12992 = vst [vmem:[#allocation34_spill] sm:$0xff] %v10263_v55  ;;  %v1583_v4 = vpop.permute.xlu1 %1582 }
 0x280   :  { %v2042_v63 = vmul.f32 %v9733_v50, %v1583_v4  ;;  %583 = vperm.xlu1 %8446, %v8598_v23   ;;  %v10285_v50 = vld [vmem:[%s12861_s4] ss:$0 sm:$0xff] }
 0x282   :  { %v2202_v48 = vadd.f32 %v2042_v63, %v1237_v46 }
 0x284   :  { %8447 = vset.pattern.permute.xlu1 %v12917_v47  ;;  %v2544_v57 = vpop.permute.xlu1 %2543  ;;  %v3167_v26 = vadd.f32 %v3007_v40, %v2202_v48  ;;  %v12994_v40 = vmov 0.0   ;;  %v10299_v48 = vld [vmem:[%s12858_s1] ss:$0 sm:$0xff] }
 0x285   :  { %v3006_v4 = vmul.f32 %v9749_v35, %v2544_v57  ;;  %1638 = vperm.xlu1 %8447, %v8598_v23  }
 0x286   :  { %v3327_v35 = vmax.f32 %v3167_v26, 0.0  ;;  %v10307_v26 = vld [vmem:[%s12859_s2] ss:$0 sm:$0xff] }
 0x287   :  { %v3166_v56 = vadd.f32 %v3006_v4, %v2201_v21  ;;  %v7957_v9 = vpop.f32.mrb[34].mxu0  ;;  %v1587_v21 = vpop.permute.xlu0 %1586 }
 0x288   :  { %v4164_v44 = vadd.f32 %v7957_v9, %v10285_v50  ;;  %v10288_v46 = vpop.f32.mrb[35].mxu0  ;;  %v10313_v9 = vld [vmem:[%s12858_s1 + $0x1] ss:$0 sm:$0xff] }
 0x289   :  { %12993 = vst [vmem:[#allocation15_spill] sm:$0xff] %v10288_v46  ;;  %v3326_v63 = vmax.f32 %v3166_v56, 0.0  ;;  %8448 = vset.pattern.permute.xlu1 %v12913_v17  ;;  %v519_v43 = vpop.permute.xlu1 %518 }
 0x28a   :  { %v4822_v23 = vmax.f32 %v4164_v44, 0.0  ;;  %2599 = vperm.xlu1 %8448, %v9950_v59   ;;  %v1072_v59 = vmul.f32 %v10299_v48, %v519_v43 }
 0x28b   :  { %7994 = vmatprep.mubr.msk.f32.mxu0 %vm3441_vm0, %v3326_v63  ;;  %v8602_v63 = vld [vmem:[%s12856_s0 + $0x268] sm:$0xff] }
 0x28c   :  { %7995 = vmatmul.mubr.msk.f32.gmra.mrb[60].mxu0 %vm3441_vm0, %v3327_v35  ;;  %5266 = vmatmul.mubr.f32.vlgmr.msra.gmra.mrb[0].mxu1 %v4822_v23  ;;  %v1238_v43 = vadd.f32 %v10307_v26, %v1072_v59  ;;  %v2043_v35 = vmul.f32 %v10313_v9, %v1587_v21  ;;  %v10324_v23 = vld [vmem:[%s12858_s1 + $0x2] ss:$0 sm:$0xff]  ;;  %v10333_v59 = vld [vmem:[%s12856_s0 + $0x2d8] sm:$0xff] }
 0x28d   :  { %v524_v3 = vpop.permute.xlu1 %523  ;;  %5271 = vmatprep.mubr.f32.mxu1 %v12994_v40  ;;  %2667 = vperm.xlu0 %8478, %v10333_v59  }
 0x28e   :  { %8449 = vset.pattern.permute.xlu1 %v12937_v45  ;;  %v1073_v57 = vmul.f32 %v10299_v48, %v524_v3  ;;  %v3009_v3 = vmul.f32 %v10324_v23, %v10174_v20  ;;  %v2203_v21 = vadd.f32 %v2043_v35, %v1238_v43  ;;  %v1595_v35 = vpop.permute.xlu0 %1594 }
 0x28f   :  { %588 = vperm.xlu1 %8449, %v9987_v36  }
 0x290   :  { %v1239_v56 = vadd.f32 %v10307_v26, %v1073_v57 }
 0x292   :  { %v1591_v4 = vpop.permute.xlu1 %1590 }
 0x293   :  { %v2044_v44 = vmul.f32 %v10313_v9, %v1591_v4  ;;  %593 = vperm.xlu1 %8449, %v8602_v63  }
 0x295   :  { %v2204_v57 = vadd.f32 %v2044_v44, %v1239_v56  ;;  %v7960_v46 = vpop.f32.mrb[36].mxu0 }
 0x296   :  { %v4168_v4 = vpop.f32.mrb[37].mxu0  ;;  %v4174_v56 = vadd.f32 %v7960_v46, %v10285_v50 }
 0x297   :  { %v4169_v28 = vadd.f32 %v10285_v50, %v4168_v4  ;;  %8450 = vset.pattern.permute.xlu1 %v12917_v47  ;;  %v2552_v55 = vpop.permute.xlu1 %2551  ;;  %v3169_v20 = vadd.f32 %v3009_v3, %v2204_v57 }
 0x298   :  { %v3008_v11 = vmul.f32 %v10324_v23, %v2552_v55  ;;  %1646 = vperm.xlu1 %8450, %v8602_v63   ;;  %v4824_v12 = vmax.f32 %v4174_v56, 0.0 }
 0x299   :  { %v4823_v44 = vmax.f32 %v4169_v28, 0.0  ;;  %v3329_v33 = vmax.f32 %v3169_v20, 0.0 }
 0x29a   :  { %v3168_v53 = vadd.f32 %v3008_v11, %v2203_v21  ;;  %v2045_v21 = vmul.f32 %v10313_v9, %v1595_v35 }
 0x29b   :  { %5272 = vmatmul.mubr.f32.gmra.mrb[2].mxu1 %v4823_v44  ;;  %v10361_v44 = vld [vmem:[%s12856_s0 + $0x2e8] sm:$0xff] }
 0x29c   :  { %v3328_v4 = vmax.f32 %v3168_v53, 0.0  ;;  %8451 = vset.pattern.permute.xlu1 %v12913_v17  ;;  %v529_v30 = vpop.permute.xlu1 %528  ;;  %5277 = vmatprep.mubr.f32.mxu1 %v12994_v40 }
 0x29d   :  { %2607 = vperm.xlu1 %8451, %v9987_v36   ;;  %v1074_v36 = vmul.f32 %v10299_v48, %v529_v30  ;;  %v3011_v30 = vmul.f32 %v10324_v23, %v10180_v1  ;;  %2675 = vperm.xlu0 %8478, %v10361_v44  }
 0x29e   :  { %7997 = vmatprep.mubr.msk.f32.mxu0 %vm3441_vm0, %v3328_v4 }
 0x29f   :  { %v7963_v55 = vpop.f32.mrb[38].mxu0  ;;  %7998 = vmatmul.mubr.msk.f32.gmra.mrb[62].mxu0 %vm3441_vm0, %v3329_v33  ;;  %5278 = vmatmul.mubr.f32.gmra.mrb[4].mxu1 %v4824_v12  ;;  %v1240_v57 = vadd.f32 %v10307_v26, %v1074_v36 }
 0x2a0   :  { %v534_v46 = vpop.permute.xlu1 %533  ;;  %v4178_v28 = vpop.f32.mrb[39].mxu0  ;;  %5283 = vmatprep.mubr.f32.mxu1 %v12994_v40  ;;  %v4184_v63 = vadd.f32 %v7963_v55, %v10285_v50 }
 0x2a1   :  { %v4179_v53 = vadd.f32 %v10285_v50, %v4178_v28  ;;  %8453 = vset.pattern.permute.xlu1 %v12937_v45  ;;  %v1075_v11 = vmul.f32 %v10299_v48, %v534_v46  ;;  %v2205_v55 = vadd.f32 %v2045_v21, %v1240_v57 }
 0x2a2   :  { %598 = vperm.xlu1 %8453, %v10013_v49   ;;  %v4826_v20 = vmax.f32 %v4184_v63, 0.0 }
 0x2a3   :  { %v4825_v43 = vmax.f32 %v4179_v53, 0.0  ;;  %v1241_v12 = vadd.f32 %v10307_v26, %v1075_v11  ;;  %v10371_v11 = vld [vmem:[%s12856_s0 + $0x2f8] sm:$0xff] }
 0x2a4   :  { %2683 = vperm.xlu0 %8478, %v10371_v11  }
 0x2a5   :  { %v1599_v33 = vpop.permute.xlu1 %1598  ;;  %5284 = vmatmul.mubr.f32.gmra.mrb[6].mxu1 %v4825_v43 }
 0x2a6   :  { %v2046_v3 = vmul.f32 %v10313_v9, %v1599_v33  ;;  %603 = vperm.xlu1 %8453, %v10108_v14   ;;  %5289 = vmatprep.mubr.f32.mxu1 %v12994_v40 }
 0x2a8   :  { %v2206_v56 = vadd.f32 %v2046_v3, %v1241_v12  ;;  %v10382_v3 = vld [vmem:[%s12856_s0 + $0x308] sm:$0xff] }
 0x2a9   :  { %5290 = vmatmul.mubr.f32.gmra.mrb[8].mxu1 %v4826_v20  ;;  %2691 = vperm.xlu0 %8478, %v10382_v3   ;;  %v10393_v20 = vld [vmem:[%s12856_s0 + $0x318] sm:$0xff] }
 0x2aa   :  { %8454 = vset.pattern.permute.xlu1 %v12917_v47  ;;  %v2560_v4 = vpop.permute.xlu1 %2559  ;;  %5295 = vmatprep.mubr.f32.mxu1 %v12994_v40  ;;  %v3171_v1 = vadd.f32 %v3011_v30, %v2206_v56  ;;  %v1603_v56 = vpop.permute.xlu0 %1602 }
 0x2ab   :  { %v3010_v46 = vmul.f32 %v10324_v23, %v2560_v4  ;;  %1654 = vperm.xlu1 %8454, %v10108_v14  }
 0x2ac   :  { %v3331_v14 = vmax.f32 %v3171_v1, 0.0 }
 0x2ad   :  { %v3170_v28 = vadd.f32 %v3010_v46, %v2205_v55  ;;  %v7966_v53 = vpop.f32.mrb[40].mxu0  ;;  %2699 = vperm.xlu0 %8478, %v10393_v20  }
 0x2ae   :  { %v4188_v36 = vpop.f32.mrb[41].mxu0  ;;  %v4194_v33 = vadd.f32 %v7966_v53, %v10285_v50 }
 0x2af   :  { %v3330_v63 = vmax.f32 %v3170_v28, 0.0  ;;  %v4189_v43 = vadd.f32 %v10285_v50, %v4188_v36  ;;  %8455 = vset.pattern.permute.xlu1 %v12913_v17  ;;  %v539_v35 = vpop.permute.xlu1 %538  ;;  %v10405_v36 = vld [vmem:[%s12856_s0 + $0x328] sm:$0xff] }
 0x2b0   :  { %2615 = vperm.xlu1 %8455, %v10013_v49   ;;  %v4828_v49 = vmax.f32 %v4194_v33, 0.0  ;;  %v1076_v30 = vmul.f32 %v10299_v48, %v539_v35  ;;  %v3013_v35 = vmul.f32 %v10324_v23, %v10195_v15 }
 0x2b1   :  { %v4827_v12 = vmax.f32 %v4189_v43, 0.0  ;;  %8000 = vmatprep.mubr.msk.f32.mxu0 %vm3441_vm0, %v3330_v63  ;;  %v2047_v43 = vmul.f32 %v10313_v9, %v1603_v56  ;;  %2707 = vperm.xlu0 %8478, %v10405_v36  }
 0x2b2   :  { %8001 = vmatmul.mubr.msk.f32.gmra.mrb[64].mxu0 %vm3441_vm0, %v3331_v14  ;;  %v1242_v63 = vadd.f32 %v10307_v26, %v1076_v30 }
 0x2b3   :  { %v544_v57 = vpop.permute.xlu1 %543  ;;  %5296 = vmatmul.mubr.f32.gmra.mrb[10].mxu1 %v4827_v12 }
 0x2b4   :  { %8456 = vset.pattern.permute.xlu1 %v12937_v45  ;;  %5301 = vmatprep.mubr.f32.mxu1 %v12994_v40  ;;  %v1077_v21 = vmul.f32 %v10299_v48, %v544_v57 }
 0x2b5   :  { %608 = vperm.xlu1 %8456, %v10024_v18  }
 0x2b6   :  { %v1243_v1 = vadd.f32 %v10307_v26, %v1077_v21  ;;  %v2207_v21 = vadd.f32 %v2047_v43, %v1242_v63 }
 0x2b7   :  { %v7969_v4 = vpop.f32.mrb[42].mxu0  ;;  %5302 = vmatmul.mubr.f32.gmra.mrb[12].mxu1 %v4828_v49  ;;  %v147_v49 = vld [vmem:[%s12856_s0 + $0x338] sm:$0xff] }
 0x2b8   :  { %v1607_v55 = vpop.permute.xlu1 %1606  ;;  %v4198_v46 = vpop.f32.mrb[43].mxu0  ;;  %5307 = vmatprep.mubr.f32.mxu1 %v12994_v40  ;;  %v4204_v14 = vadd.f32 %v7969_v4, %v10285_v50  ;;  %2715 = vperm.xlu0 %8478, %v147_v49  }
 0x2b9   :  { %v2048_v28 = vmul.f32 %v10313_v9, %v1607_v55  ;;  %v4199_v53 = vadd.f32 %v10285_v50, %v4198_v46  ;;  %613 = vperm.xlu1 %8456, %v10133_v29   ;;  %v149_v55 = vld [vmem:[%s12856_s0 + $0x348] sm:$0xff] }
 0x2ba   :  { %v4830_v15 = vmax.f32 %v4204_v14, 0.0 }
 0x2bb   :  { %v2208_v33 = vadd.f32 %v2048_v28, %v1243_v1  ;;  %v4829_v12 = vmax.f32 %v4199_v53, 0.0 }
 0x2bc   :  { %2723 = vperm.xlu0 %8478, %v149_v55   ;;  %v3015_v55 = vmul.f32 %v10324_v23, %v10209_v62 }
 0x2bd   :  { %8457 = vset.pattern.permute.xlu1 %v12917_v47  ;;  %v2568_v57 = vpop.permute.xlu1 %2567  ;;  %5308 = vmatmul.mubr.f32.gmra.mrb[14].mxu1 %v4829_v12  ;;  %v3173_v56 = vadd.f32 %v3013_v35, %v2208_v33  ;;  %v153_v33 = vld [vmem:[%s12856_s0 + $0x368] sm:$0xff]  ;;  %v1611_v12 = vpop.permute.xlu0 %1610 }
 0x2be   :  { %v3012_v30 = vmul.f32 %v10324_v23, %v2568_v57  ;;  %1662 = vperm.xlu1 %8457, %v10133_v29   ;;  %5313 = vmatprep.mubr.f32.mxu1 %v12994_v40  ;;  %v151_v29 = vld [vmem:[%s12856_s0 + $0x358] sm:$0xff] }
 0x2bf   :  { %v3333_v28 = vmax.f32 %v3173_v56, 0.0 }
 0x2c0   :  { %v3172_v4 = vadd.f32 %v3012_v30, %v2207_v21  ;;  %2731 = vperm.xlu0 %8478, %v151_v29  }
 0x2c1   :  { %5314 = vmatmul.mubr.f32.gmra.mrb[16].mxu1 %v4830_v15 }
 0x2c2   :  { %v3332_v46 = vmax.f32 %v3172_v4, 0.0  ;;  %8458 = vset.pattern.permute.xlu1 %v12913_v17  ;;  %v549_v1 = vpop.permute.xlu1 %548  ;;  %5319 = vmatprep.mubr.f32.mxu1 %v12994_v40  ;;  %v2049_v4 = vmul.f32 %v10313_v9, %v1611_v12 }
 0x2c3   :  { %2623 = vperm.xlu1 %8458, %v10024_v18   ;;  %v1078_v18 = vmul.f32 %v10299_v48, %v549_v1 }
 0x2c4   :  { %8003 = vmatprep.mubr.msk.f32.mxu0 %vm3441_vm0, %v3332_v46  ;;  %2739 = vperm.xlu0 %8478, %v153_v33  }
 0x2c5   :  { %8004 = vmatmul.mubr.msk.f32.gmra.mrb[66].mxu0 %vm3441_vm0, %v3333_v28  ;;  %v1244_v56 = vadd.f32 %v10307_v26, %v1078_v18  ;;  %v10451_v28 = vld [vmem:[%s12856_s0 + $0x300] sm:$0xff] }
 0x2c6   :  { %v554_v53 = vpop.permute.xlu1 %553 }
 0x2c7   :  { %8459 = vset.pattern.permute.xlu1 %v12937_v45  ;;  %v7972_v63 = vpop.f32.mrb[44].mxu0  ;;  %v1079_v43 = vmul.f32 %v10299_v48, %v554_v53  ;;  %v2209_v53 = vadd.f32 %v2049_v4, %v1244_v56 }
 0x2c8   :  { %618 = vperm.xlu1 %8459, %v10038_v10   ;;  %v4208_v35 = vpop.f32.mrb[45].mxu0  ;;  %v4214_v57 = vadd.f32 %v7972_v63, %v10285_v50  ;;  %8502 = vset.pattern.permute.xlu0 %v12917_v47 }
 0x2c9   :  { %v4209_v14 = vadd.f32 %v10285_v50, %v4208_v35  ;;  %v1245_v30 = vadd.f32 %v10307_v26, %v1079_v43  ;;  %1722 = vperm.xlu0 %8502, %v10451_v28  }
 0x2ca   :  { %v4832_v1 = vmax.f32 %v4214_v57, 0.0 }
 0x2cb   :  { %v4831_v49 = vmax.f32 %v4209_v14, 0.0  ;;  %v1615_v21 = vpop.permute.xlu1 %1614 }
 0x2cc   :  { %v2050_v15 = vmul.f32 %v10313_v9, %v1615_v21  ;;  %623 = vperm.xlu1 %8459, %v10166_v41  }
 0x2cd   :  { %5320 = vmatmul.mubr.f32.gmra.mrb[18].mxu1 %v4831_v49 }
 0x2ce   :  { %v2210_v46 = vadd.f32 %v2050_v15, %v1245_v30  ;;  %5325 = vmatprep.mubr.f32.mxu1 %v12994_v40  ;;  %v1619_v30 = vpop.permute.xlu0 %1618 }
 0x2d0   :  { %8460 = vset.pattern.permute.xlu1 %v12917_v47  ;;  %v2576_v29 = vpop.permute.xlu1 %2575  ;;  %v3175_v62 = vadd.f32 %v3015_v55, %v2210_v46  ;;  %v10475_v46 = vld [vmem:[%s12856_s0 + $0x310] sm:$0xff] }
 0x2d1   :  { %v3014_v63 = vmul.f32 %v10324_v23, %v2576_v29  ;;  %1670 = vperm.xlu1 %8460, %v10166_v41   ;;  %5326 = vmatmul.mubr.f32.gmra.mrb[20].mxu1 %v4832_v1  ;;  %v2051_v29 = vmul.f32 %v10313_v9, %v1619_v30 }
 0x2d2   :  { %5331 = vmatprep.mubr.f32.mxu1 %v12994_v40  ;;  %v3335_v14 = vmax.f32 %v3175_v62, 0.0  ;;  %1730 = vperm.xlu0 %8502, %v10475_v46  }
 0x2d3   :  { %v3174_v43 = vadd.f32 %v3014_v63, %v2209_v53  ;;  %v3017_v53 = vmul.f32 %v10324_v23, %v10219_v7 }
 0x2d5   :  { %v3334_v35 = vmax.f32 %v3174_v43, 0.0  ;;  %8461 = vset.pattern.permute.xlu1 %v12913_v17  ;;  %v559_v18 = vpop.permute.xlu1 %558 }
 0x2d6   :  { %2631 = vperm.xlu1 %8461, %v10038_v10   ;;  %v1080_v49 = vmul.f32 %v10299_v48, %v559_v18 }
 0x2d7   :  { %8006 = vmatprep.mubr.msk.f32.mxu0 %vm3441_vm0, %v3334_v35 }
 0x2d8   :  { %8007 = vmatmul.mubr.msk.f32.gmra.mrb[68].mxu0 %vm3441_vm0, %v3335_v14  ;;  %v1246_v1 = vadd.f32 %v10307_v26, %v1080_v49 }
 0x2d9   :  { %v564_v33 = vpop.permute.xlu1 %563 }
 0x2da   :  { %8462 = vset.pattern.permute.xlu1 %v12937_v45  ;;  %v7975_v41 = vpop.f32.mrb[46].mxu0  ;;  %v1081_v12 = vmul.f32 %v10299_v48, %v564_v33  ;;  %v2211_v35 = vadd.f32 %v2051_v29, %v1246_v1 }
 0x2db   :  { %628 = vperm.xlu1 %8462, %v10050_v34   ;;  %v4218_v57 = vpop.f32.mrb[47].mxu0  ;;  %v4224_v10 = vadd.f32 %v7975_v41, %v10285_v50  ;;  %v1627_v41 = vpop.permute.xlu0 %1626 }
 0x2dc   :  { %v4219_v21 = vadd.f32 %v10285_v50, %v4218_v57  ;;  %v1247_v4 = vadd.f32 %v10307_v26, %v1081_v12 }
 0x2dd   :  { %v4834_v62 = vmax.f32 %v4224_v10, 0.0 }
 0x2de   :  { %v4833_v15 = vmax.f32 %v4219_v21, 0.0  ;;  %v1623_v56 = vpop.permute.xlu1 %1622 }
 0x2df   :  { %v2052_v55 = vmul.f32 %v10313_v9, %v1623_v56  ;;  %633 = vperm.xlu1 %8462, %v10205_v52   ;;  %v1635_v49 = vpop.permute.xlu0 %1634 }
 0x2e0   :  { %5332 = vmatmul.mubr.f32.gmra.mrb[22].mxu1 %v4833_v15 }
 0x2e1   :  { %v2212_v63 = vadd.f32 %v2052_v55, %v1247_v4  ;;  %5337 = vmatprep.mubr.f32.mxu1 %v12994_v40 }
 0x2e3   :  { %8463 = vset.pattern.permute.xlu1 %v12917_v47  ;;  %v2584_v43 = vpop.permute.xlu1 %2583  ;;  %v3177_v14 = vadd.f32 %v3017_v53, %v2212_v63  ;;  %v10494_v15 = vpop.permute.xlu0 %1642  ;;  %v10505_v63 = vld [vmem:[%s12856_s0 + $0x320] sm:$0xff] }
 0x2e4   :  { %v3016_v18 = vmul.f32 %v10324_v23, %v2584_v43  ;;  %1678 = vperm.xlu1 %8463, %v10205_v52   ;;  %5338 = vmatmul.mubr.f32.gmra.mrb[24].mxu1 %v4834_v62  ;;  %v2053_v43 = vmul.f32 %v10313_v9, %v1627_v41 }
 0x2e5   :  { %5343 = vmatprep.mubr.f32.mxu1 %v12994_v40  ;;  %v3337_v57 = vmax.f32 %v3177_v14, 0.0  ;;  %1738 = vperm.xlu0 %8502, %v10505_v63  }
 0x2e6   :  { %v3176_v33 = vadd.f32 %v3016_v18, %v2211_v35  ;;  %v3019_v35 = vmul.f32 %v10324_v23, %v10225_v54 }
 0x2e7   :  { %v10513_v14 = vpop.permute.xlu0 %1650 }
 0x2e8   :  { %v3336_v12 = vmax.f32 %v3176_v33, 0.0  ;;  %8464 = vset.pattern.permute.xlu1 %v12913_v17  ;;  %v569_v7 = vpop.permute.xlu1 %568 }
 0x2e9   :  { %2639 = vperm.xlu1 %8464, %v10050_v34   ;;  %v1082_v56 = vmul.f32 %v10299_v48, %v569_v7 }
 0x2ea   :  { %8009 = vmatprep.mubr.msk.f32.mxu0 %vm3441_vm0, %v3336_v12 }
 0x2eb   :  { %8010 = vmatmul.mubr.msk.f32.gmra.mrb[70].mxu0 %vm3441_vm0, %v3337_v57  ;;  %v1248_v62 = vadd.f32 %v10307_v26, %v1082_v56  ;;  %v10519_v54 = vpop.permute.xlu0 %1658 }
 0x2ec   :  { %v574_v21 = vpop.permute.xlu1 %573 }
 0x2ed   :  { %8465 = vset.pattern.permute.xlu1 %v12937_v45  ;;  %v7978_v52 = vpop.f32.mrb[48].mxu0  ;;  %v1083_v30 = vmul.f32 %v10299_v48, %v574_v21  ;;  %v2213_v7 = vadd.f32 %v2053_v43, %v1248_v62 }
 0x2ee   :  { %638 = vperm.xlu1 %8465, %v10057_v8   ;;  %v4228_v10 = vpop.f32.mrb[49].mxu0  ;;  %v4234_v4 = vadd.f32 %v7978_v52, %v10285_v50 }
 0x2ef   :  { %v4229_v34 = vadd.f32 %v10285_v50, %v4228_v10  ;;  %v1249_v29 = vadd.f32 %v10307_v26, %v1083_v30 }
 0x2f0   :  { %v4836_v33 = vmax.f32 %v4234_v4, 0.0 }
 0x2f1   :  { %v4835_v55 = vmax.f32 %v4229_v34, 0.0  ;;  %v1631_v1 = vpop.permute.xlu1 %1630  ;;  %v10526_v34 = vpop.permute.xlu0 %1666 }
 0x2f2   :  { %v2054_v53 = vmul.f32 %v10313_v9, %v1631_v1  ;;  %643 = vperm.xlu1 %8465, %v10245_v27  }
 0x2f3   :  { %5344 = vmatmul.mubr.f32.gmra.mrb[26].mxu1 %v4835_v55 }
 0x2f4   :  { %v2214_v18 = vadd.f32 %v2054_v53, %v1249_v29  ;;  %5349 = vmatprep.mubr.f32.mxu1 %v12994_v40 }
 0x2f6   :  { %8466 = vset.pattern.permute.xlu1 %v12917_v47  ;;  %v2592_v12 = vpop.permute.xlu1 %2591  ;;  %v3179_v41 = vadd.f32 %v3019_v35, %v2214_v18  ;;  %v10539_v18 = vld [vmem:[%s12856_s0 + $0x330] sm:$0xff] }
 0x2f7   :  { %v3018_v57 = vmul.f32 %v10324_v23, %v2592_v12  ;;  %1686 = vperm.xlu1 %8466, %v10245_v27   ;;  %5350 = vmatmul.mubr.f32.gmra.mrb[28].mxu1 %v4836_v33  ;;  %v2055_v33 = vmul.f32 %v10313_v9, %v1635_v49  ;;  %v10543_v12 = vpop.permute.xlu0 %1674 }
 0x2f8   :  { %5355 = vmatprep.mubr.f32.mxu1 %v12994_v40  ;;  %v3339_v10 = vmax.f32 %v3179_v41, 0.0  ;;  %1746 = vperm.xlu0 %8502, %v10539_v18  }
 0x2f9   :  { %v3178_v21 = vadd.f32 %v3018_v57, %v2213_v7  ;;  %v3021_v7 = vmul.f32 %v10324_v23, %v10247_v24 }
 0x2fb   :  { %v3338_v52 = vmax.f32 %v3178_v21, 0.0  ;;  %8467 = vset.pattern.permute.xlu1 %v12913_v17  ;;  %v579_v30 = vpop.permute.xlu1 %578 }
 0x2fc   :  { %2647 = vperm.xlu1 %8467, %v10057_v8   ;;  %v1084_v1 = vmul.f32 %v10299_v48, %v579_v30 }
 0x2fd   :  { %8012 = vmatprep.mubr.msk.f32.mxu0 %vm3441_vm0, %v3338_v52 }
 0x2fe   :  { %8013 = vmatmul.mubr.msk.f32.gmra.mrb[72].mxu0 %vm3441_vm0, %v3339_v10 }
 0x2ff   :  { %v584_v56 = vpop.permute.xlu1 %583 }
 0x300   :  { %8468 = vset.pattern.permute.xlu1 %v12937_v45  ;;  %v7981_v27 = vpop.f32.mrb[50].mxu0  ;;  %v1085_v4 = vmul.f32 %v10299_v48, %v584_v56  ;;  %v10553_v56 = vpop.permute.xlu0 %1682 }
 0x301   :  { %648 = vperm.xlu1 %8468, %v10066_v5   ;;  %v4238_v55 = vpop.f32.mrb[51].mxu0  ;;  %v4244_v8 = vadd.f32 %v7981_v27, %v10285_v50  ;;  %v1250_v5 = vadd.f32 %v10307_v26, %v1084_v1 }
 0x302   :  { %v4239_v29 = vadd.f32 %v10285_v50, %v4238_v55  ;;  %v1251_v43 = vadd.f32 %v10307_v26, %v1085_v4  ;;  %v8604_v55 = vld [vmem:[%s12856_s0 + $0x2c0] sm:$0xff] }
 0x303   :  { %v4838_v41 = vmax.f32 %v4244_v8, 0.0  ;;  %v2215_v52 = vadd.f32 %v2055_v33, %v1250_v5 }
 0x304   :  { %v4837_v53 = vmax.f32 %v4239_v29, 0.0  ;;  %v1639_v62 = vpop.permute.xlu1 %1638  ;;  %v10561_v1 = vpop.permute.xlu0 %1690 }
 0x305   :  { %v2056_v35 = vmul.f32 %v10313_v9, %v1639_v62  ;;  %653 = vperm.xlu1 %8468, %v10278_v16  }
 0x306   :  { %5356 = vmatmul.mubr.f32.gmra.mrb[30].mxu1 %v4837_v53  ;;  %v8605_v53 = vld [vmem:[%s12856_s0 + $0x2d0] sm:$0xff] }
 0x307   :  { %v2216_v57 = vadd.f32 %v2056_v35, %v1251_v43  ;;  %5361 = vmatprep.mubr.f32.mxu1 %v12994_v40 }
 0x309   :  { %8469 = vset.pattern.permute.xlu1 %v12917_v47  ;;  %v2600_v21 = vpop.permute.xlu1 %2599  ;;  %v3181_v49 = vadd.f32 %v3021_v7, %v2216_v57 }
 0x30a   :  { %v3020_v30 = vmul.f32 %v10324_v23, %v2600_v21  ;;  %1694 = vperm.xlu1 %8469, %v10278_v16   ;;  %5362 = vmatmul.mubr.f32.gmra.mrb[32].mxu1 %v4838_v41  ;;  %v10574_v21 = vpop.permute.xlu0 %1698 }
 0x30b   :  { %5367 = vmatprep.mubr.f32.mxu1 %v12994_v40  ;;  %v3341_v4 = vmax.f32 %v3181_v49, 0.0 }
 0x30c   :  { %v3180_v10 = vadd.f32 %v3020_v30, %v2215_v52  ;;  %v10579_v52 = vld [vmem:[%s12856_s0 + $0x340] sm:$0xff]  ;;  %v2057_v30 = vmul.f32 %v10313_v9, %v10494_v15 }
 0x30d   :  { %1754 = vperm.xlu0 %8502, %v10579_v52  }
 0x30e   :  { %v3340_v24 = vmax.f32 %v3180_v10, 0.0  ;;  %8470 = vset.pattern.permute.xlu1 %v12913_v17  ;;  %v589_v27 = vpop.permute.xlu1 %588  ;;  %v3023_v10 = vmul.f32 %v10324_v23, %v10253_v58 }
 0x30f   :  { %2655 = vperm.xlu1 %8470, %v8604_v55   ;;  %v1086_v43 = vmul.f32 %v10299_v48, %v589_v27 }
 0x310   :  { %8015 = vmatprep.mubr.msk.f32.mxu0 %vm3441_vm0, %v3340_v24 }
 0x311   :  { %8016 = vmatmul.mubr.msk.f32.gmra.mrb[74].mxu0 %vm3441_vm0, %v3341_v4  ;;  %v1252_v49 = vadd.f32 %v10307_v26, %v1086_v43 }
 0x312   :  { %v594_v16 = vpop.permute.xlu1 %593 }
 0x313   :  { %8471 = vset.pattern.permute.xlu1 %v12937_v45  ;;  %v7984_v29 = vpop.f32.mrb[52].mxu0  ;;  %v1087_v8 = vmul.f32 %v10299_v48, %v594_v16  ;;  %v2217_v55 = vadd.f32 %v2057_v30, %v1252_v49 }
 0x314   :  { %658 = vperm.xlu1 %8471, %v8605_v53   ;;  %v4248_v62 = vpop.f32.mrb[53].mxu0  ;;  %v4254_v5 = vadd.f32 %v7984_v29, %v10285_v50  ;;  %v10591_v29 = vpop.permute.xlu0 %1706 }
 0x315   :  { %v4249_v35 = vadd.f32 %v10285_v50, %v4248_v62  ;;  %v1253_v57 = vadd.f32 %v10307_v26, %v1087_v8 }
 0x316   :  { %v4840_v27 = vmax.f32 %v4254_v5, 0.0 }
 0x317   :  { %v4839_v33 = vmax.f32 %v4249_v35, 0.0  ;;  %v1647_v7 = vpop.permute.xlu1 %1646 }
 0x318   :  { %v2058_v41 = vmul.f32 %v10313_v9, %v1647_v7  ;;  %663 = vperm.xlu1 %8471, %v10333_v59   ;;  %v10597_v35 = vpop.permute.xlu0 %1714  ;;  %v8606_v7 = vld [vmem:[%s12856_s0 + $0x2e0] sm:$0xff] }
 0x319   :  { %5368 = vmatmul.mubr.f32.gmra.mrb[34].mxu1 %v4839_v33 }
 0x31a   :  { %v2218_v24 = vadd.f32 %v2058_v41, %v1253_v57  ;;  %5373 = vmatprep.mubr.f32.mxu1 %v12994_v40 }
 0x31c   :  { %8472 = vset.pattern.permute.xlu1 %v12917_v47  ;;  %v2608_v4 = vpop.permute.xlu1 %2607  ;;  %v3183_v15 = vadd.f32 %v3023_v10, %v2218_v24  ;;  %v2620_v24 = vpop.permute.xlu0 %2619 }
 0x31d   :  { %v3022_v16 = vmul.f32 %v10324_v23, %v2608_v4  ;;  %1702 = vperm.xlu1 %8472, %v10333_v59   ;;  %5374 = vmatmul.mubr.f32.gmra.mrb[36].mxu1 %v4840_v27 }
 0x31e   :  { %5379 = vmatprep.mubr.f32.mxu1 %v12994_v40  ;;  %v3343_v43 = vmax.f32 %v3183_v15, 0.0 }
 0x31f   :  { %v3182_v8 = vadd.f32 %v3022_v16, %v2217_v55  ;;  %v10613_v55 = vld [vmem:[%s12856_s0 + $0x350] sm:$0xff]  ;;  %v2059_v16 = vmul.f32 %v10313_v9, %v10513_v14 }
 0x320   :  { %1762 = vperm.xlu0 %8502, %v10613_v55  }
 0x321   :  { %v3342_v58 = vmax.f32 %v3182_v8, 0.0  ;;  %8473 = vset.pattern.permute.xlu1 %v12913_v17  ;;  %v599_v62 = vpop.permute.xlu1 %598 }
 0x322   :  { %2663 = vperm.xlu1 %8473, %v8605_v53   ;;  %v1088_v53 = vmul.f32 %v10299_v48, %v599_v62 }
 0x323   :  { %8018 = vmatprep.mubr.msk.f32.mxu0 %vm3441_vm0, %v3342_v58  ;;  %v3025_v58 = vmul.f32 %v10324_v23, %v2620_v24 }
 0x324   :  { %8019 = vmatmul.mubr.msk.f32.gmra.mrb[76].mxu0 %vm3441_vm0, %v3343_v43  ;;  %v1254_v15 = vadd.f32 %v10307_v26, %v1088_v53 }
 0x325   :  { %v604_v59 = vpop.permute.xlu1 %603 }
 0x326   :  { %8474 = vset.pattern.permute.xlu1 %v12937_v45  ;;  %v7987_v5 = vpop.f32.mrb[54].mxu0  ;;  %v1089_v33 = vmul.f32 %v10299_v48, %v604_v59  ;;  %v2219_v59 = vadd.f32 %v2059_v16, %v1254_v15 }
 0x327   :  { %668 = vperm.xlu1 %8474, %v8606_v7   ;;  %v4258_v57 = vpop.f32.mrb[55].mxu0  ;;  %v4264_v30 = vadd.f32 %v7987_v5, %v10285_v50 }
 0x328   :  { %v4259_v41 = vadd.f32 %v10285_v50, %v4258_v57  ;;  %v1255_v27 = vadd.f32 %v10307_v26, %v1089_v33 }
 0x329   :  { %v4842_v62 = vmax.f32 %v4264_v30, 0.0 }
 0x32a   :  { %v4841_v49 = vmax.f32 %v4259_v41, 0.0  ;;  %v1655_v10 = vpop.permute.xlu1 %1654 }
 0x32b   :  { %v2060_v4 = vmul.f32 %v10313_v9, %v1655_v10  ;;  %673 = vperm.xlu1 %8474, %v10361_v44   ;;  %v8607_v10 = vld [vmem:[%s12856_s0 + $0x2f0] sm:$0xff] }
 0x32c   :  { %5380 = vmatmul.mubr.f32.gmra.mrb[38].mxu1 %v4841_v49 }
 0x32d   :  { %v2220_v8 = vadd.f32 %v2060_v4, %v1255_v27  ;;  %5385 = vmatprep.mubr.f32.mxu1 %v12994_v40  ;;  %v10638_v4 = vld [vmem:[%s12856_s0 + $0x360] sm:$0xff] }
 0x32e   :  { %1770 = vperm.xlu0 %8502, %v10638_v4  }
 0x32f   :  { %8475 = vset.pattern.permute.xlu1 %v12917_v47  ;;  %v2616_v43 = vpop.permute.xlu1 %2615  ;;  %v3185_v14 = vadd.f32 %v3025_v58, %v2220_v8  ;;  %v2628_v58 = vpop.permute.xlu0 %2627 }
 0x330   :  { %v3024_v5 = vmul.f32 %v10324_v23, %v2616_v43  ;;  %1710 = vperm.xlu1 %8475, %v10361_v44   ;;  %5386 = vmatmul.mubr.f32.gmra.mrb[40].mxu1 %v4842_v62 }
 0x331   :  { %5391 = vmatprep.mubr.f32.mxu1 %v12994_v40  ;;  %v3345_v41 = vmax.f32 %v3185_v14, 0.0  ;;  %v10651_v14 = vld [vmem:[%s12856_s0 + $0x370] sm:$0xff] }
 0x332   :  { %v3184_v33 = vadd.f32 %v3024_v5, %v2219_v59  ;;  %v2061_v59 = vmul.f32 %v10313_v9, %v10519_v54  ;;  %1778 = vperm.xlu0 %8502, %v10651_v14  }
 0x334   :  { %v3344_v57 = vmax.f32 %v3184_v33, 0.0  ;;  %8476 = vset.pattern.permute.xlu1 %v12913_v17  ;;  %v609_v53 = vpop.permute.xlu1 %608 }
 0x335   :  { %2671 = vperm.xlu1 %8476, %v8606_v7   ;;  %v1090_v27 = vmul.f32 %v10299_v48, %v609_v53 }
 0x336   :  { %8021 = vmatprep.mubr.msk.f32.mxu0 %vm3441_vm0, %v3344_v57  ;;  %v3027_v57 = vmul.f32 %v10324_v23, %v2628_v58 }
 0x337   :  { %8022 = vmatmul.mubr.msk.f32.gmra.mrb[78].mxu0 %vm3441_vm0, %v3345_v41  ;;  %v1256_v5 = vadd.f32 %v10307_v26, %v1090_v27 }
 0x338   :  { %v614_v30 = vpop.permute.xlu1 %613 }
 0x339   :  { %8477 = vset.pattern.permute.xlu1 %v12937_v45  ;;  %v7990_v49 = vpop.f32.mrb[56].mxu0  ;;  %v1091_v44 = vmul.f32 %v10299_v48, %v614_v30  ;;  %v2221_v54 = vadd.f32 %v2061_v59, %v1256_v5  ;;  %v162_v5 = vld [vmem:[%s12856_s0 + $0x3b0] sm:$0xff] }
 0x33a   :  { %678 = vperm.xlu1 %8477, %v8607_v10   ;;  %v4268_v24 = vpop.f32.mrb[57].mxu0  ;;  %v4274_v16 = vadd.f32 %v7990_v49, %v10285_v50  ;;  %v156_v49 = vld [vmem:[%s12856_s0 + $0x380] sm:$0xff] }
 0x33b   :  { %v4269_v7 = vadd.f32 %v10285_v50, %v4268_v24  ;;  %v1257_v62 = vadd.f32 %v10307_v26, %v1091_v44  ;;  %1786 = vperm.xlu0 %8502, %v156_v49   ;;  %v2063_v49 = vmul.f32 %v10313_v9, %v10526_v34 }
 0x33c   :  { %v4844_v53 = vmax.f32 %v4274_v16, 0.0  ;;  %v158_v16 = vld [vmem:[%s12856_s0 + $0x390] sm:$0xff] }
 0x33d   :  { %v4843_v15 = vmax.f32 %v4269_v7, 0.0  ;;  %v1663_v8 = vpop.permute.xlu1 %1662 }
 0x33e   :  { %v2062_v43 = vmul.f32 %v10313_v9, %v1663_v8  ;;  %683 = vperm.xlu1 %8477, %v10371_v11   ;;  %v160_v8 = vld [vmem:[%s12856_s0 + $0x3a0] sm:$0xff] }
 0x33f   :  { %5392 = vmatmul.mubr.f32.gmra.mrb[42].mxu1 %v4843_v15  ;;  %1794 = vperm.xlu0 %8502, %v158_v16  }
 0x340   :  { %v2222_v33 = vadd.f32 %v2062_v43, %v1257_v62  ;;  %5397 = vmatprep.mubr.f32.mxu1 %v12994_v40 }
 0x342   :  { %8479 = vset.pattern.permute.xlu1 %v12917_v47  ;;  %v2624_v41 = vpop.permute.xlu1 %2623  ;;  %v3187_v44 = vadd.f32 %v3027_v57, %v2222_v33 }
 0x343   :  { %v3026_v30 = vmul.f32 %v10324_v23, %v2624_v41  ;;  %1718 = vperm.xlu1 %8479, %v10371_v11   ;;  %5398 = vmatmul.mubr.f32.gmra.mrb[44].mxu1 %v4844_v53  ;;  %v2636_v41 = vpop.permute.xlu0 %2635 }
 0x344   :  { %5403 = vmatprep.mubr.f32.mxu1 %v12994_v40  ;;  %v3347_v15 = vmax.f32 %v3187_v44, 0.0  ;;  %1802 = vperm.xlu0 %8502, %v160_v8   ;;  %v166_v8 = vld [vmem:[%s12856_s0 + $0x3d0] sm:$0xff] }
 0x345   :  { %v3186_v24 = vadd.f32 %v3026_v30, %v2221_v54 }
 0x347   :  { %v3346_v27 = vmax.f32 %v3186_v24, 0.0  ;;  %8480 = vset.pattern.permute.xlu1 %v12913_v17  ;;  %v619_v7 = vpop.permute.xlu1 %618 }
 0x348   :  { %2679 = vperm.xlu1 %8480, %v8607_v10   ;;  %v1092_v10 = vmul.f32 %v10299_v48, %v619_v7  ;;  %1810 = vperm.xlu0 %8502, %v162_v5  }
 0x349   :  { %8024 = vmatprep.mubr.msk.f32.mxu0 %vm3441_vm0, %v3346_v27  ;;  %v3029_v27 = vmul.f32 %v10324_v23, %v2636_v41 }
 0x34a   :  { %8025 = vmatmul.mubr.msk.f32.gmra.mrb[80].mxu0 %vm3441_vm0, %v3347_v15  ;;  %v1258_v44 = vadd.f32 %v10307_v26, %v1092_v10 }
 0x34b   :  { %v624_v11 = vpop.permute.xlu1 %623 }
 0x34c   :  { %8481 = vset.pattern.permute.xlu1 %v12937_v45  ;;  %v7993_v58 = vpop.f32.mrb[58].mxu0  ;;  %v1093_v62 = vmul.f32 %v10299_v48, %v624_v11  ;;  %v2223_v15 = vadd.f32 %v2063_v49, %v1258_v44  ;;  %v10717_v49 = vld [vmem:[%s12861_s4] ss:$0 sm:$0xff] }
 0x34d   :  { %688 = vperm.xlu1 %8481, %v10451_v28   ;;  %v4278_v43 = vpop.f32.mrb[59].mxu0  ;;  %v4284_v33 = vadd.f32 %v7993_v58, %v10285_v50 }
 0x34e   :  { %v4279_v59 = vadd.f32 %v10285_v50, %v4278_v43  ;;  %v1259_v54 = vadd.f32 %v10307_v26, %v1093_v62  ;;  %v164_v50 = vld [vmem:[%s12856_s0 + $0x3c0] sm:$0xff] }
 0x34f   :  { %v4846_v7 = vmax.f32 %v4284_v33, 0.0  ;;  %1818 = vperm.xlu0 %8502, %v164_v50  }
 0x350   :  { %v4845_v57 = vmax.f32 %v4279_v59, 0.0  ;;  %v1671_v53 = vpop.permute.xlu1 %1670  ;;  %v4981_v59 = vlaneseq }
 0x351   :  { %v2064_v30 = vmul.f32 %v10313_v9, %v1671_v53  ;;  %693 = vperm.xlu1 %8481, %v10382_v3  }
 0x352   :  { %5404 = vmatmul.mubr.f32.gmra.mrb[46].mxu1 %v4845_v57 }
 0x353   :  { %v2224_v24 = vadd.f32 %v2064_v30, %v1259_v54  ;;  %5409 = vmatprep.mubr.f32.mxu1 %v12994_v40  ;;  %1826 = vperm.xlu0 %8502, %v166_v8   ;;  %v4982_v30 = vshrl.u32 %v4981_v59, 7  ;;  %v4979_v8 = vld [vmem:[%s12862_s6] sm:$0x3] }
 0x355   :  { %8482 = vset.pattern.permute.xlu1 %v12917_v47  ;;  %v2632_v16 = vpop.permute.xlu1 %2631  ;;  %v3189_v11 = vadd.f32 %v3029_v27, %v2224_v24 }
 0x356   :  { %v3028_v34 = vmul.f32 %v10324_v23, %v2632_v16  ;;  %1726 = vperm.xlu1 %8482, %v10382_v3   ;;  %5410 = vmatmul.mubr.f32.gmra.mrb[48].mxu1 %v4846_v7  ;;  %v10705_v3 = vld [vmem:[%s12856_s0 + $0x378] sm:$0xff]  ;;  %v2644_v7 = vpop.permute.xlu0 %2643 }
 0x357   :  { %5415 = vmatprep.mubr.f32.mxu1 %v12994_v40  ;;  %v3349_v10 = vmax.f32 %v3189_v11, 0.0  ;;  %8522 = vset.pattern.permute.xlu0 %v12913_v17  ;;  %v4983_v11 = vsub.s32 0, %v4982_v30 }
 0x358   :  { %v3188_v58 = vadd.f32 %v3028_v34, %v2223_v15  ;;  %2747 = vperm.xlu0 %8522, %v10705_v3  }
 0x35a   :  { %v3348_v62 = vmax.f32 %v3188_v58, 0.0  ;;  %8483 = vset.pattern.permute.xlu1 %v12913_v17  ;;  %v629_v43 = vpop.permute.xlu1 %628  ;;  %v4987_v58 = vsub.s32 1, %v4982_v30 }
 0x35b   :  { %2687 = vperm.xlu1 %8483, %v10451_v28   ;;  %v1094_v54 = vmul.f32 %v10299_v48, %v629_v43  ;;  %v3031_v43 = vmul.f32 %v10324_v23, %v2644_v7 }
 0x35c   :  { %8027 = vmatprep.mubr.msk.f32.mxu0 %vm3441_vm0, %v3348_v62 }
 0x35d   :  { %8028 = vmatmul.mubr.msk.f32.gmra.mrb[82].mxu0 %vm3441_vm0, %v3349_v10  ;;  %v1260_v34 = vadd.f32 %v10307_v26, %v1094_v54 }
 0x35e   :  { %v634_v5 = vpop.permute.xlu1 %633 }
 0x35f   :  { %8484 = vset.pattern.permute.xlu1 %v12937_v45  ;;  %v7996_v33 = vpop.f32.mrb[60].mxu0  ;;  %v5267_v57 = vpop.f32.mrb[0].mxu1  ;;  %v1095_v28 = vmul.f32 %v10299_v48, %v634_v5  ;;  %v2065_v48 = vmul.f32 %v10313_v9, %v10543_v12  ;;  %v10733_v5 = vrot.slane %v4979_v8, %v4983_v11  ;;  %v10740_v12 = vld [vmem:[%s12856_s0 + $0x388] sm:$0xff] }
 0x360   :  { %698 = vperm.xlu1 %8484, %v10475_v46   ;;  %v4288_v53 = vpop.f32.mrb[61].mxu0  ;;  %v5269_v41 = vpop.f32.mrb[1].mxu1  ;;  %v4294_v24 = vadd.f32 %v10717_v49, %v7996_v33  ;;  %v10742_v33 = vrot.slane %v4979_v8, %v4987_v58  ;;  %2755 = vperm.xlu0 %8522, %v10740_v12   ;;  %v10758_v8 = vld [vmem:[%s12858_s1] ss:$0 sm:$0xff] }
 0x361   :  { %v4289_v44 = vadd.f32 %v10717_v49, %v4288_v53  ;;  %v1261_v16 = vadd.f32 %v10307_v26, %v1095_v28  ;;  %v5268_v54 = vadd.f32 %v5267_v57, %v10733_v5 }
 0x362   :  { %v4848_v10 = vmax.f32 %v4294_v24, 0.0 }
 0x363   :  { %v4847_v27 = vmax.f32 %v4289_v44, 0.0  ;;  %v1679_v50 = vpop.permute.xlu1 %1678  ;;  %v6086_v57 = vmax.f32 %v5268_v54, 0.0 }
 0x364   :  { %v2066_v15 = vmul.f32 %v10313_v9, %v1679_v50  ;;  %703 = vperm.xlu1 %8484, %v10393_v20   ;;  %v2225_v9 = vadd.f32 %v2065_v48, %v1260_v34 }
 0x365   :  { %5416 = vmatmul.mubr.f32.gmra.mrb[50].mxu1 %v4847_v27 }
 0x366   :  { %v2226_v62 = vadd.f32 %v2066_v15, %v1261_v16  ;;  %5421 = vmatprep.mubr.f32.mxu1 %v12994_v40 }
 0x368   :  { %8485 = vset.pattern.permute.xlu1 %v12917_v47  ;;  %v2640_v59 = vpop.permute.xlu1 %2639  ;;  %v3191_v28 = vadd.f32 %v3031_v43, %v2226_v62 }
 0x369   :  { %v3030_v26 = vmul.f32 %v10324_v23, %v2640_v59  ;;  %1734 = vperm.xlu1 %8485, %v10393_v20   ;;  %5422 = vmatmul.mubr.f32.gmra.mrb[52].mxu1 %v4848_v10  ;;  %v5270_v20 = vadd.f32 %v5269_v41, %v10742_v33 }
 0x36a   :  { %5427 = vmatprep.mubr.f32.mxu1 %v12994_v40  ;;  %v3351_v44 = vmax.f32 %v3191_v28, 0.0 }
 0x36b   :  { %v3190_v53 = vadd.f32 %v3030_v26, %v2225_v9  ;;  %v6087_v48 = vmax.f32 %v5270_v20, 0.0 }
 0x36d   :  { %v3350_v30 = vmax.f32 %v3190_v53, 0.0  ;;  %8486 = vset.pattern.permute.xlu1 %v12913_v17  ;;  %v639_v23 = vpop.permute.xlu1 %638 }
 0x36e   :  { %2695 = vperm.xlu1 %8486, %v10475_v46   ;;  %v5273_v24 = vpop.f32.mrb[2].mxu1  ;;  %v1096_v59 = vmul.f32 %v10758_v8, %v639_v23 }
 0x36f   :  { %v5274_v27 = vadd.f32 %v5273_v24, %v10733_v5  ;;  %8030 = vmatprep.mubr.msk.f32.mxu0 %vm3441_vm0, %v3350_v30  ;;  %v5275_v50 = vpop.f32.mrb[3].mxu1  ;;  %v2652_v24 = vpop.permute.xlu0 %2651 }
 0x370   :  { %v5276_v7 = vadd.f32 %v5275_v50, %v10742_v33  ;;  %8031 = vmatmul.mubr.msk.f32.gmra.mrb[84].mxu0 %vm3441_vm0, %v3351_v44 }
 0x371   :  { %v6088_v16 = vmax.f32 %v5274_v27, 0.0  ;;  %v644_v15 = vpop.permute.xlu1 %643  ;;  %v10770_v27 = vld [vmem:[%s12859_s2] ss:$0 sm:$0xff] }
 0x372   :  { %v6089_v34 = vmax.f32 %v5276_v7, 0.0  ;;  %8487 = vset.pattern.permute.xlu1 %v12937_v45  ;;  %v7999_v41 = vpop.f32.mrb[62].mxu0  ;;  %v5279_v11 = vpop.f32.mrb[4].mxu1  ;;  %v1097_v58 = vmul.f32 %v10758_v8, %v644_v15  ;;  %v10776_v7 = vld [vmem:[%s12858_s1 + $0x1] ss:$0 sm:$0xff]  ;;  %v1262_v15 = vadd.f32 %v10770_v27, %v1096_v59 }
 0x373   :  { %v6350_v46 = vmax.f32 %v6086_v57, %v6088_v16  ;;  %v5280_v62 = vadd.f32 %v5279_v11, %v10733_v5  ;;  %708 = vperm.xlu1 %8487, %v10505_v63   ;;  %v4298_v43 = vpop.f32.mrb[63].mxu0  ;;  %v5281_v10 = vpop.f32.mrb[5].mxu1  ;;  %v4304_v54 = vadd.f32 %v10717_v49, %v7999_v41  ;;  %v2067_v16 = vmul.f32 %v10776_v7, %v10553_v56 }
 0x374   :  { %v6351_v9 = vmax.f32 %v6087_v48, %v6089_v34  ;;  %v4299_v26 = vadd.f32 %v10717_v49, %v4298_v43  ;;  %v5282_v28 = vadd.f32 %v5281_v10, %v10742_v33  ;;  %v1263_v50 = vadd.f32 %v10770_v27, %v1097_v58 }
 0x375   :  { %v6090_v53 = vmax.f32 %v5280_v62, 0.0  ;;  %v4850_v43 = vmax.f32 %v4304_v54, 0.0 }
 0x376   :  { %v4849_v30 = vmax.f32 %v4299_v26, 0.0  ;;  %v6091_v20 = vmax.f32 %v5282_v28, 0.0  ;;  %v1687_v44 = vpop.permute.xlu1 %1686  ;;  %v2227_v26 = vadd.f32 %v2067_v16, %v1262_v15 }
 0x377   :  { %v6414_v23 = vmax.f32 %v6350_v46, %v6090_v53  ;;  %v2068_v57 = vmul.f32 %v10776_v7, %v1687_v44  ;;  %713 = vperm.xlu1 %8487, %v10405_v36   ;;  %v10787_v46 = vld [vmem:[%s12858_s1 + $0x2] ss:$0 sm:$0xff] }
 0x378   :  { %v6415_v48 = vmax.f32 %v6351_v9, %v6091_v20  ;;  %v5285_v34 = vpop.f32.mrb[6].mxu1  ;;  %5428 = vmatmul.mubr.f32.gmra.mrb[54].mxu1 %v4849_v30  ;;  %v3033_v58 = vmul.f32 %v10787_v46, %v2652_v24  ;;  %v10798_v30 = vld [vmem:[%s12856_s0 + $0x398] sm:$0xff] }
 0x379   :  { %v2228_v41 = vadd.f32 %v2068_v57, %v1263_v50  ;;  %v5286_v11 = vadd.f32 %v5285_v34, %v10733_v5  ;;  %v5287_v62 = vpop.f32.mrb[7].mxu1  ;;  %5433 = vmatprep.mubr.f32.mxu1 %v12994_v40  ;;  %2763 = vperm.xlu0 %8522, %v10798_v30  }
 0x37a   :  { %v5288_v56 = vadd.f32 %v5287_v62, %v10742_v33 }
 0x37b   :  { %v6092_v10 = vmax.f32 %v5286_v11, 0.0  ;;  %8488 = vset.pattern.permute.xlu1 %v12917_v47  ;;  %v2648_v59 = vpop.permute.xlu1 %2647  ;;  %v3193_v20 = vadd.f32 %v3033_v58, %v2228_v41 }
 0x37c   :  { %v6093_v9 = vmax.f32 %v5288_v56, 0.0  ;;  %v3032_v28 = vmul.f32 %v10787_v46, %v2648_v59  ;;  %1742 = vperm.xlu1 %8488, %v10405_v36   ;;  %v5291_v53 = vpop.f32.mrb[8].mxu1  ;;  %5434 = vmatmul.mubr.f32.gmra.mrb[56].mxu1 %v4850_v43 }
 0x37d   :  { %v6478_v54 = vmax.f32 %v6414_v23, %v6092_v10  ;;  %v5292_v44 = vadd.f32 %v5291_v53, %v10733_v5  ;;  %v5293_v24 = vpop.f32.mrb[9].mxu1  ;;  %5439 = vmatprep.mubr.f32.mxu1 %v12994_v40  ;;  %v3353_v62 = vmax.f32 %v3193_v20, 0.0  ;;  %v2660_v20 = vpop.permute.xlu0 %2659 }
 0x37e   :  { %v6479_v50 = vmax.f32 %v6415_v48, %v6093_v9  ;;  %v3192_v57 = vadd.f32 %v3032_v28, %v2227_v26  ;;  %v5294_v36 = vadd.f32 %v5293_v24, %v10742_v33 }
 0x37f   :  { %v6094_v16 = vmax.f32 %v5292_v44, 0.0 }
 0x380   :  { %v3352_v15 = vmax.f32 %v3192_v57, 0.0  ;;  %v6095_v34 = vmax.f32 %v5294_v36, 0.0  ;;  %8489 = vset.pattern.permute.xlu1 %v12913_v17  ;;  %v649_v11 = vpop.permute.xlu1 %648  ;;  %v8613_v57 = vld [vmem:[%s12856_s0 + $0x338] sm:$0xff] }
 0x381   :  { %v10805_v23 = vmax.f32 %v6478_v54, %v6094_v16  ;;  %2703 = vperm.xlu1 %8489, %v10505_v63   ;;  %v1098_v59 = vmul.f32 %v10758_v8, %v649_v11  ;;  %v2069_v16 = vmul.f32 %v10776_v7, %v10561_v1 }
 0x382   :  { %v10808_v41 = vmax.f32 %v6479_v50, %v6095_v34  ;;  %8033 = vmatprep.mubr.msk.f32.mxu0 %vm3441_vm0, %v3352_v15 }
 0x383   :  { %12995 = vst [vmem:[#allocation29_spill] sm:$0xff] %v10805_v23  ;;  %8034 = vmatmul.mubr.msk.f32.gmra.mrb[86].mxu0 %vm3441_vm0, %v3353_v62  ;;  %v1264_v15 = vadd.f32 %v10770_v27, %v1098_v59 }
 0x384   :  { %12996 = vst [vmem:[#allocation20_spill] sm:$0xff] %v10808_v41  ;;  %v654_v48 = vpop.permute.xlu1 %653 }
 0x385   :  { %8490 = vset.pattern.permute.xlu1 %v12937_v45  ;;  %v8002_v58 = vpop.f32.mrb[64].mxu0  ;;  %v1099_v43 = vmul.f32 %v10758_v8, %v654_v48 }
 0x386   :  { %718 = vperm.xlu1 %8490, %v10539_v18   ;;  %v4308_v56 = vpop.f32.mrb[65].mxu0  ;;  %v5297_v10 = vpop.f32.mrb[10].mxu1  ;;  %v4314_v26 = vadd.f32 %v10717_v49, %v8002_v58  ;;  %v3035_v58 = vmul.f32 %v10787_v46, %v2660_v20 }
 0x387   :  { %v4309_v63 = vadd.f32 %v10717_v49, %v4308_v56  ;;  %v5299_v9 = vpop.f32.mrb[11].mxu1  ;;  %v5298_v53 = vadd.f32 %v5297_v10, %v10733_v5  ;;  %v1265_v44 = vadd.f32 %v10770_v27, %v1099_v43 }
 0x388   :  { %v5300_v24 = vadd.f32 %v5299_v9, %v10742_v33  ;;  %v4852_v43 = vmax.f32 %v4314_v26, 0.0 }
 0x389   :  { %v4851_v28 = vmax.f32 %v4309_v63, 0.0  ;;  %v1695_v54 = vpop.permute.xlu1 %1694  ;;  %v6096_v56 = vmax.f32 %v5298_v53, 0.0 }
 0x38a   :  { %v2070_v50 = vmul.f32 %v10776_v7, %v1695_v54  ;;  %723 = vperm.xlu1 %8490, %v8613_v57   ;;  %v5303_v36 = vpop.f32.mrb[12].mxu1  ;;  %v6097_v63 = vmax.f32 %v5300_v24, 0.0  ;;  %v2229_v54 = vadd.f32 %v2069_v16, %v1264_v15 }
 0x38b   :  { %v5304_v34 = vadd.f32 %v5303_v36, %v10733_v5  ;;  %v5305_v11 = vpop.f32.mrb[13].mxu1  ;;  %5440 = vmatmul.mubr.f32.gmra.mrb[58].mxu1 %v4851_v28  ;;  %v10837_v28 = vld [vmem:[%s12856_s0 + $0x3a8] sm:$0xff] }
 0x38c   :  { %v2230_v62 = vadd.f32 %v2070_v50, %v1265_v44  ;;  %v5306_v48 = vadd.f32 %v5305_v11, %v10742_v33  ;;  %5445 = vmatprep.mubr.f32.mxu1 %v12994_v40  ;;  %2771 = vperm.xlu0 %8522, %v10837_v28  }
 0x38d   :  { %v6098_v10 = vmax.f32 %v5304_v34, 0.0 }
 0x38e   :  { %v6099_v9 = vmax.f32 %v5306_v48, 0.0  ;;  %8491 = vset.pattern.permute.xlu1 %v12917_v47  ;;  %v2656_v1 = vpop.permute.xlu1 %2655  ;;  %v3195_v26 = vadd.f32 %v3035_v58, %v2230_v62 }
 0x38f   :  { %v6352_v59 = vmax.f32 %v6096_v56, %v6098_v10  ;;  %v3034_v36 = vmul.f32 %v10787_v46, %v2656_v1  ;;  %1750 = vperm.xlu1 %8491, %v8613_v57   ;;  %5446 = vmatmul.mubr.f32.gmra.mrb[60].mxu1 %v4852_v43 }
 0x390   :  { %v6353_v20 = vmax.f32 %v6097_v63, %v6099_v9  ;;  %v5309_v53 = vpop.f32.mrb[14].mxu1  ;;  %5451 = vmatprep.mubr.f32.mxu1 %v12994_v40  ;;  %v3355_v11 = vmax.f32 %v3195_v26, 0.0 }
 0x391   :  { %v3194_v44 = vadd.f32 %v3034_v36, %v2229_v54  ;;  %v5310_v24 = vadd.f32 %v5309_v53, %v10733_v5  ;;  %v5311_v50 = vpop.f32.mrb[15].mxu1 }
 0x392   :  { %v5312_v16 = vadd.f32 %v5311_v50, %v10742_v33 }
 0x393   :  { %v3354_v57 = vmax.f32 %v3194_v44, 0.0  ;;  %v6100_v15 = vmax.f32 %v5310_v24, 0.0  ;;  %8492 = vset.pattern.permute.xlu1 %v12913_v17  ;;  %v659_v34 = vpop.permute.xlu1 %658  ;;  %v2668_v24 = vpop.permute.xlu0 %2667 }
 0x394   :  { %v6101_v48 = vmax.f32 %v5312_v16, 0.0  ;;  %2711 = vperm.xlu1 %8492, %v10539_v18   ;;  %v5315_v62 = vpop.f32.mrb[16].mxu1  ;;  %v1100_v53 = vmul.f32 %v10758_v8, %v659_v34  ;;  %v2071_v34 = vmul.f32 %v10776_v7, %v10574_v21 }
 0x395   :  { %v6416_v58 = vmax.f32 %v6352_v59, %v6100_v15  ;;  %v5316_v43 = vadd.f32 %v5315_v62, %v10733_v5  ;;  %8036 = vmatprep.mubr.msk.f32.mxu0 %vm3441_vm0, %v3354_v57  ;;  %v5317_v56 = vpop.f32.mrb[17].mxu1 }
 0x396   :  { %v6417_v10 = vmax.f32 %v6353_v20, %v6101_v48  ;;  %v5318_v63 = vadd.f32 %v5317_v56, %v10742_v33  ;;  %8037 = vmatmul.mubr.msk.f32.gmra.mrb[88].mxu0 %vm3441_vm0, %v3355_v11  ;;  %v8614_v48 = vld [vmem:[%s12856_s0 + $0x348] sm:$0xff]  ;;  %v1266_v62 = vadd.f32 %v10770_v27, %v1100_v53  ;;  %v3037_v56 = vmul.f32 %v10787_v46, %v2668_v24 }
 0x397   :  { %v6102_v9 = vmax.f32 %v5316_v43, 0.0  ;;  %v664_v1 = vpop.permute.xlu1 %663 }
 0x398   :  { %v6103_v54 = vmax.f32 %v5318_v63, 0.0  ;;  %8493 = vset.pattern.permute.xlu1 %v12937_v45  ;;  %v8005_v36 = vpop.f32.mrb[66].mxu0  ;;  %v1101_v18 = vmul.f32 %v10758_v8, %v664_v1 }
 0x399   :  { %v6480_v26 = vmax.f32 %v6416_v58, %v6102_v9  ;;  %728 = vperm.xlu1 %8493, %v10579_v52   ;;  %v4318_v59 = vpop.f32.mrb[67].mxu0  ;;  %v4324_v50 = vadd.f32 %v10717_v49, %v8005_v36  ;;  %v2676_v58 = vpop.permute.xlu0 %2675  ;;  %v2231_v36 = vadd.f32 %v2071_v34, %v1266_v62 }
 0x39a   :  { %v6481_v44 = vmax.f32 %v6417_v10, %v6103_v54  ;;  %v4319_v20 = vadd.f32 %v10717_v49, %v4318_v59  ;;  %v1267_v15 = vadd.f32 %v10770_v27, %v1101_v18  ;;  %v10872_v59 = vld [vmem:[%s12856_s0 + $0x3b8] sm:$0xff] }
 0x39b   :  { %v4854_v10 = vmax.f32 %v4324_v50, 0.0  ;;  %2779 = vperm.xlu0 %8522, %v10872_v59  }
 0x39c   :  { %v4853_v16 = vmax.f32 %v4319_v20, 0.0  ;;  %v1703_v57 = vpop.permute.xlu1 %1702 }
 0x39d   :  { %v2072_v11 = vmul.f32 %v10776_v7, %v1703_v57  ;;  %733 = vperm.xlu1 %8493, %v8614_v48   ;;  %v10876_v57 = vpop.permute.xlu0 %2683 }
 0x39e   :  { %5452 = vmatmul.mubr.f32.gmra.mrb[62].mxu1 %v4853_v16 }
 0x39f   :  { %v2232_v43 = vadd.f32 %v2072_v11, %v1267_v15  ;;  %5457 = vmatprep.mubr.f32.mxu1 %v12994_v40 }
 0x3a0   :  { %v5321_v63 = vpop.f32.mrb[18].mxu1 }
 0x3a1   :  { %v5322_v9 = vadd.f32 %v5321_v63, %v10733_v5  ;;  %8494 = vset.pattern.permute.xlu1 %v12917_v47  ;;  %v2664_v1 = vpop.permute.xlu1 %2663  ;;  %v5323_v54 = vpop.f32.mrb[19].mxu1  ;;  %v3197_v53 = vadd.f32 %v3037_v56, %v2232_v43 }
 0x3a2   :  { %v3036_v21 = vmul.f32 %v10787_v46, %v2664_v1  ;;  %v5324_v18 = vadd.f32 %v5323_v54, %v10742_v33  ;;  %1758 = vperm.xlu1 %8494, %v8614_v48   ;;  %5458 = vmatmul.mubr.f32.gmra.mrb[64].mxu1 %v4854_v10  ;;  %v10886_v10 = vpop.permute.xlu0 %2691 }
 0x3a3   :  { %v6104_v20 = vmax.f32 %v5322_v9, 0.0  ;;  %5463 = vmatprep.mubr.f32.mxu1 %v12994_v40  ;;  %v3357_v43 = vmax.f32 %v3197_v53, 0.0  ;;  %v8615_v53 = vld [vmem:[%s12856_s0 + $0x358] sm:$0xff] }
 0x3a4   :  { %v3196_v24 = vadd.f32 %v3036_v21, %v2231_v36  ;;  %v6105_v50 = vmax.f32 %v5324_v18, 0.0  ;;  %v5327_v16 = vpop.f32.mrb[20].mxu1 }
 0x3a5   :  { %v10878_v15 = vmax.f32 %v6480_v26, %v6104_v20  ;;  %v5329_v11 = vpop.f32.mrb[21].mxu1 }
 0x3a6   :  { %v3356_v48 = vmax.f32 %v3196_v24, 0.0  ;;  %v10880_v34 = vmax.f32 %v6481_v44, %v6105_v50  ;;  %8495 = vset.pattern.permute.xlu1 %v12913_v17  ;;  %v669_v62 = vpop.permute.xlu1 %668  ;;  %v10899_v20 = vpop.permute.xlu0 %2699  ;;  %v2073_v24 = vmul.f32 %v10776_v7, %v10591_v29 }
 0x3a7   :  { %2719 = vperm.xlu1 %8495, %v10579_v52   ;;  %v1102_v9 = vmul.f32 %v10758_v8, %v669_v62  ;;  %v3039_v62 = vmul.f32 %v10787_v46, %v2676_v58  ;;  %v10915_v58 = vld [vmem:[%s12856_s0 + $0x3c8] sm:$0xff] }
 0x3a8   :  { %8039 = vmatprep.mubr.msk.f32.mxu0 %vm3441_vm0, %v3356_v48  ;;  %v5328_v48 = vadd.f32 %v5327_v16, %v10733_v5  ;;  %2787 = vperm.xlu0 %8522, %v10915_v58  }
 0x3a9   :  { %8040 = vmatmul.mubr.msk.f32.gmra.mrb[90].mxu0 %vm3441_vm0, %v3357_v43  ;;  %v1268_v50 = vadd.f32 %v10770_v27, %v1102_v9 }
 0x3aa   :  { %v674_v56 = vpop.permute.xlu1 %673 }
 0x3ab   :  { %8496 = vset.pattern.permute.xlu1 %v12937_v45  ;;  %v8008_v26 = vpop.f32.mrb[68].mxu0  ;;  %v1103_v63 = vmul.f32 %v10758_v8, %v674_v56  ;;  %v5330_v56 = vadd.f32 %v5329_v11, %v10742_v33  ;;  %v6106_v11 = vmax.f32 %v5328_v48, 0.0 }
 0x3ac   :  { %738 = vperm.xlu1 %8496, %v10613_v55   ;;  %v4328_v44 = vpop.f32.mrb[69].mxu0  ;;  %v4334_v52 = vadd.f32 %v10717_v49, %v8008_v26 }
 0x3ad   :  { %v4329_v1 = vadd.f32 %v10717_v49, %v4328_v44  ;;  %v1269_v21 = vadd.f32 %v10770_v27, %v1103_v63 }
 0x3ae   :  { %v4856_v26 = vmax.f32 %v4334_v52, 0.0 }
 0x3af   :  { %v4855_v54 = vmax.f32 %v4329_v1, 0.0  ;;  %v1711_v36 = vpop.permute.xlu1 %1710 }
 0x3b0   :  { %v2074_v18 = vmul.f32 %v10776_v7, %v1711_v36  ;;  %743 = vperm.xlu1 %8496, %v8615_v53   ;;  %v2233_v36 = vadd.f32 %v2073_v24, %v1268_v50 }
 0x3b1   :  { %5464 = vmatmul.mubr.f32.gmra.mrb[66].mxu1 %v4855_v54 }
 0x3b2   :  { %v2234_v43 = vadd.f32 %v2074_v18, %v1269_v21  ;;  %5469 = vmatprep.mubr.f32.mxu1 %v12994_v40  ;;  %v10917_v21 = vpop.permute.xlu0 %2707  ;;  %v6107_v18 = vmax.f32 %v5330_v56, 0.0 }
 0x3b3   :  { %v5333_v63 = vpop.f32.mrb[22].mxu1 }
 0x3b4   :  { %v5334_v44 = vadd.f32 %v5333_v63, %v10733_v5  ;;  %8497 = vset.pattern.permute.xlu1 %v12917_v47  ;;  %v2672_v1 = vpop.permute.xlu1 %2671  ;;  %v5335_v29 = vpop.f32.mrb[23].mxu1  ;;  %v3199_v52 = vadd.f32 %v3039_v62, %v2234_v43 }
 0x3b5   :  { %v3038_v9 = vmul.f32 %v10787_v46, %v2672_v1  ;;  %v5336_v16 = vadd.f32 %v5335_v29, %v10742_v33  ;;  %1766 = vperm.xlu1 %8497, %v8615_v53   ;;  %5470 = vmatmul.mubr.f32.gmra.mrb[68].mxu1 %v4856_v26 }
 0x3b6   :  { %v6108_v54 = vmax.f32 %v5334_v44, 0.0  ;;  %5475 = vmatprep.mubr.f32.mxu1 %v12994_v40  ;;  %v3359_v43 = vmax.f32 %v3199_v52, 0.0 }
 0x3b7   :  { %v3198_v24 = vadd.f32 %v3038_v9, %v2233_v36  ;;  %v6109_v50 = vmax.f32 %v5336_v16, 0.0  ;;  %v5339_v63 = vpop.f32.mrb[24].mxu1  ;;  %v10927_v36 = vpop.permute.xlu0 %2715 }
 0x3b8   :  { %v6354_v53 = vmax.f32 %v6106_v11, %v6108_v54  ;;  %v5340_v26 = vadd.f32 %v5339_v63, %v10733_v5  ;;  %v5341_v1 = vpop.f32.mrb[25].mxu1 }
 0x3b9   :  { %v3358_v29 = vmax.f32 %v3198_v24, 0.0  ;;  %v6355_v41 = vmax.f32 %v6107_v18, %v6109_v50  ;;  %v5342_v48 = vadd.f32 %v5341_v1, %v10742_v33  ;;  %8498 = vset.pattern.permute.xlu1 %v12913_v17  ;;  %v679_v62 = vpop.permute.xlu1 %678  ;;  %v8616_v1 = vld [vmem:[%s12856_s0 + $0x368] sm:$0xff] }
 0x3ba   :  { %v6110_v44 = vmax.f32 %v5340_v26, 0.0  ;;  %2727 = vperm.xlu1 %8498, %v10613_v55   ;;  %v10935_v55 = vld [vmem:[%s12856_s0 + $0x3d8] sm:$0xff]  ;;  %v1104_v18 = vmul.f32 %v10758_v8, %v679_v62 }
 0x3bb   :  { %v6111_v23 = vmax.f32 %v5342_v48, 0.0  ;;  %8042 = vmatprep.mubr.msk.f32.mxu0 %vm3441_vm0, %v3358_v29  ;;  %2795 = vperm.xlu0 %8522, %v10935_v55   ;;  %v10941_v63 = vpop.permute.xlu0 %2723  ;;  %v169_v29 = vld [vmem:[%s12856_s0 + $0x3e8] sm:$0xff]  ;;  %v2075_v48 = vmul.f32 %v10776_v7, %v10597_v35 }
 0x3bc   :  { %v6418_v56 = vmax.f32 %v6354_v53, %v6110_v44  ;;  %8043 = vmatmul.mubr.msk.f32.gmra.mrb[92].mxu0 %vm3441_vm0, %v3359_v43  ;;  %v1270_v62 = vadd.f32 %v10770_v27, %v1104_v18  ;;  %v3041_v43 = vmul.f32 %v10787_v46, %v10876_v57  ;;  %v171_v18 = vld [vmem:[%s12856_s0 + $0x3f8] sm:$0xff] }
 0x3bd   :  { %v6419_v9 = vmax.f32 %v6355_v41, %v6111_v23  ;;  %v684_v16 = vpop.permute.xlu1 %683 }
 0x3be   :  { %8499 = vset.pattern.permute.xlu1 %v12937_v45  ;;  %v8011_v11 = vpop.f32.mrb[70].mxu0  ;;  %v1105_v54 = vmul.f32 %v10758_v8, %v684_v16  ;;  %v6688_v16 = vrot.slane %v10878_v15, 4 }
 0x3bf   :  { %748 = vperm.xlu1 %8499, %v10638_v4   ;;  %v4338_v52 = vpop.f32.mrb[71].mxu0  ;;  %v4344_v23 = vadd.f32 %v10717_v49, %v8011_v11  ;;  %2803 = vperm.xlu0 %8522, %v169_v29   ;;  %v10964_v57 = vpop.permute.xlu0 %2731 }
 0x3c0   :  { %v4339_v24 = vadd.f32 %v10717_v49, %v4338_v52  ;;  %v1271_v53 = vadd.f32 %v10770_v27, %v1105_v54 }
 0x3c1   :  { %v4858_v11 = vmax.f32 %v4344_v23, 0.0 }
 0x3c2   :  { %v4857_v41 = vmax.f32 %v4339_v24, 0.0  ;;  %v1719_v50 = vpop.permute.xlu1 %1718 }
 0x3c3   :  { %v2076_v26 = vmul.f32 %v10776_v7, %v1719_v50  ;;  %753 = vperm.xlu1 %8499, %v8616_v1   ;;  %v2235_v50 = vadd.f32 %v2075_v48, %v1270_v62  ;;  %2811 = vperm.xlu0 %8522, %v171_v18   ;;  %v173_v62 = vld [vmem:[%s12856_s0 + $0x408] sm:$0xff] }
 0x3c4   :  { %5476 = vmatmul.mubr.f32.gmra.mrb[70].mxu1 %v4857_v41  ;;  %v6694_v41 = vrot.slane %v10880_v34, 4 }
 0x3c5   :  { %v2236_v44 = vadd.f32 %v2076_v26, %v1271_v53  ;;  %5481 = vmatprep.mubr.f32.mxu1 %v12994_v40 }
 0x3c6   :  { %v5345_v54 = vpop.f32.mrb[26].mxu1 }
 0x3c7   :  { %v5346_v52 = vadd.f32 %v5345_v54, %v10733_v5  ;;  %8500 = vset.pattern.permute.xlu1 %v12917_v47  ;;  %v2680_v24 = vpop.permute.xlu1 %2679  ;;  %v5347_v35 = vpop.f32.mrb[27].mxu1  ;;  %v3201_v26 = vadd.f32 %v3041_v43, %v2236_v44  ;;  %v6689_v54 = vmax.f32 %v10878_v15, %v6688_v16  ;;  %2819 = vperm.xlu0 %8522, %v173_v62  }
 0x3c8   :  { %v3040_v53 = vmul.f32 %v10787_v46, %v2680_v24  ;;  %v5348_v23 = vadd.f32 %v5347_v35, %v10742_v33  ;;  %1774 = vperm.xlu1 %8500, %v8616_v1   ;;  %5482 = vmatmul.mubr.f32.gmra.mrb[72].mxu1 %v4858_v11  ;;  %v6695_v1 = vmax.f32 %v10880_v34, %v6694_v41 }
 0x3c9   :  { %v6112_v29 = vmax.f32 %v5346_v52, 0.0  ;;  %5487 = vmatprep.mubr.f32.mxu1 %v12994_v40  ;;  %v3361_v16 = vmax.f32 %v3201_v26, 0.0 }
 0x3ca   :  { %v3200_v2 = vadd.f32 %v3040_v53, %v2235_v50  ;;  %v6113_v0 = vmax.f32 %v5348_v23, 0.0  ;;  %v5351_v25 = vpop.f32.mrb[28].mxu1 }
 0x3cb   :  { %v6482_v31 = vmax.f32 %v6418_v56, %v6112_v29  ;;  %v5352_v61 = vadd.f32 %v5351_v25, %v10733_v5  ;;  %v5353_v48 = vpop.f32.mrb[29].mxu1  ;;  %v6690_v25 = vrot.slane %v6689_v54, 2  ;;  %v10978_v56 = vpop.permute.xlu0 %2739  ;;  %v177_v29 = vld [vmem:[%s12856_s0 + $0x428] sm:$0xff] }
 0x3cc   :  { %v3360_v43 = vmax.f32 %v3200_v2, 0.0  ;;  %v6483_v44 = vmax.f32 %v6419_v9, %v6113_v0  ;;  %v5354_v11 = vadd.f32 %v5353_v48, %v10742_v33  ;;  %8501 = vset.pattern.permute.xlu1 %v12913_v17  ;;  %v689_v15 = vpop.permute.xlu1 %688  ;;  %v175_v2 = vld [vmem:[%s12856_s0 + $0x418] sm:$0xff]  ;;  %v6696_v0 = vrot.slane %v6695_v1, 2 }
 0x3cd   :  { %v6114_v52 = vmax.f32 %v5352_v61, 0.0  ;;  %2735 = vperm.xlu1 %8501, %v10638_v4   ;;  %2827 = vperm.xlu0 %8522, %v175_v2   ;;  %v6691_v18 = vmax.f32 %v6689_v54, %v6690_v25  ;;  %v1106_v23 = vmul.f32 %v10758_v8, %v689_v15 }
 0x3ce   :  { %v6115_v24 = vmax.f32 %v5354_v11, 0.0  ;;  %8045 = vmatprep.mubr.msk.f32.mxu0 %vm3441_vm0, %v3360_v43  ;;  %v6697_v48 = vmax.f32 %v6695_v1, %v6696_v0  ;;  %v3043_v0 = vmul.f32 %v10787_v46, %v10886_v10 }
 0x3cf   :  { %v6546_v35 = vmax.f32 %v6482_v31, %v6114_v52  ;;  %8046 = vmatmul.mubr.msk.f32.gmra.mrb[94].mxu0 %vm3441_vm0, %v3361_v16  ;;  %v1723_v43 = vpop.permute.xlu0 %1722 }
 0x3d0   :  { %v6547_v34 = vmax.f32 %v6483_v44, %v6115_v24  ;;  %v694_v9 = vpop.permute.xlu1 %693  ;;  %v2077_v1 = vmul.f32 %v10776_v7, %v1723_v43  ;;  %v6698_v2 = vrot.slane %v6697_v48, 1 }
 0x3d1   :  { %v6700_v61 = vrot.slane %v6546_v35, 4  ;;  %8503 = vset.pattern.permute.xlu1 %v12937_v45  ;;  %v8014_v4 = vpop.f32.mrb[72].mxu0  ;;  %v1107_v50 = vmul.f32 %v10758_v8, %v694_v9  ;;  %2835 = vperm.xlu0 %8522, %v177_v29  }
 0x3d2   :  { %v6706_v41 = vrot.slane %v6547_v34, 4  ;;  %758 = vperm.xlu1 %8503, %v10651_v14   ;;  %v4348_v31 = vpop.f32.mrb[73].mxu0  ;;  %v4354_v54 = vadd.f32 %v10717_v49, %v8014_v4  ;;  %v6692_v14 = vrot.slane %v6691_v18, 1  ;;  %v6699_v43 = vmax.f32 %v6697_v48, %v6698_v2 }
 0x3d3   :  { %v6701_v53 = vmax.f32 %v6546_v35, %v6700_v61  ;;  %v4349_v26 = vadd.f32 %v10717_v49, %v4348_v31  ;;  %v1273_v25 = vadd.f32 %v10770_v27, %v1107_v50  ;;  %v1272_v35 = vadd.f32 %v10770_v27, %v1106_v23  ;;  %v11005_v50 = vld [vmem:[%s12856_s0 + $0x3e0] sm:$0xff] }
 0x3d4   :  { %v6707_v62 = vmax.f32 %v6547_v34, %v6706_v41  ;;  %v4860_v4 = vmax.f32 %v4354_v54, 0.0  ;;  %v6693_v31 = vmax.f32 %v6691_v18, %v6692_v14 }
 0x3d5   :  { %v6702_v44 = vrot.slane %v6701_v53, 2  ;;  %v4859_v11 = vmax.f32 %v4349_v26, 0.0  ;;  %v1727_v16 = vpop.permute.xlu1 %1726  ;;  %8540 = vset.pattern.permute.xlu0 %v12917_v47  ;;  %v2237_v29 = vadd.f32 %v2077_v1, %v1272_v35 }
 0x3d6   :  { %v6708_v52 = vrot.slane %v6707_v62, 2  ;;  %v2078_v15 = vmul.f32 %v10776_v7, %v1727_v16  ;;  %763 = vperm.xlu1 %8503, %v10705_v3   ;;  %1834 = vperm.xlu0 %8540, %v11005_v50  }
 0x3d7   :  { %v6703_v24 = vmax.f32 %v6701_v53, %v6702_v44  ;;  %5488 = vmatmul.mubr.f32.gmra.mrb[74].mxu1 %v4859_v11 }
 0x3d8   :  { %v6709_v34 = vmax.f32 %v6707_v62, %v6708_v52  ;;  %v2238_v9 = vadd.f32 %v2078_v15, %v1273_v25  ;;  %5493 = vmatprep.mubr.f32.mxu1 %v12994_v40 }
 0x3d9   :  { %v6704_v61 = vrot.slane %v6703_v24, 1  ;;  %v5357_v41 = vpop.f32.mrb[30].mxu1 }
 0x3da   :  { %v6710_v53 = vrot.slane %v6709_v34, 1  ;;  %8504 = vset.pattern.permute.xlu1 %v12917_v47  ;;  %v2688_v10 = vpop.permute.xlu1 %2687  ;;  %v5359_v23 = vpop.f32.mrb[31].mxu1  ;;  %v3203_v54 = vadd.f32 %v3043_v0, %v2238_v9  ;;  %v5358_v18 = vadd.f32 %v5357_v41, %v10733_v5 }
 0x3db   :  { %v6705_v26 = vmax.f32 %v6703_v24, %v6704_v61  ;;  %v3042_v62 = vmul.f32 %v10787_v46, %v2688_v10  ;;  %1782 = vperm.xlu1 %8504, %v10705_v3   ;;  %5494 = vmatmul.mubr.f32.gmra.mrb[76].mxu1 %v4860_v4  ;;  %v5360_v14 = vadd.f32 %v5359_v23, %v10742_v33  ;;  %v8618_v23 = vld [vmem:[%s12856_s0 + $0x380] sm:$0xff] }
 0x3dc   :  { %v6711_v44 = vmax.f32 %v6709_v34, %v6710_v53  ;;  %5499 = vmatprep.mubr.f32.mxu1 %v12994_v40  ;;  %v3363_v1 = vmax.f32 %v3203_v54, 0.0  ;;  %v6116_v2 = vmax.f32 %v5358_v18, 0.0  ;;  %v8617_v34 = vld [vmem:[%s12856_s0 + $0x370] sm:$0xff] }
 0x3dd   :  { %v11015_v11 = vsel %vm7079_vm1, %v6705_v26, %v6693_v31  ;;  %v3202_v16 = vadd.f32 %v3042_v62, %v2237_v29  ;;  %v5363_v52 = vpop.f32.mrb[32].mxu1  ;;  %v6117_v9 = vmax.f32 %v5360_v14, 0.0 }
 0x3de   :  { %v11019_v25 = vsel %vm7079_vm1, %v6711_v44, %v6699_v43  ;;  %v5364_v3 = vadd.f32 %v5363_v52, %v10733_v5  ;;  %v5365_v15 = vpop.f32.mrb[33].mxu1  ;;  %v1731_v43 = vpop.permute.xlu0 %1730  ;;  %v11043_v52 = vld [vmem:[%s12856_s0 + $0x3f0] sm:$0xff] }
 0x3df   :  { %v3362_v48 = vmax.f32 %v3202_v16, 0.0  ;;  %v5366_v24 = vadd.f32 %v5365_v15, %v10742_v33  ;;  %8505 = vset.pattern.permute.xlu1 %v12913_v17  ;;  %v699_v35 = vpop.permute.xlu1 %698  ;;  %v2079_v15 = vmul.f32 %v10776_v7, %v1731_v43  ;;  %1842 = vperm.xlu0 %8540, %v11043_v52  }
 0x3e0   :  { %v6118_v0 = vmax.f32 %v5364_v3, 0.0  ;;  %2743 = vperm.xlu1 %8505, %v8617_v34   ;;  %v1108_v29 = vmul.f32 %v10758_v8, %v699_v35 }
 0x3e1   :  { %v6119_v61 = vmax.f32 %v5366_v24, 0.0  ;;  %8048 = vmatprep.mubr.msk.f32.mxu0 %vm3441_vm0, %v3362_v48 }
 0x3e2   :  { %v6356_v4 = vmax.f32 %v6116_v2, %v6118_v0  ;;  %8049 = vmatmul.mubr.msk.f32.gmra.mrb[96].mxu0 %vm3441_vm0, %v3363_v1  ;;  %v1274_v3 = vadd.f32 %v10770_v27, %v1108_v29 }
 0x3e3   :  { %v6357_v41 = vmax.f32 %v6117_v9, %v6119_v61  ;;  %v704_v31 = vpop.permute.xlu1 %703 }
 0x3e4   :  { %8506 = vset.pattern.permute.xlu1 %v12937_v45  ;;  %v8017_v53 = vpop.f32.mrb[74].mxu0  ;;  %v1109_v10 = vmul.f32 %v10758_v8, %v704_v31  ;;  %v2239_v34 = vadd.f32 %v2079_v15, %v1274_v3 }
 0x3e5   :  { %768 = vperm.xlu1 %8506, %v8618_v23   ;;  %v4358_v26 = vpop.f32.mrb[75].mxu0  ;;  %v4364_v44 = vadd.f32 %v10717_v49, %v8017_v53 }
 0x3e6   :  { %v4359_v62 = vadd.f32 %v10717_v49, %v4358_v26  ;;  %v1275_v16 = vadd.f32 %v10770_v27, %v1109_v10  ;;  %v3045_v49 = vmul.f32 %v10787_v46, %v10899_v20 }
 0x3e7   :  { %v4862_v24 = vmax.f32 %v4364_v44, 0.0 }
 0x3e8   :  { %v4861_v54 = vmax.f32 %v4359_v62, 0.0  ;;  %v1735_v18 = vpop.permute.xlu1 %1734 }
 0x3e9   :  { %v2080_v14 = vmul.f32 %v10776_v7, %v1735_v18  ;;  %773 = vperm.xlu1 %8506, %v10740_v12  }
 0x3ea   :  { %5500 = vmatmul.mubr.f32.gmra.mrb[78].mxu1 %v4861_v54 }
 0x3eb   :  { %v2240_v48 = vadd.f32 %v2080_v14, %v1275_v16  ;;  %5505 = vmatprep.mubr.f32.mxu1 %v12994_v40 }
 0x3ec   :  { %v5369_v35 = vpop.f32.mrb[34].mxu1 }
 0x3ed   :  { %v5370_v1 = vadd.f32 %v5369_v35, %v10733_v5  ;;  %8507 = vset.pattern.permute.xlu1 %v12917_v47  ;;  %v2696_v2 = vpop.permute.xlu1 %2695  ;;  %v5371_v0 = vpop.f32.mrb[35].mxu1  ;;  %v3205_v20 = vadd.f32 %v3045_v49, %v2240_v48 }
 0x3ee   :  { %v3044_v9 = vmul.f32 %v10787_v46, %v2696_v2  ;;  %v5372_v61 = vadd.f32 %v5371_v0, %v10742_v33  ;;  %1790 = vperm.xlu1 %8507, %v10740_v12   ;;  %5506 = vmatmul.mubr.f32.gmra.mrb[80].mxu1 %v4862_v24  ;;  %v8619_v24 = vld [vmem:[%s12856_s0 + $0x390] sm:$0xff]  ;;  %v1739_v0 = vpop.permute.xlu0 %1738 }
 0x3ef   :  { %v6120_v31 = vmax.f32 %v5370_v1, 0.0  ;;  %5511 = vmatprep.mubr.f32.mxu1 %v12994_v40  ;;  %v3365_v12 = vmax.f32 %v3205_v20, 0.0  ;;  %v11071_v1 = vld [vmem:[%s12861_s4] ss:$0 sm:$0xff] }
 0x3f0   :  { %v3204_v53 = vadd.f32 %v3044_v9, %v2239_v34  ;;  %v6121_v10 = vmax.f32 %v5372_v61, 0.0  ;;  %v5375_v26 = vpop.f32.mrb[36].mxu1 }
 0x3f1   :  { %v6420_v29 = vmax.f32 %v6356_v4, %v6120_v31  ;;  %v5376_v62 = vadd.f32 %v5375_v26, %v10733_v5  ;;  %v5377_v43 = vpop.f32.mrb[37].mxu1  ;;  %v2081_v26 = vmul.f32 %v10776_v7, %v1739_v0 }
 0x3f2   :  { %v3364_v44 = vmax.f32 %v3204_v53, 0.0  ;;  %v6421_v54 = vmax.f32 %v6357_v41, %v6121_v10  ;;  %v5378_v18 = vadd.f32 %v5377_v43, %v10742_v33  ;;  %8508 = vset.pattern.permute.xlu1 %v12913_v17  ;;  %v709_v16 = vpop.permute.xlu1 %708  ;;  %v11081_v53 = vld [vmem:[%s12856_s0 + $0x400] sm:$0xff] }
 0x3f3   :  { %v6122_v14 = vmax.f32 %v5376_v62, 0.0  ;;  %2751 = vperm.xlu1 %8508, %v8618_v23   ;;  %v1110_v23 = vmul.f32 %v10758_v8, %v709_v16  ;;  %1850 = vperm.xlu0 %8540, %v11081_v53  }
 0x3f4   :  { %v6123_v3 = vmax.f32 %v5378_v18, 0.0  ;;  %8051 = vmatprep.mubr.msk.f32.mxu0 %vm3441_vm0, %v3364_v44 }
 0x3f5   :  { %v6484_v15 = vmax.f32 %v6420_v29, %v6122_v14  ;;  %8052 = vmatmul.mubr.msk.f32.gmra.mrb[98].mxu0 %vm3441_vm0, %v3365_v12  ;;  %v1276_v10 = vadd.f32 %v10770_v27, %v1110_v23  ;;  %v3047_v29 = vmul.f32 %v10787_v46, %v10917_v21 }
 0x3f6   :  { %v6485_v4 = vmax.f32 %v6421_v54, %v6123_v3  ;;  %v714_v49 = vpop.permute.xlu1 %713 }
 0x3f7   :  { %8509 = vset.pattern.permute.xlu1 %v12937_v45  ;;  %v8020_v48 = vpop.f32.mrb[76].mxu0  ;;  %v1111_v41 = vmul.f32 %v10758_v8, %v714_v49  ;;  %v2241_v12 = vadd.f32 %v2081_v26, %v1276_v10 }
 0x3f8   :  { %778 = vperm.xlu1 %8509, %v8619_v24   ;;  %v4368_v35 = vpop.f32.mrb[77].mxu0  ;;  %v4374_v34 = vadd.f32 %v11071_v1, %v8020_v48 }
 0x3f9   :  { %v4369_v2 = vadd.f32 %v11071_v1, %v4368_v35  ;;  %v1277_v20 = vadd.f32 %v10770_v27, %v1111_v41 }
 0x3fa   :  { %v4864_v43 = vmax.f32 %v4374_v34, 0.0 }
 0x3fb   :  { %v4863_v9 = vmax.f32 %v4369_v2, 0.0  ;;  %v1743_v61 = vpop.permute.xlu1 %1742 }
 0x3fc   :  { %v2082_v31 = vmul.f32 %v10776_v7, %v1743_v61  ;;  %783 = vperm.xlu1 %8509, %v10798_v30  }
 0x3fd   :  { %5512 = vmatmul.mubr.f32.gmra.mrb[82].mxu1 %v4863_v9 }
 0x3fe   :  { %v2242_v62 = vadd.f32 %v2082_v31, %v1277_v20  ;;  %5517 = vmatprep.mubr.f32.mxu1 %v12994_v40 }
 0x3ff   :  { %v5381_v44 = vpop.f32.mrb[38].mxu1 }
 0x400   :  { %v5382_v54 = vadd.f32 %v5381_v44, %v10733_v5  ;;  %8510 = vset.pattern.permute.xlu1 %v12917_v47  ;;  %v2704_v18 = vpop.permute.xlu1 %2703  ;;  %v5383_v16 = vpop.f32.mrb[39].mxu1  ;;  %v3207_v21 = vadd.f32 %v3047_v29, %v2242_v62 }
 0x401   :  { %v3046_v14 = vmul.f32 %v10787_v46, %v2704_v18  ;;  %v5384_v3 = vadd.f32 %v5383_v16, %v10742_v33  ;;  %1798 = vperm.xlu1 %8510, %v10798_v30   ;;  %5518 = vmatmul.mubr.f32.gmra.mrb[84].mxu1 %v4864_v43  ;;  %v11103_v43 = vld [vmem:[%s12856_s0 + $0x3a0] sm:$0xff] }
 0x402   :  { %v6124_v49 = vmax.f32 %v5382_v54, 0.0  ;;  %5523 = vmatprep.mubr.f32.mxu1 %v12994_v40  ;;  %v3367_v61 = vmax.f32 %v3207_v21, 0.0  ;;  %v11109_v54 = vld [vmem:[%s12858_s1] ss:$0 sm:$0xff] }
 0x403   :  { %v3206_v48 = vadd.f32 %v3046_v14, %v2241_v12  ;;  %v6125_v41 = vmax.f32 %v5384_v3, 0.0  ;;  %v5387_v35 = vpop.f32.mrb[40].mxu1 }
 0x404   :  { %v6548_v23 = vmax.f32 %v6484_v15, %v6124_v49  ;;  %v5389_v2 = vpop.f32.mrb[41].mxu1 }
 0x405   :  { %v3366_v0 = vmax.f32 %v3206_v48, 0.0  ;;  %v6549_v34 = vmax.f32 %v6485_v4, %v6125_v41  ;;  %8511 = vset.pattern.permute.xlu1 %v12913_v17  ;;  %v719_v9 = vpop.permute.xlu1 %718 }
 0x406   :  { %v6712_v20 = vrot.slane %v6548_v23, 4  ;;  %2759 = vperm.xlu1 %8511, %v8619_v24   ;;  %v1112_v18 = vmul.f32 %v11109_v54, %v719_v9  ;;  %v11125_v9 = vld [vmem:[%s12859_s2] ss:$0 sm:$0xff] }
 0x407   :  { %v6718_v31 = vrot.slane %v6549_v34, 4  ;;  %8054 = vmatprep.mubr.msk.f32.mxu0 %vm3441_vm0, %v3366_v0  ;;  %v11120_v0 = vld [vmem:[%s12856_s0 + $0x410] sm:$0xff] }
 0x408   :  { %v6713_v30 = vmax.f32 %v6548_v23, %v6712_v20  ;;  %8055 = vmatmul.mubr.msk.f32.gmra.mrb[100].mxu0 %vm3441_vm0, %v3367_v61  ;;  %v1278_v61 = vadd.f32 %v11125_v9, %v1112_v18  ;;  %1858 = vperm.xlu0 %8540, %v11120_v0   ;;  %v3049_v20 = vmul.f32 %v10787_v46, %v10927_v36 }
 0x409   :  { %v6719_v10 = vmax.f32 %v6549_v34, %v6718_v31  ;;  %v724_v26 = vpop.permute.xlu1 %723 }
 0x40a   :  { %v6714_v29 = vrot.slane %v6713_v30, 2  ;;  %8512 = vset.pattern.permute.xlu1 %v12937_v45  ;;  %v8023_v15 = vpop.f32.mrb[78].mxu0  ;;  %v1113_v4 = vmul.f32 %v10758_v8, %v724_v26  ;;  %v1747_v8 = vpop.permute.xlu0 %1746  ;;  %v5390_v26 = vadd.f32 %v5389_v2, %v10742_v33  ;;  %v11153_v2 = vld [vmem:[%s12858_s1 + $0x2] ss:$0 sm:$0xff] }
 0x40b   :  { %v6720_v62 = vrot.slane %v6719_v10, 2  ;;  %788 = vperm.xlu1 %8512, %v11103_v43   ;;  %v4378_v24 = vpop.f32.mrb[79].mxu0  ;;  %v4384_v3 = vadd.f32 %v11071_v1, %v8023_v15 }
 0x40c   :  { %v6715_v44 = vmax.f32 %v6713_v30, %v6714_v29  ;;  %v4379_v16 = vadd.f32 %v11071_v1, %v4378_v24  ;;  %v1279_v41 = vadd.f32 %v10770_v27, %v1113_v4  ;;  %v11131_v27 = vld [vmem:[%s12858_s1 + $0x1] ss:$0 sm:$0xff]  ;;  %v5388_v30 = vadd.f32 %v5387_v35, %v10733_v5 }
 0x40d   :  { %v6721_v12 = vmax.f32 %v6719_v10, %v6720_v62  ;;  %v4866_v29 = vmax.f32 %v4384_v3, 0.0 }
 0x40e   :  { %v6716_v14 = vrot.slane %v6715_v44, 1  ;;  %v4865_v21 = vmax.f32 %v4379_v16, 0.0  ;;  %v1751_v49 = vpop.permute.xlu1 %1750  ;;  %v6126_v18 = vmax.f32 %v5388_v30, 0.0 }
 0x40f   :  { %v6722_v48 = vrot.slane %v6721_v12, 1  ;;  %v2084_v23 = vmul.f32 %v10776_v7, %v1751_v49  ;;  %793 = vperm.xlu1 %8512, %v10837_v28   ;;  %v2083_v7 = vmul.f32 %v11131_v27, %v1747_v8 }
 0x410   :  { %v6717_v34 = vmax.f32 %v6715_v44, %v6716_v14  ;;  %5524 = vmatmul.mubr.f32.gmra.mrb[86].mxu1 %v4865_v21 }
 0x411   :  { %v6723_v31 = vmax.f32 %v6721_v12, %v6722_v48  ;;  %v2244_v10 = vadd.f32 %v2084_v23, %v1279_v41  ;;  %5529 = vmatprep.mubr.f32.mxu1 %v12994_v40  ;;  %v2243_v35 = vadd.f32 %v2083_v7, %v1278_v61 }
 0x412   :  { %v5393_v15 = vpop.f32.mrb[42].mxu1  ;;  %v11142_v62 = vsel %vm7081_vm2, %v6717_v34, %v11015_v11 }
 0x413   :  { %v5394_v4 = vadd.f32 %v5393_v15, %v10733_v5  ;;  %8513 = vset.pattern.permute.xlu1 %v12917_v47  ;;  %v2712_v24 = vpop.permute.xlu1 %2711  ;;  %v5395_v46 = vpop.f32.mrb[43].mxu1  ;;  %v11148_v36 = vsel %vm7081_vm2, %v6723_v31, %v11019_v25  ;;  %v3209_v16 = vadd.f32 %v3049_v20, %v2244_v10  ;;  %v6127_v25 = vmax.f32 %v5390_v26, 0.0  ;;  %v8626_v15 = vld [vmem:[%s12856_s0 + $0x3b0] sm:$0xff] }
 0x414   :  { %v3048_v44 = vmul.f32 %v11153_v2, %v2712_v24  ;;  %v5396_v11 = vadd.f32 %v5395_v46, %v10742_v33  ;;  %1806 = vperm.xlu1 %8513, %v10837_v28   ;;  %5530 = vmatmul.mubr.f32.gmra.mrb[88].mxu1 %v4866_v29  ;;  %v1755_v46 = vpop.permute.xlu0 %1754 }
 0x415   :  { %v6128_v12 = vmax.f32 %v5394_v4, 0.0  ;;  %5535 = vmatprep.mubr.f32.mxu1 %v12994_v40  ;;  %v3369_v61 = vmax.f32 %v3209_v16, 0.0 }
 0x416   :  { %v3208_v8 = vadd.f32 %v3048_v44, %v2243_v35  ;;  %v6129_v14 = vmax.f32 %v5396_v11, 0.0  ;;  %v5399_v3 = vpop.f32.mrb[44].mxu1 }
 0x417   :  { %v6358_v21 = vmax.f32 %v6126_v18, %v6128_v12  ;;  %v5400_v49 = vadd.f32 %v5399_v3, %v10733_v5  ;;  %v5401_v48 = vpop.f32.mrb[45].mxu1  ;;  %v11179_v12 = vld [vmem:[%s12856_s0 + $0x420] sm:$0xff] }
 0x418   :  { %v3368_v41 = vmax.f32 %v3208_v8, 0.0  ;;  %v6359_v23 = vmax.f32 %v6127_v25, %v6129_v14  ;;  %v5402_v34 = vadd.f32 %v5401_v48, %v10742_v33  ;;  %8514 = vset.pattern.permute.xlu1 %v12913_v17  ;;  %v729_v28 = vpop.permute.xlu1 %728  ;;  %v2085_v8 = vmul.f32 %v11131_v27, %v1755_v46  ;;  %1866 = vperm.xlu0 %8540, %v11179_v12   ;;  %v11187_v48 = vpop.permute.xlu0 %1762 }
 0x419   :  { %v6130_v7 = vmax.f32 %v5400_v49, 0.0  ;;  %2767 = vperm.xlu1 %8514, %v11103_v43   ;;  %v1114_v43 = vmul.f32 %v11109_v54, %v729_v28  ;;  %v3051_v14 = vmul.f32 %v11153_v2, %v10941_v63 }
 0x41a   :  { %v6131_v20 = vmax.f32 %v5402_v34, 0.0  ;;  %8057 = vmatprep.mubr.msk.f32.mxu0 %vm3441_vm0, %v3368_v41 }
 0x41b   :  { %v6422_v31 = vmax.f32 %v6358_v21, %v6130_v7  ;;  %8058 = vmatmul.mubr.msk.f32.gmra.mrb[102].mxu0 %vm3441_vm0, %v3369_v61  ;;  %v1280_v25 = vadd.f32 %v11125_v9, %v1114_v43 }
 0x41c   :  { %v6423_v30 = vmax.f32 %v6359_v23, %v6131_v20  ;;  %v734_v10 = vpop.permute.xlu1 %733  ;;  %v11196_v46 = vpop.permute.xlu0 %1770 }
 0x41d   :  { %8515 = vset.pattern.permute.xlu1 %v12937_v45  ;;  %v8026_v26 = vpop.f32.mrb[80].mxu0  ;;  %v1115_v29 = vmul.f32 %v11109_v54, %v734_v10  ;;  %v2245_v28 = vadd.f32 %v2085_v8, %v1280_v25 }
 0x41e   :  { %798 = vperm.xlu1 %8515, %v8626_v15   ;;  %v4388_v4 = vpop.f32.mrb[81].mxu0  ;;  %v4394_v35 = vadd.f32 %v11071_v1, %v8026_v26 }
 0x41f   :  { %v4389_v24 = vadd.f32 %v11071_v1, %v4388_v4  ;;  %v1281_v18 = vadd.f32 %v11125_v9, %v1115_v29 }
 0x420   :  { %v4868_v21 = vmax.f32 %v4394_v35, 0.0 }
 0x421   :  { %v4867_v44 = vmax.f32 %v4389_v24, 0.0  ;;  %v1759_v11 = vpop.permute.xlu1 %1758 }
 0x422   :  { %v2086_v16 = vmul.f32 %v11131_v27, %v1759_v11  ;;  %803 = vperm.xlu1 %8515, %v10872_v59  }
 0x423   :  { %5536 = vmatmul.mubr.f32.gmra.mrb[90].mxu1 %v4867_v44 }
 0x424   :  { %v2246_v3 = vadd.f32 %v2086_v16, %v1281_v18  ;;  %5541 = vmatprep.mubr.f32.mxu1 %v12994_v40  ;;  %v11203_v18 = vld [vmem:[%s12856_s0 + $0x430] sm:$0xff] }
 0x425   :  { %v5405_v49 = vpop.f32.mrb[46].mxu1  ;;  %1874 = vperm.xlu0 %8540, %v11203_v18  }
 0x426   :  { %v5406_v41 = vadd.f32 %v5405_v49, %v10733_v5  ;;  %8516 = vset.pattern.permute.xlu1 %v12917_v47  ;;  %v2720_v23 = vpop.permute.xlu1 %2719  ;;  %v5407_v34 = vpop.f32.mrb[47].mxu1  ;;  %v3211_v63 = vadd.f32 %v3051_v14, %v2246_v3  ;;  %v180_v3 = vld [vmem:[%s12856_s0 + $0x440] sm:$0xff] }
 0x427   :  { %v3050_v61 = vmul.f32 %v11153_v2, %v2720_v23  ;;  %v5408_v7 = vadd.f32 %v5407_v34, %v10742_v33  ;;  %1814 = vperm.xlu1 %8516, %v10872_v59   ;;  %5542 = vmatmul.mubr.f32.gmra.mrb[92].mxu1 %v4868_v21  ;;  %v8627_v34 = vld [vmem:[%s12856_s0 + $0x3c0] sm:$0xff] }
 0x428   :  { %v6132_v20 = vmax.f32 %v5406_v41, 0.0  ;;  %5547 = vmatprep.mubr.f32.mxu1 %v12994_v40  ;;  %v3371_v16 = vmax.f32 %v3211_v63, 0.0  ;;  %v11212_v41 = vpop.permute.xlu0 %1778 }
 0x429   :  { %v3210_v10 = vadd.f32 %v3050_v61, %v2245_v28  ;;  %v6133_v26 = vmax.f32 %v5408_v7, 0.0  ;;  %v5411_v29 = vpop.f32.mrb[48].mxu1  ;;  %1882 = vperm.xlu0 %8540, %v180_v3  }
 0x42a   :  { %v6486_v4 = vmax.f32 %v6422_v31, %v6132_v20  ;;  %v5412_v43 = vadd.f32 %v5411_v29, %v10733_v5  ;;  %v5413_v24 = vpop.f32.mrb[49].mxu1 }
 0x42b   :  { %v3370_v35 = vmax.f32 %v3210_v10, 0.0  ;;  %v6487_v44 = vmax.f32 %v6423_v30, %v6133_v26  ;;  %v5414_v11 = vadd.f32 %v5413_v24, %v10742_v33  ;;  %8517 = vset.pattern.permute.xlu1 %v12913_v17  ;;  %v739_v59 = vpop.permute.xlu1 %738  ;;  %v182_v10 = vld [vmem:[%s12856_s0 + $0x450] sm:$0xff] }
 0x42c   :  { %v6134_v25 = vmax.f32 %v5412_v43, 0.0  ;;  %2775 = vperm.xlu1 %8517, %v8626_v15   ;;  %v1116_v7 = vmul.f32 %v11109_v54, %v739_v59 }
 0x42d   :  { %v6135_v31 = vmax.f32 %v5414_v11, 0.0  ;;  %8060 = vmatprep.mubr.msk.f32.mxu0 %vm3441_vm0, %v3370_v35  ;;  %1890 = vperm.xlu0 %8540, %v182_v10   ;;  %v186_v10 = vld [vmem:[%s12856_s0 + $0x470] sm:$0xff] }
 0x42e   :  { %v6550_v8 = vmax.f32 %v6486_v4, %v6134_v25  ;;  %8061 = vmatmul.mubr.msk.f32.gmra.mrb[104].mxu0 %vm3441_vm0, %v3371_v16  ;;  %v1282_v59 = vadd.f32 %v11125_v9, %v1116_v7  ;;  %v2087_v16 = vmul.f32 %v11131_v27, %v11187_v48  ;;  %v11230_v25 = vpop.permute.xlu0 %1786 }
 0x42f   :  { %v6551_v30 = vmax.f32 %v6487_v44, %v6135_v31  ;;  %v744_v14 = vpop.permute.xlu1 %743  ;;  %v3053_v31 = vmul.f32 %v11153_v2, %v10964_v57 }
 0x430   :  { %v6724_v21 = vrot.slane %v6550_v8, 4  ;;  %8518 = vset.pattern.permute.xlu1 %v12937_v45  ;;  %v8029_v49 = vpop.f32.mrb[82].mxu0  ;;  %v1117_v23 = vmul.f32 %v11109_v54, %v744_v14  ;;  %v184_v14 = vld [vmem:[%s12856_s0 + $0x460] sm:$0xff]  ;;  %v2247_v57 = vadd.f32 %v2087_v16, %v1282_v59 }
 0x431   :  { %v6730_v15 = vrot.slane %v6551_v30, 4  ;;  %808 = vperm.xlu1 %8518, %v8627_v34   ;;  %v4398_v28 = vpop.f32.mrb[83].mxu0  ;;  %v4404_v29 = vadd.f32 %v11071_v1, %v8029_v49  ;;  %1898 = vperm.xlu0 %8540, %v184_v14  }
 0x432   :  { %v6725_v61 = vmax.f32 %v6550_v8, %v6724_v21  ;;  %v4399_v63 = vadd.f32 %v11071_v1, %v4398_v28  ;;  %v1283_v35 = vadd.f32 %v11125_v9, %v1117_v23 }
 0x433   :  { %v6731_v20 = vmax.f32 %v6551_v30, %v6730_v15  ;;  %v4870_v21 = vmax.f32 %v4404_v29, 0.0 }
 0x434   :  { %v6726_v26 = vrot.slane %v6725_v61, 2  ;;  %v4869_v4 = vmax.f32 %v4399_v63, 0.0  ;;  %v1767_v43 = vpop.permute.xlu1 %1766 }
 0x435   :  { %v6732_v24 = vrot.slane %v6731_v20, 2  ;;  %v2088_v44 = vmul.f32 %v11131_v27, %v1767_v43  ;;  %813 = vperm.xlu1 %8518, %v10915_v58   ;;  %v11247_v43 = vpop.permute.xlu0 %1794  ;;  %1906 = vperm.xlu0 %8540, %v186_v10  }
 0x436   :  { %v6727_v11 = vmax.f32 %v6725_v61, %v6726_v26  ;;  %5548 = vmatmul.mubr.f32.gmra.mrb[94].mxu1 %v4869_v4 }
 0x437   :  { %v6733_v8 = vmax.f32 %v6731_v20, %v6732_v24  ;;  %v2248_v30 = vadd.f32 %v2088_v44, %v1283_v35  ;;  %5553 = vmatprep.mubr.f32.mxu1 %v12994_v40 }
 0x438   :  { %v6728_v3 = vrot.slane %v6727_v11, 1  ;;  %v5417_v49 = vpop.f32.mrb[50].mxu1 }
 0x439   :  { %v6734_v15 = vrot.slane %v6733_v8, 1  ;;  %8519 = vset.pattern.permute.xlu1 %v12917_v47  ;;  %v2728_v48 = vpop.permute.xlu1 %2727  ;;  %v5419_v23 = vpop.f32.mrb[51].mxu1  ;;  %v3213_v63 = vadd.f32 %v3053_v31, %v2248_v30  ;;  %v5418_v20 = vadd.f32 %v5417_v49, %v10733_v5  ;;  %8554 = vset.pattern.permute.xlu0 %v12913_v17 }
 0x43a   :  { %v6729_v28 = vmax.f32 %v6727_v11, %v6728_v3  ;;  %v3052_v61 = vmul.f32 %v11153_v2, %v2728_v48  ;;  %1822 = vperm.xlu1 %8519, %v10915_v58   ;;  %5554 = vmatmul.mubr.f32.gmra.mrb[96].mxu1 %v4870_v21  ;;  %v5420_v29 = vadd.f32 %v5419_v23, %v10742_v33  ;;  %v11264_v3 = vld [vmem:[%s12856_s0 + $0x438] sm:$0xff]  ;;  %v8628_v23 = vld [vmem:[%s12856_s0 + $0x3d0] sm:$0xff] }
 0x43b   :  { %v6735_v7 = vmax.f32 %v6733_v8, %v6734_v15  ;;  %5559 = vmatprep.mubr.f32.mxu1 %v12994_v40  ;;  %v3373_v31 = vmax.f32 %v3213_v63, 0.0  ;;  %v6136_v8 = vmax.f32 %v5418_v20, 0.0  ;;  %2843 = vperm.xlu0 %8554, %v11264_v3   ;;  %v11269_v15 = vpop.permute.xlu0 %1802 }
 0x43c   :  { %v3212_v26 = vadd.f32 %v3052_v61, %v2247_v57  ;;  %v5423_v4 = vpop.f32.mrb[52].mxu1  ;;  %v11251_v58 = vsel %vm7083_vm3, %v6729_v28, %v11142_v62  ;;  %v6137_v14 = vmax.f32 %v5420_v29, 0.0 }
 0x43d   :  { %v5424_v24 = vadd.f32 %v5423_v4, %v10733_v5  ;;  %v5425_v35 = vpop.f32.mrb[53].mxu1  ;;  %v11256_v44 = vsel %vm7083_vm3, %v6735_v7, %v11148_v36  ;;  %v2089_v4 = vmul.f32 %v11131_v27, %v11196_v46 }
 0x43e   :  { %v3372_v11 = vmax.f32 %v3212_v26, 0.0  ;;  %v5426_v59 = vadd.f32 %v5425_v35, %v10742_v33  ;;  %8520 = vset.pattern.permute.xlu1 %v12913_v17  ;;  %v749_v16 = vpop.permute.xlu1 %748  ;;  %v3055_v35 = vmul.f32 %v11153_v2, %v10978_v56  ;;  %v11298_v56 = vld [vmem:[%s12856_s0 + $0x448] sm:$0xff] }
 0x43f   :  { %v6138_v30 = vmax.f32 %v5424_v24, 0.0  ;;  %2783 = vperm.xlu1 %8520, %v8627_v34   ;;  %v1118_v57 = vmul.f32 %v11109_v54, %v749_v16  ;;  %v11282_v29 = vpop.permute.xlu0 %1810  ;;  %2851 = vperm.xlu0 %8554, %v11298_v56  }
 0x440   :  { %v6139_v62 = vmax.f32 %v5426_v59, 0.0  ;;  %8063 = vmatprep.mubr.msk.f32.mxu0 %vm3441_vm0, %v3372_v11 }
 0x441   :  { %v6360_v36 = vmax.f32 %v6136_v8, %v6138_v30  ;;  %8064 = vmatmul.mubr.msk.f32.gmra.mrb[106].mxu0 %vm3441_vm0, %v3373_v31  ;;  %v1284_v24 = vadd.f32 %v11125_v9, %v1118_v57 }
 0x442   :  { %v6361_v21 = vmax.f32 %v6137_v14, %v6139_v62  ;;  %v754_v49 = vpop.permute.xlu1 %753 }
 0x443   :  { %8521 = vset.pattern.permute.xlu1 %v12937_v45  ;;  %v8032_v34 = vpop.f32.mrb[84].mxu0  ;;  %v1119_v48 = vmul.f32 %v11109_v54, %v754_v49  ;;  %v2249_v14 = vadd.f32 %v2089_v4, %v1284_v24 }
 0x444   :  { %818 = vperm.xlu1 %8521, %v8628_v23   ;;  %v4408_v28 = vpop.f32.mrb[85].mxu0  ;;  %v4414_v7 = vadd.f32 %v11071_v1, %v8032_v34 }
 0x445   :  { %v4409_v61 = vadd.f32 %v11071_v1, %v4408_v28  ;;  %v1285_v10 = vadd.f32 %v11125_v9, %v1119_v48  ;;  %v11300_v48 = vpop.permute.xlu0 %1818 }
 0x446   :  { %v4872_v59 = vmax.f32 %v4414_v7, 0.0 }
 0x447   :  { %v4871_v63 = vmax.f32 %v4409_v61, 0.0  ;;  %v1775_v20 = vpop.permute.xlu1 %1774 }
 0x448   :  { %v2090_v26 = vmul.f32 %v11131_v27, %v1775_v20  ;;  %823 = vperm.xlu1 %8521, %v10935_v55  }
 0x449   :  { %5560 = vmatmul.mubr.f32.gmra.mrb[98].mxu1 %v4871_v63 }
 0x44a   :  { %v2250_v11 = vadd.f32 %v2090_v26, %v1285_v10  ;;  %5565 = vmatprep.mubr.f32.mxu1 %v12994_v40 }
 0x44b   :  { %v5429_v16 = vpop.f32.mrb[54].mxu1 }
 0x44c   :  { %v5430_v31 = vadd.f32 %v5429_v16, %v10733_v5  ;;  %8523 = vset.pattern.permute.xlu1 %v12917_v47  ;;  %v2736_v8 = vpop.permute.xlu1 %2735  ;;  %v5431_v30 = vpop.f32.mrb[55].mxu1  ;;  %v3215_v49 = vadd.f32 %v3055_v35, %v2250_v11 }
 0x44d   :  { %v3054_v46 = vmul.f32 %v11153_v2, %v2736_v8  ;;  %v5432_v62 = vadd.f32 %v5431_v30, %v10742_v33  ;;  %1830 = vperm.xlu1 %8523, %v10935_v55   ;;  %5566 = vmatmul.mubr.f32.gmra.mrb[100].mxu1 %v4872_v59 }
 0x44e   :  { %v6140_v34 = vmax.f32 %v5430_v31, 0.0  ;;  %5571 = vmatprep.mubr.f32.mxu1 %v12994_v40  ;;  %v3375_v24 = vmax.f32 %v3215_v49, 0.0 }
 0x44f   :  { %v3214_v28 = vadd.f32 %v3054_v46, %v2249_v14  ;;  %v6141_v57 = vmax.f32 %v5432_v62, 0.0  ;;  %v5435_v61 = vpop.f32.mrb[56].mxu1 }
 0x450   :  { %v6424_v7 = vmax.f32 %v6360_v36, %v6140_v34  ;;  %v5436_v55 = vadd.f32 %v5435_v61, %v10733_v5  ;;  %v5437_v63 = vpop.f32.mrb[57].mxu1  ;;  %v11309_v36 = vpop.permute.xlu0 %1826  ;;  %v8629_v61 = vld [vmem:[%s12856_s0 + $0x3e8] sm:$0xff] }
 0x451   :  { %v3374_v20 = vmax.f32 %v3214_v28, 0.0  ;;  %v6425_v10 = vmax.f32 %v6361_v21, %v6141_v57  ;;  %v5438_v26 = vadd.f32 %v5437_v63, %v10742_v33  ;;  %8524 = vset.pattern.permute.xlu1 %v12913_v17  ;;  %v759_v4 = vpop.permute.xlu1 %758 }
 0x452   :  { %v6142_v35 = vmax.f32 %v5436_v55, 0.0  ;;  %2791 = vperm.xlu1 %8524, %v8628_v23   ;;  %v1120_v23 = vmul.f32 %v11109_v54, %v759_v4 }
 0x453   :  { %v6143_v11 = vmax.f32 %v5438_v26, 0.0  ;;  %8066 = vmatprep.mubr.msk.f32.mxu0 %vm3441_vm0, %v3374_v20 }
 0x454   :  { %v6488_v59 = vmax.f32 %v6424_v7, %v6142_v35  ;;  %8067 = vmatmul.mubr.msk.f32.gmra.mrb[108].mxu0 %vm3441_vm0, %v3375_v24  ;;  %v2748_v34 = vpop.permute.xlu0 %2747  ;;  %v2091_v7 = vmul.f32 %v11131_v27, %v11212_v41  ;;  %v1286_v55 = vadd.f32 %v11125_v9, %v1120_v23 }
 0x455   :  { %v6489_v16 = vmax.f32 %v6425_v10, %v6143_v11  ;;  %v764_v31 = vpop.permute.xlu1 %763  ;;  %v3057_v20 = vmul.f32 %v11153_v2, %v2748_v34 }
 0x456   :  { %8525 = vset.pattern.permute.xlu1 %v12937_v45  ;;  %v8035_v21 = vpop.f32.mrb[86].mxu0  ;;  %v1121_v8 = vmul.f32 %v11109_v54, %v764_v31  ;;  %v2251_v11 = vadd.f32 %v2091_v7, %v1286_v55 }
 0x457   :  { %828 = vperm.xlu1 %8525, %v11005_v50   ;;  %v4418_v30 = vpop.f32.mrb[87].mxu0  ;;  %v4424_v46 = vadd.f32 %v11071_v1, %v8035_v21  ;;  %v11334_v21 = vld [vmem:[%s12856_s0 + $0x458] sm:$0xff] }
 0x458   :  { %v4419_v14 = vadd.f32 %v11071_v1, %v4418_v30  ;;  %v1287_v28 = vadd.f32 %v11125_v9, %v1121_v8  ;;  %2859 = vperm.xlu0 %8554, %v11334_v21  }
 0x459   :  { %v4874_v10 = vmax.f32 %v4424_v46, 0.0 }
 0x45a   :  { %v4873_v62 = vmax.f32 %v4419_v14, 0.0  ;;  %v1783_v49 = vpop.permute.xlu1 %1782 }
 0x45b   :  { %v2092_v57 = vmul.f32 %v11131_v27, %v1783_v49  ;;  %833 = vperm.xlu1 %8525, %v8629_v61  }
 0x45c   :  { %5572 = vmatmul.mubr.f32.gmra.mrb[102].mxu1 %v4873_v62 }
 0x45d   :  { %v2252_v63 = vadd.f32 %v2092_v57, %v1287_v28  ;;  %5577 = vmatprep.mubr.f32.mxu1 %v12994_v40 }
 0x45e   :  { %v5441_v26 = vpop.f32.mrb[58].mxu1 }
 0x45f   :  { %v5442_v4 = vadd.f32 %v5441_v26, %v10733_v5  ;;  %8526 = vset.pattern.permute.xlu1 %v12917_v47  ;;  %v2744_v24 = vpop.permute.xlu1 %2743  ;;  %v5443_v35 = vpop.f32.mrb[59].mxu1  ;;  %v3217_v8 = vadd.f32 %v3057_v20, %v2252_v63 }
 0x460   :  { %v3056_v31 = vmul.f32 %v11153_v2, %v2744_v24  ;;  %v5444_v41 = vadd.f32 %v5443_v35, %v10742_v33  ;;  %1838 = vperm.xlu1 %8526, %v8629_v61   ;;  %5578 = vmatmul.mubr.f32.gmra.mrb[104].mxu1 %v4874_v10 }
 0x461   :  { %v6144_v30 = vmax.f32 %v5442_v4, 0.0  ;;  %5583 = vmatprep.mubr.f32.mxu1 %v12994_v40  ;;  %v3377_v61 = vmax.f32 %v3217_v8, 0.0 }
 0x462   :  { %v3216_v23 = vadd.f32 %v3056_v31, %v2251_v11  ;;  %v6145_v14 = vmax.f32 %v5444_v41, 0.0  ;;  %v5447_v46 = vpop.f32.mrb[60].mxu1 }
 0x463   :  { %v6552_v62 = vmax.f32 %v6488_v59, %v6144_v30  ;;  %v5449_v49 = vpop.f32.mrb[61].mxu1 }
 0x464   :  { %v3376_v34 = vmax.f32 %v3216_v23, 0.0  ;;  %v6553_v28 = vmax.f32 %v6489_v16, %v6145_v14  ;;  %8527 = vset.pattern.permute.xlu1 %v12913_v17  ;;  %v769_v57 = vpop.permute.xlu1 %768  ;;  %v2756_v14 = vpop.permute.xlu0 %2755 }
 0x465   :  { %v6736_v7 = vrot.slane %v6552_v62, 4  ;;  %2799 = vperm.xlu1 %8527, %v11005_v50   ;;  %v1122_v50 = vmul.f32 %v11109_v54, %v769_v57  ;;  %v2093_v57 = vmul.f32 %v11131_v27, %v11230_v25 }
 0x466   :  { %v6742_v55 = vrot.slane %v6553_v28, 4  ;;  %8069 = vmatprep.mubr.msk.f32.mxu0 %vm3441_vm0, %v3376_v34 }
 0x467   :  { %v6737_v63 = vmax.f32 %v6552_v62, %v6736_v7  ;;  %8070 = vmatmul.mubr.msk.f32.gmra.mrb[110].mxu0 %vm3441_vm0, %v3377_v61  ;;  %v8630_v61 = vld [vmem:[%s12856_s0 + $0x3f8] sm:$0xff] }
 0x468   :  { %v6743_v20 = vmax.f32 %v6553_v28, %v6742_v55  ;;  %v774_v10 = vpop.permute.xlu1 %773  ;;  %v1288_v55 = vadd.f32 %v11125_v9, %v1122_v50 }
 0x469   :  { %v6738_v26 = vrot.slane %v6737_v63, 2  ;;  %8528 = vset.pattern.permute.xlu1 %v12937_v45  ;;  %v8038_v59 = vpop.f32.mrb[88].mxu0  ;;  %v1123_v4 = vmul.f32 %v11109_v54, %v774_v10 }
 0x46a   :  { %v6744_v16 = vrot.slane %v6743_v20, 2  ;;  %838 = vperm.xlu1 %8528, %v11043_v52   ;;  %v4428_v24 = vpop.f32.mrb[89].mxu0  ;;  %v4434_v8 = vadd.f32 %v11071_v1, %v8038_v59  ;;  %v5450_v59 = vadd.f32 %v5449_v49, %v10742_v33 }
 0x46b   :  { %v6739_v35 = vmax.f32 %v6737_v63, %v6738_v26  ;;  %v4429_v11 = vadd.f32 %v11071_v1, %v4428_v24  ;;  %v1289_v34 = vadd.f32 %v11125_v9, %v1123_v4  ;;  %v3059_v26 = vmul.f32 %v11153_v2, %v2756_v14 }
 0x46c   :  { %v6745_v31 = vmax.f32 %v6743_v20, %v6744_v16  ;;  %v5448_v20 = vadd.f32 %v5447_v46, %v10733_v5  ;;  %v4876_v16 = vmax.f32 %v4434_v8, 0.0 }
 0x46d   :  { %v6740_v41 = vrot.slane %v6739_v35, 1  ;;  %v4875_v30 = vmax.f32 %v4429_v11, 0.0  ;;  %v1791_v23 = vpop.permute.xlu1 %1790  ;;  %v2253_v11 = vadd.f32 %v2093_v57, %v1288_v55 }
 0x46e   :  { %v6746_v62 = vrot.slane %v6745_v31, 1  ;;  %v2094_v28 = vmul.f32 %v11131_v27, %v1791_v23  ;;  %843 = vperm.xlu1 %8528, %v8630_v61  }
 0x46f   :  { %v6741_v7 = vmax.f32 %v6739_v35, %v6740_v41  ;;  %5584 = vmatmul.mubr.f32.gmra.mrb[106].mxu1 %v4875_v30  ;;  %v6146_v41 = vmax.f32 %v5448_v20, 0.0 }
 0x470   :  { %v6747_v63 = vmax.f32 %v6745_v31, %v6746_v62  ;;  %v2254_v10 = vadd.f32 %v2094_v28, %v1289_v34  ;;  %5589 = vmatprep.mubr.f32.mxu1 %v12994_v40 }
 0x471   :  { %v5453_v4 = vpop.f32.mrb[62].mxu1  ;;  %v11362_v24 = vsel %vm7085_vm4, %v6741_v7, %v11251_v58  ;;  %v11375_v58 = vld [vmem:[%s12856_s0 + $0x468] sm:$0xff] }
 0x472   :  { %v5454_v25 = vadd.f32 %v5453_v4, %v10733_v5  ;;  %8529 = vset.pattern.permute.xlu1 %v12917_v47  ;;  %v2752_v35 = vpop.permute.xlu1 %2751  ;;  %v5455_v50 = vpop.f32.mrb[63].mxu1  ;;  %v11368_v46 = vsel %vm7085_vm4, %v6747_v63, %v11256_v44  ;;  %v3219_v8 = vadd.f32 %v3059_v26, %v2254_v10  ;;  %2867 = vperm.xlu0 %8554, %v11375_v58   ;;  %v6147_v44 = vmax.f32 %v5450_v59, 0.0 }
 0x473   :  { %v3058_v31 = vmul.f32 %v11153_v2, %v2752_v35  ;;  %v5456_v49 = vadd.f32 %v5455_v50, %v10742_v33  ;;  %1846 = vperm.xlu1 %8529, %v8630_v61   ;;  %5590 = vmatmul.mubr.f32.gmra.mrb[108].mxu1 %v4876_v16 }
 0x474   :  { %v6148_v30 = vmax.f32 %v5454_v25, 0.0  ;;  %5595 = vmatprep.mubr.f32.mxu1 %v12994_v40  ;;  %v3379_v20 = vmax.f32 %v3219_v8, 0.0  ;;  %v2764_v8 = vpop.permute.xlu0 %2763 }
 0x475   :  { %v3218_v23 = vadd.f32 %v3058_v31, %v2253_v11  ;;  %v6149_v14 = vmax.f32 %v5456_v49, 0.0  ;;  %v5459_v62 = vpop.f32.mrb[64].mxu1 }
 0x476   :  { %v6362_v34 = vmax.f32 %v6146_v41, %v6148_v30  ;;  %v5460_v28 = vadd.f32 %v5459_v62, %v10733_v5  ;;  %v5461_v61 = vpop.f32.mrb[65].mxu1 }
 0x477   :  { %v3378_v57 = vmax.f32 %v3218_v23, 0.0  ;;  %v6363_v7 = vmax.f32 %v6147_v44, %v6149_v14  ;;  %v5462_v55 = vadd.f32 %v5461_v61, %v10742_v33  ;;  %8530 = vset.pattern.permute.xlu1 %v12913_v17  ;;  %v779_v63 = vpop.permute.xlu1 %778  ;;  %v8631_v23 = vld [vmem:[%s12856_s0 + $0x408] sm:$0xff]  ;;  %v2095_v14 = vmul.f32 %v11131_v27, %v11247_v43  ;;  %v11406_v43 = vld [vmem:[%s12856_s0 + $0x478] sm:$0xff] }
 0x478   :  { %v6150_v10 = vmax.f32 %v5460_v28, 0.0  ;;  %2807 = vperm.xlu1 %8530, %v11043_v52   ;;  %v1124_v11 = vmul.f32 %v11109_v54, %v779_v63  ;;  %2875 = vperm.xlu0 %8554, %v11406_v43  }
 0x479   :  { %v6151_v26 = vmax.f32 %v5462_v55, 0.0  ;;  %8072 = vmatprep.mubr.msk.f32.mxu0 %vm3441_vm0, %v3378_v57 }
 0x47a   :  { %v6426_v59 = vmax.f32 %v6362_v34, %v6150_v10  ;;  %8073 = vmatmul.mubr.msk.f32.gmra.mrb[112].mxu0 %vm3441_vm0, %v3379_v20  ;;  %v1290_v62 = vadd.f32 %v11125_v9, %v1124_v11 }
 0x47b   :  { %v6427_v16 = vmax.f32 %v6363_v7, %v6151_v26  ;;  %v784_v4 = vpop.permute.xlu1 %783 }
 0x47c   :  { %8531 = vset.pattern.permute.xlu1 %v12937_v45  ;;  %v8041_v25 = vpop.f32.mrb[90].mxu0  ;;  %v1125_v35 = vmul.f32 %v11109_v54, %v784_v4  ;;  %v2255_v63 = vadd.f32 %v2095_v14, %v1290_v62 }
 0x47d   :  { %848 = vperm.xlu1 %8531, %v11081_v53   ;;  %v4438_v50 = vpop.f32.mrb[91].mxu0  ;;  %v4444_v31 = vadd.f32 %v11071_v1, %v8041_v25 }
 0x47e   :  { %v4439_v52 = vadd.f32 %v11071_v1, %v4438_v50  ;;  %v1291_v30 = vadd.f32 %v11125_v9, %v1125_v35  ;;  %v3061_v1 = vmul.f32 %v11153_v2, %v2764_v8 }
 0x47f   :  { %v4878_v28 = vmax.f32 %v4444_v31, 0.0 }
 0x480   :  { %v4877_v49 = vmax.f32 %v4439_v52, 0.0  ;;  %v1799_v41 = vpop.permute.xlu1 %1798 }
 0x481   :  { %v2096_v44 = vmul.f32 %v11131_v27, %v1799_v41  ;;  %853 = vperm.xlu1 %8531, %v8631_v23  }
 0x482   :  { %5596 = vmatmul.mubr.f32.gmra.mrb[110].mxu1 %v4877_v49  ;;  %v11416_v49 = vld [vmem:[%s12856_s0 + $0x488] sm:$0xff] }
 0x483   :  { %v2256_v34 = vadd.f32 %v2096_v44, %v1291_v30  ;;  %5601 = vmatprep.mubr.f32.mxu1 %v12994_v40  ;;  %2883 = vperm.xlu0 %8554, %v11416_v49  }
 0x484   :  { %v5465_v61 = vpop.f32.mrb[66].mxu1 }
 0x485   :  { %v5466_v57 = vadd.f32 %v5465_v61, %v10733_v5  ;;  %8532 = vset.pattern.permute.xlu1 %v12917_v47  ;;  %v2760_v7 = vpop.permute.xlu1 %2759  ;;  %v5467_v55 = vpop.f32.mrb[67].mxu1  ;;  %v3221_v26 = vadd.f32 %v3061_v1, %v2256_v34 }
 0x486   :  { %v3060_v20 = vmul.f32 %v11153_v2, %v2760_v7  ;;  %v5468_v10 = vadd.f32 %v5467_v55, %v10742_v33  ;;  %1854 = vperm.xlu1 %8532, %v8631_v23   ;;  %5602 = vmatmul.mubr.f32.gmra.mrb[112].mxu1 %v4878_v28 }
 0x487   :  { %v6152_v4 = vmax.f32 %v5466_v57, 0.0  ;;  %5607 = vmatprep.mubr.f32.mxu1 %v12994_v40  ;;  %v3381_v23 = vmax.f32 %v3221_v26, 0.0  ;;  %v193_v26 = vld [vmem:[%s12856_s0 + $0x4a8] sm:$0xff] }
 0x488   :  { %v3220_v25 = vadd.f32 %v3060_v20, %v2255_v63  ;;  %v6153_v35 = vmax.f32 %v5468_v10, 0.0  ;;  %v5471_v50 = vpop.f32.mrb[68].mxu1  ;;  %v11434_v20 = vld [vmem:[%s12861_s4] ss:$0 sm:$0xff] }
 0x489   :  { %v6490_v11 = vmax.f32 %v6426_v59, %v6152_v4  ;;  %v5472_v52 = vadd.f32 %v5471_v50, %v10733_v5  ;;  %v5473_v31 = vpop.f32.mrb[69].mxu1 }
 0x48a   :  { %v3380_v41 = vmax.f32 %v3220_v25, 0.0  ;;  %v6491_v8 = vmax.f32 %v6427_v16, %v6153_v35  ;;  %v5474_v30 = vadd.f32 %v5473_v31, %v10742_v33  ;;  %8533 = vset.pattern.permute.xlu1 %v12913_v17  ;;  %v789_v44 = vpop.permute.xlu1 %788  ;;  %v191_v16 = vld [vmem:[%s12856_s0 + $0x498] sm:$0xff] }
 0x48b   :  { %v6154_v14 = vmax.f32 %v5472_v52, 0.0  ;;  %2815 = vperm.xlu1 %8533, %v11081_v53   ;;  %2891 = vperm.xlu0 %8554, %v191_v16   ;;  %v1126_v63 = vmul.f32 %v11109_v54, %v789_v44  ;;  %v2772_v52 = vpop.permute.xlu0 %2771 }
 0x48c   :  { %v6155_v59 = vmax.f32 %v5474_v30, 0.0  ;;  %8075 = vmatprep.mubr.msk.f32.mxu0 %vm3441_vm0, %v3380_v41  ;;  %v2097_v30 = vmul.f32 %v11131_v27, %v11269_v15 }
 0x48d   :  { %v6554_v62 = vmax.f32 %v6490_v11, %v6154_v14  ;;  %8076 = vmatmul.mubr.msk.f32.gmra.mrb[114].mxu0 %vm3441_vm0, %v3381_v23  ;;  %v1292_v23 = vadd.f32 %v11125_v9, %v1126_v63 }
 0x48e   :  { %v6555_v34 = vmax.f32 %v6491_v8, %v6155_v59  ;;  %v794_v1 = vpop.permute.xlu1 %793  ;;  %v8633_v8 = vld [vmem:[%s12856_s0 + $0x418] sm:$0xff] }
 0x48f   :  { %v6748_v28 = vrot.slane %v6554_v62, 4  ;;  %8534 = vset.pattern.permute.xlu1 %v12937_v45  ;;  %v8044_v61 = vpop.f32.mrb[92].mxu0  ;;  %v1127_v57 = vmul.f32 %v11109_v54, %v794_v1  ;;  %2899 = vperm.xlu0 %8554, %v193_v26  }
 0x490   :  { %v6754_v53 = vrot.slane %v6555_v34, 4  ;;  %858 = vperm.xlu1 %8534, %v11120_v0   ;;  %v4448_v7 = vpop.f32.mrb[93].mxu0  ;;  %v4454_v35 = vadd.f32 %v11434_v20, %v8044_v61 }
 0x491   :  { %v6749_v55 = vmax.f32 %v6554_v62, %v6748_v28  ;;  %v4449_v10 = vadd.f32 %v11434_v20, %v4448_v7  ;;  %v1293_v31 = vadd.f32 %v11125_v9, %v1127_v57  ;;  %v3063_v62 = vmul.f32 %v11153_v2, %v2772_v52  ;;  %v11454_v28 = vld [vmem:[%s12856_s0 + $0x480] sm:$0xff] }
 0x492   :  { %v6755_v4 = vmax.f32 %v6555_v34, %v6754_v53  ;;  %v4880_v34 = vmax.f32 %v4454_v35, 0.0  ;;  %v2257_v53 = vadd.f32 %v2097_v30, %v1292_v23 }
 0x493   :  { %v6750_v25 = vrot.slane %v6749_v55, 2  ;;  %v4879_v50 = vmax.f32 %v4449_v10, 0.0  ;;  %v1807_v11 = vpop.permute.xlu1 %1806  ;;  %8566 = vset.pattern.permute.xlu0 %v12917_v47 }
 0x494   :  { %v6756_v54 = vrot.slane %v6755_v4, 2  ;;  %v2098_v41 = vmul.f32 %v11131_v27, %v1807_v11  ;;  %863 = vperm.xlu1 %8534, %v8633_v8   ;;  %1914 = vperm.xlu0 %8566, %v11454_v28  }
 0x495   :  { %v6751_v44 = vmax.f32 %v6749_v55, %v6750_v25  ;;  %5608 = vmatmul.mubr.f32.gmra.mrb[114].mxu1 %v4879_v50 }
 0x496   :  { %v6757_v14 = vmax.f32 %v6755_v4, %v6756_v54  ;;  %v2258_v59 = vadd.f32 %v2098_v41, %v1293_v31  ;;  %5613 = vmatprep.mubr.f32.mxu1 %v12994_v40 }
 0x497   :  { %v6752_v16 = vrot.slane %v6751_v44, 1  ;;  %v5477_v1 = vpop.f32.mrb[70].mxu1 }
 0x498   :  { %v6758_v27 = vrot.slane %v6757_v14, 1  ;;  %8535 = vset.pattern.permute.xlu1 %v12917_v47  ;;  %v2768_v9 = vpop.permute.xlu1 %2767  ;;  %v5479_v15 = vpop.f32.mrb[71].mxu1  ;;  %v3223_v55 = vadd.f32 %v3063_v62, %v2258_v59  ;;  %v5478_v63 = vadd.f32 %v5477_v1, %v10733_v5  ;;  %v11481_v62 = vld [vmem:[%s12858_s1] ss:$0 sm:$0xff] }
 0x499   :  { %v6753_v61 = vmax.f32 %v6751_v44, %v6752_v16  ;;  %v3062_v57 = vmul.f32 %v11153_v2, %v2768_v9  ;;  %1862 = vperm.xlu1 %8535, %v8633_v8   ;;  %5614 = vmatmul.mubr.f32.gmra.mrb[116].mxu1 %v4880_v34  ;;  %v5480_v26 = vadd.f32 %v5479_v15, %v10742_v33 }
 0x49a   :  { %v6759_v7 = vmax.f32 %v6757_v14, %v6758_v27  ;;  %5619 = vmatprep.mubr.f32.mxu1 %v12994_v40  ;;  %v3383_v41 = vmax.f32 %v3223_v55, 0.0  ;;  %v6156_v8 = vmax.f32 %v5478_v63, 0.0  ;;  %v8637_v63 = vld [vmem:[%s12856_s0 + $0x428] sm:$0xff] }
 0x49b   :  { %v3222_v10 = vadd.f32 %v3062_v57, %v2257_v53  ;;  %v5483_v4 = vpop.f32.mrb[72].mxu1  ;;  %v11465_v25 = vsel %vm7087_vm5, %v6753_v61, %v11362_v24  ;;  %v6157_v24 = vmax.f32 %v5480_v26, 0.0  ;;  %v2780_v61 = vpop.permute.xlu0 %2779  ;;  %v11491_v53 = vld [vmem:[%s12859_s2] ss:$0 sm:$0xff] }
 0x49c   :  { %v5484_v35 = vadd.f32 %v5483_v4, %v10733_v5  ;;  %v5485_v50 = vpop.f32.mrb[73].mxu1  ;;  %v11470_v11 = vsel %vm7087_vm5, %v6759_v7, %v11368_v46  ;;  %v11497_v7 = vld [vmem:[%s12858_s1 + $0x1] ss:$0 sm:$0xff] }
 0x49d   :  { %v3382_v52 = vmax.f32 %v3222_v10, 0.0  ;;  %v5486_v54 = vadd.f32 %v5485_v50, %v10742_v33  ;;  %8536 = vset.pattern.permute.xlu1 %v12913_v17  ;;  %v799_v31 = vpop.permute.xlu1 %798  ;;  %v11506_v10 = vld [vmem:[%s12856_s0 + $0x490] sm:$0xff]  ;;  %v2099_v26 = vmul.f32 %v11497_v7, %v11282_v29  ;;  %v3065_v50 = vmul.f32 %v11153_v2, %v2780_v61  ;;  %v11519_v29 = vld [vmem:[%s12858_s1 + $0x2] ss:$0 sm:$0xff] }
 0x49e   :  { %v6158_v30 = vmax.f32 %v5484_v35, 0.0  ;;  %2823 = vperm.xlu1 %8536, %v11120_v0   ;;  %v1128_v34 = vmul.f32 %v11481_v62, %v799_v31  ;;  %1922 = vperm.xlu0 %8566, %v11506_v10  }
 0x49f   :  { %v6159_v44 = vmax.f32 %v5486_v54, 0.0  ;;  %8078 = vmatprep.mubr.msk.f32.mxu0 %vm3441_vm0, %v3382_v52 }
 0x4a0   :  { %v6364_v23 = vmax.f32 %v6156_v8, %v6158_v30  ;;  %8079 = vmatmul.mubr.msk.f32.gmra.mrb[116].mxu0 %vm3441_vm0, %v3383_v41  ;;  %v1294_v4 = vadd.f32 %v11491_v53, %v1128_v34 }
 0x4a1   :  { %v6365_v46 = vmax.f32 %v6157_v24, %v6159_v44  ;;  %v804_v14 = vpop.permute.xlu1 %803 }
 0x4a2   :  { %8537 = vset.pattern.permute.xlu1 %v12937_v45  ;;  %v8047_v59 = vpop.f32.mrb[94].mxu0  ;;  %v1129_v16 = vmul.f32 %v11481_v62, %v804_v14  ;;  %v2259_v30 = vadd.f32 %v2099_v26, %v1294_v4 }
 0x4a3   :  { %868 = vperm.xlu1 %8537, %v11179_v12   ;;  %v4458_v0 = vpop.f32.mrb[95].mxu0  ;;  %v4464_v27 = vadd.f32 %v11434_v20, %v8047_v59 }
 0x4a4   :  { %v4459_v1 = vadd.f32 %v11434_v20, %v4458_v0  ;;  %v1295_v57 = vadd.f32 %v11491_v53, %v1129_v16 }
 0x4a5   :  { %v4882_v52 = vmax.f32 %v4464_v27, 0.0 }
 0x4a6   :  { %v4881_v9 = vmax.f32 %v4459_v1, 0.0  ;;  %v1815_v15 = vpop.permute.xlu1 %1814 }
 0x4a7   :  { %v2100_v55 = vmul.f32 %v11497_v7, %v1815_v15  ;;  %873 = vperm.xlu1 %8537, %v8637_v63  }
 0x4a8   :  { %5620 = vmatmul.mubr.f32.gmra.mrb[118].mxu1 %v4881_v9 }
 0x4a9   :  { %v2260_v35 = vadd.f32 %v2100_v55, %v1295_v57  ;;  %5625 = vmatprep.mubr.f32.mxu1 %v12994_v40 }
 0x4aa   :  { %v5489_v54 = vpop.f32.mrb[74].mxu1 }
 0x4ab   :  { %v5490_v31 = vadd.f32 %v5489_v54, %v10733_v5  ;;  %8538 = vset.pattern.permute.xlu1 %v12917_v47  ;;  %v2776_v41 = vpop.permute.xlu1 %2775  ;;  %v5491_v8 = vpop.f32.mrb[75].mxu1  ;;  %v3225_v44 = vadd.f32 %v3065_v50, %v2260_v35 }
 0x4ac   :  { %v3064_v24 = vmul.f32 %v11519_v29, %v2776_v41  ;;  %v5492_v2 = vadd.f32 %v5491_v8, %v10742_v33  ;;  %1870 = vperm.xlu1 %8538, %v8637_v63   ;;  %5626 = vmatmul.mubr.f32.gmra.mrb[120].mxu1 %v4882_v52  ;;  %v2788_v50 = vpop.permute.xlu0 %2787 }
 0x4ad   :  { %v6160_v14 = vmax.f32 %v5490_v31, 0.0  ;;  %5631 = vmatprep.mubr.f32.mxu1 %v12994_v40  ;;  %v3385_v55 = vmax.f32 %v3225_v44, 0.0 }
 0x4ae   :  { %v3224_v59 = vadd.f32 %v3064_v24, %v2259_v30  ;;  %v6161_v16 = vmax.f32 %v5492_v2, 0.0  ;;  %v5495_v0 = vpop.f32.mrb[76].mxu1 }
 0x4af   :  { %v6428_v34 = vmax.f32 %v6364_v23, %v6160_v14  ;;  %v5496_v1 = vadd.f32 %v5495_v0, %v10733_v5  ;;  %v5497_v27 = vpop.f32.mrb[77].mxu1  ;;  %v2101_v14 = vmul.f32 %v11497_v7, %v11300_v48  ;;  %v3067_v0 = vmul.f32 %v11519_v29, %v2788_v50 }
 0x4b0   :  { %v3384_v9 = vmax.f32 %v3224_v59, 0.0  ;;  %v6429_v15 = vmax.f32 %v6365_v46, %v6161_v16  ;;  %v5498_v61 = vadd.f32 %v5497_v27, %v10742_v33  ;;  %8539 = vset.pattern.permute.xlu1 %v12913_v17  ;;  %v809_v57 = vpop.permute.xlu1 %808  ;;  %v11539_v44 = vpop.permute.xlu0 %2795 }
 0x4b1   :  { %v6162_v63 = vmax.f32 %v5496_v1, 0.0  ;;  %2831 = vperm.xlu1 %8539, %v11179_v12   ;;  %v1130_v31 = vmul.f32 %v11481_v62, %v809_v57 }
 0x4b2   :  { %v6163_v26 = vmax.f32 %v5498_v61, 0.0  ;;  %8081 = vmatprep.mubr.msk.f32.mxu0 %vm3441_vm0, %v3384_v9 }
 0x4b3   :  { %v6492_v4 = vmax.f32 %v6428_v34, %v6162_v63  ;;  %8082 = vmatmul.mubr.msk.f32.gmra.mrb[118].mxu0 %vm3441_vm0, %v3385_v55  ;;  %v1296_v59 = vadd.f32 %v11491_v53, %v1130_v31 }
 0x4b4   :  { %v6493_v23 = vmax.f32 %v6429_v15, %v6163_v26  ;;  %v814_v35 = vpop.permute.xlu1 %813  ;;  %v11557_v26 = vpop.permute.xlu0 %2803 }
 0x4b5   :  { %8541 = vset.pattern.permute.xlu1 %v12937_v45  ;;  %v8050_v46 = vpop.f32.mrb[96].mxu0  ;;  %v1131_v52 = vmul.f32 %v11481_v62, %v814_v35  ;;  %v2261_v61 = vadd.f32 %v2101_v14, %v1296_v59 }
 0x4b6   :  { %878 = vperm.xlu1 %8541, %v11203_v18   ;;  %v4468_v54 = vpop.f32.mrb[97].mxu0  ;;  %v4474_v41 = vadd.f32 %v11434_v20, %v8050_v46  ;;  %v11544_v18 = vld [vmem:[%s12856_s0 + $0x4a0] sm:$0xff] }
 0x4b7   :  { %v4469_v12 = vadd.f32 %v11434_v20, %v4468_v54  ;;  %v1297_v24 = vadd.f32 %v11491_v53, %v1131_v52  ;;  %1930 = vperm.xlu0 %8566, %v11544_v18  }
 0x4b8   :  { %v4884_v34 = vmax.f32 %v4474_v41, 0.0 }
 0x4b9   :  { %v4883_v8 = vmax.f32 %v4469_v12, 0.0  ;;  %v1823_v30 = vpop.permute.xlu1 %1822 }
 0x4ba   :  { %v2102_v2 = vmul.f32 %v11497_v7, %v1823_v30  ;;  %883 = vperm.xlu1 %8541, %v11264_v3  }
 0x4bb   :  { %5632 = vmatmul.mubr.f32.gmra.mrb[122].mxu1 %v4883_v8 }
 0x4bc   :  { %v2262_v16 = vadd.f32 %v2102_v2, %v1297_v24  ;;  %5637 = vmatprep.mubr.f32.mxu1 %v12994_v40 }
 0x4bd   :  { %v5501_v1 = vpop.f32.mrb[78].mxu1 }
 0x4be   :  { %v5502_v27 = vadd.f32 %v5501_v1, %v10733_v5  ;;  %8542 = vset.pattern.permute.xlu1 %v12917_v47  ;;  %v2784_v9 = vpop.permute.xlu1 %2783  ;;  %v5503_v15 = vpop.f32.mrb[79].mxu1  ;;  %v3227_v55 = vadd.f32 %v3067_v0, %v2262_v16  ;;  %v11573_v1 = vld [vmem:[%s12856_s0 + $0x440] sm:$0xff] }
 0x4bf   :  { %v3066_v48 = vmul.f32 %v11519_v29, %v2784_v9  ;;  %v5504_v57 = vadd.f32 %v5503_v15, %v10742_v33  ;;  %1878 = vperm.xlu1 %8542, %v11264_v3   ;;  %5638 = vmatmul.mubr.f32.gmra.mrb[124].mxu1 %v4884_v34  ;;  %v8639_v3 = vld [vmem:[%s12856_s0 + $0x430] sm:$0xff] }
 0x4c0   :  { %v6164_v63 = vmax.f32 %v5502_v27, 0.0  ;;  %5643 = vmatprep.mubr.f32.mxu1 %v12994_v40  ;;  %v3387_v8 = vmax.f32 %v3227_v55, 0.0 }
 0x4c1   :  { %v3226_v35 = vadd.f32 %v3066_v48, %v2261_v61  ;;  %v6165_v50 = vmax.f32 %v5504_v57, 0.0  ;;  %v5507_v46 = vpop.f32.mrb[80].mxu1  ;;  %v11581_v57 = vld [vmem:[%s12856_s0 + $0x4b0] sm:$0xff] }
 0x4c2   :  { %v6556_v52 = vmax.f32 %v6492_v4, %v6164_v63  ;;  %v5509_v54 = vpop.f32.mrb[81].mxu1  ;;  %v11566_v4 = vpop.permute.xlu0 %2811  ;;  %1938 = vperm.xlu0 %8566, %v11581_v57  }
 0x4c3   :  { %v3386_v31 = vmax.f32 %v3226_v35, 0.0  ;;  %v6557_v12 = vmax.f32 %v6493_v23, %v6165_v50  ;;  %8543 = vset.pattern.permute.xlu1 %v12913_v17  ;;  %v819_v41 = vpop.permute.xlu1 %818 }
 0x4c4   :  { %v6760_v30 = vrot.slane %v6556_v52, 4  ;;  %2839 = vperm.xlu1 %8543, %v8639_v3   ;;  %v1132_v15 = vmul.f32 %v11481_v62, %v819_v41 }
 0x4c5   :  { %v6766_v24 = vrot.slane %v6557_v12, 4  ;;  %8084 = vmatprep.mubr.msk.f32.mxu0 %vm3441_vm0, %v3386_v31 }
 0x4c6   :  { %v6761_v2 = vmax.f32 %v6556_v52, %v6760_v30  ;;  %8085 = vmatmul.mubr.msk.f32.gmra.mrb[120].mxu0 %vm3441_vm0, %v3387_v8  ;;  %v11584_v52 = vpop.permute.xlu0 %2819  ;;  %v2103_v8 = vmul.f32 %v11497_v7, %v11309_v36  ;;  %v1298_v30 = vadd.f32 %v11491_v53, %v1132_v15  ;;  %v5510_v36 = vadd.f32 %v5509_v54, %v10742_v33 }
 0x4c7   :  { %v6767_v14 = vmax.f32 %v6557_v12, %v6766_v24  ;;  %v824_v23 = vpop.permute.xlu1 %823  ;;  %v3069_v24 = vmul.f32 %v11519_v29, %v11539_v44 }
 0x4c8   :  { %v6762_v59 = vrot.slane %v6761_v2, 2  ;;  %8544 = vset.pattern.permute.xlu1 %v12937_v45  ;;  %v8053_v16 = vpop.f32.mrb[98].mxu0  ;;  %v1133_v34 = vmul.f32 %v11481_v62, %v824_v23  ;;  %v11600_v23 = vld [vmem:[%s12856_s0 + $0x4c0] sm:$0xff]  ;;  %v2263_v54 = vadd.f32 %v2103_v8, %v1298_v30 }
 0x4c9   :  { %v6768_v0 = vrot.slane %v6767_v14, 2  ;;  %888 = vperm.xlu1 %8544, %v11573_v1   ;;  %v4478_v27 = vpop.f32.mrb[99].mxu0  ;;  %v4484_v63 = vadd.f32 %v11434_v20, %v8053_v16  ;;  %1946 = vperm.xlu0 %8566, %v11600_v23  }
 0x4ca   :  { %v6763_v9 = vmax.f32 %v6761_v2, %v6762_v59  ;;  %v4479_v61 = vadd.f32 %v11434_v20, %v4478_v27  ;;  %v1299_v12 = vadd.f32 %v11491_v53, %v1133_v34  ;;  %v5508_v2 = vadd.f32 %v5507_v46, %v10733_v5  ;;  %v11614_v15 = vpop.permute.xlu0 %2827 }
 0x4cb   :  { %v6769_v48 = vmax.f32 %v6767_v14, %v6768_v0  ;;  %v4886_v16 = vmax.f32 %v4484_v63, 0.0 }
 0x4cc   :  { %v6764_v55 = vrot.slane %v6763_v9, 1  ;;  %v4885_v35 = vmax.f32 %v4479_v61, 0.0  ;;  %v1831_v50 = vpop.permute.xlu1 %1830 }
 0x4cd   :  { %v6770_v31 = vrot.slane %v6769_v48, 1  ;;  %v2104_v41 = vmul.f32 %v11497_v7, %v1831_v50  ;;  %893 = vperm.xlu1 %8544, %v11298_v56  }
 0x4ce   :  { %5644 = vmatmul.mubr.f32.gmra.mrb[126].mxu1 %v4885_v35  ;;  %v6765_v3 = vmax.f32 %v6763_v9, %v6764_v55  ;;  %v6167_v35 = vmax.f32 %v5510_v36, 0.0  ;;  %v11627_v36 = vpop.permute.xlu0 %2835 }
 0x4cf   :  { %v2264_v14 = vadd.f32 %v2104_v41, %v1299_v12  ;;  %5649 = vmatprep.mubr.f32.mxu1 %v12994_v40  ;;  %v6771_v59 = vmax.f32 %v6769_v48, %v6770_v31 }
 0x4d0   :  { %v5513_v0 = vpop.f32.mrb[82].mxu1  ;;  %v11606_v44 = vsel %vm7089_vm6, %v6765_v3, %v11465_v25  ;;  %v6166_v25 = vmax.f32 %v5508_v2, 0.0 }
 0x4d1   :  { %v5514_v46 = vadd.f32 %v5513_v0, %v10733_v5  ;;  %8545 = vset.pattern.permute.xlu1 %v12917_v47  ;;  %v2792_v34 = vpop.permute.xlu1 %2791  ;;  %v5515_v27 = vpop.f32.mrb[83].mxu1  ;;  %v11612_v9 = vsel %vm7089_vm6, %v6771_v59, %v11470_v11  ;;  %v3229_v55 = vadd.f32 %v3069_v24, %v2264_v14  ;;  %v198_v11 = vld [vmem:[%s12856_s0 + $0x4d0] sm:$0xff]  ;;  %v11633_v0 = vld [vmem:[%s12856_s0 + $0x4b8] sm:$0xff] }
 0x4d2   :  { %v3068_v61 = vmul.f32 %v11519_v29, %v2792_v34  ;;  %v5516_v48 = vadd.f32 %v5515_v27, %v10742_v33  ;;  %1886 = vperm.xlu1 %8545, %v11298_v56   ;;  %5650 = vmatmul.mubr.f32.gmra.mrb[128].mxu1 %v4886_v16 }
 0x4d3   :  { %v6168_v63 = vmax.f32 %v5514_v46, 0.0  ;;  %5655 = vmatprep.mubr.f32.mxu1 %v12994_v40  ;;  %1954 = vperm.xlu0 %8566, %v198_v11   ;;  %v3389_v14 = vmax.f32 %v3229_v55, 0.0 }
 0x4d4   :  { %v3228_v50 = vadd.f32 %v3068_v61, %v2263_v54  ;;  %v6169_v31 = vmax.f32 %v5516_v48, 0.0  ;;  %v5519_v12 = vpop.f32.mrb[84].mxu1  ;;  %v8641_v61 = vld [vmem:[%s12856_s0 + $0x450] sm:$0xff] }
 0x4d5   :  { %v6366_v41 = vmax.f32 %v6166_v25, %v6168_v63  ;;  %v5520_v8 = vadd.f32 %v5519_v12, %v10733_v5  ;;  %v5521_v30 = vpop.f32.mrb[85].mxu1  ;;  %v1835_v63 = vpop.permute.xlu0 %1834 }
 0x4d6   :  { %v3388_v56 = vmax.f32 %v3228_v50, 0.0  ;;  %v6367_v3 = vmax.f32 %v6167_v35, %v6169_v31  ;;  %v5522_v24 = vadd.f32 %v5521_v30, %v10742_v33  ;;  %8546 = vset.pattern.permute.xlu1 %v12913_v17  ;;  %v829_v2 = vpop.permute.xlu1 %828  ;;  %v3071_v30 = vmul.f32 %v11519_v29, %v11557_v26  ;;  %v11662_v26 = vld [vmem:[%s12856_s0 + $0x4c8] sm:$0xff] }
 0x4d7   :  { %v6170_v59 = vmax.f32 %v5520_v8, 0.0  ;;  %2847 = vperm.xlu1 %8546, %v11573_v1   ;;  %8574 = vset.pattern.permute.xlu0 %v12913_v17  ;;  %v1134_v25 = vmul.f32 %v11481_v62, %v829_v2  ;;  %v2105_v8 = vmul.f32 %v11497_v7, %v1835_v63 }
 0x4d8   :  { %v6171_v16 = vmax.f32 %v5522_v24, 0.0  ;;  %8087 = vmatprep.mubr.msk.f32.mxu0 %vm3441_vm0, %v3388_v56  ;;  %2907 = vperm.xlu0 %8574, %v11633_v0  }
 0x4d9   :  { %v6430_v46 = vmax.f32 %v6366_v41, %v6170_v59  ;;  %8088 = vmatmul.mubr.msk.f32.gmra.mrb[122].mxu0 %vm3441_vm0, %v3389_v14  ;;  %v1300_v41 = vadd.f32 %v11491_v53, %v1134_v25 }
 0x4da   :  { %v6431_v34 = vmax.f32 %v6367_v3, %v6171_v16  ;;  %v834_v27 = vpop.permute.xlu1 %833 }
 0x4db   :  { %8547 = vset.pattern.permute.xlu1 %v12937_v45  ;;  %v8056_v1 = vpop.f32.mrb[100].mxu0  ;;  %v1135_v54 = vmul.f32 %v11481_v62, %v834_v27  ;;  %v2265_v16 = vadd.f32 %v2105_v8, %v1300_v41 }
 0x4dc   :  { %898 = vperm.xlu1 %8547, %v8641_v61   ;;  %v4488_v48 = vpop.f32.mrb[101].mxu0  ;;  %v4494_v11 = vadd.f32 %v11434_v20, %v8056_v1  ;;  %2915 = vperm.xlu0 %8574, %v11662_v26  }
 0x4dd   :  { %v4489_v55 = vadd.f32 %v11434_v20, %v4488_v48  ;;  %v1301_v31 = vadd.f32 %v11491_v53, %v1135_v54 }
 0x4de   :  { %v4888_v3 = vmax.f32 %v4494_v11, 0.0 }
 0x4df   :  { %v4887_v35 = vmax.f32 %v4489_v55, 0.0  ;;  %v1839_v50 = vpop.permute.xlu1 %1838 }
 0x4e0   :  { %v2106_v12 = vmul.f32 %v11497_v7, %v1839_v50  ;;  %903 = vperm.xlu1 %8547, %v11334_v21  }
 0x4e1   :  { %5656 = vmatmul.mubr.f32.gmra.mrb[130].mxu1 %v4887_v35 }
 0x4e2   :  { %v2266_v56 = vadd.f32 %v2106_v12, %v1301_v31  ;;  %5661 = vmatprep.mubr.f32.mxu1 %v12994_v40 }
 0x4e3   :  { %v5525_v24 = vpop.f32.mrb[86].mxu1 }
 0x4e4   :  { %v5526_v2 = vadd.f32 %v5525_v24, %v10733_v5  ;;  %8548 = vset.pattern.permute.xlu1 %v12917_v47  ;;  %v2800_v14 = vpop.permute.xlu1 %2799  ;;  %v5527_v59 = vpop.f32.mrb[87].mxu1  ;;  %v3231_v54 = vadd.f32 %v3071_v30, %v2266_v56 }
 0x4e5   :  { %v3070_v27 = vmul.f32 %v11519_v29, %v2800_v14  ;;  %v5528_v1 = vadd.f32 %v5527_v59, %v10742_v33  ;;  %1894 = vperm.xlu1 %8548, %v11334_v21   ;;  %5662 = vmatmul.mubr.f32.gmra.mrb[132].mxu1 %v4888_v3 }
 0x4e6   :  { %v6172_v48 = vmax.f32 %v5526_v2, 0.0  ;;  %5667 = vmatprep.mubr.f32.mxu1 %v12994_v40  ;;  %v3391_v8 = vmax.f32 %v3231_v54, 0.0 }
 0x4e7   :  { %v3230_v25 = vadd.f32 %v3070_v27, %v2265_v16  ;;  %v6173_v55 = vmax.f32 %v5528_v1, 0.0  ;;  %v5531_v63 = vpop.f32.mrb[88].mxu1  ;;  %v8642_v16 = vld [vmem:[%s12856_s0 + $0x460] sm:$0xff] }
 0x4e8   :  { %v6494_v11 = vmax.f32 %v6430_v46, %v6172_v48  ;;  %v5532_v35 = vadd.f32 %v5531_v63, %v10733_v5  ;;  %v5533_v50 = vpop.f32.mrb[89].mxu1 }
 0x4e9   :  { %v3390_v21 = vmax.f32 %v3230_v25, 0.0  ;;  %v6495_v31 = vmax.f32 %v6431_v34, %v6173_v55  ;;  %v5534_v12 = vadd.f32 %v5533_v50, %v10742_v33  ;;  %8549 = vset.pattern.permute.xlu1 %v12913_v17  ;;  %v839_v41 = vpop.permute.xlu1 %838  ;;  %v1843_v25 = vpop.permute.xlu0 %1842 }
 0x4ea   :  { %v6174_v30 = vmax.f32 %v5532_v35, 0.0  ;;  %2855 = vperm.xlu1 %8549, %v8641_v61   ;;  %v1136_v1 = vmul.f32 %v11481_v62, %v839_v41  ;;  %v2107_v41 = vmul.f32 %v11497_v7, %v1843_v25 }
 0x4eb   :  { %v6175_v56 = vmax.f32 %v5534_v12, 0.0  ;;  %8090 = vmatprep.mubr.msk.f32.mxu0 %vm3441_vm0, %v3390_v21 }
 0x4ec   :  { %v6558_v3 = vmax.f32 %v6494_v11, %v6174_v30  ;;  %8091 = vmatmul.mubr.msk.f32.gmra.mrb[124].mxu0 %vm3441_vm0, %v3391_v8  ;;  %v1302_v8 = vadd.f32 %v11491_v53, %v1136_v1  ;;  %v3073_v30 = vmul.f32 %v11519_v29, %v11566_v4  ;;  %v11693_v4 = vld [vmem:[%s12856_s0 + $0x4d8] sm:$0xff] }
 0x4ed   :  { %v6559_v46 = vmax.f32 %v6495_v31, %v6175_v56  ;;  %v844_v24 = vpop.permute.xlu1 %843  ;;  %2923 = vperm.xlu0 %8574, %v11693_v4  }
 0x4ee   :  { %v6772_v2 = vrot.slane %v6558_v3, 4  ;;  %8550 = vset.pattern.permute.xlu1 %v12937_v45  ;;  %v8059_v34 = vpop.f32.mrb[102].mxu0  ;;  %v1137_v59 = vmul.f32 %v11481_v62, %v844_v24 }
 0x4ef   :  { %v6778_v14 = vrot.slane %v6559_v46, 4  ;;  %908 = vperm.xlu1 %8550, %v8642_v16   ;;  %v4498_v61 = vpop.f32.mrb[103].mxu0  ;;  %v4504_v63 = vadd.f32 %v11434_v20, %v8059_v34 }
 0x4f0   :  { %v6773_v27 = vmax.f32 %v6558_v3, %v6772_v2  ;;  %v4499_v54 = vadd.f32 %v11434_v20, %v4498_v61  ;;  %v1303_v21 = vadd.f32 %v11491_v53, %v1137_v59  ;;  %v2267_v61 = vadd.f32 %v2107_v41, %v1302_v8 }
 0x4f1   :  { %v6779_v48 = vmax.f32 %v6559_v46, %v6778_v14  ;;  %v4890_v46 = vmax.f32 %v4504_v63, 0.0 }
 0x4f2   :  { %v6774_v55 = vrot.slane %v6773_v27, 2  ;;  %v4889_v11 = vmax.f32 %v4499_v54, 0.0  ;;  %v1847_v35 = vpop.permute.xlu1 %1846 }
 0x4f3   :  { %v6780_v50 = vrot.slane %v6779_v48, 2  ;;  %v2108_v31 = vmul.f32 %v11497_v7, %v1847_v35  ;;  %913 = vperm.xlu1 %8550, %v11375_v58  }
 0x4f4   :  { %v6775_v12 = vmax.f32 %v6773_v27, %v6774_v55  ;;  %5668 = vmatmul.mubr.f32.gmra.mrb[134].mxu1 %v4889_v11 }
 0x4f5   :  { %v6781_v56 = vmax.f32 %v6779_v48, %v6780_v50  ;;  %v2268_v3 = vadd.f32 %v2108_v31, %v1303_v21  ;;  %5673 = vmatprep.mubr.f32.mxu1 %v12994_v40 }
 0x4f6   :  { %v5537_v24 = vpop.f32.mrb[90].mxu1  ;;  %v6776_v2 = vrot.slane %v6775_v12, 1 }
 0x4f7   :  { %8551 = vset.pattern.permute.xlu1 %v12917_v47  ;;  %v2808_v34 = vpop.permute.xlu1 %2807  ;;  %v5539_v14 = vpop.f32.mrb[91].mxu1  ;;  %v6782_v59 = vrot.slane %v6781_v56, 1  ;;  %v3233_v54 = vadd.f32 %v3073_v30, %v2268_v3  ;;  %v5538_v48 = vadd.f32 %v5537_v24, %v10733_v5 }
 0x4f8   :  { %v3072_v27 = vmul.f32 %v11519_v29, %v2808_v34  ;;  %1902 = vperm.xlu1 %8551, %v11375_v58   ;;  %5674 = vmatmul.mubr.f32.gmra.mrb[136].mxu1 %v4890_v46  ;;  %v6777_v1 = vmax.f32 %v6775_v12, %v6776_v2  ;;  %v5540_v63 = vadd.f32 %v5539_v14, %v10742_v33  ;;  %v8643_v14 = vld [vmem:[%s12856_s0 + $0x470] sm:$0xff] }
 0x4f9   :  { %5679 = vmatprep.mubr.f32.mxu1 %v12994_v40  ;;  %v6783_v25 = vmax.f32 %v6781_v56, %v6782_v59  ;;  %v3393_v41 = vmax.f32 %v3233_v54, 0.0  ;;  %v6176_v30 = vmax.f32 %v5538_v48, 0.0 }
 0x4fa   :  { %v3232_v55 = vadd.f32 %v3072_v27, %v2267_v61  ;;  %v5543_v11 = vpop.f32.mrb[92].mxu1  ;;  %v11701_v58 = vsel %vm7091_vm7, %v6777_v1, %v11606_v44  ;;  %v6177_v3 = vmax.f32 %v5540_v63, 0.0  ;;  %v11722_v27 = vld [vmem:[%s12856_s0 + $0x4e8] sm:$0xff]  ;;  %v1851_v1 = vpop.permute.xlu0 %1850 }
 0x4fb   :  { %v5544_v35 = vadd.f32 %v5543_v11, %v10733_v5  ;;  %v5545_v50 = vpop.f32.mrb[93].mxu1  ;;  %v11706_v21 = vsel %vm7091_vm7, %v6783_v25, %v11612_v9  ;;  %2931 = vperm.xlu0 %8574, %v11722_v27  }
 0x4fc   :  { %v3392_v31 = vmax.f32 %v3232_v55, 0.0  ;;  %v5546_v12 = vadd.f32 %v5545_v50, %v10742_v33  ;;  %8552 = vset.pattern.permute.xlu1 %v12913_v17  ;;  %v849_v8 = vpop.permute.xlu1 %848  ;;  %v3075_v50 = vmul.f32 %v11519_v29, %v11584_v52 }
 0x4fd   :  { %v6178_v56 = vmax.f32 %v5544_v35, 0.0  ;;  %2863 = vperm.xlu1 %8552, %v8642_v16   ;;  %v1138_v59 = vmul.f32 %v11481_v62, %v849_v8  ;;  %v2109_v35 = vmul.f32 %v11497_v7, %v1851_v1 }
 0x4fe   :  { %v6179_v44 = vmax.f32 %v5546_v12, 0.0  ;;  %8093 = vmatprep.mubr.msk.f32.mxu0 %vm3441_vm0, %v3392_v31  ;;  %v11737_v12 = vld [vmem:[%s12856_s0 + $0x4e0] sm:$0xff] }
 0x4ff   :  { %v6368_v46 = vmax.f32 %v6176_v30, %v6178_v56  ;;  %8094 = vmatmul.mubr.msk.f32.gmra.mrb[126].mxu0 %vm3441_vm0, %v3393_v41  ;;  %v1304_v11 = vadd.f32 %v11491_v53, %v1138_v59  ;;  %8580 = vset.pattern.permute.xlu0 %v12917_v47 }
 0x500   :  { %v6369_v24 = vmax.f32 %v6177_v3, %v6179_v44  ;;  %v854_v9 = vpop.permute.xlu1 %853  ;;  %1962 = vperm.xlu0 %8580, %v11737_v12  }
 0x501   :  { %8553 = vset.pattern.permute.xlu1 %v12937_v45  ;;  %v8062_v2 = vpop.f32.mrb[104].mxu0  ;;  %v1139_v34 = vmul.f32 %v11481_v62, %v854_v9  ;;  %v2269_v3 = vadd.f32 %v2109_v35, %v1304_v11 }
 0x502   :  { %918 = vperm.xlu1 %8553, %v8643_v14   ;;  %v4508_v16 = vpop.f32.mrb[105].mxu0  ;;  %v4514_v54 = vadd.f32 %v11434_v20, %v8062_v2 }
 0x503   :  { %v4509_v61 = vadd.f32 %v11434_v20, %v4508_v16  ;;  %v1305_v55 = vadd.f32 %v11491_v53, %v1139_v34 }
 0x504   :  { %v4892_v8 = vmax.f32 %v4514_v54, 0.0 }
 0x505   :  { %v4891_v48 = vmax.f32 %v4509_v61, 0.0  ;;  %v1855_v25 = vpop.permute.xlu1 %1854 }
 0x506   :  { %v2110_v63 = vmul.f32 %v11497_v7, %v1855_v25  ;;  %923 = vperm.xlu1 %8553, %v11406_v43  }
 0x507   :  { %5680 = vmatmul.mubr.f32.gmra.mrb[138].mxu1 %v4891_v48 }
 0x508   :  { %v2270_v31 = vadd.f32 %v2110_v63, %v1305_v55  ;;  %5685 = vmatprep.mubr.f32.mxu1 %v12994_v40 }
 0x509   :  { %v5549_v41 = vpop.f32.mrb[94].mxu1 }
 0x50a   :  { %v5550_v30 = vadd.f32 %v5549_v41, %v10733_v5  ;;  %8555 = vset.pattern.permute.xlu1 %v12917_v47  ;;  %v2816_v56 = vpop.permute.xlu1 %2815  ;;  %v5551_v52 = vpop.f32.mrb[95].mxu1  ;;  %v3235_v2 = vadd.f32 %v3075_v50, %v2270_v31 }
 0x50b   :  { %v3074_v44 = vmul.f32 %v11519_v29, %v2816_v56  ;;  %v5552_v9 = vadd.f32 %v5551_v52, %v10742_v33  ;;  %1910 = vperm.xlu1 %8555, %v11406_v43   ;;  %5686 = vmatmul.mubr.f32.gmra.mrb[140].mxu1 %v4892_v8  ;;  %v1859_v52 = vpop.permute.xlu0 %1858 }
 0x50c   :  { %v6180_v34 = vmax.f32 %v5550_v30, 0.0  ;;  %5691 = vmatprep.mubr.f32.mxu1 %v12994_v40  ;;  %v3395_v43 = vmax.f32 %v3235_v2, 0.0 }
 0x50d   :  { %v3234_v16 = vadd.f32 %v3074_v44, %v2269_v3  ;;  %v6181_v59 = vmax.f32 %v5552_v9, 0.0  ;;  %v5555_v61 = vpop.f32.mrb[96].mxu1 }
 0x50e   :  { %v6432_v1 = vmax.f32 %v6368_v46, %v6180_v34  ;;  %v5556_v54 = vadd.f32 %v5555_v61, %v10733_v5  ;;  %v5557_v48 = vpop.f32.mrb[97].mxu1  ;;  %v2111_v61 = vmul.f32 %v11497_v7, %v1859_v52 }
 0x50f   :  { %v3394_v25 = vmax.f32 %v3234_v16, 0.0  ;;  %v6433_v55 = vmax.f32 %v6369_v24, %v6181_v59  ;;  %v5558_v63 = vadd.f32 %v5557_v48, %v10742_v33  ;;  %8556 = vset.pattern.permute.xlu1 %v12913_v17  ;;  %v859_v11 = vpop.permute.xlu1 %858  ;;  %v11764_v16 = vld [vmem:[%s12856_s0 + $0x4f0] sm:$0xff] }
 0x510   :  { %v6182_v35 = vmax.f32 %v5556_v54, 0.0  ;;  %2871 = vperm.xlu1 %8556, %v8643_v14   ;;  %v1140_v56 = vmul.f32 %v11481_v62, %v859_v11  ;;  %1970 = vperm.xlu0 %8580, %v11764_v16  }
 0x511   :  { %v6183_v50 = vmax.f32 %v5558_v63, 0.0  ;;  %8096 = vmatprep.mubr.msk.f32.mxu0 %vm3441_vm0, %v3394_v25 }
 0x512   :  { %v6496_v31 = vmax.f32 %v6432_v1, %v6182_v35  ;;  %8097 = vmatmul.mubr.msk.f32.gmra.mrb[128].mxu0 %vm3441_vm0, %v3395_v43  ;;  %v1306_v59 = vadd.f32 %v11491_v53, %v1140_v56  ;;  %v3077_v1 = vmul.f32 %v11519_v29, %v11614_v15 }
 0x513   :  { %v6497_v46 = vmax.f32 %v6433_v55, %v6183_v50  ;;  %v864_v8 = vpop.permute.xlu1 %863  ;;  %v1867_v55 = vpop.permute.xlu0 %1866 }
 0x514   :  { %8557 = vset.pattern.permute.xlu1 %v12937_v45  ;;  %v8065_v41 = vpop.f32.mrb[106].mxu0  ;;  %v1141_v24 = vmul.f32 %v11481_v62, %v864_v8  ;;  %v2271_v35 = vadd.f32 %v2111_v61, %v1306_v59  ;;  %8584 = vset.pattern.permute.xlu0 %v12913_v17 }
 0x515   :  { %928 = vperm.xlu1 %8557, %v11454_v28   ;;  %v4518_v30 = vpop.f32.mrb[107].mxu0  ;;  %v4524_v3 = vadd.f32 %v11434_v20, %v8065_v41 }
 0x516   :  { %v4519_v14 = vadd.f32 %v11434_v20, %v4518_v30  ;;  %v1307_v2 = vadd.f32 %v11491_v53, %v1141_v24  ;;  %v11781_v24 = vld [vmem:[%s12856_s0 + $0x4f8] sm:$0xff] }
 0x517   :  { %v4894_v48 = vmax.f32 %v4524_v3, 0.0  ;;  %v11784_v52 = vpop.permute.xlu0 %1874  ;;  %2939 = vperm.xlu0 %8584, %v11781_v24  }
 0x518   :  { %v4893_v44 = vmax.f32 %v4519_v14, 0.0  ;;  %v1863_v9 = vpop.permute.xlu1 %1862 }
 0x519   :  { %v2112_v34 = vmul.f32 %v11497_v7, %v1863_v9  ;;  %933 = vperm.xlu1 %8557, %v11416_v49  }
 0x51a   :  { %5692 = vmatmul.mubr.f32.gmra.mrb[142].mxu1 %v4893_v44 }
 0x51b   :  { %v2272_v54 = vadd.f32 %v2112_v34, %v1307_v2  ;;  %5697 = vmatprep.mubr.f32.mxu1 %v12994_v40  ;;  %v11795_v61 = vpop.permute.xlu0 %1882 }
 0x51c   :  { %v5561_v25 = vpop.f32.mrb[98].mxu1 }
 0x51d   :  { %v5562_v63 = vadd.f32 %v5561_v25, %v10733_v5  ;;  %8558 = vset.pattern.permute.xlu1 %v12917_v47  ;;  %v2824_v11 = vpop.permute.xlu1 %2823  ;;  %v5563_v43 = vpop.f32.mrb[99].mxu1  ;;  %v3237_v15 = vadd.f32 %v3077_v1, %v2272_v54 }
 0x51e   :  { %v3076_v50 = vmul.f32 %v11519_v29, %v2824_v11  ;;  %v5564_v8 = vadd.f32 %v5563_v43, %v10742_v33  ;;  %1918 = vperm.xlu1 %8558, %v11416_v49   ;;  %5698 = vmatmul.mubr.f32.gmra.mrb[144].mxu1 %v4894_v48 }
 0x51f   :  { %v6184_v41 = vmax.f32 %v5562_v63, 0.0  ;;  %5703 = vmatprep.mubr.f32.mxu1 %v12994_v40  ;;  %v3397_v34 = vmax.f32 %v3237_v15, 0.0  ;;  %v2113_v15 = vmul.f32 %v11497_v7, %v1867_v55 }
 0x520   :  { %v3236_v30 = vadd.f32 %v3076_v50, %v2271_v35  ;;  %v6185_v56 = vmax.f32 %v5564_v8, 0.0  ;;  %v5567_v14 = vpop.f32.mrb[100].mxu1  ;;  %v8644_v35 = vld [vmem:[%s12856_s0 + $0x498] sm:$0xff]  ;;  %v11808_v50 = vpop.permute.xlu0 %1890 }
 0x521   :  { %v11787_v49 = vmax.f32 %v6496_v31, %v6184_v41  ;;  %v5569_v3 = vpop.f32.mrb[101].mxu1  ;;  %v5568_v41 = vadd.f32 %v5567_v14, %v10733_v5 }
 0x522   :  { %v3396_v44 = vmax.f32 %v3236_v30, 0.0  ;;  %v11789_v9 = vmax.f32 %v6497_v46, %v6185_v56  ;;  %8559 = vset.pattern.permute.xlu1 %v12913_v17  ;;  %v869_v2 = vpop.permute.xlu1 %868  ;;  %v5570_v56 = vadd.f32 %v5569_v3, %v10742_v33 }
 0x523   :  { %2879 = vperm.xlu1 %8559, %v11454_v28   ;;  %v1142_v54 = vmul.f32 %v11481_v62, %v869_v2  ;;  %v6186_v14 = vmax.f32 %v5568_v41, 0.0 }
 0x524   :  { %8099 = vmatprep.mubr.msk.f32.mxu0 %vm3441_vm0, %v3396_v44  ;;  %v6187_v3 = vmax.f32 %v5570_v56, 0.0 }
 0x525   :  { %8100 = vmatmul.mubr.msk.f32.gmra.mrb[130].mxu0 %vm3441_vm0, %v3397_v34  ;;  %v1308_v8 = vadd.f32 %v11491_v53, %v1142_v54 }
 0x526   :  { %v874_v59 = vpop.permute.xlu1 %873 }
 0x527   :  { %8560 = vset.pattern.permute.xlu1 %v12937_v45  ;;  %v8068_v31 = vpop.f32.mrb[108].mxu0  ;;  %v1143_v1 = vmul.f32 %v11481_v62, %v874_v59  ;;  %v2273_v55 = vadd.f32 %v2113_v15, %v1308_v8 }
 0x528   :  { %938 = vperm.xlu1 %8560, %v11506_v10   ;;  %v4528_v46 = vpop.f32.mrb[109].mxu0  ;;  %v4534_v28 = vadd.f32 %v11434_v20, %v8068_v31 }
 0x529   :  { %v4529_v48 = vadd.f32 %v11434_v20, %v4528_v46  ;;  %v1309_v11 = vadd.f32 %v11491_v53, %v1143_v1  ;;  %v3079_v20 = vmul.f32 %v11519_v29, %v11627_v36 }
 0x52a   :  { %v4896_v44 = vmax.f32 %v4534_v28, 0.0 }
 0x52b   :  { %v4895_v25 = vmax.f32 %v4529_v48, 0.0  ;;  %v1871_v63 = vpop.permute.xlu1 %1870  ;;  %v11821_v48 = vpop.permute.xlu0 %1898 }
 0x52c   :  { %v2114_v43 = vmul.f32 %v11497_v7, %v1871_v63  ;;  %943 = vperm.xlu1 %8560, %v8644_v35  }
 0x52d   :  { %5704 = vmatmul.mubr.f32.gmra.mrb[146].mxu1 %v4895_v25 }
 0x52e   :  { %v2274_v30 = vadd.f32 %v2114_v43, %v1309_v11  ;;  %5709 = vmatprep.mubr.f32.mxu1 %v12994_v40 }
 0x52f   :  { %v5573_v2 = vpop.f32.mrb[102].mxu1 }
 0x530   :  { %v5574_v34 = vadd.f32 %v5573_v2, %v10733_v5  ;;  %8561 = vset.pattern.permute.xlu1 %v12917_v47  ;;  %v2832_v59 = vpop.permute.xlu1 %2831  ;;  %v5575_v31 = vpop.f32.mrb[103].mxu1  ;;  %v3239_v46 = vadd.f32 %v3079_v20, %v2274_v30 }
 0x531   :  { %v3078_v1 = vmul.f32 %v11519_v29, %v2832_v59  ;;  %v5576_v36 = vadd.f32 %v5575_v31, %v10742_v33  ;;  %1926 = vperm.xlu1 %8561, %v8644_v35   ;;  %5710 = vmatmul.mubr.f32.gmra.mrb[148].mxu1 %v4896_v44 }
 0x532   :  { %v6188_v54 = vmax.f32 %v5574_v34, 0.0  ;;  %5715 = vmatprep.mubr.f32.mxu1 %v12994_v40  ;;  %v3399_v41 = vmax.f32 %v3239_v46, 0.0  ;;  %v11830_v34 = vpop.permute.xlu0 %1906 }
 0x533   :  { %v3238_v28 = vadd.f32 %v3078_v1, %v2273_v55  ;;  %v6189_v25 = vmax.f32 %v5576_v36, 0.0  ;;  %v5579_v63 = vpop.f32.mrb[104].mxu1 }
 0x534   :  { %v6370_v11 = vmax.f32 %v6186_v14, %v6188_v54  ;;  %v5580_v43 = vadd.f32 %v5579_v63, %v10733_v5  ;;  %v5581_v8 = vpop.f32.mrb[105].mxu1  ;;  %v11839_v14 = vld [vmem:[%s12861_s4] ss:$0 sm:$0xff] }
 0x535   :  { %v3398_v15 = vmax.f32 %v3238_v28, 0.0  ;;  %v6371_v2 = vmax.f32 %v6187_v3, %v6189_v25  ;;  %v5582_v35 = vadd.f32 %v5581_v8, %v10742_v33  ;;  %8562 = vset.pattern.permute.xlu1 %v12913_v17  ;;  %v879_v20 = vpop.permute.xlu1 %878 }
 0x536   :  { %v6190_v30 = vmax.f32 %v5580_v43, 0.0  ;;  %2887 = vperm.xlu1 %8562, %v11506_v10   ;;  %v1144_v10 = vmul.f32 %v11481_v62, %v879_v20  ;;  %v2844_v25 = vpop.permute.xlu0 %2843  ;;  %v2115_v43 = vmul.f32 %v11497_v7, %v11784_v52 }
 0x537   :  { %v6191_v44 = vmax.f32 %v5582_v35, 0.0  ;;  %8102 = vmatprep.mubr.msk.f32.mxu0 %vm3441_vm0, %v3398_v15  ;;  %v6784_v35 = vrot.slane %v11787_v49, 4 }
 0x538   :  { %v6434_v56 = vmax.f32 %v6370_v11, %v6190_v30  ;;  %8103 = vmatmul.mubr.msk.f32.gmra.mrb[132].mxu0 %vm3441_vm0, %v3399_v41  ;;  %v1310_v8 = vadd.f32 %v11491_v53, %v1144_v10 }
 0x539   :  { %v6435_v59 = vmax.f32 %v6371_v2, %v6191_v44  ;;  %v884_v31 = vpop.permute.xlu1 %883  ;;  %v3081_v2 = vmul.f32 %v11519_v29, %v2844_v25  ;;  %v6785_v10 = vmax.f32 %v11787_v49, %v6784_v35 }
 0x53a   :  { %8563 = vset.pattern.permute.xlu1 %v12937_v45  ;;  %v8071_v55 = vpop.f32.mrb[110].mxu0  ;;  %v1145_v1 = vmul.f32 %v11481_v62, %v884_v31  ;;  %v8646_v62 = vld [vmem:[%s12856_s0 + $0x4a8] sm:$0xff]  ;;  %v2275_v52 = vadd.f32 %v2115_v43, %v1310_v8 }
 0x53b   :  { %948 = vperm.xlu1 %8563, %v11544_v18   ;;  %v4538_v36 = vpop.f32.mrb[111].mxu0  ;;  %v4544_v54 = vadd.f32 %v11839_v14, %v8071_v55  ;;  %v6786_v49 = vrot.slane %v6785_v10, 2 }
 0x53c   :  { %v4539_v46 = vadd.f32 %v11839_v14, %v4538_v36  ;;  %v1311_v63 = vadd.f32 %v11491_v53, %v1145_v1 }
 0x53d   :  { %v4898_v20 = vmax.f32 %v4544_v54, 0.0 }
 0x53e   :  { %v4897_v3 = vmax.f32 %v4539_v46, 0.0  ;;  %v1879_v28 = vpop.permute.xlu1 %1878 }
 0x53f   :  { %v2116_v11 = vmul.f32 %v11497_v7, %v1879_v28  ;;  %953 = vperm.xlu1 %8563, %v8646_v62   ;;  %v6790_v7 = vrot.slane %v11789_v9, 4 }
 0x540   :  { %5716 = vmatmul.mubr.f32.gmra.mrb[150].mxu1 %v4897_v3 }
 0x541   :  { %v2276_v15 = vadd.f32 %v2116_v11, %v1311_v63  ;;  %5721 = vmatprep.mubr.f32.mxu1 %v12994_v40  ;;  %v6791_v11 = vmax.f32 %v11789_v9, %v6790_v7 }
 0x542   :  { %v5585_v41 = vpop.f32.mrb[106].mxu1 }
 0x543   :  { %v5586_v30 = vadd.f32 %v5585_v41, %v10733_v5  ;;  %8564 = vset.pattern.permute.xlu1 %v12917_v47  ;;  %v2840_v44 = vpop.permute.xlu1 %2839  ;;  %v5587_v31 = vpop.f32.mrb[107].mxu1  ;;  %v3241_v1 = vadd.f32 %v3081_v2, %v2276_v15 }
 0x544   :  { %v3080_v53 = vmul.f32 %v11519_v29, %v2840_v44  ;;  %v5588_v55 = vadd.f32 %v5587_v31, %v10742_v33  ;;  %1934 = vperm.xlu1 %8564, %v8646_v62   ;;  %5722 = vmatmul.mubr.f32.gmra.mrb[152].mxu1 %v4898_v20  ;;  %v6792_v20 = vrot.slane %v6791_v11, 2  ;;  %v6787_v44 = vmax.f32 %v6785_v10, %v6786_v49 }
 0x545   :  { %v6192_v36 = vmax.f32 %v5586_v30, 0.0  ;;  %5727 = vmatprep.mubr.f32.mxu1 %v12994_v40  ;;  %v3401_v15 = vmax.f32 %v3241_v1, 0.0 }
 0x546   :  { %v3240_v46 = vadd.f32 %v3080_v53, %v2275_v52  ;;  %v6193_v54 = vmax.f32 %v5588_v55, 0.0  ;;  %v5591_v3 = vpop.f32.mrb[108].mxu1 }
 0x547   :  { %v6498_v28 = vmax.f32 %v6434_v56, %v6192_v36  ;;  %v5592_v25 = vadd.f32 %v5591_v3, %v10733_v5  ;;  %v5593_v63 = vpop.f32.mrb[109].mxu1  ;;  %v6793_v36 = vmax.f32 %v6791_v11, %v6792_v20  ;;  %v11888_v11 = vld [vmem:[%s12858_s1 + $0x1] ss:$0 sm:$0xff] }
 0x548   :  { %v3400_v29 = vmax.f32 %v3240_v46, 0.0  ;;  %v6499_v43 = vmax.f32 %v6435_v59, %v6193_v54  ;;  %v5594_v62 = vadd.f32 %v5593_v63, %v10742_v33  ;;  %8565 = vset.pattern.permute.xlu1 %v12913_v17  ;;  %v889_v8 = vpop.permute.xlu1 %888  ;;  %v6788_v63 = vrot.slane %v6787_v44, 1 }
 0x549   :  { %v6194_v2 = vmax.f32 %v5592_v25, 0.0  ;;  %2895 = vperm.xlu1 %8565, %v11544_v18   ;;  %v11872_v18 = vld [vmem:[%s12858_s1] ss:$0 sm:$0xff]  ;;  %v2852_v25 = vpop.permute.xlu0 %2851 }
 0x54a   :  { %v6195_v35 = vmax.f32 %v5594_v62, 0.0  ;;  %8105 = vmatprep.mubr.msk.f32.mxu0 %vm3441_vm0, %v3400_v29  ;;  %v1146_v55 = vmul.f32 %v11872_v18, %v889_v8 }
 0x54b   :  { %v6562_v56 = vmax.f32 %v6498_v28, %v6194_v2  ;;  %8106 = vmatmul.mubr.msk.f32.gmra.mrb[134].mxu0 %vm3441_vm0, %v3401_v15  ;;  %v2117_v15 = vmul.f32 %v11888_v11, %v11795_v61  ;;  %v6789_v61 = vmax.f32 %v6787_v44, %v6788_v63 }
 0x54c   :  { %v6563_v9 = vmax.f32 %v6499_v43, %v6195_v35  ;;  %v894_v41 = vpop.permute.xlu1 %893  ;;  %v11882_v43 = vld [vmem:[%s12859_s2] ss:$0 sm:$0xff]  ;;  %v6794_v35 = vrot.slane %v6793_v36, 1 }
 0x54d   :  { %v6796_v59 = vrot.slane %v6562_v56, 4  ;;  %8567 = vset.pattern.permute.xlu1 %v12937_v45  ;;  %v8074_v30 = vpop.f32.mrb[112].mxu0  ;;  %v1147_v7 = vmul.f32 %v11872_v18, %v894_v41  ;;  %v1312_v49 = vadd.f32 %v11882_v43, %v1146_v55 }
 0x54e   :  { %v6802_v31 = vrot.slane %v6563_v9, 4  ;;  %958 = vperm.xlu1 %8567, %v11581_v57   ;;  %v4548_v52 = vpop.f32.mrb[113].mxu0  ;;  %v4554_v10 = vadd.f32 %v11839_v14, %v8074_v30 }
 0x54f   :  { %v6797_v53 = vmax.f32 %v6562_v56, %v6796_v59  ;;  %v4549_v1 = vadd.f32 %v11839_v14, %v4548_v52  ;;  %v1313_v62 = vadd.f32 %v11882_v43, %v1147_v7 }
 0x550   :  { %v6803_v46 = vmax.f32 %v6563_v9, %v6802_v31  ;;  %v11898_v9 = vld [vmem:[%s12858_s1 + $0x2] ss:$0 sm:$0xff]  ;;  %v4900_v30 = vmax.f32 %v4554_v10, 0.0 }
 0x551   :  { %v6798_v54 = vrot.slane %v6797_v53, 2  ;;  %v4899_v3 = vmax.f32 %v4549_v1, 0.0  ;;  %v1887_v28 = vpop.permute.xlu1 %1886  ;;  %v3083_v41 = vmul.f32 %v11898_v9, %v2852_v25  ;;  %v2277_v1 = vadd.f32 %v2117_v15, %v1312_v49 }
 0x552   :  { %v6804_v29 = vrot.slane %v6803_v46, 2  ;;  %v2118_v8 = vmul.f32 %v11888_v11, %v1887_v28  ;;  %963 = vperm.xlu1 %8567, %v11633_v0  }
 0x553   :  { %v6799_v2 = vmax.f32 %v6797_v53, %v6798_v54  ;;  %5728 = vmatmul.mubr.f32.gmra.mrb[154].mxu1 %v4899_v3  ;;  %v6795_v54 = vmax.f32 %v6793_v36, %v6794_v35 }
 0x554   :  { %v6805_v56 = vmax.f32 %v6803_v46, %v6804_v29  ;;  %v2278_v20 = vadd.f32 %v2118_v8, %v1313_v62  ;;  %5733 = vmatprep.mubr.f32.mxu1 %v12994_v40 }
 0x555   :  { %v6800_v59 = vrot.slane %v6799_v2, 1  ;;  %v5597_v31 = vpop.f32.mrb[110].mxu1 }
 0x556   :  { %v6806_v7 = vrot.slane %v6805_v56, 1  ;;  %8568 = vset.pattern.permute.xlu1 %v12917_v47  ;;  %v2848_v52 = vpop.permute.xlu1 %2847  ;;  %v5599_v53 = vpop.f32.mrb[111].mxu1  ;;  %v3243_v28 = vadd.f32 %v3083_v41, %v2278_v20  ;;  %v5598_v25 = vadd.f32 %v5597_v31, %v10733_v5 }
 0x557   :  { %v6801_v55 = vmax.f32 %v6799_v2, %v6800_v59  ;;  %v3082_v46 = vmul.f32 %v11898_v9, %v2848_v52  ;;  %1942 = vperm.xlu1 %8568, %v11633_v0   ;;  %5734 = vmatmul.mubr.f32.gmra.mrb[156].mxu1 %v4900_v30  ;;  %v5600_v63 = vadd.f32 %v5599_v53, %v10742_v33 }
 0x558   :  { %v6807_v3 = vmax.f32 %v6805_v56, %v6806_v7  ;;  %5739 = vmatprep.mubr.f32.mxu1 %v12994_v40  ;;  %v3403_v49 = vmax.f32 %v3243_v28, 0.0  ;;  %v6196_v35 = vmax.f32 %v5598_v25, 0.0  ;;  %v2119_v25 = vmul.f32 %v11888_v11, %v11808_v50 }
 0x559   :  { %v11908_v44 = vsel %vm7079_vm1, %v6801_v55, %v6789_v61  ;;  %v3242_v10 = vadd.f32 %v3082_v46, %v2277_v1  ;;  %v5603_v29 = vpop.f32.mrb[112].mxu1  ;;  %v6197_v20 = vmax.f32 %v5600_v63, 0.0 }
 0x55a   :  { %v11912_v62 = vsel %vm7079_vm1, %v6807_v3, %v6795_v54  ;;  %v5604_v0 = vadd.f32 %v5603_v29, %v10733_v5  ;;  %v5605_v8 = vpop.f32.mrb[113].mxu1  ;;  %v2860_v54 = vpop.permute.xlu0 %2859 }
 0x55b   :  { %v3402_v36 = vmax.f32 %v3242_v10, 0.0  ;;  %v5606_v15 = vadd.f32 %v5605_v8, %v10742_v33  ;;  %8569 = vset.pattern.permute.xlu1 %v12913_v17  ;;  %v899_v2 = vpop.permute.xlu1 %898  ;;  %v3085_v63 = vmul.f32 %v11898_v9, %v2860_v54  ;;  %v8651_v54 = vld [vmem:[%s12856_s0 + $0x4c0] sm:$0xff] }
 0x55c   :  { %v6198_v56 = vmax.f32 %v5604_v0, 0.0  ;;  %2903 = vperm.xlu1 %8569, %v11581_v57   ;;  %v1148_v53 = vmul.f32 %v11872_v18, %v899_v2 }
 0x55d   :  { %v6199_v41 = vmax.f32 %v5606_v15, 0.0  ;;  %8108 = vmatprep.mubr.msk.f32.mxu0 %vm3441_vm0, %v3402_v36 }
 0x55e   :  { %v6372_v59 = vmax.f32 %v6196_v35, %v6198_v56  ;;  %8109 = vmatmul.mubr.msk.f32.gmra.mrb[136].mxu0 %vm3441_vm0, %v3403_v49 }
 0x55f   :  { %v6373_v30 = vmax.f32 %v6197_v20, %v6199_v41  ;;  %v904_v31 = vpop.permute.xlu1 %903 }
 0x560   :  { %8570 = vset.pattern.permute.xlu1 %v12937_v45  ;;  %v8077_v61 = vpop.f32.mrb[114].mxu0  ;;  %v1149_v7 = vmul.f32 %v11872_v18, %v904_v31 }
 0x561   :  { %968 = vperm.xlu1 %8570, %v11600_v23   ;;  %v4558_v52 = vpop.f32.mrb[115].mxu0  ;;  %v4564_v55 = vadd.f32 %v11839_v14, %v8077_v61  ;;  %v1314_v23 = vadd.f32 %v11882_v43, %v1148_v53 }
 0x562   :  { %v4559_v57 = vadd.f32 %v11839_v14, %v4558_v52  ;;  %v1315_v3 = vadd.f32 %v11882_v43, %v1149_v7 }
 0x563   :  { %v4902_v29 = vmax.f32 %v4564_v55, 0.0  ;;  %v2279_v2 = vadd.f32 %v2119_v25, %v1314_v23 }
 0x564   :  { %v4901_v1 = vmax.f32 %v4559_v57, 0.0  ;;  %v1895_v46 = vpop.permute.xlu1 %1894 }
 0x565   :  { %v2120_v28 = vmul.f32 %v11888_v11, %v1895_v46  ;;  %973 = vperm.xlu1 %8570, %v11662_v26  }
 0x566   :  { %5740 = vmatmul.mubr.f32.gmra.mrb[158].mxu1 %v4901_v1 }
 0x567   :  { %v2280_v10 = vadd.f32 %v2120_v28, %v1315_v3  ;;  %5745 = vmatprep.mubr.f32.mxu1 %v12994_v40 }
 0x568   :  { %v5609_v0 = vpop.f32.mrb[114].mxu1 }
 0x569   :  { %v5610_v8 = vadd.f32 %v5609_v0, %v10733_v5  ;;  %8571 = vset.pattern.permute.xlu1 %v12917_v47  ;;  %v2856_v36 = vpop.permute.xlu1 %2855  ;;  %v5611_v15 = vpop.f32.mrb[115].mxu1  ;;  %v3245_v35 = vadd.f32 %v3085_v63, %v2280_v10  ;;  %v8652_v10 = vld [vmem:[%s12856_s0 + $0x4d0] sm:$0xff] }
 0x56a   :  { %v3084_v49 = vmul.f32 %v11898_v9, %v2856_v36  ;;  %v5612_v50 = vadd.f32 %v5611_v15, %v10742_v33  ;;  %1950 = vperm.xlu1 %8571, %v11662_v26   ;;  %5746 = vmatmul.mubr.f32.gmra.mrb[160].mxu1 %v4902_v29 }
 0x56b   :  { %v6200_v56 = vmax.f32 %v5610_v8, 0.0  ;;  %5751 = vmatprep.mubr.f32.mxu1 %v12994_v40  ;;  %v3405_v26 = vmax.f32 %v3245_v35, 0.0  ;;  %v2121_v35 = vmul.f32 %v11888_v11, %v11821_v48 }
 0x56c   :  { %v3244_v20 = vadd.f32 %v3084_v49, %v2279_v2  ;;  %v6201_v41 = vmax.f32 %v5612_v50, 0.0  ;;  %v5615_v31 = vpop.f32.mrb[116].mxu1  ;;  %v2868_v2 = vpop.permute.xlu0 %2867 }
 0x56d   :  { %v6436_v61 = vmax.f32 %v6372_v59, %v6200_v56  ;;  %v5616_v7 = vadd.f32 %v5615_v31, %v10733_v5  ;;  %v5617_v52 = vpop.f32.mrb[117].mxu1 }
 0x56e   :  { %v3404_v53 = vmax.f32 %v3244_v20, 0.0  ;;  %v6437_v57 = vmax.f32 %v6373_v30, %v6201_v41  ;;  %v5618_v55 = vadd.f32 %v5617_v52, %v10742_v33  ;;  %8572 = vset.pattern.permute.xlu1 %v12913_v17  ;;  %v909_v1 = vpop.permute.xlu1 %908  ;;  %v3087_v41 = vmul.f32 %v11898_v9, %v2868_v2 }
 0x56f   :  { %v6202_v46 = vmax.f32 %v5616_v7, 0.0  ;;  %2911 = vperm.xlu1 %8572, %v8651_v54   ;;  %v1150_v29 = vmul.f32 %v11872_v18, %v909_v1 }
 0x570   :  { %v6203_v3 = vmax.f32 %v5618_v55, 0.0  ;;  %8111 = vmatprep.mubr.msk.f32.mxu0 %vm3441_vm0, %v3404_v53 }
 0x571   :  { %v6500_v59 = vmax.f32 %v6436_v61, %v6202_v46  ;;  %8112 = vmatmul.mubr.msk.f32.gmra.mrb[138].mxu0 %vm3441_vm0, %v3405_v26  ;;  %v1316_v56 = vadd.f32 %v11882_v43, %v1150_v29 }
 0x572   :  { %v6501_v28 = vmax.f32 %v6437_v57, %v6203_v3  ;;  %v914_v30 = vpop.permute.xlu1 %913 }
 0x573   :  { %8573 = vset.pattern.permute.xlu1 %v12937_v45  ;;  %v8080_v25 = vpop.f32.mrb[116].mxu0  ;;  %v1151_v23 = vmul.f32 %v11872_v18, %v914_v30  ;;  %v2281_v57 = vadd.f32 %v2121_v35, %v1316_v56 }
 0x574   :  { %978 = vperm.xlu1 %8573, %v8652_v10   ;;  %v4568_v63 = vpop.f32.mrb[117].mxu0  ;;  %v4574_v8 = vadd.f32 %v11839_v14, %v8080_v25 }
 0x575   :  { %v4569_v0 = vadd.f32 %v11839_v14, %v4568_v63  ;;  %v1317_v49 = vadd.f32 %v11882_v43, %v1151_v23 }
 0x576   :  { %v4904_v31 = vmax.f32 %v4574_v8, 0.0 }
 0x577   :  { %v4903_v36 = vmax.f32 %v4569_v0, 0.0  ;;  %v1903_v15 = vpop.permute.xlu1 %1902 }
 0x578   :  { %v2122_v50 = vmul.f32 %v11888_v11, %v1903_v15  ;;  %983 = vperm.xlu1 %8573, %v11693_v4   ;;  %v2876_v15 = vpop.permute.xlu0 %2875 }
 0x579   :  { %5752 = vmatmul.mubr.f32.gmra.mrb[162].mxu1 %v4903_v36 }
 0x57a   :  { %v2282_v20 = vadd.f32 %v2122_v50, %v1317_v49  ;;  %5757 = vmatprep.mubr.f32.mxu1 %v12994_v40 }
 0x57b   :  { %v5621_v61 = vpop.f32.mrb[118].mxu1 }
 0x57c   :  { %v5622_v7 = vadd.f32 %v5621_v61, %v10733_v5  ;;  %8575 = vset.pattern.permute.xlu1 %v12917_v47  ;;  %v2864_v52 = vpop.permute.xlu1 %2863  ;;  %v5623_v53 = vpop.f32.mrb[119].mxu1  ;;  %v3247_v1 = vadd.f32 %v3087_v41, %v2282_v20 }
 0x57d   :  { %v3086_v55 = vmul.f32 %v11898_v9, %v2864_v52  ;;  %v5624_v48 = vadd.f32 %v5623_v53, %v10742_v33  ;;  %1958 = vperm.xlu1 %8575, %v11693_v4   ;;  %5758 = vmatmul.mubr.f32.gmra.mrb[164].mxu1 %v4904_v31 }
 0x57e   :  { %v6204_v26 = vmax.f32 %v5622_v7, 0.0  ;;  %5763 = vmatprep.mubr.f32.mxu1 %v12994_v40  ;;  %v3407_v0 = vmax.f32 %v3247_v1, 0.0 }
 0x57f   :  { %v3246_v46 = vadd.f32 %v3086_v55, %v2281_v57  ;;  %v6205_v54 = vmax.f32 %v5624_v48, 0.0  ;;  %v5627_v3 = vpop.f32.mrb[120].mxu1  ;;  %v11979_v57 = vpop.permute.xlu0 %2883 }
 0x580   :  { %v6564_v30 = vmax.f32 %v6500_v59, %v6204_v26  ;;  %v5629_v25 = vpop.f32.mrb[121].mxu1  ;;  %v2123_v26 = vmul.f32 %v11888_v11, %v11830_v34 }
 0x581   :  { %v3406_v23 = vmax.f32 %v3246_v46, 0.0  ;;  %v6565_v63 = vmax.f32 %v6501_v28, %v6205_v54  ;;  %8576 = vset.pattern.permute.xlu1 %v12913_v17  ;;  %v919_v29 = vpop.permute.xlu1 %918 }
 0x582   :  { %v6808_v8 = vrot.slane %v6564_v30, 4  ;;  %2919 = vperm.xlu1 %8576, %v8652_v10   ;;  %v1152_v20 = vmul.f32 %v11872_v18, %v919_v29 }
 0x583   :  { %v6814_v36 = vrot.slane %v6565_v63, 4  ;;  %8114 = vmatprep.mubr.msk.f32.mxu0 %vm3441_vm0, %v3406_v23  ;;  %v5628_v23 = vadd.f32 %v5627_v3, %v10733_v5 }
 0x584   :  { %v6809_v4 = vmax.f32 %v6564_v30, %v6808_v8  ;;  %8115 = vmatmul.mubr.msk.f32.gmra.mrb[140].mxu0 %vm3441_vm0, %v3407_v0  ;;  %v1318_v54 = vadd.f32 %v11882_v43, %v1152_v20  ;;  %v5630_v0 = vadd.f32 %v5629_v25, %v10742_v33 }
 0x585   :  { %v6815_v2 = vmax.f32 %v6565_v63, %v6814_v36  ;;  %v924_v49 = vpop.permute.xlu1 %923  ;;  %v3089_v63 = vmul.f32 %v11898_v9, %v2876_v15  ;;  %v12001_v15 = vpop.permute.xlu0 %2891 }
 0x586   :  { %v6810_v50 = vrot.slane %v6809_v4, 2  ;;  %8577 = vset.pattern.permute.xlu1 %v12937_v45  ;;  %v8083_v59 = vpop.f32.mrb[118].mxu0  ;;  %v1153_v35 = vmul.f32 %v11872_v18, %v924_v49 }
 0x587   :  { %v6816_v28 = vrot.slane %v6815_v2, 2  ;;  %988 = vperm.xlu1 %8577, %v11737_v12   ;;  %v4578_v56 = vpop.f32.mrb[119].mxu0  ;;  %v4584_v7 = vadd.f32 %v11839_v14, %v8083_v59 }
 0x588   :  { %v6811_v10 = vmax.f32 %v6809_v4, %v6810_v50  ;;  %v4579_v41 = vadd.f32 %v11839_v14, %v4578_v56  ;;  %v1319_v48 = vadd.f32 %v11882_v43, %v1153_v35  ;;  %v2283_v50 = vadd.f32 %v2123_v26, %v1318_v54 }
 0x589   :  { %v6817_v31 = vmax.f32 %v6815_v2, %v6816_v28  ;;  %v4906_v8 = vmax.f32 %v4584_v7, 0.0  ;;  %v6207_v56 = vmax.f32 %v5630_v0, 0.0 }
 0x58a   :  { %v6812_v61 = vrot.slane %v6811_v10, 1  ;;  %v4905_v52 = vmax.f32 %v4579_v41, 0.0  ;;  %v1911_v53 = vpop.permute.xlu1 %1910 }
 0x58b   :  { %v6818_v55 = vrot.slane %v6817_v31, 1  ;;  %v2124_v1 = vmul.f32 %v11888_v11, %v1911_v53  ;;  %993 = vperm.xlu1 %8577, %v11722_v27  }
 0x58c   :  { %v6813_v46 = vmax.f32 %v6811_v10, %v6812_v61  ;;  %5764 = vmatmul.mubr.f32.gmra.mrb[166].mxu1 %v4905_v52 }
 0x58d   :  { %v6819_v30 = vmax.f32 %v6817_v31, %v6818_v55  ;;  %v2284_v29 = vadd.f32 %v2124_v1, %v1319_v48  ;;  %5769 = vmatprep.mubr.f32.mxu1 %v12994_v40  ;;  %v12011_v1 = vpop.permute.xlu0 %2899 }
 0x58e   :  { %v5633_v36 = vpop.f32.mrb[122].mxu1  ;;  %v11993_v4 = vsel %vm7081_vm2, %v6813_v46, %v11908_v44  ;;  %v6206_v44 = vmax.f32 %v5628_v23, 0.0 }
 0x58f   :  { %v5634_v34 = vadd.f32 %v5633_v36, %v10733_v5  ;;  %8578 = vset.pattern.permute.xlu1 %v12917_v47  ;;  %v2872_v2 = vpop.permute.xlu1 %2871  ;;  %v5635_v49 = vpop.f32.mrb[123].mxu1  ;;  %v11999_v3 = vsel %vm7081_vm2, %v6819_v30, %v11912_v62  ;;  %v3249_v28 = vadd.f32 %v3089_v63, %v2284_v29 }
 0x590   :  { %v3088_v25 = vmul.f32 %v11898_v9, %v2872_v2  ;;  %v5636_v59 = vadd.f32 %v5635_v49, %v10742_v33  ;;  %1966 = vperm.xlu1 %8578, %v11722_v27   ;;  %5770 = vmatmul.mubr.f32.gmra.mrb[168].mxu1 %v4906_v8 }
 0x591   :  { %v6208_v35 = vmax.f32 %v5634_v34, 0.0  ;;  %5775 = vmatprep.mubr.f32.mxu1 %v12994_v40  ;;  %v3409_v55 = vmax.f32 %v3249_v28, 0.0  ;;  %v1915_v8 = vpop.permute.xlu0 %1914 }
 0x592   :  { %v3248_v10 = vadd.f32 %v3088_v25, %v2283_v50  ;;  %v6209_v20 = vmax.f32 %v5636_v59, 0.0  ;;  %v5639_v62 = vpop.f32.mrb[124].mxu1  ;;  %v2125_v25 = vmul.f32 %v11888_v11, %v1915_v8  ;;  %v3091_v59 = vmul.f32 %v11898_v9, %v11979_v57 }
 0x593   :  { %v6374_v41 = vmax.f32 %v6206_v44, %v6208_v35  ;;  %v5640_v31 = vadd.f32 %v5639_v62, %v10733_v5  ;;  %v5641_v61 = vpop.f32.mrb[125].mxu1 }
 0x594   :  { %v3408_v7 = vmax.f32 %v3248_v10, 0.0  ;;  %v6375_v52 = vmax.f32 %v6207_v56, %v6209_v20  ;;  %v5642_v53 = vadd.f32 %v5641_v61, %v10742_v33  ;;  %8579 = vset.pattern.permute.xlu1 %v12913_v17  ;;  %v929_v27 = vpop.permute.xlu1 %928 }
 0x595   :  { %v6210_v48 = vmax.f32 %v5640_v31, 0.0  ;;  %2927 = vperm.xlu1 %8579, %v11737_v12   ;;  %v1154_v12 = vmul.f32 %v11872_v18, %v929_v27 }
 0x596   :  { %v6211_v26 = vmax.f32 %v5642_v53, 0.0  ;;  %8117 = vmatprep.mubr.msk.f32.mxu0 %vm3441_vm0, %v3408_v7 }
 0x597   :  { %v6438_v46 = vmax.f32 %v6374_v41, %v6210_v48  ;;  %8118 = vmatmul.mubr.msk.f32.gmra.mrb[142].mxu0 %vm3441_vm0, %v3409_v55 }
 0x598   :  { %v6439_v54 = vmax.f32 %v6375_v52, %v6211_v26  ;;  %v934_v30 = vpop.permute.xlu1 %933 }
 0x599   :  { %8581 = vset.pattern.permute.xlu1 %v12937_v45  ;;  %v8086_v23 = vpop.f32.mrb[120].mxu0  ;;  %v1155_v63 = vmul.f32 %v11872_v18, %v934_v30  ;;  %v1320_v45 = vadd.f32 %v11882_v43, %v1154_v12 }
 0x59a   :  { %998 = vperm.xlu1 %8581, %v11764_v16   ;;  %v4588_v29 = vpop.f32.mrb[121].mxu0  ;;  %v4594_v36 = vadd.f32 %v11839_v14, %v8086_v23 }
 0x59b   :  { %v4589_v0 = vadd.f32 %v11839_v14, %v4588_v29  ;;  %v1321_v49 = vadd.f32 %v11882_v43, %v1155_v63  ;;  %v2285_v62 = vadd.f32 %v2125_v25, %v1320_v45  ;;  %v1923_v45 = vpop.permute.xlu0 %1922 }
 0x59c   :  { %v4908_v28 = vmax.f32 %v4594_v36, 0.0 }
 0x59d   :  { %v4907_v34 = vmax.f32 %v4589_v0, 0.0  ;;  %v1919_v2 = vpop.permute.xlu1 %1918 }
 0x59e   :  { %v2126_v50 = vmul.f32 %v11888_v11, %v1919_v2  ;;  %1003 = vperm.xlu1 %8581, %v11781_v24  }
 0x59f   :  { %5776 = vmatmul.mubr.f32.gmra.mrb[170].mxu1 %v4907_v34 }
 0x5a0   :  { %v2286_v44 = vadd.f32 %v2126_v50, %v1321_v49  ;;  %5781 = vmatprep.mubr.f32.mxu1 %v12994_v40 }
 0x5a1   :  { %v5645_v35 = vpop.f32.mrb[126].mxu1 }
 0x5a2   :  { %v5646_v56 = vadd.f32 %v5645_v35, %v10733_v5  ;;  %8582 = vset.pattern.permute.xlu1 %v12917_v47  ;;  %v2880_v10 = vpop.permute.xlu1 %2879  ;;  %v5647_v20 = vpop.f32.mrb[127].mxu1  ;;  %v3251_v57 = vadd.f32 %v3091_v59, %v2286_v44 }
 0x5a3   :  { %v3090_v41 = vmul.f32 %v11898_v9, %v2880_v10  ;;  %v5648_v31 = vadd.f32 %v5647_v20, %v10742_v33  ;;  %1974 = vperm.xlu1 %8582, %v11781_v24   ;;  %5782 = vmatmul.mubr.f32.gmra.mrb[172].mxu1 %v4908_v28 }
 0x5a4   :  { %v6212_v61 = vmax.f32 %v5646_v56, 0.0  ;;  %5787 = vmatprep.mubr.f32.mxu1 %v12994_v40  ;;  %v3411_v24 = vmax.f32 %v3251_v57, 0.0 }
 0x5a5   :  { %v3250_v7 = vadd.f32 %v3090_v41, %v2285_v62  ;;  %v6213_v52 = vmax.f32 %v5648_v31, 0.0  ;;  %v5651_v53 = vpop.f32.mrb[128].mxu1  ;;  %v2127_v41 = vmul.f32 %v11888_v11, %v1923_v45  ;;  %v3093_v31 = vmul.f32 %v11898_v9, %v12001_v15 }
 0x5a6   :  { %v6502_v27 = vmax.f32 %v6438_v46, %v6212_v61  ;;  %v5652_v47 = vadd.f32 %v5651_v53, %v10733_v5  ;;  %v5653_v55 = vpop.f32.mrb[129].mxu1 }
 0x5a7   :  { %v3410_v48 = vmax.f32 %v3250_v7, 0.0  ;;  %v6503_v26 = vmax.f32 %v6439_v54, %v6213_v52  ;;  %v5654_v30 = vadd.f32 %v5653_v55, %v10742_v33  ;;  %8583 = vset.pattern.permute.xlu1 %v12913_v17  ;;  %v939_v23 = vpop.permute.xlu1 %938 }
 0x5a8   :  { %v6214_v63 = vmax.f32 %v5652_v47, 0.0  ;;  %2935 = vperm.xlu1 %8583, %v11764_v16   ;;  %v1156_v49 = vmul.f32 %v11872_v18, %v939_v23 }
 0x5a9   :  { %v6215_v29 = vmax.f32 %v5654_v30, 0.0  ;;  %8120 = vmatprep.mubr.msk.f32.mxu0 %vm3441_vm0, %v3410_v48 }
 0x5aa   :  { %v6566_v12 = vmax.f32 %v6502_v27, %v6214_v63  ;;  %8121 = vmatmul.mubr.msk.f32.gmra.mrb[144].mxu0 %vm3441_vm0, %v3411_v24  ;;  %v1322_v62 = vadd.f32 %v11882_v43, %v1156_v49 }
 0x5ab   :  { %v6567_v46 = vmax.f32 %v6503_v26, %v6215_v29  ;;  %v944_v0 = vpop.permute.xlu1 %943 }
 0x5ac   :  { %v6820_v8 = vrot.slane %v6566_v12, 4  ;;  %v8089_v36 = vpop.f32.mrb[122].mxu0  ;;  %v1157_v34 = vmul.f32 %v11872_v18, %v944_v0  ;;  %v2287_v26 = vadd.f32 %v2127_v41, %v1322_v62 }
 0x5ad   :  { %v6826_v54 = vrot.slane %v6567_v46, 4  ;;  %v4598_v2 = vpop.f32.mrb[123].mxu0  ;;  %v4604_v59 = vadd.f32 %v11839_v14, %v8089_v36 }
 0x5ae   :  { %v6821_v17 = vmax.f32 %v6566_v12, %v6820_v8  ;;  %v4599_v50 = vadd.f32 %v11839_v14, %v4598_v2  ;;  %v1323_v56 = vadd.f32 %v11882_v43, %v1157_v34 }
 0x5af   :  { %v6827_v16 = vmax.f32 %v6567_v46, %v6826_v54  ;;  %v4910_v52 = vmax.f32 %v4604_v59, 0.0 }
 0x5b0   :  { %v6822_v25 = vrot.slane %v6821_v17, 2  ;;  %v4909_v44 = vmax.f32 %v4599_v50, 0.0  ;;  %v1927_v28 = vpop.permute.xlu1 %1926 }
 0x5b1   :  { %v6828_v35 = vrot.slane %v6827_v16, 2  ;;  %v2128_v10 = vmul.f32 %v11888_v11, %v1927_v28  ;;  %v1931_v28 = vpop.permute.xlu0 %1930 }
 0x5b2   :  { %v6823_v20 = vmax.f32 %v6821_v17, %v6822_v25  ;;  %5788 = vmatmul.mubr.f32.gmra.mrb[174].mxu1 %v4909_v44 }
 0x5b3   :  { %v6829_v57 = vmax.f32 %v6827_v16, %v6828_v35  ;;  %v2288_v61 = vadd.f32 %v2128_v10, %v1323_v56  ;;  %5793 = vmatprep.mubr.f32.mxu1 %v12994_v40 }
 0x5b4   :  { %v6824_v7 = vrot.slane %v6823_v20, 1  ;;  %v5657_v53 = vpop.f32.mrb[130].mxu1 }
 0x5b5   :  { %v6830_v27 = vrot.slane %v6829_v57, 1  ;;  %v2888_v47 = vpop.permute.xlu1 %2887  ;;  %v5659_v55 = vpop.f32.mrb[131].mxu1  ;;  %v3253_v24 = vadd.f32 %v3093_v31, %v2288_v61  ;;  %v5658_v63 = vadd.f32 %v5657_v53, %v10733_v5  ;;  %v3095_v53 = vmul.f32 %v11898_v9, %v12011_v1 }
 0x5b6   :  { %v6825_v48 = vmax.f32 %v6823_v20, %v6824_v7  ;;  %v3092_v30 = vmul.f32 %v11898_v9, %v2888_v47  ;;  %5794 = vmatmul.mubr.f32.gmra.mrb[176].mxu1 %v4910_v52  ;;  %v5660_v29 = vadd.f32 %v5659_v55, %v10742_v33  ;;  %v1939_v61 = vpop.permute.xlu0 %1938  ;;  %v2129_v52 = vmul.f32 %v11888_v11, %v1931_v28 }
 0x5b7   :  { %v6831_v23 = vmax.f32 %v6829_v57, %v6830_v27  ;;  %5799 = vmatprep.mubr.f32.mxu1 %v12994_v40  ;;  %v3413_v17 = vmax.f32 %v3253_v24, 0.0  ;;  %v6216_v49 = vmax.f32 %v5658_v63, 0.0 }
 0x5b8   :  { %v3252_v15 = vadd.f32 %v3092_v30, %v2287_v26  ;;  %v5663_v12 = vpop.f32.mrb[132].mxu1  ;;  %v12058_v46 = vsel %vm7083_vm3, %v6825_v48, %v11993_v4  ;;  %v6217_v16 = vmax.f32 %v5660_v29, 0.0 }
 0x5b9   :  { %v5664_v0 = vadd.f32 %v5663_v12, %v10733_v5  ;;  %v5665_v8 = vpop.f32.mrb[133].mxu1  ;;  %v12063_v36 = vsel %vm7083_vm3, %v6831_v23, %v11999_v3 }
 0x5ba   :  { %v3412_v54 = vmax.f32 %v3252_v15, 0.0  ;;  %v5666_v34 = vadd.f32 %v5665_v8, %v10742_v33  ;;  %v949_v2 = vpop.permute.xlu1 %948  ;;  %v12082_v12 = vpop.permute.xlu0 %1946 }
 0x5bb   :  { %v6218_v50 = vmax.f32 %v5664_v0, 0.0  ;;  %v1158_v56 = vmul.f32 %v11872_v18, %v949_v2 }
 0x5bc   :  { %v6219_v45 = vmax.f32 %v5666_v34, 0.0  ;;  %8123 = vmatprep.mubr.msk.f32.mxu0 %vm3441_vm0, %v3412_v54 }
 0x5bd   :  { %v6376_v4 = vmax.f32 %v6216_v49, %v6218_v50  ;;  %8124 = vmatmul.mubr.msk.f32.gmra.mrb[146].mxu0 %vm3441_vm0, %v3413_v17  ;;  %v1324_v7 = vadd.f32 %v11882_v43, %v1158_v56 }
 0x5be   :  { %v6377_v25 = vmax.f32 %v6217_v16, %v6219_v45  ;;  %v954_v59 = vpop.permute.xlu1 %953 }
 0x5bf   :  { %v8092_v44 = vpop.f32.mrb[124].mxu0  ;;  %v1159_v3 = vmul.f32 %v11872_v18, %v954_v59  ;;  %v2289_v23 = vadd.f32 %v2129_v52, %v1324_v7 }
 0x5c0   :  { %v4608_v35 = vpop.f32.mrb[125].mxu0  ;;  %v4614_v20 = vadd.f32 %v11839_v14, %v8092_v44 }
 0x5c1   :  { %v4609_v10 = vadd.f32 %v11839_v14, %v4608_v35  ;;  %v1325_v31 = vadd.f32 %v11882_v43, %v1159_v3  ;;  %v12089_v3 = vpop.permute.xlu0 %1954 }
 0x5c2   :  { %v4912_v47 = vmax.f32 %v4614_v20, 0.0 }
 0x5c3   :  { %v4911_v62 = vmax.f32 %v4609_v10, 0.0  ;;  %v1935_v41 = vpop.permute.xlu1 %1934 }
 0x5c4   :  { %v2130_v57 = vmul.f32 %v11888_v11, %v1935_v41 }
 0x5c5   :  { %5800 = vmatmul.mubr.f32.gmra.mrb[178].mxu1 %v4911_v62  ;;  %v2908_v7 = vpop.permute.xlu0 %2907 }
 0x5c6   :  { %v2290_v27 = vadd.f32 %v2130_v57, %v1325_v31  ;;  %5805 = vmatprep.mubr.f32.mxu1 %v12994_v40 }
 0x5c7   :  { %v5669_v55 = vpop.f32.mrb[134].mxu1 }
 0x5c8   :  { %v5670_v48 = vadd.f32 %v5669_v55, %v10733_v5  ;;  %v2896_v26 = vpop.permute.xlu1 %2895  ;;  %v5671_v30 = vpop.f32.mrb[135].mxu1  ;;  %v3255_v15 = vadd.f32 %v3095_v53, %v2290_v27  ;;  %v2131_v27 = vmul.f32 %v11888_v11, %v1939_v61 }
 0x5c9   :  { %v3094_v24 = vmul.f32 %v11898_v9, %v2896_v26  ;;  %v5672_v63 = vadd.f32 %v5671_v30, %v10742_v33  ;;  %5806 = vmatmul.mubr.f32.gmra.mrb[180].mxu1 %v4912_v47 }
 0x5ca   :  { %v6220_v29 = vmax.f32 %v5670_v48, 0.0  ;;  %5811 = vmatprep.mubr.f32.mxu1 %v12994_v40  ;;  %v3415_v45 = vmax.f32 %v3255_v15, 0.0  ;;  %v3097_v48 = vmul.f32 %v11898_v9, %v2908_v7 }
 0x5cb   :  { %v3254_v1 = vadd.f32 %v3094_v24, %v2289_v23  ;;  %v6221_v0 = vmax.f32 %v5672_v63, 0.0  ;;  %v5675_v8 = vpop.f32.mrb[136].mxu1 }
 0x5cc   :  { %v6440_v54 = vmax.f32 %v6376_v4, %v6220_v29  ;;  %v5676_v34 = vadd.f32 %v5675_v8, %v10733_v5  ;;  %v5677_v2 = vpop.f32.mrb[137].mxu1 }
 0x5cd   :  { %v3414_v17 = vmax.f32 %v3254_v1, 0.0  ;;  %v6441_v49 = vmax.f32 %v6377_v25, %v6221_v0  ;;  %v5678_v50 = vadd.f32 %v5677_v2, %v10742_v33  ;;  %v959_v16 = vpop.permute.xlu1 %958 }
 0x5ce   :  { %v6222_v59 = vmax.f32 %v5676_v34, 0.0  ;;  %v1160_v25 = vmul.f32 %v11872_v18, %v959_v16 }
 0x5cf   :  { %v6223_v44 = vmax.f32 %v5678_v50, 0.0  ;;  %8126 = vmatprep.mubr.msk.f32.mxu0 %vm3441_vm0, %v3414_v17 }
 0x5d0   :  { %v6504_v28 = vmax.f32 %v6440_v54, %v6222_v59  ;;  %8127 = vmatmul.mubr.msk.f32.gmra.mrb[148].mxu0 %vm3441_vm0, %v3415_v45  ;;  %v1326_v47 = vadd.f32 %v11882_v43, %v1160_v25 }
 0x5d1   :  { %v6505_v35 = vmax.f32 %v6441_v49, %v6223_v44  ;;  %v964_v4 = vpop.permute.xlu1 %963 }
 0x5d2   :  { %v8095_v56 = vpop.f32.mrb[126].mxu0  ;;  %v1161_v10 = vmul.f32 %v11872_v18, %v964_v4  ;;  %v2291_v63 = vadd.f32 %v2131_v27, %v1326_v47 }
 0x5d3   :  { %v4618_v20 = vpop.f32.mrb[127].mxu0  ;;  %v4624_v41 = vadd.f32 %v11839_v14, %v8095_v56 }
 0x5d4   :  { %v4619_v62 = vadd.f32 %v11839_v14, %v4618_v20  ;;  %v1327_v52 = vadd.f32 %v11882_v43, %v1161_v10 }
 0x5d5   :  { %v4914_v26 = vmax.f32 %v4624_v41, 0.0 }
 0x5d6   :  { %v4913_v31 = vmax.f32 %v4619_v62, 0.0  ;;  %v1943_v57 = vpop.permute.xlu1 %1942 }
 0x5d7   :  { %v2132_v53 = vmul.f32 %v11888_v11, %v1943_v57 }
 0x5d8   :  { %5812 = vmatmul.mubr.f32.gmra.mrb[182].mxu1 %v4913_v31  ;;  %v12112_v31 = vld [vmem:[%s12861_s4] ss:$0 sm:$0xff] }
 0x5d9   :  { %v2292_v55 = vadd.f32 %v2132_v53, %v1327_v52  ;;  %5817 = vmatprep.mubr.f32.mxu1 %v12994_v40 }
 0x5da   :  { %v5681_v30 = vpop.f32.mrb[138].mxu1 }
 0x5db   :  { %v5682_v14 = vadd.f32 %v5681_v30, %v10733_v5  ;;  %v2904_v23 = vpop.permute.xlu1 %2903  ;;  %v5683_v24 = vpop.f32.mrb[139].mxu1  ;;  %v3257_v61 = vadd.f32 %v3097_v48, %v2292_v55 }
 0x5dc   :  { %v3096_v15 = vmul.f32 %v11898_v9, %v2904_v23  ;;  %v5684_v29 = vadd.f32 %v5683_v24, %v10742_v33  ;;  %5818 = vmatmul.mubr.f32.gmra.mrb[184].mxu1 %v4914_v26  ;;  %v2916_v55 = vpop.permute.xlu0 %2915 }
 0x5dd   :  { %v6224_v1 = vmax.f32 %v5682_v14, 0.0  ;;  %5823 = vmatprep.mubr.f32.mxu1 %v12994_v40  ;;  %v3417_v16 = vmax.f32 %v3257_v61, 0.0 }
 0x5de   :  { %v3256_v0 = vadd.f32 %v3096_v15, %v2291_v63  ;;  %v6225_v8 = vmax.f32 %v5684_v29, 0.0  ;;  %v5687_v54 = vpop.f32.mrb[140].mxu1  ;;  %v3099_v29 = vmul.f32 %v11898_v9, %v2916_v55  ;;  %v12144_v55 = vld [vmem:[%s12858_s1] ss:$0 sm:$0xff] }
 0x5df   :  { %v6568_v34 = vmax.f32 %v6504_v28, %v6224_v1  ;;  %v5689_v2 = vpop.f32.mrb[141].mxu1  ;;  %v5688_v63 = vadd.f32 %v5687_v54, %v10733_v5 }
 0x5e0   :  { %v3416_v17 = vmax.f32 %v3256_v0, 0.0  ;;  %v6569_v49 = vmax.f32 %v6505_v35, %v6225_v8  ;;  %v969_v50 = vpop.permute.xlu1 %968  ;;  %v5690_v61 = vadd.f32 %v5689_v2, %v10742_v33 }
 0x5e1   :  { %v6832_v45 = vrot.slane %v6568_v34, 4  ;;  %v1162_v35 = vmul.f32 %v11872_v18, %v969_v50  ;;  %v6226_v2 = vmax.f32 %v5688_v63, 0.0  ;;  %v2924_v63 = vpop.permute.xlu0 %2923 }
 0x5e2   :  { %v6838_v59 = vrot.slane %v6569_v49, 4  ;;  %8129 = vmatprep.mubr.msk.f32.mxu0 %vm3441_vm0, %v3416_v17 }
 0x5e3   :  { %v6833_v44 = vmax.f32 %v6568_v34, %v6832_v45  ;;  %8130 = vmatmul.mubr.msk.f32.gmra.mrb[150].mxu0 %vm3441_vm0, %v3417_v16  ;;  %v1328_v23 = vadd.f32 %v11882_v43, %v1162_v35 }
 0x5e4   :  { %v6839_v4 = vmax.f32 %v6569_v49, %v6838_v59  ;;  %v974_v56 = vpop.permute.xlu1 %973 }
 0x5e5   :  { %v6834_v10 = vrot.slane %v6833_v44, 2  ;;  %v8098_v20 = vpop.f32.mrb[128].mxu0  ;;  %v1163_v62 = vmul.f32 %v11872_v18, %v974_v56  ;;  %v2133_v18 = vmul.f32 %v11888_v11, %v12082_v12 }
 0x5e6   :  { %v6840_v25 = vrot.slane %v6839_v4, 2  ;;  %v4628_v28 = vpop.f32.mrb[129].mxu0  ;;  %v4634_v53 = vadd.f32 %v12112_v31, %v8098_v20 }
 0x5e7   :  { %v6835_v41 = vmax.f32 %v6833_v44, %v6834_v10  ;;  %v4629_v57 = vadd.f32 %v12112_v31, %v4628_v28  ;;  %v1329_v26 = vadd.f32 %v11882_v43, %v1163_v62  ;;  %v2293_v49 = vadd.f32 %v2133_v18, %v1328_v23 }
 0x5e8   :  { %v6841_v7 = vmax.f32 %v6839_v4, %v6840_v25  ;;  %v4916_v1 = vmax.f32 %v4634_v53, 0.0 }
 0x5e9   :  { %v6836_v52 = vrot.slane %v6835_v41, 1  ;;  %v4915_v27 = vmax.f32 %v4629_v57, 0.0  ;;  %v1951_v47 = vpop.permute.xlu1 %1950 }
 0x5ea   :  { %v6842_v48 = vrot.slane %v6841_v7, 1  ;;  %v2134_v30 = vmul.f32 %v11888_v11, %v1951_v47 }
 0x5eb   :  { %v6837_v14 = vmax.f32 %v6835_v41, %v6836_v52  ;;  %5824 = vmatmul.mubr.f32.gmra.mrb[186].mxu1 %v4915_v27 }
 0x5ec   :  { %v6843_v24 = vmax.f32 %v6841_v7, %v6842_v48  ;;  %v2294_v15 = vadd.f32 %v2134_v30, %v1329_v26  ;;  %5829 = vmatprep.mubr.f32.mxu1 %v12994_v40 }
 0x5ed   :  { %v5693_v0 = vpop.f32.mrb[142].mxu1  ;;  %v12127_v8 = vsel %vm7085_vm4, %v6837_v14, %v12058_v46  ;;  %v6227_v46 = vmax.f32 %v5690_v61, 0.0 }
 0x5ee   :  { %v5694_v12 = vadd.f32 %v5693_v0, %v10733_v5  ;;  %v2912_v34 = vpop.permute.xlu1 %2911  ;;  %v5695_v17 = vpop.f32.mrb[143].mxu1  ;;  %v12132_v54 = vsel %vm7085_vm4, %v6843_v24, %v12063_v36  ;;  %v3259_v45 = vadd.f32 %v3099_v29, %v2294_v15  ;;  %v3101_v0 = vmul.f32 %v11898_v9, %v2924_v63 }
 0x5ef   :  { %v3098_v50 = vmul.f32 %v11898_v9, %v2912_v34  ;;  %v5696_v16 = vadd.f32 %v5695_v17, %v10742_v33  ;;  %5830 = vmatmul.mubr.f32.gmra.mrb[188].mxu1 %v4916_v1 }
 0x5f0   :  { %v6228_v59 = vmax.f32 %v5694_v12, 0.0  ;;  %5835 = vmatprep.mubr.f32.mxu1 %v12994_v40  ;;  %v3419_v35 = vmax.f32 %v3259_v45, 0.0  ;;  %v12158_v12 = vld [vmem:[%s12858_s1 + $0x1] ss:$0 sm:$0xff] }
 0x5f1   :  { %v3258_v44 = vadd.f32 %v3098_v50, %v2293_v49  ;;  %v6229_v4 = vmax.f32 %v5696_v16, 0.0  ;;  %v5699_v56 = vpop.f32.mrb[144].mxu1  ;;  %v2135_v34 = vmul.f32 %v12158_v12, %v12089_v3 }
 0x5f2   :  { %v6378_v10 = vmax.f32 %v6226_v2, %v6228_v59  ;;  %v5700_v20 = vadd.f32 %v5699_v56, %v10733_v5  ;;  %v5701_v36 = vpop.f32.mrb[145].mxu1 }
 0x5f3   :  { %v3418_v25 = vmax.f32 %v3258_v44, 0.0  ;;  %v6379_v62 = vmax.f32 %v6227_v46, %v6229_v4  ;;  %v5702_v28 = vadd.f32 %v5701_v36, %v10742_v33  ;;  %v979_v41 = vpop.permute.xlu1 %978 }
 0x5f4   :  { %v6230_v57 = vmax.f32 %v5700_v20, 0.0  ;;  %v1164_v30 = vmul.f32 %v12144_v55, %v979_v41 }
 0x5f5   :  { %v6231_v7 = vmax.f32 %v5702_v28, 0.0  ;;  %8132 = vmatprep.mubr.msk.f32.mxu0 %vm3441_vm0, %v3418_v25 }
 0x5f6   :  { %v6442_v52 = vmax.f32 %v6378_v10, %v6230_v57  ;;  %8133 = vmatmul.mubr.msk.f32.gmra.mrb[152].mxu0 %vm3441_vm0, %v3419_v35  ;;  %v1330_v61 = vadd.f32 %v11882_v43, %v1164_v30  ;;  %v2932_v35 = vpop.permute.xlu0 %2931 }
 0x5f7   :  { %v6443_v53 = vmax.f32 %v6379_v62, %v6231_v7  ;;  %v984_v27 = vpop.permute.xlu1 %983 }
 0x5f8   :  { %v8101_v47 = vpop.f32.mrb[130].mxu0  ;;  %v1165_v48 = vmul.f32 %v12144_v55, %v984_v27  ;;  %v2295_v16 = vadd.f32 %v2135_v34, %v1330_v61  ;;  %v8656_v34 = vld [vmem:[%s12859_s2] ss:$0 sm:$0xff] }
 0x5f9   :  { %v4638_v26 = vpop.f32.mrb[131].mxu0  ;;  %v4644_v14 = vadd.f32 %v12112_v31, %v8101_v47 }
 0x5fa   :  { %v4639_v18 = vadd.f32 %v12112_v31, %v4638_v26  ;;  %v1331_v15 = vadd.f32 %v11882_v43, %v1165_v48  ;;  %v1963_v63 = vpop.permute.xlu0 %1962 }
 0x5fb   :  { %v4918_v17 = vmax.f32 %v4644_v14, 0.0 }
 0x5fc   :  { %v4917_v23 = vmax.f32 %v4639_v18, 0.0  ;;  %v1959_v24 = vpop.permute.xlu1 %1958 }
 0x5fd   :  { %v2136_v29 = vmul.f32 %v11888_v11, %v1959_v24 }
 0x5fe   :  { %5836 = vmatmul.mubr.f32.gmra.mrb[190].mxu1 %v4917_v23 }
 0x5ff   :  { %v2296_v1 = vadd.f32 %v2136_v29, %v1331_v15  ;;  %5841 = vmatprep.mubr.f32.mxu1 %v12994_v40 }
 0x600   :  { %v5705_v49 = vpop.f32.mrb[146].mxu1 }
 0x601   :  { %v5706_v11 = vadd.f32 %v5705_v49, %v10733_v5  ;;  %v2920_v50 = vpop.permute.xlu1 %2919  ;;  %v5707_v43 = vpop.f32.mrb[147].mxu1  ;;  %v3261_v59 = vadd.f32 %v3101_v0, %v2296_v1 }
 0x602   :  { %v3100_v2 = vmul.f32 %v11898_v9, %v2920_v50  ;;  %v5708_v45 = vadd.f32 %v5707_v43, %v10742_v33  ;;  %5842 = vmatmul.mubr.f32.gmra.mrb[192].mxu1 %v4918_v17  ;;  %v2137_v43 = vmul.f32 %v12158_v12, %v1963_v63 }
 0x603   :  { %v6232_v46 = vmax.f32 %v5706_v11, 0.0  ;;  %5847 = vmatprep.mubr.f32.mxu1 %v12994_v40  ;;  %v3421_v9 = vmax.f32 %v3261_v59, 0.0 }
 0x604   :  { %v3260_v44 = vadd.f32 %v3100_v2, %v2295_v16  ;;  %v6233_v4 = vmax.f32 %v5708_v45, 0.0  ;;  %v5711_v56 = vpop.f32.mrb[148].mxu1 }
 0x605   :  { %v6506_v3 = vmax.f32 %v6442_v52, %v6232_v46  ;;  %v5712_v10 = vadd.f32 %v5711_v56, %v10733_v5  ;;  %v5713_v20 = vpop.f32.mrb[149].mxu1 }
 0x606   :  { %v3420_v36 = vmax.f32 %v3260_v44, 0.0  ;;  %v6507_v25 = vmax.f32 %v6443_v53, %v6233_v4  ;;  %v5714_v62 = vadd.f32 %v5713_v20, %v10742_v33  ;;  %v989_v28 = vpop.permute.xlu1 %988  ;;  %v8657_v44 = vld [vmem:[%s12858_s1 + $0x2] ss:$0 sm:$0xff] }
 0x607   :  { %v6234_v41 = vmax.f32 %v5712_v10, 0.0  ;;  %v1166_v14 = vmul.f32 %v12144_v55, %v989_v28  ;;  %v3103_v4 = vmul.f32 %v8657_v44, %v2932_v35 }
 0x608   :  { %v6235_v57 = vmax.f32 %v5714_v62, 0.0  ;;  %8135 = vmatprep.mubr.msk.f32.mxu0 %vm3441_vm0, %v3420_v36 }
 0x609   :  { %v6570_v7 = vmax.f32 %v6506_v3, %v6234_v41  ;;  %8136 = vmatmul.mubr.msk.f32.gmra.mrb[154].mxu0 %vm3441_vm0, %v3421_v9  ;;  %v1332_v50 = vadd.f32 %v8656_v34, %v1166_v14 }
 0x60a   :  { %v6571_v27 = vmax.f32 %v6507_v25, %v6235_v57  ;;  %v994_v47 = vpop.permute.xlu1 %993 }
 0x60b   :  { %v6844_v52 = vrot.slane %v6570_v7, 4  ;;  %v8104_v48 = vpop.f32.mrb[132].mxu0  ;;  %v1167_v30 = vmul.f32 %v12144_v55, %v994_v47  ;;  %v2297_v36 = vadd.f32 %v2137_v43, %v1332_v50 }
 0x60c   :  { %v6850_v26 = vrot.slane %v6571_v27, 4  ;;  %v4648_v53 = vpop.f32.mrb[133].mxu0  ;;  %v4654_v29 = vadd.f32 %v12112_v31, %v8104_v48 }
 0x60d   :  { %v6845_v18 = vmax.f32 %v6570_v7, %v6844_v52  ;;  %v4649_v23 = vadd.f32 %v12112_v31, %v4648_v53  ;;  %v1333_v17 = vadd.f32 %v8656_v34, %v1167_v30 }
 0x60e   :  { %v6851_v24 = vmax.f32 %v6571_v27, %v6850_v26  ;;  %v4920_v59 = vmax.f32 %v4654_v29, 0.0  ;;  %v1971_v29 = vpop.permute.xlu0 %1970 }
 0x60f   :  { %v6846_v15 = vrot.slane %v6845_v18, 2  ;;  %v4919_v61 = vmax.f32 %v4649_v23, 0.0  ;;  %v1967_v1 = vpop.permute.xlu1 %1966 }
 0x610   :  { %v6852_v0 = vrot.slane %v6851_v24, 2  ;;  %v2138_v49 = vmul.f32 %v12158_v12, %v1967_v1 }
 0x611   :  { %v6847_v11 = vmax.f32 %v6845_v18, %v6846_v15  ;;  %5848 = vmatmul.mubr.f32.gmra.mrb[194].mxu1 %v4919_v61 }
 0x612   :  { %v6853_v16 = vmax.f32 %v6851_v24, %v6852_v0  ;;  %v2298_v2 = vadd.f32 %v2138_v49, %v1333_v17  ;;  %5853 = vmatprep.mubr.f32.mxu1 %v12994_v40  ;;  %v2940_v43 = vpop.permute.xlu0 %2939 }
 0x613   :  { %v6848_v45 = vrot.slane %v6847_v11, 1  ;;  %v5717_v46 = vpop.f32.mrb[150].mxu1 }
 0x614   :  { %v6854_v56 = vrot.slane %v6853_v16, 1  ;;  %v2928_v3 = vpop.permute.xlu1 %2927  ;;  %v5719_v10 = vpop.f32.mrb[151].mxu1  ;;  %v3263_v28 = vadd.f32 %v3103_v4, %v2298_v2  ;;  %v5718_v9 = vadd.f32 %v5717_v46, %v10733_v5  ;;  %v3105_v4 = vmul.f32 %v8657_v44, %v2940_v43 }
 0x615   :  { %v6849_v20 = vmax.f32 %v6847_v11, %v6848_v45  ;;  %v3102_v25 = vmul.f32 %v8657_v44, %v2928_v3  ;;  %5854 = vmatmul.mubr.f32.gmra.mrb[196].mxu1 %v4920_v59  ;;  %v5720_v57 = vadd.f32 %v5719_v10, %v10742_v33  ;;  %v2139_v59 = vmul.f32 %v12158_v12, %v1971_v29 }
 0x616   :  { %v6855_v62 = vmax.f32 %v6853_v16, %v6854_v56  ;;  %5859 = vmatprep.mubr.f32.mxu1 %v12994_v40  ;;  %v3423_v53 = vmax.f32 %v3263_v28, 0.0  ;;  %v6236_v18 = vmax.f32 %v5718_v9, 0.0 }
 0x617   :  { %v3262_v41 = vadd.f32 %v3102_v25, %v2297_v36  ;;  %v5723_v7 = vpop.f32.mrb[152].mxu1  ;;  %v12188_v35 = vsel %vm7087_vm5, %v6849_v20, %v12127_v8  ;;  %v6237_v23 = vmax.f32 %v5720_v57, 0.0 }
 0x618   :  { %v5724_v27 = vadd.f32 %v5723_v7, %v10733_v5  ;;  %v5725_v47 = vpop.f32.mrb[153].mxu1  ;;  %v12193_v52 = vsel %vm7087_vm5, %v6855_v62, %v12132_v54 }
 0x619   :  { %v3422_v48 = vmax.f32 %v3262_v41, 0.0  ;;  %v5726_v26 = vadd.f32 %v5725_v47, %v10742_v33  ;;  %v999_v30 = vpop.permute.xlu1 %998 }
 0x61a   :  { %v6238_v14 = vmax.f32 %v5724_v27, 0.0  ;;  %v1168_v0 = vmul.f32 %v12144_v55, %v999_v30 }
 0x61b   :  { %v6239_v24 = vmax.f32 %v5726_v26, 0.0  ;;  %8138 = vmatprep.mubr.msk.f32.mxu0 %vm3441_vm0, %v3422_v48 }
 0x61c   :  { %v6380_v8 = vmax.f32 %v6236_v18, %v6238_v14  ;;  %8139 = vmatmul.mubr.msk.f32.gmra.mrb[156].mxu0 %vm3441_vm0, %v3423_v53  ;;  %v1334_v45 = vadd.f32 %v8656_v34, %v1168_v0 }
 0x61d   :  { %v6381_v63 = vmax.f32 %v6237_v23, %v6239_v24  ;;  %v1004_v15 = vpop.permute.xlu1 %1003  ;;  %v3994_v24 = vadd.f32 %v12112_v31, %v9832_v39  ;;  %v4004_v39 = vadd.f32 %v12112_v31, %v9847_v51 }
 0x61e   :  { %v8107_v61 = vpop.f32.mrb[134].mxu0  ;;  %v1169_v54 = vmul.f32 %v12144_v55, %v1004_v15  ;;  %v2299_v36 = vadd.f32 %v2139_v59, %v1334_v45 }
 0x61f   :  { %v4658_v1 = vpop.f32.mrb[135].mxu0  ;;  %v4664_v49 = vadd.f32 %v12112_v31, %v8107_v61  ;;  %v3999_v61 = vadd.f32 %v12112_v31, %v9854_v13 }
 0x620   :  { %v4659_v17 = vadd.f32 %v12112_v31, %v4658_v1  ;;  %v1335_v16 = vadd.f32 %v8656_v34, %v1169_v54 }
 0x621   :  { %v4922_v56 = vmax.f32 %v4664_v49, 0.0  ;;  %v4789_v0 = vmax.f32 %v3999_v61, 0.0 }
 0x622   :  { %v4921_v11 = vmax.f32 %v4659_v17, 0.0  ;;  %v1975_v50 = vpop.permute.xlu1 %1974 }
 0x623   :  { %v2140_v2 = vmul.f32 %v12158_v12, %v1975_v50 }
 0x624   :  { %5860 = vmatmul.mubr.f32.gmra.mrb[198].mxu1 %v4921_v11 }
 0x625   :  { %v2300_v46 = vadd.f32 %v2140_v2, %v1335_v16  ;;  %5865 = vmatprep.mubr.f32.mxu1 %v12994_v40  ;;  %v4790_v16 = vmax.f32 %v4004_v39, 0.0  ;;  %v4009_v2 = vadd.f32 %v12112_v31, %v9875_v38 }
 0x626   :  { %v5729_v55 = vpop.f32.mrb[154].mxu1 }
 0x627   :  { %v5730_v3 = vadd.f32 %v5729_v55, %v10733_v5  ;;  %v2936_v10 = vpop.permute.xlu1 %2935  ;;  %v5731_v20 = vpop.f32.mrb[155].mxu1  ;;  %v3265_v28 = vadd.f32 %v3105_v4, %v2300_v46  ;;  %v4014_v55 = vadd.f32 %v12112_v31, %v9871_v42 }
 0x628   :  { %v3104_v25 = vmul.f32 %v8657_v44, %v2936_v10  ;;  %v5732_v62 = vadd.f32 %v5731_v20, %v10742_v33  ;;  %5866 = vmatmul.mubr.f32.gmra.mrb[200].mxu1 %v4922_v56  ;;  %v3989_v44 = vadd.f32 %v12112_v31, %v9838_v6  ;;  %v4788_v6 = vmax.f32 %v3994_v24, 0.0 }
 0x629   :  { %v6240_v34 = vmax.f32 %v5730_v3, 0.0  ;;  %5871 = vmatprep.mubr.f32.mxu1 %v12994_v40  ;;  %v3425_v30 = vmax.f32 %v3265_v28, 0.0  ;;  %v4791_v3 = vmax.f32 %v4009_v2, 0.0  ;;  %v4792_v38 = vmax.f32 %v4014_v55, 0.0 }
 0x62a   :  { %v3264_v12 = vadd.f32 %v3104_v25, %v2299_v36  ;;  %v6241_v9 = vmax.f32 %v5732_v62, 0.0  ;;  %v5735_v41 = vpop.f32.mrb[156].mxu1  ;;  %v4019_v28 = vadd.f32 %v12112_v31, %v9892_v22  ;;  %v4029_v24 = vadd.f32 %v12112_v31, %v9910_v32 }
 0x62b   :  { %v6444_v57 = vmax.f32 %v6380_v8, %v6240_v34  ;;  %v5736_v7 = vadd.f32 %v5735_v41, %v10733_v5  ;;  %v5737_v27 = vpop.f32.mrb[157].mxu1  ;;  %v4787_v8 = vmax.f32 %v3989_v44, 0.0  ;;  %v4034_v32 = vadd.f32 %v12112_v31, %v9907_v37 }
 0x62c   :  { %v3424_v47 = vmax.f32 %v3264_v12, 0.0  ;;  %v6445_v48 = vmax.f32 %v6381_v63, %v6241_v9  ;;  %v5738_v26 = vadd.f32 %v5737_v27, %v10742_v33  ;;  %v4795_v39 = vmax.f32 %v4029_v24, 0.0 }
 0x62d   :  { %v6242_v53 = vmax.f32 %v5736_v7, 0.0 }
 0x62e   :  { %v6243_v18 = vmax.f32 %v5738_v26, 0.0  ;;  %8141 = vmatprep.mubr.msk.f32.mxu0 %vm3441_vm0, %v3424_v47  ;;  %v4024_v47 = vadd.f32 %v12112_v31, %v9889_v19 }
 0x62f   :  { %v6508_v14 = vmax.f32 %v6444_v57, %v6242_v53  ;;  %8142 = vmatmul.mubr.msk.f32.gmra.mrb[158].mxu0 %vm3441_vm0, %v3425_v30 }
 0x630   :  { %v6509_v23 = vmax.f32 %v6445_v48, %v6243_v18  ;;  %5055 = vmatprep.mubr.f32.mxu0 %v12994_v40  ;;  %v4793_v48 = vmax.f32 %v4019_v28, 0.0  ;;  %v4794_v19 = vmax.f32 %v4024_v47, 0.0  ;;  %v12999_v28 = vld [vmem:[#allocation31_spill] sm:$0xff] }
 0x631   :  { %v8110_v63 = vpop.f32.mrb[136].mxu0 }
 0x632   :  { %v4668_v15 = vpop.f32.mrb[137].mxu0  ;;  %v4674_v54 = vadd.f32 %v12112_v31, %v8110_v63 }
 0x633   :  { %v4669_v29 = vadd.f32 %v12112_v31, %v4668_v15  ;;  %5056 = vmatmul.mubr.f32.vlgmr.msra.gmra.mrb[160].mxu0 %v4787_v8 }
 0x634   :  { %5061 = vmatprep.mubr.f32.mxu0 %v12994_v40  ;;  %v4924_v17 = vmax.f32 %v4674_v54, 0.0 }
 0x635   :  { %v4923_v1 = vmax.f32 %v4669_v29, 0.0 }
 0x637   :  { %5062 = vmatmul.mubr.f32.gmra.mrb[162].mxu0 %v4788_v6  ;;  %5872 = vmatmul.mubr.f32.gmra.mrb[202].mxu1 %v4923_v1 }
 0x638   :  { %5067 = vmatprep.mubr.f32.mxu0 %v12994_v40  ;;  %5877 = vmatprep.mubr.f32.mxu1 %v12994_v40 }
 0x639   :  { %v5741_v49 = vpop.f32.mrb[158].mxu1 }
 0x63a   :  { %v5742_v11 = vadd.f32 %v5741_v49, %v10733_v5  ;;  %v5743_v50 = vpop.f32.mrb[159].mxu1 }
 0x63b   :  { %v5744_v13 = vadd.f32 %v5743_v50, %v10742_v33  ;;  %5068 = vmatmul.mubr.f32.gmra.mrb[164].mxu0 %v4789_v0  ;;  %5878 = vmatmul.mubr.f32.gmra.mrb[204].mxu1 %v4924_v17 }
 0x63c   :  { %v6244_v43 = vmax.f32 %v5742_v11, 0.0  ;;  %5073 = vmatprep.mubr.f32.mxu0 %v12994_v40  ;;  %5883 = vmatprep.mubr.f32.mxu1 %v12994_v40 }
 0x63d   :  { %v6245_v51 = vmax.f32 %v5744_v13, 0.0  ;;  %v5747_v45 = vpop.f32.mrb[160].mxu1 }
 0x63e   :  { %v6572_v59 = vmax.f32 %v6508_v14, %v6244_v43  ;;  %v5749_v46 = vpop.f32.mrb[161].mxu1  ;;  %v5748_v44 = vadd.f32 %v5747_v45, %v10733_v5  ;;  %v4796_v43 = vmax.f32 %v4034_v32, 0.0 }
 0x63f   :  { %v6573_v4 = vmax.f32 %v6509_v23, %v6245_v51  ;;  %5074 = vmatmul.mubr.f32.gmra.mrb[166].mxu0 %v4790_v16  ;;  %v5750_v53 = vadd.f32 %v5749_v46, %v10742_v33  ;;  %v4039_v16 = vadd.f32 %v12112_v31, %v9930_v60 }
 0x640   :  { %v6856_v56 = vrot.slane %v6572_v59, 4  ;;  %5079 = vmatprep.mubr.f32.mxu0 %v12994_v40  ;;  %v6246_v6 = vmax.f32 %v5748_v44, 0.0 }
 0x641   :  { %v6862_v10 = vrot.slane %v6573_v4, 4 }
 0x642   :  { %v6857_v20 = vmax.f32 %v6572_v59, %v6856_v56  ;;  %v12997_v59 = vld [vmem:[#allocation3_spill] sm:$0xff] }
 0x643   :  { %v6863_v36 = vmax.f32 %v6573_v4, %v6862_v10  ;;  %5080 = vmatmul.mubr.f32.gmra.mrb[168].mxu0 %v4791_v3  ;;  %v4044_v46 = vadd.f32 %v12112_v31, %v12997_v59  ;;  %v4797_v4 = vmax.f32 %v4039_v16, 0.0  ;;  %v12998_v10 = vld [vmem:[#allocation2_spill] sm:$0xff] }
 0x644   :  { %v6858_v25 = vrot.slane %v6857_v20, 2  ;;  %v8113_v62 = vpop.f32.mrb[138].mxu0  ;;  %5085 = vmatprep.mubr.f32.mxu0 %v12994_v40 }
 0x645   :  { %v6864_v34 = vrot.slane %v6863_v36, 2  ;;  %v4678_v12 = vpop.f32.mrb[139].mxu0  ;;  %v4684_v7 = vadd.f32 %v12112_v31, %v8113_v62  ;;  %v4798_v60 = vmax.f32 %v4044_v46, 0.0 }
 0x646   :  { %v6859_v9 = vmax.f32 %v6857_v20, %v6858_v25  ;;  %v4679_v41 = vadd.f32 %v12112_v31, %v4678_v12  ;;  %v4049_v20 = vadd.f32 %v12112_v31, %v12998_v10 }
 0x647   :  { %v6865_v57 = vmax.f32 %v6863_v36, %v6864_v34  ;;  %5086 = vmatmul.mubr.f32.gmra.mrb[170].mxu0 %v4792_v38  ;;  %v4926_v18 = vmax.f32 %v4684_v7, 0.0  ;;  %v4054_v34 = vadd.f32 %v12112_v31, %v12999_v28 }
 0x648   :  { %v6860_v42 = vrot.slane %v6859_v9, 1  ;;  %v4925_v27 = vmax.f32 %v4679_v41, 0.0  ;;  %5091 = vmatprep.mubr.f32.mxu0 %v12994_v40  ;;  %v4799_v12 = vmax.f32 %v4049_v20, 0.0 }
 0x649   :  { %v6866_v26 = vrot.slane %v6865_v57, 1 }
 0x64a   :  { %5884 = vmatmul.mubr.f32.gmra.mrb[206].mxu1 %v4925_v27  ;;  %v6861_v22 = vmax.f32 %v6859_v9, %v6860_v42 }
 0x64b   :  { %5092 = vmatmul.mubr.f32.gmra.mrb[172].mxu0 %v4793_v48  ;;  %5889 = vmatprep.mubr.f32.mxu1 %v12994_v40  ;;  %v6867_v30 = vmax.f32 %v6865_v57, %v6866_v26  ;;  %v4800_v48 = vmax.f32 %v4054_v34, 0.0  ;;  %v13000_v26 = vld [vmem:[#allocation36_spill] sm:$0xff] }
 0x64c   :  { %v5753_v14 = vpop.f32.mrb[162].mxu1  ;;  %5097 = vmatprep.mubr.f32.mxu0 %v12994_v40  ;;  %v12249_v23 = vsel %vm7089_vm6, %v6861_v22, %v12188_v35  ;;  %v6247_v35 = vmax.f32 %v5750_v53, 0.0  ;;  %v4059_v22 = vadd.f32 %v12112_v31, %v13000_v26 }
 0x64d   :  { %v5754_v8 = vadd.f32 %v5753_v14, %v10733_v5  ;;  %v5755_v63 = vpop.f32.mrb[163].mxu1  ;;  %v12256_v15 = vsel %vm7089_vm6, %v6867_v30, %v12193_v52 }
 0x64e   :  { %v5756_v29 = vadd.f32 %v5755_v63, %v10742_v33  ;;  %5890 = vmatmul.mubr.f32.gmra.mrb[208].mxu1 %v4926_v18 }
 0x64f   :  { %v6248_v61 = vmax.f32 %v5754_v8, 0.0  ;;  %5098 = vmatmul.mubr.f32.gmra.mrb[174].mxu0 %v4794_v19  ;;  %5895 = vmatprep.mubr.f32.mxu1 %v12994_v40  ;;  %v13001_v19 = vld [vmem:[#allocation4_spill] sm:$0xff]  ;;  %v4801_v8 = vmax.f32 %v4059_v22, 0.0 }
 0x650   :  { %v6249_v54 = vmax.f32 %v5756_v29, 0.0  ;;  %v5759_v1 = vpop.f32.mrb[164].mxu1  ;;  %5103 = vmatprep.mubr.f32.mxu0 %v12994_v40  ;;  %v4064_v24 = vadd.f32 %v12112_v31, %v13001_v19 }
 0x651   :  { %v6382_v0 = vmax.f32 %v6246_v6, %v6248_v61  ;;  %v5760_v52 = vadd.f32 %v5759_v1, %v10733_v5  ;;  %v5761_v17 = vpop.f32.mrb[165].mxu1 }
 0x652   :  { %v6383_v49 = vmax.f32 %v6247_v35, %v6249_v54  ;;  %v5762_v11 = vadd.f32 %v5761_v17, %v10742_v33  ;;  %v4802_v32 = vmax.f32 %v4064_v24, 0.0 }
 0x653   :  { %v6250_v50 = vmax.f32 %v5760_v52, 0.0  ;;  %5104 = vmatmul.mubr.f32.gmra.mrb[176].mxu0 %v4795_v39  ;;  %v13002_v39 = vld [vmem:[#allocation6_spill] sm:$0xff] }
 0x654   :  { %v6251_v13 = vmax.f32 %v5762_v11, 0.0  ;;  %5109 = vmatprep.mubr.f32.mxu0 %v12994_v40 }
 0x655   :  { %v6446_v2 = vmax.f32 %v6382_v0, %v6250_v50  ;;  %v4069_v0 = vadd.f32 %v12112_v31, %v13002_v39 }
 0x656   :  { %v6447_v51 = vmax.f32 %v6383_v49, %v6251_v13 }
 0x657   :  { %v8116_v37 = vpop.f32.mrb[140].mxu0  ;;  %5110 = vmatmul.mubr.f32.gmra.mrb[178].mxu0 %v4796_v43  ;;  %v13003_v43 = vld [vmem:[#allocation8_spill] sm:$0xff] }
 0x658   :  { %v4688_v45 = vpop.f32.mrb[141].mxu0  ;;  %5115 = vmatprep.mubr.f32.mxu0 %v12994_v40  ;;  %v4694_v55 = vadd.f32 %v12112_v31, %v8116_v37  ;;  %v4074_v16 = vadd.f32 %v12112_v31, %v13003_v43 }
 0x659   :  { %v4689_v56 = vadd.f32 %v12112_v31, %v4688_v45 }
 0x65a   :  { %v4928_v36 = vmax.f32 %v4694_v55, 0.0  ;;  %v4804_v55 = vmax.f32 %v4074_v16, 0.0 }
 0x65b   :  { %v4927_v3 = vmax.f32 %v4689_v56, 0.0  ;;  %5116 = vmatmul.mubr.f32.gmra.mrb[180].mxu0 %v4797_v4 }
 0x65c   :  { %5121 = vmatprep.mubr.f32.mxu0 %v12994_v40 }
 0x65d   :  { %5896 = vmatmul.mubr.f32.gmra.mrb[210].mxu1 %v4927_v3  ;;  %v13004_v3 = vld [vmem:[#allocation32_spill] sm:$0xff] }
 0x65e   :  { %5901 = vmatprep.mubr.f32.mxu1 %v12994_v40 }
 0x65f   :  { %5122 = vmatmul.mubr.f32.gmra.mrb[182].mxu0 %v4798_v60  ;;  %v5765_v25 = vpop.f32.mrb[166].mxu1  ;;  %v4079_v60 = vadd.f32 %v12112_v31, %v13004_v3  ;;  %v13011_v3 = vld [vmem:[#allocation10_spill] sm:$0xff] }
 0x660   :  { %v5766_v62 = vadd.f32 %v5765_v25, %v10733_v5  ;;  %v5767_v38 = vpop.f32.mrb[167].mxu1  ;;  %5127 = vmatprep.mubr.f32.mxu0 %v12994_v40 }
 0x661   :  { %v5768_v9 = vadd.f32 %v5767_v38, %v10742_v33  ;;  %5902 = vmatmul.mubr.f32.gmra.mrb[212].mxu1 %v4928_v36 }
 0x662   :  { %v6252_v41 = vmax.f32 %v5766_v62, 0.0  ;;  %5907 = vmatprep.mubr.f32.mxu1 %v12994_v40 }
 0x663   :  { %v6253_v57 = vmax.f32 %v5768_v9, 0.0  ;;  %5128 = vmatmul.mubr.f32.gmra.mrb[184].mxu0 %v4799_v12  ;;  %v5771_v42 = vpop.f32.mrb[168].mxu1  ;;  %v13005_v9 = vld [vmem:[#allocation5_spill] sm:$0xff] }
 0x664   :  { %v6510_v7 = vmax.f32 %v6446_v2, %v6252_v41  ;;  %v5772_v27 = vadd.f32 %v5771_v42, %v10733_v5  ;;  %v5773_v47 = vpop.f32.mrb[169].mxu1  ;;  %5133 = vmatprep.mubr.f32.mxu0 %v12994_v40  ;;  %v4803_v2 = vmax.f32 %v4069_v0, 0.0  ;;  %v4084_v41 = vadd.f32 %v12112_v31, %v13005_v9  ;;  %v13009_v0 = vld [vmem:[#allocation7_spill] sm:$0xff] }
 0x665   :  { %v6511_v44 = vmax.f32 %v6447_v51, %v6253_v57  ;;  %v5774_v30 = vadd.f32 %v5773_v47, %v10742_v33  ;;  %v4805_v57 = vmax.f32 %v4079_v60, 0.0  ;;  %v4114_v60 = vadd.f32 %v12112_v31, %v13011_v3 }
 0x666   :  { %v6254_v53 = vmax.f32 %v5772_v27, 0.0  ;;  %v4806_v26 = vmax.f32 %v4084_v41, 0.0 }
 0x667   :  { %v6255_v18 = vmax.f32 %v5774_v30, 0.0  ;;  %5134 = vmatmul.mubr.f32.gmra.mrb[186].mxu0 %v4800_v48 }
 0x668   :  { %v6574_v14 = vmax.f32 %v6510_v7, %v6254_v53  ;;  %5139 = vmatprep.mubr.f32.mxu0 %v12994_v40 }
 0x669   :  { %v6575_v63 = vmax.f32 %v6511_v44, %v6255_v18  ;;  %v13007_v18 = vld [vmem:[#allocation26_spill] sm:$0xff] }
 0x66a   :  { %v6868_v29 = vrot.slane %v6574_v14, 4  ;;  %v8119_v6 = vpop.f32.mrb[142].mxu0 }
 0x66b   :  { %v6874_v61 = vrot.slane %v6575_v63, 4  ;;  %v4698_v35 = vpop.f32.mrb[143].mxu0  ;;  %5140 = vmatmul.mubr.f32.gmra.mrb[188].mxu0 %v4801_v8  ;;  %v4704_v49 = vadd.f32 %v12112_v31, %v8119_v6 }
 0x66c   :  { %v6869_v54 = vmax.f32 %v6574_v14, %v6868_v29  ;;  %v4699_v1 = vadd.f32 %v12112_v31, %v4698_v35  ;;  %5145 = vmatprep.mubr.f32.mxu0 %v12994_v40  ;;  %v4094_v14 = vadd.f32 %v12112_v31, %v13007_v18  ;;  %v13008_v29 = vld [vmem:[#allocation12_spill] sm:$0xff] }
 0x66d   :  { %v6875_v52 = vmax.f32 %v6575_v63, %v6874_v61  ;;  %v4930_v37 = vmax.f32 %v4704_v49, 0.0  ;;  %v4099_v6 = vadd.f32 %v12112_v31, %v13008_v29 }
 0x66e   :  { %v6870_v17 = vrot.slane %v6869_v54, 2  ;;  %v4929_v11 = vmax.f32 %v4699_v1, 0.0  ;;  %v4808_v63 = vmax.f32 %v4094_v14, 0.0 }
 0x66f   :  { %v6876_v50 = vrot.slane %v6875_v52, 2  ;;  %5146 = vmatmul.mubr.f32.gmra.mrb[190].mxu0 %v4802_v32 }
 0x670   :  { %v6871_v13 = vmax.f32 %v6869_v54, %v6870_v17  ;;  %5908 = vmatmul.mubr.f32.gmra.mrb[214].mxu1 %v4929_v11  ;;  %5151 = vmatprep.mubr.f32.mxu0 %v12994_v40  ;;  %v4809_v17 = vmax.f32 %v4099_v6, 0.0 }
 0x671   :  { %v6877_v51 = vmax.f32 %v6875_v52, %v6876_v50  ;;  %5913 = vmatprep.mubr.f32.mxu1 %v12994_v40  ;;  %v4104_v52 = vadd.f32 %v12112_v31, %v13009_v0  ;;  %v13017_v0 = vld [vmem:[#allocation14_spill] sm:$0xff] }
 0x672   :  { %v5777_v45 = vpop.f32.mrb[170].mxu1  ;;  %v6872_v59 = vrot.slane %v6871_v13, 1 }
 0x673   :  { %5152 = vmatmul.mubr.f32.gmra.mrb[192].mxu0 %v4803_v2  ;;  %v5779_v46 = vpop.f32.mrb[171].mxu1  ;;  %v6878_v4 = vrot.slane %v6877_v51, 1  ;;  %v5778_v10 = vadd.f32 %v5777_v45, %v10733_v5  ;;  %v13010_v45 = vld [vmem:[#allocation27_spill] sm:$0xff] }
 0x674   :  { %5914 = vmatmul.mubr.f32.gmra.mrb[216].mxu1 %v4930_v37  ;;  %5157 = vmatprep.mubr.f32.mxu0 %v12994_v40  ;;  %v6873_v56 = vmax.f32 %v6871_v13, %v6872_v59  ;;  %v5780_v36 = vadd.f32 %v5779_v46, %v10742_v33  ;;  %v4810_v37 = vmax.f32 %v4104_v52, 0.0  ;;  %v4109_v59 = vadd.f32 %v12112_v31, %v13010_v45 }
 0x675   :  { %5919 = vmatprep.mubr.f32.mxu1 %v12994_v40  ;;  %v6879_v20 = vmax.f32 %v6877_v51, %v6878_v4  ;;  %v6256_v42 = vmax.f32 %v5778_v10, 0.0  ;;  %v4144_v52 = vadd.f32 %v12112_v31, %v13017_v0 }
 0x676   :  { %v5783_v25 = vpop.f32.mrb[172].mxu1  ;;  %v12308_v62 = vsel %vm7091_vm7, %v6873_v56, %v12249_v23  ;;  %v6257_v23 = vmax.f32 %v5780_v36, 0.0  ;;  %v4811_v10 = vmax.f32 %v4109_v59, 0.0 }
 0x677   :  { %v5784_v38 = vadd.f32 %v5783_v25, %v10733_v5  ;;  %5158 = vmatmul.mubr.f32.gmra.mrb[194].mxu0 %v4804_v55  ;;  %v5785_v28 = vpop.f32.mrb[173].mxu1  ;;  %v12313_v34 = vsel %vm7091_vm7, %v6879_v20, %v12256_v15  ;;  %v13006_v15 = vld [vmem:[#allocation37_spill] sm:$0xff] }
 0x678   :  { %v5786_v12 = vadd.f32 %v5785_v28, %v10742_v33  ;;  %5163 = vmatprep.mubr.f32.mxu0 %v12994_v40  ;;  %v4089_v22 = vadd.f32 %v12112_v31, %v13006_v15  ;;  %v4812_v28 = vmax.f32 %v4114_v60, 0.0 }
 0x679   :  { %v6258_v7 = vmax.f32 %v5784_v38, 0.0 }
 0x67a   :  { %v6259_v27 = vmax.f32 %v5786_v12, 0.0  ;;  %v4807_v19 = vmax.f32 %v4089_v22, 0.0  ;;  %v13012_v12 = vld [vmem:[#allocation33_spill] sm:$0xff] }
 0x67b   :  { %v6384_v47 = vmax.f32 %v6256_v42, %v6258_v7  ;;  %5164 = vmatmul.mubr.f32.gmra.mrb[196].mxu0 %v4805_v57  ;;  %v4119_v9 = vadd.f32 %v12112_v31, %v13012_v12  ;;  %v13013_v42 = vld [vmem:[#allocation9_spill] sm:$0xff] }
 0x67c   :  { %v6385_v48 = vmax.f32 %v6257_v23, %v6259_v27  ;;  %5169 = vmatprep.mubr.f32.mxu0 %v12994_v40  ;;  %v4124_v7 = vadd.f32 %v12112_v31, %v13013_v42  ;;  %v13020_v42 = vld [vmem:[#allocation15_spill] sm:$0xff] }
 0x67d   :  { %v8122_v44 = vpop.f32.mrb[144].mxu0  ;;  %v4813_v23 = vmax.f32 %v4119_v9, 0.0 }
 0x67e   :  { %v4708_v30 = vpop.f32.mrb[145].mxu0  ;;  %v4714_v24 = vadd.f32 %v12112_v31, %v8122_v44  ;;  %v4814_v44 = vmax.f32 %v4124_v7, 0.0 }
 0x67f   :  { %v4709_v53 = vadd.f32 %v12112_v31, %v4708_v30  ;;  %5170 = vmatmul.mubr.f32.gmra.mrb[198].mxu0 %v4806_v26  ;;  %v13014_v30 = vld [vmem:[#allocation16_spill] sm:$0xff] }
 0x680   :  { %5175 = vmatprep.mubr.f32.mxu0 %v12994_v40  ;;  %v4932_v61 = vmax.f32 %v4714_v24, 0.0  ;;  %v13015_v24 = vld [vmem:[#allocation11_spill] sm:$0xff] }
 0x681   :  { %v4931_v8 = vmax.f32 %v4709_v53, 0.0  ;;  %v4129_v53 = vadd.f32 %v12112_v31, %v13014_v30 }
 0x683   :  { %5176 = vmatmul.mubr.f32.gmra.mrb[200].mxu0 %v4807_v19  ;;  %5920 = vmatmul.mubr.f32.gmra.mrb[218].mxu1 %v4931_v8  ;;  %v4134_v8 = vadd.f32 %v12112_v31, %v13015_v24 }
 0x684   :  { %5181 = vmatprep.mubr.f32.mxu0 %v12994_v40  ;;  %5925 = vmatprep.mubr.f32.mxu1 %v12994_v40 }
 0x685   :  { %v5789_v35 = vpop.f32.mrb[174].mxu1 }
 0x686   :  { %v5790_v54 = vadd.f32 %v5789_v35, %v10733_v5  ;;  %v5791_v1 = vpop.f32.mrb[175].mxu1  ;;  %v13016_v35 = vld [vmem:[#allocation28_spill] sm:$0xff] }
 0x687   :  { %v5792_v32 = vadd.f32 %v5791_v1, %v10742_v33  ;;  %5182 = vmatmul.mubr.f32.gmra.mrb[202].mxu0 %v4808_v63  ;;  %5926 = vmatmul.mubr.f32.gmra.mrb[220].mxu1 %v4932_v61  ;;  %v4815_v63 = vmax.f32 %v4129_v53, 0.0  ;;  %v4816_v61 = vmax.f32 %v4134_v8, 0.0 }
 0x688   :  { %v6260_v39 = vmax.f32 %v5790_v54, 0.0  ;;  %5187 = vmatprep.mubr.f32.mxu0 %v12994_v40  ;;  %5931 = vmatprep.mubr.f32.mxu1 %v12994_v40  ;;  %v4139_v54 = vadd.f32 %v12112_v31, %v13016_v35 }
 0x689   :  { %v6261_v49 = vmax.f32 %v5792_v32, 0.0  ;;  %v5795_v11 = vpop.f32.mrb[176].mxu1 }
 0x68a   :  { %v6448_v50 = vmax.f32 %v6384_v47, %v6260_v39  ;;  %v5796_v13 = vadd.f32 %v5795_v11, %v10733_v5  ;;  %v5797_v43 = vpop.f32.mrb[177].mxu1 }
 0x68b   :  { %v6449_v16 = vmax.f32 %v6385_v48, %v6261_v49  ;;  %v5798_v2 = vadd.f32 %v5797_v43, %v10742_v33  ;;  %5188 = vmatmul.mubr.f32.gmra.mrb[204].mxu0 %v4809_v17  ;;  %v4817_v17 = vmax.f32 %v4139_v54, 0.0 }
 0x68c   :  { %v6262_v51 = vmax.f32 %v5796_v13, 0.0  ;;  %5193 = vmatprep.mubr.f32.mxu0 %v12994_v40 }
 0x68d   :  { %v6263_v46 = vmax.f32 %v5798_v2, 0.0  ;;  %v4818_v2 = vmax.f32 %v4144_v52, 0.0 }
 0x68e   :  { %v6512_v4 = vmax.f32 %v6448_v50, %v6262_v51  ;;  %v13018_v51 = vld [vmem:[#allocation34_spill] sm:$0xff] }
 0x68f   :  { %v6513_v56 = vmax.f32 %v6449_v16, %v6263_v46  ;;  %5194 = vmatmul.mubr.f32.gmra.mrb[206].mxu0 %v4810_v37 }
 0x690   :  { %v8125_v55 = vpop.f32.mrb[146].mxu0  ;;  %5199 = vmatprep.mubr.f32.mxu0 %v12994_v40 }
 0x691   :  { %v4718_v20 = vpop.f32.mrb[147].mxu0  ;;  %v4724_v25 = vadd.f32 %v12112_v31, %v8125_v55 }
 0x692   :  { %v4719_v36 = vadd.f32 %v12112_v31, %v4718_v20  ;;  %v13019_v20 = vld [vmem:[#allocation13_spill] sm:$0xff] }
 0x693   :  { %5200 = vmatmul.mubr.f32.gmra.mrb[208].mxu0 %v4811_v10  ;;  %v4934_v41 = vmax.f32 %v4724_v25, 0.0 }
 0x694   :  { %v4933_v38 = vmax.f32 %v4719_v36, 0.0  ;;  %5205 = vmatprep.mubr.f32.mxu0 %v12994_v40 }
 0x696   :  { %5932 = vmatmul.mubr.f32.gmra.mrb[222].mxu1 %v4933_v38 }
 0x697   :  { %5206 = vmatmul.mubr.f32.gmra.mrb[210].mxu0 %v4812_v28  ;;  %5937 = vmatprep.mubr.f32.mxu1 %v12994_v40 }
 0x698   :  { %v5801_v57 = vpop.f32.mrb[178].mxu1  ;;  %5211 = vmatprep.mubr.f32.mxu0 %v12994_v40 }
 0x699   :  { %v5802_v27 = vadd.f32 %v5801_v57, %v10733_v5  ;;  %v5803_v47 = vpop.f32.mrb[179].mxu1 }
 0x69a   :  { %v5804_v48 = vadd.f32 %v5803_v47, %v10742_v33  ;;  %5938 = vmatmul.mubr.f32.gmra.mrb[224].mxu1 %v4934_v41 }
 0x69b   :  { %v6264_v26 = vmax.f32 %v5802_v27, 0.0  ;;  %5212 = vmatmul.mubr.f32.gmra.mrb[212].mxu0 %v4813_v23  ;;  %5943 = vmatprep.mubr.f32.mxu1 %v12994_v40 }
 0x69c   :  { %v6265_v15 = vmax.f32 %v5804_v48, 0.0  ;;  %v5807_v22 = vpop.f32.mrb[180].mxu1  ;;  %5217 = vmatprep.mubr.f32.mxu0 %v12994_v40 }
 0x69d   :  { %v12360_v18 = vmax.f32 %v6512_v4, %v6264_v26  ;;  %v5809_v14 = vpop.f32.mrb[181].mxu1  ;;  %v5808_v49 = vadd.f32 %v5807_v22, %v10733_v5 }
 0x69e   :  { %v12362_v19 = vmax.f32 %v6513_v56, %v6265_v15  ;;  %v5810_v11 = vadd.f32 %v5809_v14, %v10742_v33 }
 0x69f   :  { %5218 = vmatmul.mubr.f32.gmra.mrb[214].mxu0 %v4814_v44  ;;  %v6266_v59 = vmax.f32 %v5808_v49, 0.0  ;;  %v6880_v53 = vrot.slane %v12360_v18, 4 }
 0x6a0   :  { %5223 = vmatprep.mubr.f32.mxu0 %v12994_v40  ;;  %v6267_v4 = vmax.f32 %v5810_v11, 0.0  ;;  %v6886_v8 = vrot.slane %v12362_v19, 4 }
 0x6a1   :  { %v6881_v35 = vmax.f32 %v12360_v18, %v6880_v53 }
 0x6a3   :  { %v8128_v29 = vpop.f32.mrb[148].mxu0  ;;  %5224 = vmatmul.mubr.f32.gmra.mrb[216].mxu0 %v4815_v63  ;;  %v6882_v11 = vrot.slane %v6881_v35, 2 }
 0x6a4   :  { %v4728_v6 = vpop.f32.mrb[149].mxu0  ;;  %5229 = vmatprep.mubr.f32.mxu0 %v12994_v40  ;;  %v4734_v32 = vadd.f32 %v12112_v31, %v8128_v29 }
 0x6a5   :  { %v4729_v1 = vadd.f32 %v12112_v31, %v4728_v6  ;;  %v12383_v31 = vld [vmem:[%s12861_s4] ss:$0 sm:$0xff]  ;;  %v6883_v18 = vmax.f32 %v6881_v35, %v6882_v11 }
 0x6a6   :  { %v4936_v50 = vmax.f32 %v4734_v32, 0.0  ;;  %v4149_v37 = vadd.f32 %v12383_v31, %v13018_v51  ;;  %v4154_v36 = vadd.f32 %v12383_v31, %v13019_v20  ;;  %v4159_v7 = vadd.f32 %v12383_v31, %v13020_v42 }
 0x6a7   :  { %v4935_v39 = vmax.f32 %v4729_v1, 0.0  ;;  %5230 = vmatmul.mubr.f32.gmra.mrb[218].mxu0 %v4816_v61 }
 0x6a8   :  { %5235 = vmatprep.mubr.f32.mxu0 %v12994_v40  ;;  %v4819_v25 = vmax.f32 %v4149_v37, 0.0  ;;  %v4820_v57 = vmax.f32 %v4154_v36, 0.0  ;;  %v4821_v26 = vmax.f32 %v4159_v7, 0.0 }
 0x6a9   :  { %5944 = vmatmul.mubr.f32.gmra.mrb[226].mxu1 %v4935_v39  ;;  %v6887_v39 = vmax.f32 %v12362_v19, %v6886_v8 }
 0x6aa   :  { %5949 = vmatprep.mubr.f32.mxu1 %v12994_v40 }
 0x6ab   :  { %5236 = vmatmul.mubr.f32.gmra.mrb[220].mxu0 %v4817_v17  ;;  %v5813_v13 = vpop.f32.mrb[182].mxu1 }
 0x6ac   :  { %v5814_v43 = vadd.f32 %v5813_v13, %v10733_v5  ;;  %v5815_v16 = vpop.f32.mrb[183].mxu1  ;;  %5241 = vmatprep.mubr.f32.mxu0 %v12994_v40  ;;  %v6888_v13 = vrot.slane %v6887_v39, 2 }
 0x6ad   :  { %v5816_v45 = vadd.f32 %v5815_v16, %v10742_v33  ;;  %5950 = vmatmul.mubr.f32.gmra.mrb[228].mxu1 %v4936_v50 }
 0x6ae   :  { %v6268_v46 = vmax.f32 %v5814_v43, 0.0  ;;  %5955 = vmatprep.mubr.f32.mxu1 %v12994_v40 }
 0x6af   :  { %v6269_v56 = vmax.f32 %v5816_v45, 0.0  ;;  %5242 = vmatmul.mubr.f32.gmra.mrb[222].mxu0 %v4818_v2  ;;  %v5819_v55 = vpop.f32.mrb[184].mxu1 }
 0x6b0   :  { %v6386_v3 = vmax.f32 %v6266_v59, %v6268_v46  ;;  %v5820_v60 = vadd.f32 %v5819_v55, %v10733_v5  ;;  %v5821_v10 = vpop.f32.mrb[185].mxu1  ;;  %5247 = vmatprep.mubr.f32.mxu0 %v12994_v40  ;;  %v6889_v46 = vmax.f32 %v6887_v39, %v6888_v13 }
 0x6b1   :  { %v6387_v38 = vmax.f32 %v6267_v4, %v6269_v56  ;;  %v5822_v28 = vadd.f32 %v5821_v10, %v10742_v33 }
 0x6b2   :  { %v6270_v12 = vmax.f32 %v5820_v60, 0.0  ;;  %v6884_v60 = vrot.slane %v6883_v18, 1  ;;  %v6890_v20 = vrot.slane %v6889_v46, 1 }
 0x6b3   :  { %v6271_v9 = vmax.f32 %v5822_v28, 0.0  ;;  %5248 = vmatmul.mubr.f32.gmra.mrb[224].mxu0 %v4819_v25 }
 0x6b4   :  { %v6450_v41 = vmax.f32 %v6386_v3, %v6270_v12  ;;  %5253 = vmatprep.mubr.f32.mxu0 %v12994_v40  ;;  %v6891_v42 = vmax.f32 %v6889_v46, %v6890_v20 }
 0x6b5   :  { %v6451_v23 = vmax.f32 %v6387_v38, %v6271_v9 }
 0x6b6   :  { %v8131_v27 = vpop.f32.mrb[150].mxu0 }
 0x6b7   :  { %v4738_v47 = vpop.f32.mrb[151].mxu0  ;;  %5254 = vmatmul.mubr.f32.gmra.mrb[226].mxu0 %v4820_v57  ;;  %v4744_v15 = vadd.f32 %v12383_v31, %v8131_v27 }
 0x6b8   :  { %v4739_v48 = vadd.f32 %v12383_v31, %v4738_v47  ;;  %5259 = vmatprep.mubr.f32.mxu0 %v12994_v40 }
 0x6b9   :  { %v4938_v44 = vmax.f32 %v4744_v15, 0.0 }
 0x6ba   :  { %v4937_v22 = vmax.f32 %v4739_v48, 0.0 }
 0x6bb   :  { %5260 = vmatmul.mubr.f32.gmra.mrb[228].mxu0 %v4821_v26 }
 0x6bc   :  { %5956 = vmatmul.mubr.f32.gmra.mrb[230].mxu1 %v4937_v22 }
 0x6bd   :  { %5961 = vmatprep.mubr.f32.mxu1 %v12994_v40 }
 0x6be   :  { %v5825_v30 = vpop.f32.mrb[186].mxu1 }
 0x6bf   :  { %v5826_v14 = vadd.f32 %v5825_v30, %v10733_v5  ;;  %v5827_v24 = vpop.f32.mrb[187].mxu1 }
 0x6c0   :  { %v5828_v63 = vadd.f32 %v5827_v24, %v10742_v33  ;;  %5962 = vmatmul.mubr.f32.gmra.mrb[232].mxu1 %v4938_v44 }
 0x6c1   :  { %v6272_v29 = vmax.f32 %v5826_v14, 0.0  ;;  %5967 = vmatprep.mubr.f32.mxu1 %v12994_v40 }
 0x6c2   :  { %v6273_v6 = vmax.f32 %v5828_v63, 0.0  ;;  %v5831_v61 = vpop.f32.mrb[188].mxu1 }
 0x6c3   :  { %v6514_v54 = vmax.f32 %v6450_v41, %v6272_v29  ;;  %v5832_v1 = vadd.f32 %v5831_v61, %v10733_v5  ;;  %v5833_v32 = vpop.f32.mrb[189].mxu1  ;;  %v6885_v41 = vmax.f32 %v6883_v18, %v6884_v60 }
 0x6c4   :  { %v6515_v0 = vmax.f32 %v6451_v23, %v6273_v6  ;;  %v5834_v52 = vadd.f32 %v5833_v32, %v10742_v33 }
 0x6c5   :  { %v6274_v17 = vmax.f32 %v5832_v1, 0.0 }
 0x6c6   :  { %v6275_v49 = vmax.f32 %v5834_v52, 0.0 }
 0x6c7   :  { %v6578_v50 = vmax.f32 %v6514_v54, %v6274_v17 }
 0x6c8   :  { %v6579_v43 = vmax.f32 %v6515_v0, %v6275_v49 }
 0x6c9   :  { %v6892_v16 = vrot.slane %v6578_v50, 4  ;;  %v8134_v2 = vpop.f32.mrb[152].mxu0 }
 0x6ca   :  { %v6898_v51 = vrot.slane %v6579_v43, 4  ;;  %v4748_v37 = vpop.f32.mrb[153].mxu0  ;;  %v4754_v56 = vadd.f32 %v12383_v31, %v8134_v2  ;;  %v6993_v2 = vld [vmem:[%s12863_s7 + $0x88] sm:$0xff] }
 0x6cb   :  { %v6893_v45 = vmax.f32 %v6578_v50, %v6892_v16  ;;  %v4749_v59 = vadd.f32 %v12383_v31, %v4748_v37  ;;  %v6992_v16 = vld [vmem:[%s12863_s7 + $0x80] sm:$0xff] }
 0x6cc   :  { %v6899_v4 = vmax.f32 %v6579_v43, %v6898_v51  ;;  %v4940_v38 = vmax.f32 %v4754_v56, 0.0  ;;  %v6976_v51 = vld [vmem:[%s12863_s7] sm:$0xff] }
 0x6cd   :  { %v6894_v19 = vrot.slane %v6893_v45, 2  ;;  %v4939_v55 = vmax.f32 %v4749_v59, 0.0  ;;  %v6977_v59 = vld [vmem:[%s12863_s7 + $0x8] sm:$0xff] }
 0x6ce   :  { %v6900_v3 = vrot.slane %v6899_v4, 2 }
 0x6cf   :  { %v6895_v10 = vmax.f32 %v6893_v45, %v6894_v19  ;;  %5968 = vmatmul.mubr.f32.gmra.mrb[234].mxu1 %v4939_v55  ;;  %v8252_v45 = vpack.c.bf16 %v6993_v2, %v6992_v16 }
 0x6d0   :  { %v6901_v36 = vmax.f32 %v6899_v4, %v6900_v3  ;;  %5973 = vmatprep.mubr.f32.mxu1 %v12994_v40  ;;  %v8254_v4 = vpack.c.bf16 %v6977_v59, %v6976_v51 }
 0x6d1   :  { %v6896_v25 = vrot.slane %v6895_v10, 1  ;;  %v5837_v28 = vpop.f32.mrb[190].mxu1  ;;  %8253 = vmatprep.subr.bf16.mxu0 %v8252_v45 }
 0x6d2   :  { %v6902_v12 = vrot.slane %v6901_v36, 1  ;;  %v5839_v9 = vpop.f32.mrb[191].mxu1  ;;  %v5838_v23 = vadd.f32 %v5837_v28, %v10733_v5  ;;  %8255 = vmatpush3.bf16.msra.mxu0 %v8254_v4 }
 0x6d3   :  { %v6897_v57 = vmax.f32 %v6895_v10, %v6896_v25  ;;  %5974 = vmatmul.mubr.f32.gmra.mrb[236].mxu1 %v4940_v38  ;;  %v5840_v47 = vadd.f32 %v5839_v9, %v10742_v33  ;;  %v6994_v9 = vld [vmem:[%s12863_s7 + $0x90] sm:$0xff] }
 0x6d4   :  { %v6903_v7 = vmax.f32 %v6901_v36, %v6902_v12  ;;  %5979 = vmatprep.mubr.f32.mxu1 %v12994_v40  ;;  %v6276_v30 = vmax.f32 %v5838_v23, 0.0  ;;  %v6979_v23 = vld [vmem:[%s12863_s7 + $0x18] sm:$0xff] }
 0x6d5   :  { %v12416_v27 = vsel %vm7079_vm1, %v6897_v57, %v6885_v41  ;;  %v5843_v48 = vpop.f32.mrb[192].mxu1  ;;  %v6277_v14 = vmax.f32 %v5840_v47, 0.0  ;;  %v6995_v41 = vld [vmem:[%s12863_s7 + $0x98] sm:$0xff]  ;;  %v6978_v57 = vld [vmem:[%s12863_s7 + $0x10] sm:$0xff] }
 0x6d6   :  { %v12420_v26 = vsel %vm7079_vm1, %v6903_v7, %v6891_v42  ;;  %v5844_v15 = vadd.f32 %v5843_v48, %v10733_v5  ;;  %v5845_v22 = vpop.f32.mrb[193].mxu1  ;;  %v8256_v7 = vpack.c.bf16 %v6995_v41, %v6994_v9  ;;  %v8258_v48 = vpack.c.bf16 %v6979_v23, %v6978_v57 }
 0x6d7   :  { %v5846_v44 = vadd.f32 %v5845_v22, %v10742_v33 }
 0x6d8   :  { %v6278_v53 = vmax.f32 %v5844_v15, 0.0  ;;  %8257 = vmatprep.subr.bf16.mxu0 %v8256_v7 }
 0x6d9   :  { %v6279_v24 = vmax.f32 %v5846_v44, 0.0  ;;  %8259 = vmatpush3.bf16.msra.mxu0 %v8258_v48 }
 0x6da   :  { %v6388_v8 = vmax.f32 %v6276_v30, %v6278_v53 }
 0x6db   :  { %v6389_v63 = vmax.f32 %v6277_v14, %v6279_v24 }
 0x6dc   :  { %v8137_v29 = vpop.f32.mrb[154].mxu0 }
 0x6dd   :  { %v4758_v6 = vpop.f32.mrb[155].mxu0  ;;  %v4764_v35 = vadd.f32 %v12383_v31, %v8137_v29 }
 0x6de   :  { %v4759_v61 = vadd.f32 %v12383_v31, %v4758_v6 }
 0x6df   :  { %v4942_v1 = vmax.f32 %v4764_v35, 0.0 }
 0x6e0   :  { %v4941_v54 = vmax.f32 %v4759_v61, 0.0 }
 0x6e2   :  { %5980 = vmatmul.mubr.f32.gmra.mrb[238].mxu1 %v4941_v54 }
 0x6e3   :  { %5985 = vmatprep.mubr.f32.mxu1 %v12994_v40 }
 0x6e4   :  { %v5849_v32 = vpop.f32.mrb[194].mxu1 }
 0x6e5   :  { %v5850_v39 = vadd.f32 %v5849_v32, %v10733_v5  ;;  %v5851_v0 = vpop.f32.mrb[195].mxu1 }
 0x6e6   :  { %v5852_v52 = vadd.f32 %v5851_v0, %v10742_v33  ;;  %5986 = vmatmul.mubr.f32.gmra.mrb[240].mxu1 %v4942_v1 }
 0x6e7   :  { %v6280_v17 = vmax.f32 %v5850_v39, 0.0  ;;  %5991 = vmatprep.mubr.f32.mxu1 %v12994_v40 }
 0x6e8   :  { %v6281_v49 = vmax.f32 %v5852_v52, 0.0  ;;  %v5855_v11 = vpop.f32.mrb[196].mxu1 }
 0x6e9   :  { %v6452_v50 = vmax.f32 %v6388_v8, %v6280_v17  ;;  %v5856_v13 = vadd.f32 %v5855_v11, %v10733_v5  ;;  %v5857_v43 = vpop.f32.mrb[197].mxu1 }
 0x6ea   :  { %v6453_v37 = vmax.f32 %v6389_v63, %v6281_v49  ;;  %v5858_v18 = vadd.f32 %v5857_v43, %v10742_v33 }
 0x6eb   :  { %v6282_v46 = vmax.f32 %v5856_v13, 0.0 }
 0x6ec   :  { %v6283_v19 = vmax.f32 %v5858_v18, 0.0 }
 0x6ed   :  { %v6516_v56 = vmax.f32 %v6452_v50, %v6282_v46 }
 0x6ee   :  { %v6517_v55 = vmax.f32 %v6453_v37, %v6283_v19 }
 0x6ef   :  { %v8140_v3 = vpop.f32.mrb[156].mxu0 }
 0x6f0   :  { %v4768_v60 = vpop.f32.mrb[157].mxu0  ;;  %v4774_v20 = vadd.f32 %v12383_v31, %v8140_v3 }
 0x6f1   :  { %v4769_v10 = vadd.f32 %v12383_v31, %v4768_v60 }
 0x6f2   :  { %v4944_v25 = vmax.f32 %v4774_v20, 0.0  ;;  %v6980_v20 = vld [vmem:[%s12863_s7 + $0x20] sm:$0xff] }
 0x6f3   :  { %v4943_v36 = vmax.f32 %v4769_v10, 0.0 }
 0x6f5   :  { %5992 = vmatmul.mubr.f32.gmra.mrb[242].mxu1 %v4943_v36  ;;  %v6981_v36 = vld [vmem:[%s12863_s7 + $0x28] sm:$0xff] }
 0x6f6   :  { %5997 = vmatprep.mubr.f32.mxu1 %v12994_v40 }
 0x6f7   :  { %v5861_v38 = vpop.f32.mrb[198].mxu1 }
 0x6f8   :  { %v5862_v28 = vadd.f32 %v5861_v38, %v10733_v5  ;;  %v5863_v12 = vpop.f32.mrb[199].mxu1 }
 0x6f9   :  { %v5864_v42 = vadd.f32 %v5863_v12, %v10742_v33  ;;  %5998 = vmatmul.mubr.f32.gmra.mrb[244].mxu1 %v4944_v25 }
 0x6fa   :  { %v6284_v47 = vmax.f32 %v5862_v28, 0.0  ;;  %6003 = vmatprep.mubr.f32.mxu1 %v12994_v40 }
 0x6fb   :  { %v6285_v15 = vmax.f32 %v5864_v42, 0.0  ;;  %v5867_v22 = vpop.f32.mrb[200].mxu1 }
 0x6fc   :  { %v6580_v44 = vmax.f32 %v6516_v56, %v6284_v47  ;;  %v5869_v30 = vpop.f32.mrb[201].mxu1  ;;  %v5868_v13 = vadd.f32 %v5867_v22, %v10733_v5  ;;  %v6997_v56 = vld [vmem:[%s12863_s7 + $0xa8] sm:$0xff] }
 0x6fd   :  { %v6581_v53 = vmax.f32 %v6517_v55, %v6285_v15  ;;  %v5870_v2 = vadd.f32 %v5869_v30, %v10742_v33  ;;  %v6998_v30 = vld [vmem:[%s12863_s7 + $0xb0] sm:$0xff] }
 0x6fe   :  { %v6904_v14 = vrot.slane %v6580_v44, 4 }
 0x6ff   :  { %v6910_v24 = vrot.slane %v6581_v53, 4  ;;  %v6287_v12 = vmax.f32 %v5870_v2, 0.0 }
 0x700   :  { %v6905_v8 = vmax.f32 %v6580_v44, %v6904_v14 }
 0x701   :  { %v6911_v63 = vmax.f32 %v6581_v53, %v6910_v24  ;;  %v6999_v53 = vld [vmem:[%s12863_s7 + $0xb8] sm:$0xff] }
 0x702   :  { %v6906_v29 = vrot.slane %v6905_v8, 2  ;;  %v8143_v6 = vpop.f32.mrb[158].mxu0 }
 0x703   :  { %v6912_v61 = vrot.slane %v6911_v63, 2  ;;  %v4778_v35 = vpop.f32.mrb[159].mxu0  ;;  %v4784_v0 = vadd.f32 %v12383_v31, %v8143_v6  ;;  %v6983_v6 = vld [vmem:[%s12863_s7 + $0x38] sm:$0xff] }
 0x704   :  { %v6907_v54 = vmax.f32 %v6905_v8, %v6906_v29  ;;  %v4779_v1 = vadd.f32 %v12383_v31, %v4778_v35  ;;  %v6982_v29 = vld [vmem:[%s12863_s7 + $0x30] sm:$0xff] }
 0x705   :  { %v6913_v32 = vmax.f32 %v6911_v63, %v6912_v61  ;;  %v4946_v51 = vmax.f32 %v4784_v0, 0.0 }
 0x706   :  { %v6908_v39 = vrot.slane %v6907_v54, 1  ;;  %v4945_v52 = vmax.f32 %v4779_v1, 0.0  ;;  %v5057_v17 = vpop.f32.mrb[160].mxu0  ;;  %v8266_v1 = vpack.c.bf16 %v6983_v6, %v6982_v29 }
 0x707   :  { %v6914_v49 = vrot.slane %v6913_v32, 1  ;;  %v5059_v11 = vpop.f32.mrb[161].mxu0  ;;  %v5058_v16 = vadd.f32 %v5057_v17, %v10733_v5 }
 0x708   :  { %v6909_v50 = vmax.f32 %v6907_v54, %v6908_v39  ;;  %6004 = vmatmul.mubr.f32.gmra.mrb[246].mxu1 %v4945_v52  ;;  %v5060_v37 = vadd.f32 %v5059_v11, %v10742_v33  ;;  %v8264_v54 = vpack.c.bf16 %v6999_v53, %v6998_v30 }
 0x709   :  { %v6915_v43 = vmax.f32 %v6913_v32, %v6914_v49  ;;  %6009 = vmatprep.mubr.f32.mxu1 %v12994_v40  ;;  %v6996_v40 = vld [vmem:[%s12863_s7 + $0xa0] sm:$0xff]  ;;  %v6016_v25 = vmax.f32 %v5058_v16, 0.0 }
 0x70a   :  { %v5063_v18 = vpop.f32.mrb[162].mxu0  ;;  %v5873_v31 = vpop.f32.mrb[202].mxu1  ;;  %v12471_v45 = vsel %vm7081_vm2, %v6909_v50, %v12416_v27  ;;  %v6286_v27 = vmax.f32 %v5868_v13, 0.0  ;;  %v8260_v10 = vpack.c.bf16 %v6997_v56, %v6996_v40  ;;  %v6017_v9 = vmax.f32 %v5060_v37, 0.0  ;;  %v7000_v50 = vld [vmem:[%s12863_s7 + $0xc0] sm:$0xff]  ;;  %v7001_v13 = vld [vmem:[%s12863_s7 + $0xc8] sm:$0xff] }
 0x70b   :  { %v5064_v59 = vadd.f32 %v5063_v18, %v10733_v5  ;;  %v5874_v46 = vadd.f32 %v5873_v31, %v10733_v5  ;;  %v5065_v4 = vpop.f32.mrb[163].mxu0  ;;  %v5875_v19 = vpop.f32.mrb[203].mxu1  ;;  %v12483_v55 = vsel %vm7081_vm2, %v6915_v43, %v12420_v26  ;;  %v8262_v26 = vpack.c.bf16 %v6981_v36, %v6980_v20  ;;  %v6984_v37 = vld [vmem:[%s12863_s7 + $0x40] sm:$0xff]  ;;  %v6985_v18 = vld [vmem:[%s12863_s7 + $0x48] sm:$0xff]  ;;  %v6986_v36 = vld [vmem:[%s12863_s7 + $0x50] sm:$0xff] }
 0x70c   :  { %v5066_v3 = vadd.f32 %v5065_v4, %v10742_v33  ;;  %v5876_v60 = vadd.f32 %v5875_v19, %v10742_v33  ;;  %6010 = vmatmul.mubr.f32.gmra.mrb[248].mxu1 %v4946_v51  ;;  %8261 = vmatprep.subr.bf16.mxu0 %v8260_v10  ;;  %v8268_v51 = vpack.c.bf16 %v7001_v13, %v7000_v50 }
 0x70d   :  { %v6018_v38 = vmax.f32 %v5064_v59, 0.0  ;;  %v6288_v28 = vmax.f32 %v5874_v46, 0.0  ;;  %8263 = vmatpush3.bf16.msra.mxu0 %v8262_v26  ;;  %v8270_v59 = vpack.c.bf16 %v6985_v18, %v6984_v37 }
 0x70e   :  { %v6019_v41 = vmax.f32 %v5066_v3, 0.0  ;;  %v6289_v57 = vmax.f32 %v5876_v60, 0.0  ;;  %v5069_v42 = vpop.f32.mrb[164].mxu0  ;;  %v5879_v7 = vpop.f32.mrb[204].mxu1  ;;  %8265 = vmatprep.subr.bf16.mxu0 %v8264_v54  ;;  %v7003_v3 = vld [vmem:[%s12863_s7 + $0xd8] sm:$0xff] }
 0x70f   :  { %v6336_v23 = vmax.f32 %v6016_v25, %v6018_v38  ;;  %v6390_v47 = vmax.f32 %v6286_v27, %v6288_v28  ;;  %v5070_v48 = vadd.f32 %v5069_v42, %v10733_v5  ;;  %v5880_v15 = vadd.f32 %v5879_v7, %v10733_v5  ;;  %v5071_v22 = vpop.f32.mrb[165].mxu0  ;;  %v5881_v44 = vpop.f32.mrb[205].mxu1  ;;  %v7002_v27 = vld [vmem:[%s12863_s7 + $0xd0] sm:$0xff]  ;;  %v6987_v25 = vld [vmem:[%s12863_s7 + $0x58] sm:$0xff]  ;;  %v7005_v42 = vld [vmem:[%s12863_s7 + $0xe8] sm:$0xff] }
 0x710   :  { %v6337_v14 = vmax.f32 %v6017_v9, %v6019_v41  ;;  %v6391_v24 = vmax.f32 %v6287_v12, %v6289_v57  ;;  %v5072_v8 = vadd.f32 %v5071_v22, %v10742_v33  ;;  %v5882_v63 = vadd.f32 %v5881_v44, %v10742_v33  ;;  %v7004_v57 = vld [vmem:[%s12863_s7 + $0xe0] sm:$0xff] }
 0x711   :  { %v6020_v61 = vmax.f32 %v5070_v48, 0.0  ;;  %v6290_v35 = vmax.f32 %v5880_v15, 0.0  ;;  %8267 = vmatpush3.bf16.msra.mxu0 %v8266_v1  ;;  %v8272_v20 = vpack.c.bf16 %v7003_v3, %v7002_v27  ;;  %v8274_v28 = vpack.c.bf16 %v6987_v25, %v6986_v36  ;;  %v6988_v48 = vld [vmem:[%s12863_s7 + $0x60] sm:$0xff]  ;;  %v6989_v15 = vld [vmem:[%s12863_s7 + $0x68] sm:$0xff] }
 0x712   :  { %v6021_v32 = vmax.f32 %v5072_v8, 0.0  ;;  %v6291_v39 = vmax.f32 %v5882_v63, 0.0  ;;  %v5075_v0 = vpop.f32.mrb[166].mxu0  ;;  %8269 = vmatprep.subr.bf16.mxu0 %v8268_v51  ;;  %v8278_v44 = vpack.c.bf16 %v6989_v15, %v6988_v48 }
 0x713   :  { %v6400_v52 = vmax.f32 %v6336_v23, %v6020_v61  ;;  %v12509_v17 = vmax.f32 %v6390_v47, %v6290_v35  ;;  %v5076_v49 = vadd.f32 %v5075_v0, %v10733_v5  ;;  %v5077_v11 = vpop.f32.mrb[167].mxu0  ;;  %v8276_v47 = vpack.c.bf16 %v7005_v42, %v7004_v57  ;;  %v7006_v61 = vld [vmem:[%s12863_s7 + $0xf0] sm:$0xff]  ;;  %v7007_v35 = vld [vmem:[%s12863_s7 + $0xf8] sm:$0xff] }
 0x714   :  { %v6401_v43 = vmax.f32 %v6337_v14, %v6021_v32  ;;  %v12518_v16 = vmax.f32 %v6391_v24, %v6291_v39  ;;  %v5078_v2 = vadd.f32 %v5077_v11, %v10742_v33  ;;  %v8280_v39 = vpack.c.bf16 %v7007_v35, %v7006_v61  ;;  %v6990_v0 = vld [vmem:[%s12863_s7 + $0x70] sm:$0xff] }
 0x715   :  { %v6022_v31 = vmax.f32 %v5076_v49, 0.0  ;;  %8271 = vmatpush3.bf16.msra.mxu0 %v8270_v59 }
 0x716   :  { %v6023_v46 = vmax.f32 %v5078_v2, 0.0  ;;  %v5081_v4 = vpop.f32.mrb[168].mxu0  ;;  %8273 = vmatprep.subr.bf16.mxu0 %v8272_v20 }
 0x717   :  { %v6464_v19 = vmax.f32 %v6400_v52, %v6022_v31  ;;  %v5082_v40 = vadd.f32 %v5081_v4, %v10733_v5  ;;  %v5083_v56 = vpop.f32.mrb[169].mxu0  ;;  %v6991_v52 = vld [vmem:[%s12863_s7 + $0x78] sm:$0xff] }
 0x718   :  { %v6465_v60 = vmax.f32 %v6401_v43, %v6023_v46  ;;  %v5084_v10 = vadd.f32 %v5083_v56, %v10742_v33  ;;  %v8282_v43 = vpack.c.bf16 %v6991_v52, %v6990_v0 }
 0x719   :  { %v6024_v38 = vmax.f32 %v5082_v40, 0.0  ;;  %8275 = vmatpush3.bf16.msra.mxu0 %v8274_v28 }
 0x71a   :  { %v6025_v26 = vmax.f32 %v5084_v10, 0.0  ;;  %v5087_v12 = vpop.f32.mrb[170].mxu0  ;;  %8277 = vmatprep.subr.bf16.mxu0 %v8276_v47 }
 0x71b   :  { %v6528_v9 = vmax.f32 %v6464_v19, %v6024_v38  ;;  %v5089_v41 = vpop.f32.mrb[171].mxu0  ;;  %v5088_v23 = vadd.f32 %v5087_v12, %v10733_v5 }
 0x71c   :  { %v6529_v7 = vmax.f32 %v6465_v60, %v6025_v26  ;;  %v5090_v30 = vadd.f32 %v5089_v41, %v10742_v33 }
 0x71d   :  { %v5885_v22 = vpop.f32.mrb[206].mxu1  ;;  %v6592_v8 = vrot.slane %v6528_v9, 4  ;;  %v6026_v54 = vmax.f32 %v5088_v23, 0.0  ;;  %8279 = vmatpush3.bf16.msra.mxu0 %v8278_v44 }
 0x71e   :  { %v5886_v53 = vadd.f32 %v5885_v22, %v10733_v5  ;;  %v5093_v14 = vpop.f32.mrb[172].mxu0  ;;  %v5887_v24 = vpop.f32.mrb[207].mxu1  ;;  %v6598_v49 = vrot.slane %v6529_v7, 4  ;;  %v6027_v2 = vmax.f32 %v5090_v30, 0.0  ;;  %8281 = vmatprep.subr.bf16.mxu0 %v8280_v39 }
 0x71f   :  { %v5094_v63 = vadd.f32 %v5093_v14, %v10733_v5  ;;  %v5888_v29 = vadd.f32 %v5887_v24, %v10742_v33  ;;  %v5095_v6 = vpop.f32.mrb[173].mxu0  ;;  %v6593_v46 = vmax.f32 %v6528_v9, %v6592_v8 }
 0x720   :  { %v6292_v1 = vmax.f32 %v5886_v53, 0.0  ;;  %v5096_v32 = vadd.f32 %v5095_v6, %v10742_v33  ;;  %v6599_v10 = vmax.f32 %v6529_v7, %v6598_v49 }
 0x721   :  { %v6028_v11 = vmax.f32 %v5094_v63, 0.0  ;;  %v6293_v50 = vmax.f32 %v5888_v29, 0.0  ;;  %v5891_v13 = vpop.f32.mrb[208].mxu1  ;;  %8283 = vmatpush3.bf16.msra.mxu0 %v8282_v43  ;;  %v6594_v28 = vrot.slane %v6593_v46, 2 }
 0x722   :  { %v6518_v51 = vmax.f32 %v12509_v17, %v6292_v1  ;;  %v6029_v37 = vmax.f32 %v5096_v32, 0.0  ;;  %v5892_v18 = vadd.f32 %v5891_v13, %v10733_v5  ;;  %v5099_v31 = vpop.f32.mrb[174].mxu0  ;;  %v5893_v59 = vpop.f32.mrb[209].mxu1  ;;  %v6600_v23 = vrot.slane %v6599_v10, 2 }
 0x723   :  { %v6338_v4 = vmax.f32 %v6026_v54, %v6028_v11  ;;  %v6519_v19 = vmax.f32 %v12518_v16, %v6293_v50  ;;  %v5100_v40 = vadd.f32 %v5099_v31, %v10733_v5  ;;  %v5101_v56 = vpop.f32.mrb[175].mxu0  ;;  %v5894_v60 = vadd.f32 %v5893_v59, %v10742_v33 }
 0x724   :  { %v6339_v27 = vmax.f32 %v6027_v2, %v6029_v37  ;;  %v6294_v3 = vmax.f32 %v5892_v18, 0.0  ;;  %v5102_v20 = vadd.f32 %v5101_v56, %v10742_v33  ;;  %v12579_v30 = vmax.f32 %v6593_v46, %v6594_v28 }
 0x725   :  { %v6030_v17 = vmax.f32 %v5100_v40, 0.0  ;;  %v6295_v25 = vmax.f32 %v5894_v60, 0.0  ;;  %v12583_v61 = vmax.f32 %v6599_v10, %v6600_v23 }
 0x726   :  { %v6582_v36 = vmax.f32 %v6518_v51, %v6294_v3  ;;  %v5105_v38 = vpop.f32.mrb[176].mxu0  ;;  %v6031_v12 = vmax.f32 %v5102_v20, 0.0  ;;  %v6596_v0 = vrot.slane %v12579_v30, 1 }
 0x727   :  { %v6402_v26 = vmax.f32 %v6338_v4, %v6030_v17  ;;  %v5106_v16 = vadd.f32 %v5105_v38, %v10733_v5  ;;  %v5107_v9 = vpop.f32.mrb[177].mxu0  ;;  %v6583_v57 = vmax.f32 %v6519_v19, %v6295_v25  ;;  %v6602_v37 = vrot.slane %v12583_v61, 1 }
 0x728   :  { %v6916_v41 = vrot.slane %v6582_v36, 4  ;;  %v5108_v42 = vadd.f32 %v5107_v9, %v10742_v33  ;;  %v6403_v47 = vmax.f32 %v6339_v27, %v6031_v12 }
 0x729   :  { %v6032_v48 = vmax.f32 %v5106_v16, 0.0  ;;  %v6922_v15 = vrot.slane %v6583_v57, 4 }
 0x72a   :  { %v6917_v7 = vmax.f32 %v6582_v36, %v6916_v41  ;;  %v6033_v22 = vmax.f32 %v5108_v42, 0.0  ;;  %v5111_v44 = vpop.f32.mrb[178].mxu0 }
 0x72b   :  { %v6466_v53 = vmax.f32 %v6402_v26, %v6032_v48  ;;  %v5112_v14 = vadd.f32 %v5111_v44, %v10733_v5  ;;  %v5113_v24 = vpop.f32.mrb[179].mxu0  ;;  %v6923_v63 = vmax.f32 %v6583_v57, %v6922_v15 }
 0x72c   :  { %v6918_v8 = vrot.slane %v6917_v7, 2  ;;  %v6467_v29 = vmax.f32 %v6403_v47, %v6033_v22  ;;  %v5114_v6 = vadd.f32 %v5113_v24, %v10742_v33 }
 0x72d   :  { %v6034_v35 = vmax.f32 %v5112_v14, 0.0  ;;  %v6924_v1 = vrot.slane %v6923_v63, 2 }
 0x72e   :  { %v6919_v54 = vmax.f32 %v6917_v7, %v6918_v8  ;;  %v6035_v32 = vmax.f32 %v5114_v6, 0.0  ;;  %v5117_v39 = vpop.f32.mrb[180].mxu0 }
 0x72f   :  { %v6530_v52 = vmax.f32 %v6466_v53, %v6034_v35  ;;  %v5118_v49 = vadd.f32 %v5117_v39, %v10733_v5  ;;  %v5119_v11 = vpop.f32.mrb[181].mxu0  ;;  %v6925_v13 = vmax.f32 %v6923_v63, %v6924_v1 }
 0x730   :  { %v6920_v50 = vrot.slane %v6919_v54, 1  ;;  %v6531_v43 = vmax.f32 %v6467_v29, %v6035_v32  ;;  %v5120_v2 = vadd.f32 %v5119_v11, %v10742_v33  ;;  %v5897_v51 = vpop.f32.mrb[210].mxu1 }
 0x731   :  { %v6604_v18 = vrot.slane %v6530_v52, 4  ;;  %v6036_v31 = vmax.f32 %v5118_v49, 0.0  ;;  %v5898_v59 = vadd.f32 %v5897_v51, %v10733_v5  ;;  %v5899_v46 = vpop.f32.mrb[211].mxu1  ;;  %v6926_v19 = vrot.slane %v6925_v13, 1 }
 0x732   :  { %v6921_v4 = vmax.f32 %v6919_v54, %v6920_v50  ;;  %v6610_v40 = vrot.slane %v6531_v43, 4  ;;  %v6037_v56 = vmax.f32 %v5120_v2, 0.0  ;;  %v5123_v27 = vpop.f32.mrb[182].mxu0  ;;  %v5900_v10 = vadd.f32 %v5899_v46, %v10742_v33 }
 0x733   :  { %v6605_v3 = vmax.f32 %v6530_v52, %v6604_v18  ;;  %v6296_v60 = vmax.f32 %v5898_v59, 0.0  ;;  %v5124_v17 = vadd.f32 %v5123_v27, %v10733_v5  ;;  %v5125_v20 = vpop.f32.mrb[183].mxu0  ;;  %v6927_v36 = vmax.f32 %v6925_v13, %v6926_v19 }
 0x734   :  { %v6611_v25 = vmax.f32 %v6531_v43, %v6610_v40  ;;  %v5126_v38 = vadd.f32 %v5125_v20, %v10742_v33  ;;  %v5903_v28 = vpop.f32.mrb[212].mxu1  ;;  %v12595_v26 = vsel %vm7083_vm3, %v6921_v4, %v12471_v45  ;;  %v6297_v16 = vmax.f32 %v5900_v10, 0.0 }
 0x735   :  { %v6606_v12 = vrot.slane %v6605_v3, 2  ;;  %v6038_v9 = vmax.f32 %v5124_v17, 0.0  ;;  %v5904_v41 = vadd.f32 %v5903_v28, %v10733_v5  ;;  %v5905_v57 = vpop.f32.mrb[213].mxu1  ;;  %v12601_v7 = vsel %vm7083_vm3, %v6927_v36, %v12483_v55 }
 0x736   :  { %v6612_v42 = vrot.slane %v6611_v25, 2  ;;  %v6039_v23 = vmax.f32 %v5126_v38, 0.0  ;;  %v5906_v47 = vadd.f32 %v5905_v57, %v10742_v33  ;;  %v5129_v48 = vpop.f32.mrb[184].mxu0  ;;  %v6597_v55 = vmax.f32 %v12579_v30, %v6596_v0 }
 0x737   :  { %v6607_v15 = vmax.f32 %v6605_v3, %v6606_v12  ;;  %v6340_v22 = vmax.f32 %v6036_v31, %v6038_v9  ;;  %v6298_v44 = vmax.f32 %v5904_v41, 0.0  ;;  %v5130_v45 = vadd.f32 %v5129_v48, %v10733_v5  ;;  %v5131_v53 = vpop.f32.mrb[185].mxu0 }
 0x738   :  { %v6613_v14 = vmax.f32 %v6611_v25, %v6612_v42  ;;  %v6341_v24 = vmax.f32 %v6037_v56, %v6039_v23  ;;  %v6299_v8 = vmax.f32 %v5906_v47, 0.0  ;;  %v5132_v63 = vadd.f32 %v5131_v53, %v10742_v33 }
 0x739   :  { %v6608_v29 = vrot.slane %v6607_v15, 1  ;;  %v6392_v6 = vmax.f32 %v6296_v60, %v6298_v44  ;;  %v6040_v35 = vmax.f32 %v5130_v45, 0.0  ;;  %v6603_v13 = vmax.f32 %v12583_v61, %v6602_v37 }
 0x73a   :  { %v6614_v54 = vrot.slane %v6613_v14, 1  ;;  %v6393_v1 = vmax.f32 %v6297_v16, %v6299_v8  ;;  %v6041_v32 = vmax.f32 %v5132_v63, 0.0  ;;  %v5135_v39 = vpop.f32.mrb[186].mxu0 }
 0x73b   :  { %v6609_v52 = vmax.f32 %v6607_v15, %v6608_v29  ;;  %v6404_v49 = vmax.f32 %v6340_v22, %v6040_v35  ;;  %v5136_v11 = vadd.f32 %v5135_v39, %v10733_v5  ;;  %v5137_v50 = vpop.f32.mrb[187].mxu0 }
 0x73c   :  { %v6615_v43 = vmax.f32 %v6613_v14, %v6614_v54  ;;  %v6405_v2 = vmax.f32 %v6341_v24, %v6041_v32  ;;  %v5138_v51 = vadd.f32 %v5137_v50, %v10742_v33 }
 0x73d   :  { %v12610_v18 = vsel %vm7079_vm1, %v6609_v52, %v6597_v55  ;;  %v6042_v31 = vmax.f32 %v5136_v11, 0.0 }
 0x73e   :  { %v12613_v59 = vsel %vm7079_vm1, %v6615_v43, %v6603_v13  ;;  %v6043_v46 = vmax.f32 %v5138_v51, 0.0  ;;  %v5141_v30 = vpop.f32.mrb[188].mxu0 }
 0x73f   :  { %v6468_v0 = vmax.f32 %v6404_v49, %v6042_v31  ;;  %v5142_v4 = vadd.f32 %v5141_v30, %v10733_v5  ;;  %v5143_v19 = vpop.f32.mrb[189].mxu0 }
 0x740   :  { %v6469_v40 = vmax.f32 %v6405_v2, %v6043_v46  ;;  %v5144_v61 = vadd.f32 %v5143_v19, %v10742_v33 }
 0x741   :  { %v6044_v37 = vmax.f32 %v5142_v4, 0.0 }
 0x742   :  { %v6045_v56 = vmax.f32 %v5144_v61, 0.0  ;;  %v5147_v27 = vpop.f32.mrb[190].mxu0 }
 0x743   :  { %v6532_v3 = vmax.f32 %v6468_v0, %v6044_v37  ;;  %v5148_v60 = vadd.f32 %v5147_v27, %v10733_v5  ;;  %v5149_v10 = vpop.f32.mrb[191].mxu0  ;;  %v5909_v17 = vpop.f32.mrb[214].mxu1 }
 0x744   :  { %v6533_v20 = vmax.f32 %v6469_v40, %v6045_v56  ;;  %v5910_v36 = vadd.f32 %v5909_v17, %v10733_v5  ;;  %v5911_v25 = vpop.f32.mrb[215].mxu1  ;;  %v5150_v16 = vadd.f32 %v5149_v10, %v10742_v33 }
 0x745   :  { %v6616_v38 = vrot.slane %v6532_v3, 4  ;;  %v5912_v28 = vadd.f32 %v5911_v25, %v10742_v33  ;;  %v6046_v42 = vmax.f32 %v5148_v60, 0.0 }
 0x746   :  { %v6622_v12 = vrot.slane %v6533_v20, 4  ;;  %v6300_v9 = vmax.f32 %v5910_v36, 0.0  ;;  %v5153_v41 = vpop.f32.mrb[192].mxu0  ;;  %v6047_v54 = vmax.f32 %v5150_v16, 0.0 }
 0x747   :  { %v6617_v57 = vmax.f32 %v6532_v3, %v6616_v38  ;;  %v6301_v23 = vmax.f32 %v5912_v28, 0.0  ;;  %v5154_v47 = vadd.f32 %v5153_v41, %v10733_v5  ;;  %v5155_v48 = vpop.f32.mrb[193].mxu0  ;;  %v5915_v15 = vpop.f32.mrb[216].mxu1 }
 0x748   :  { %v6623_v22 = vmax.f32 %v6533_v20, %v6622_v12  ;;  %v6456_v44 = vmax.f32 %v6392_v6, %v6300_v9  ;;  %v5156_v45 = vadd.f32 %v5155_v48, %v10742_v33  ;;  %v5916_v53 = vadd.f32 %v5915_v15, %v10733_v5  ;;  %v5917_v14 = vpop.f32.mrb[217].mxu1 }
 0x749   :  { %v6618_v24 = vrot.slane %v6617_v57, 2  ;;  %v6457_v8 = vmax.f32 %v6393_v1, %v6301_v23  ;;  %v6048_v63 = vmax.f32 %v5154_v47, 0.0  ;;  %v5918_v29 = vadd.f32 %v5917_v14, %v10742_v33 }
 0x74a   :  { %v6624_v35 = vrot.slane %v6623_v22, 2  ;;  %v6049_v32 = vmax.f32 %v5156_v45, 0.0  ;;  %v6302_v39 = vmax.f32 %v5916_v53, 0.0  ;;  %v5159_v55 = vpop.f32.mrb[194].mxu0 }
 0x74b   :  { %v6619_v52 = vmax.f32 %v6617_v57, %v6618_v24  ;;  %v6342_v49 = vmax.f32 %v6046_v42, %v6048_v63  ;;  %v6303_v11 = vmax.f32 %v5918_v29, 0.0  ;;  %v5160_v6 = vadd.f32 %v5159_v55, %v10733_v5  ;;  %v5161_v50 = vpop.f32.mrb[195].mxu0 }
 0x74c   :  { %v6625_v13 = vmax.f32 %v6623_v22, %v6624_v35  ;;  %v6343_v43 = vmax.f32 %v6047_v54, %v6049_v32  ;;  %v6520_v2 = vmax.f32 %v6456_v44, %v6302_v39  ;;  %v5162_v51 = vadd.f32 %v5161_v50, %v10742_v33 }
 0x74d   :  { %v6620_v1 = vrot.slane %v6619_v52, 1  ;;  %v6521_v31 = vmax.f32 %v6457_v8, %v6303_v11  ;;  %v6050_v46 = vmax.f32 %v5160_v6, 0.0 }
 0x74e   :  { %v6626_v30 = vrot.slane %v6625_v13, 1  ;;  %v6051_v0 = vmax.f32 %v5162_v51, 0.0  ;;  %v5165_v4 = vpop.f32.mrb[196].mxu0 }
 0x74f   :  { %v6621_v19 = vmax.f32 %v6619_v52, %v6620_v1  ;;  %v6406_v40 = vmax.f32 %v6342_v49, %v6050_v46  ;;  %v5166_v61 = vadd.f32 %v5165_v4, %v10733_v5  ;;  %v5167_v37 = vpop.f32.mrb[197].mxu0 }
 0x750   :  { %v6627_v56 = vmax.f32 %v6625_v13, %v6626_v30  ;;  %v6407_v27 = vmax.f32 %v6343_v43, %v6051_v0  ;;  %v5168_v3 = vadd.f32 %v5167_v37, %v10742_v33 }
 0x751   :  { %v12631_v60 = vsel %vm7081_vm2, %v6621_v19, %v12610_v18  ;;  %v6052_v10 = vmax.f32 %v5166_v61, 0.0 }
 0x752   :  { %v6053_v17 = vmax.f32 %v5168_v3, 0.0  ;;  %v5171_v20 = vpop.f32.mrb[198].mxu0  ;;  %v12635_v36 = vsel %vm7081_vm2, %v6627_v56, %v12613_v59 }
 0x753   :  { %v6470_v25 = vmax.f32 %v6406_v40, %v6052_v10  ;;  %v5172_v38 = vadd.f32 %v5171_v20, %v10733_v5  ;;  %v5173_v28 = vpop.f32.mrb[199].mxu0 }
 0x754   :  { %v6471_v12 = vmax.f32 %v6407_v27, %v6053_v17  ;;  %v5174_v16 = vadd.f32 %v5173_v28, %v10742_v33 }
 0x755   :  { %v6054_v9 = vmax.f32 %v5172_v38, 0.0 }
 0x756   :  { %v6055_v41 = vmax.f32 %v5174_v16, 0.0  ;;  %v5177_v57 = vpop.f32.mrb[200].mxu0  ;;  %v5921_v42 = vpop.f32.mrb[218].mxu1 }
 0x757   :  { %v6534_v18 = vmax.f32 %v6470_v25, %v6054_v9  ;;  %v5922_v23 = vadd.f32 %v5921_v42, %v10733_v5  ;;  %v5179_v47 = vpop.f32.mrb[201].mxu0  ;;  %v5923_v48 = vpop.f32.mrb[219].mxu1  ;;  %v5178_v44 = vadd.f32 %v5177_v57, %v10733_v5 }
 0x758   :  { %v6535_v15 = vmax.f32 %v6471_v12, %v6055_v41  ;;  %v5924_v59 = vadd.f32 %v5923_v48, %v10742_v33  ;;  %v5180_v14 = vadd.f32 %v5179_v47, %v10742_v33 }
 0x759   :  { %v6628_v22 = vrot.slane %v6534_v18, 4  ;;  %v6304_v45 = vmax.f32 %v5922_v23, 0.0  ;;  %v6056_v6 = vmax.f32 %v5178_v44, 0.0 }
 0x75a   :  { %v6634_v53 = vrot.slane %v6535_v15, 4  ;;  %v6305_v24 = vmax.f32 %v5924_v59, 0.0  ;;  %v5183_v8 = vpop.f32.mrb[202].mxu0  ;;  %v5927_v63 = vpop.f32.mrb[220].mxu1  ;;  %v6057_v51 = vmax.f32 %v5180_v14, 0.0 }
 0x75b   :  { %v6629_v29 = vmax.f32 %v6534_v18, %v6628_v22  ;;  %v6584_v35 = vmax.f32 %v6520_v2, %v6304_v45  ;;  %v5184_v54 = vadd.f32 %v5183_v8, %v10733_v5  ;;  %v5185_v32 = vpop.f32.mrb[203].mxu0  ;;  %v5929_v39 = vpop.f32.mrb[221].mxu1 }
 0x75c   :  { %v6635_v55 = vmax.f32 %v6535_v15, %v6634_v53  ;;  %v6585_v52 = vmax.f32 %v6521_v31, %v6305_v24  ;;  %v5186_v49 = vadd.f32 %v5185_v32, %v10742_v33  ;;  %v5930_v32 = vadd.f32 %v5929_v39, %v10742_v33 }
 0x75d   :  { %v6630_v11 = vrot.slane %v6629_v29, 2  ;;  %v6928_v50 = vrot.slane %v6584_v35, 4  ;;  %v6058_v13 = vmax.f32 %v5184_v54, 0.0 }
 0x75e   :  { %v6636_v43 = vrot.slane %v6635_v55, 2  ;;  %v6934_v1 = vrot.slane %v6585_v52, 4  ;;  %v6059_v46 = vmax.f32 %v5186_v49, 0.0  ;;  %v5189_v30 = vpop.f32.mrb[204].mxu0 }
 0x75f   :  { %v6631_v0 = vmax.f32 %v6629_v29, %v6630_v11  ;;  %v6929_v4 = vmax.f32 %v6584_v35, %v6928_v50  ;;  %v6344_v2 = vmax.f32 %v6056_v6, %v6058_v13  ;;  %v5190_v19 = vadd.f32 %v5189_v30, %v10733_v5  ;;  %v5191_v40 = vpop.f32.mrb[205].mxu0 }
 0x760   :  { %v6637_v61 = vmax.f32 %v6635_v55, %v6636_v43  ;;  %v6935_v37 = vmax.f32 %v6585_v52, %v6934_v1  ;;  %v6345_v31 = vmax.f32 %v6057_v51, %v6059_v46  ;;  %v5192_v56 = vadd.f32 %v5191_v40, %v10742_v33 }
 0x761   :  { %v6632_v27 = vrot.slane %v6631_v0, 1  ;;  %v6930_v3 = vrot.slane %v6929_v4, 2  ;;  %v6060_v10 = vmax.f32 %v5190_v19, 0.0  ;;  %v5928_v35 = vadd.f32 %v5927_v63, %v10733_v5 }
 0x762   :  { %v6638_v17 = vrot.slane %v6637_v61, 1  ;;  %v6936_v20 = vrot.slane %v6935_v37, 2  ;;  %v6061_v25 = vmax.f32 %v5192_v56, 0.0  ;;  %v5195_v38 = vpop.f32.mrb[206].mxu0  ;;  %v6307_v30 = vmax.f32 %v5930_v32, 0.0  ;;  %v7239_v32 = vld [vmem:[%s12864_s9] sm:$0xff] }
 0x763   :  { %v6633_v28 = vmax.f32 %v6631_v0, %v6632_v27  ;;  %v6931_v12 = vmax.f32 %v6929_v4, %v6930_v3  ;;  %v6408_v16 = vmax.f32 %v6344_v2, %v6060_v10  ;;  %v5196_v9 = vadd.f32 %v5195_v38, %v10733_v5  ;;  %v5197_v41 = vpop.f32.mrb[207].mxu0 }
 0x764   :  { %v6639_v57 = vmax.f32 %v6637_v61, %v6638_v17  ;;  %v6937_v42 = vmax.f32 %v6935_v37, %v6936_v20  ;;  %v6409_v18 = vmax.f32 %v6345_v31, %v6061_v25  ;;  %v5198_v23 = vadd.f32 %v5197_v41, %v10742_v33 }
 0x765   :  { %v12651_v47 = vsel %vm7083_vm3, %v6633_v28, %v12631_v60  ;;  %v6932_v48 = vrot.slane %v6931_v12, 1  ;;  %v6062_v15 = vmax.f32 %v5196_v9, 0.0  ;;  %v6306_v39 = vmax.f32 %v5928_v35, 0.0 }
 0x766   :  { %v6938_v59 = vrot.slane %v6937_v42, 1  ;;  %v6063_v22 = vmax.f32 %v5198_v23, 0.0  ;;  %v5201_v44 = vpop.f32.mrb[208].mxu0  ;;  %v12655_v45 = vsel %vm7083_vm3, %v6639_v57, %v12635_v36 }
 0x767   :  { %v6933_v53 = vmax.f32 %v6931_v12, %v6932_v48  ;;  %v6472_v14 = vmax.f32 %v6408_v16, %v6062_v15  ;;  %v5202_v24 = vadd.f32 %v5201_v44, %v10733_v5  ;;  %v5203_v8 = vpop.f32.mrb[209].mxu0 }
 0x768   :  { %v6939_v29 = vmax.f32 %v6937_v42, %v6938_v59  ;;  %v6473_v54 = vmax.f32 %v6409_v18, %v6063_v22  ;;  %v5204_v60 = vadd.f32 %v5203_v8, %v10742_v33 }
 0x769   :  { %v6064_v55 = vmax.f32 %v5202_v24, 0.0  ;;  %v5933_v52 = vpop.f32.mrb[222].mxu1  ;;  %v12663_v49 = vsel %vm7085_vm4, %v6933_v53, %v12595_v26 }
 0x76a   :  { %v6065_v36 = vmax.f32 %v5204_v60, 0.0  ;;  %v5934_v11 = vadd.f32 %v5933_v52, %v10733_v5  ;;  %v5207_v6 = vpop.f32.mrb[210].mxu0  ;;  %v5935_v50 = vpop.f32.mrb[223].mxu1  ;;  %v12668_v13 = vsel %vm7085_vm4, %v6939_v29, %v12601_v7 }
 0x76b   :  { %v6536_v63 = vmax.f32 %v6472_v14, %v6064_v55  ;;  %v5936_v43 = vadd.f32 %v5935_v50, %v10742_v33  ;;  %v5209_v51 = vpop.f32.mrb[211].mxu0  ;;  %v5208_v26 = vadd.f32 %v5207_v6, %v10733_v5  ;;  %v7240_v55 = vld [vmem:[%s12864_s9 + $0x8] sm:$0xff] }
 0x76c   :  { %v6537_v1 = vmax.f32 %v6473_v54, %v6065_v36  ;;  %v6308_v46 = vmax.f32 %v5934_v11, 0.0  ;;  %v5210_v61 = vadd.f32 %v5209_v51, %v10742_v33  ;;  %v12686_v50 = vpack.c.bf16 %v7240_v55, %v7239_v32 }
 0x76d   :  { %v6640_v0 = vrot.slane %v6536_v63, 4  ;;  %v6309_v4 = vmax.f32 %v5936_v43, 0.0  ;;  %v5939_v2 = vpop.f32.mrb[224].mxu1  ;;  %v6066_v12 = vmax.f32 %v5208_v26, 0.0 }
 0x76e   :  { %v6646_v19 = vrot.slane %v6537_v1, 4  ;;  %v6394_v40 = vmax.f32 %v6306_v39, %v6308_v46  ;;  %v5940_v7 = vadd.f32 %v5939_v2, %v10733_v5  ;;  %v5213_v37 = vpop.f32.mrb[212].mxu0  ;;  %v5941_v31 = vpop.f32.mrb[225].mxu1  ;;  %v6067_v57 = vmax.f32 %v5210_v61, 0.0  ;;  %8285 = vmatprep.subr.bf16.mxu0 %v12686_v50 }
 0x76f   :  { %v6641_v56 = vmax.f32 %v6536_v63, %v6640_v0  ;;  %v6395_v27 = vmax.f32 %v6307_v30, %v6309_v4  ;;  %v5214_v3 = vadd.f32 %v5213_v37, %v10733_v5  ;;  %v5942_v10 = vadd.f32 %v5941_v31, %v10742_v33  ;;  %v5215_v17 = vpop.f32.mrb[213].mxu0 }
 0x770   :  { %v6647_v20 = vmax.f32 %v6537_v1, %v6646_v19  ;;  %v6310_v25 = vmax.f32 %v5940_v7, 0.0  ;;  %v5216_v38 = vadd.f32 %v5215_v17, %v10742_v33 }
 0x771   :  { %v6642_v28 = vrot.slane %v6641_v56, 2  ;;  %v6068_v16 = vmax.f32 %v5214_v3, 0.0  ;;  %v6311_v9 = vmax.f32 %v5942_v10, 0.0 }
 0x772   :  { %v6648_v41 = vrot.slane %v6647_v20, 2  ;;  %v6458_v42 = vmax.f32 %v6394_v40, %v6310_v25  ;;  %v6069_v18 = vmax.f32 %v5216_v38, 0.0  ;;  %v5219_v23 = vpop.f32.mrb[214].mxu0 }
 0x773   :  { %v6643_v48 = vmax.f32 %v6641_v56, %v6642_v28  ;;  %v6346_v15 = vmax.f32 %v6066_v12, %v6068_v16  ;;  %v6459_v59 = vmax.f32 %v6395_v27, %v6311_v9  ;;  %v5220_v22 = vadd.f32 %v5219_v23, %v10733_v5  ;;  %v5221_v44 = vpop.f32.mrb[215].mxu0 }
 0x774   :  { %v6649_v53 = vmax.f32 %v6647_v20, %v6648_v41  ;;  %v6347_v14 = vmax.f32 %v6067_v57, %v6069_v18  ;;  %v5222_v24 = vadd.f32 %v5221_v44, %v10742_v33 }
 0x775   :  { %v6644_v8 = vrot.slane %v6643_v48, 1  ;;  %v6070_v29 = vmax.f32 %v5220_v22, 0.0 }
 0x776   :  { %v6650_v35 = vrot.slane %v6649_v53, 1  ;;  %v6071_v54 = vmax.f32 %v5222_v24, 0.0  ;;  %v5225_v60 = vpop.f32.mrb[216].mxu0 }
 0x777   :  { %v6645_v52 = vmax.f32 %v6643_v48, %v6644_v8  ;;  %v6410_v36 = vmax.f32 %v6346_v15, %v6070_v29  ;;  %v5226_v11 = vadd.f32 %v5225_v60, %v10733_v5  ;;  %v5227_v6 = vpop.f32.mrb[217].mxu0 }
 0x778   :  { %v6651_v63 = vmax.f32 %v6649_v53, %v6650_v35  ;;  %v6411_v43 = vmax.f32 %v6347_v14, %v6071_v54  ;;  %v5228_v51 = vadd.f32 %v5227_v6, %v10742_v33 }
 0x779   :  { %v6072_v39 = vmax.f32 %v5226_v11, 0.0  ;;  %v12691_v1 = vsel %vm7085_vm4, %v6645_v52, %v12651_v47 }
 0x77a   :  { %v6073_v46 = vmax.f32 %v5228_v51, 0.0  ;;  %v5231_v30 = vpop.f32.mrb[218].mxu0  ;;  %v12696_v0 = vsel %vm7085_vm4, %v6651_v63, %v12655_v45 }
 0x77b   :  { %v6474_v26 = vmax.f32 %v6410_v36, %v6072_v39  ;;  %v5232_v4 = vadd.f32 %v5231_v30, %v10733_v5  ;;  %v5233_v2 = vpop.f32.mrb[219].mxu0 }
 0x77c   :  { %v6475_v19 = vmax.f32 %v6411_v43, %v6073_v46  ;;  %v5234_v40 = vadd.f32 %v5233_v2, %v10742_v33  ;;  %v5945_v61 = vpop.f32.mrb[226].mxu1 }
 0x77d   :  { %v6074_v7 = vmax.f32 %v5232_v4, 0.0  ;;  %v5946_v47 = vadd.f32 %v5945_v61, %v10733_v5  ;;  %v5947_v37 = vpop.f32.mrb[227].mxu1 }
 0x77e   :  { %v6075_v31 = vmax.f32 %v5234_v40, 0.0  ;;  %v5948_v56 = vadd.f32 %v5947_v37, %v10742_v33  ;;  %v5237_v27 = vpop.f32.mrb[220].mxu0 }
 0x77f   :  { %v6538_v3 = vmax.f32 %v6474_v26, %v6074_v7  ;;  %v6312_v10 = vmax.f32 %v5946_v47, 0.0  ;;  %v5239_v45 = vpop.f32.mrb[221].mxu0  ;;  %v5238_v12 = vadd.f32 %v5237_v27, %v10733_v5 }
 0x780   :  { %v6539_v17 = vmax.f32 %v6475_v19, %v6075_v31  ;;  %v6313_v20 = vmax.f32 %v5948_v56, 0.0  ;;  %v5951_v25 = vpop.f32.mrb[228].mxu1  ;;  %v5240_v18 = vadd.f32 %v5239_v45, %v10742_v33  ;;  %v13021_v19 = vld [vmem:[#allocation29_spill] sm:$0xff] }
 0x781   :  { %v6652_v38 = vrot.slane %v6538_v3, 4  ;;  %v6522_v28 = vmax.f32 %v6458_v42, %v6312_v10  ;;  %v5952_v16 = vadd.f32 %v5951_v25, %v10733_v5  ;;  %v5953_v9 = vpop.f32.mrb[229].mxu1  ;;  %v6076_v29 = vmax.f32 %v5238_v12, 0.0 }
 0x782   :  { %v6658_v41 = vrot.slane %v6539_v17, 4  ;;  %v6523_v57 = vmax.f32 %v6459_v59, %v6313_v20  ;;  %v5954_v23 = vadd.f32 %v5953_v9, %v10742_v33  ;;  %v5243_v48 = vpop.f32.mrb[222].mxu0  ;;  %v6077_v59 = vmax.f32 %v5240_v18, 0.0 }
 0x783   :  { %v6653_v15 = vmax.f32 %v6538_v3, %v6652_v38  ;;  %v6314_v22 = vmax.f32 %v5952_v16, 0.0  ;;  %v5244_v44 = vadd.f32 %v5243_v48, %v10733_v5  ;;  %v5245_v53 = vpop.f32.mrb[223].mxu0  ;;  %v6676_v40 = vrot.slane %v13021_v19, 4  ;;  %v13022_v38 = vld [vmem:[#allocation20_spill] sm:$0xff] }
 0x784   :  { %v6659_v14 = vmax.f32 %v6539_v17, %v6658_v41  ;;  %v6315_v24 = vmax.f32 %v5954_v23, 0.0  ;;  %v5246_v42 = vadd.f32 %v5245_v53, %v10742_v33 }
 0x785   :  { %v6654_v8 = vrot.slane %v6653_v15, 2  ;;  %v6586_v35 = vmax.f32 %v6522_v28, %v6314_v22  ;;  %v6078_v54 = vmax.f32 %v5244_v44, 0.0  ;;  %v6682_v28 = vrot.slane %v13022_v38, 4 }
 0x786   :  { %v6660_v60 = vrot.slane %v6659_v14, 2  ;;  %v6587_v32 = vmax.f32 %v6523_v57, %v6315_v24  ;;  %v6079_v55 = vmax.f32 %v5246_v42, 0.0  ;;  %v5249_v52 = vpop.f32.mrb[224].mxu0 }
 0x787   :  { %v6655_v36 = vmax.f32 %v6653_v15, %v6654_v8  ;;  %v6940_v11 = vrot.slane %v6586_v35, 4  ;;  %v6348_v6 = vmax.f32 %v6076_v29, %v6078_v54  ;;  %v5250_v63 = vadd.f32 %v5249_v52, %v10733_v5  ;;  %v5251_v43 = vpop.f32.mrb[225].mxu0 }
 0x788   :  { %v6661_v51 = vmax.f32 %v6659_v14, %v6660_v60  ;;  %v6946_v39 = vrot.slane %v6587_v32, 4  ;;  %v6349_v46 = vmax.f32 %v6077_v59, %v6079_v55  ;;  %v5252_v30 = vadd.f32 %v5251_v43, %v10742_v33 }
 0x789   :  { %v6656_v26 = vrot.slane %v6655_v36, 1  ;;  %v6941_v4 = vmax.f32 %v6586_v35, %v6940_v11  ;;  %v6080_v2 = vmax.f32 %v5250_v63, 0.0  ;;  %v6677_v14 = vmax.f32 %v13021_v19, %v6676_v40 }
 0x78a   :  { %v6662_v61 = vrot.slane %v6661_v51, 1  ;;  %v6947_v7 = vmax.f32 %v6587_v32, %v6946_v39  ;;  %v6081_v47 = vmax.f32 %v5252_v30, 0.0  ;;  %v5255_v37 = vpop.f32.mrb[226].mxu0 }
 0x78b   :  { %v6657_v31 = vmax.f32 %v6655_v36, %v6656_v26  ;;  %v6942_v56 = vrot.slane %v6941_v4, 2  ;;  %v6412_v27 = vmax.f32 %v6348_v6, %v6080_v2  ;;  %v5256_v3 = vadd.f32 %v5255_v37, %v10733_v5  ;;  %v5257_v10 = vpop.f32.mrb[227].mxu0 }
 0x78c   :  { %v6663_v45 = vmax.f32 %v6661_v51, %v6662_v61  ;;  %v6948_v17 = vrot.slane %v6947_v7, 2  ;;  %v6413_v20 = vmax.f32 %v6349_v46, %v6081_v47  ;;  %v5258_v25 = vadd.f32 %v5257_v10, %v10742_v33 }
 0x78d   :  { %v6943_v12 = vmax.f32 %v6941_v4, %v6942_v56  ;;  %v6082_v16 = vmax.f32 %v5256_v3, 0.0  ;;  %v7088_v9 = vsel %vm7087_vm5, %v6657_v31, %v12691_v1  ;;  %v6683_v1 = vmax.f32 %v13022_v38, %v6682_v28 }
 0x78e   :  { %v6949_v41 = vmax.f32 %v6947_v7, %v6948_v17  ;;  %v6083_v57 = vmax.f32 %v5258_v25, 0.0  ;;  %v5261_v18 = vpop.f32.mrb[228].mxu0  ;;  %v7097_v23 = vsel %vm7087_vm5, %v6663_v45, %v12696_v0  ;;  %v6678_v11 = vrot.slane %v6677_v14, 2 }
 0x78f   :  { %v6944_v48 = vrot.slane %v6943_v12, 1  ;;  %v6476_v15 = vmax.f32 %v6412_v27, %v6082_v16  ;;  %v5262_v22 = vadd.f32 %v5261_v18, %v10733_v5  ;;  %v5263_v44 = vpop.f32.mrb[229].mxu0  ;;  %v5957_v53 = vpop.f32.mrb[230].mxu1  ;;  %v6684_v39 = vrot.slane %v6683_v1, 2  ;;  %v7242_v16 = vld [vmem:[%s12864_s9 + $0x18] sm:$0xff] }
 0x790   :  { %v6950_v24 = vrot.slane %v6949_v41, 1  ;;  %v6477_v42 = vmax.f32 %v6413_v20, %v6083_v57  ;;  %v5264_v8 = vadd.f32 %v5263_v44, %v10742_v33  ;;  %v5959_v29 = vpop.f32.mrb[231].mxu1  ;;  %v5958_v0 = vadd.f32 %v5957_v53, %v10733_v5 }
 0x791   :  { %v6945_v35 = vmax.f32 %v6943_v12, %v6944_v48  ;;  %v6084_v54 = vmax.f32 %v5262_v22, 0.0  ;;  %v5960_v55 = vadd.f32 %v5959_v29, %v10742_v33  ;;  %v6679_v61 = vmax.f32 %v6677_v14, %v6678_v11  ;;  %v7241_v12 = vld [vmem:[%s12864_s9 + $0x10] sm:$0xff] }
 0x792   :  { %v6951_v60 = vmax.f32 %v6949_v41, %v6950_v24  ;;  %v6085_v59 = vmax.f32 %v5264_v8, 0.0  ;;  %v6316_v4 = vmax.f32 %v5958_v0, 0.0  ;;  %v6685_v37 = vmax.f32 %v6683_v1, %v6684_v39 }
 0x793   :  { %v6540_v32 = vmax.f32 %v6476_v15, %v6084_v54  ;;  %v5963_v52 = vpop.f32.mrb[232].mxu1  ;;  %v12726_v36 = vsel %vm7087_vm5, %v6945_v35, %v12663_v49  ;;  %v6317_v40 = vmax.f32 %v5960_v55, 0.0  ;;  %v8288_v14 = vpack.c.bf16 %v7242_v16, %v7241_v12  ;;  %v7246_v55 = vld [vmem:[%s12864_s9 + $0x38] sm:$0xff] }
 0x794   :  { %v6541_v6 = vmax.f32 %v6477_v42, %v6085_v59  ;;  %v5964_v63 = vadd.f32 %v5963_v52, %v10733_v5  ;;  %v5965_v43 = vpop.f32.mrb[233].mxu1  ;;  %v12731_v51 = vsel %vm7087_vm5, %v6951_v60, %v12668_v13  ;;  %v6680_v13 = vrot.slane %v6679_v61, 1  ;;  %v7243_v42 = vld [vmem:[%s12864_s9 + $0x20] sm:$0xff] }
 0x795   :  { %v6664_v46 = vrot.slane %v6540_v32, 4  ;;  %v5966_v30 = vadd.f32 %v5965_v43, %v10742_v33  ;;  %v6686_v17 = vrot.slane %v6685_v37, 1  ;;  %v7248_v43 = vld [vmem:[%s12864_s9 + $0x48] sm:$0xff] }
 0x796   :  { %v6670_v26 = vrot.slane %v6541_v6, 4  ;;  %v6318_v2 = vmax.f32 %v5964_v63, 0.0  ;;  %v6681_v38 = vmax.f32 %v6679_v61, %v6680_v13  ;;  %v7247_v63 = vld [vmem:[%s12864_s9 + $0x40] sm:$0xff] }
 0x797   :  { %v6665_v19 = vmax.f32 %v6540_v32, %v6664_v46  ;;  %v6319_v49 = vmax.f32 %v5966_v30, 0.0  ;;  %v6687_v41 = vmax.f32 %v6685_v37, %v6686_v17  ;;  %v7245_v32 = vld [vmem:[%s12864_s9 + $0x30] sm:$0xff] }
 0x798   :  { %v6671_v7 = vmax.f32 %v6541_v6, %v6670_v26  ;;  %v6396_v47 = vmax.f32 %v6316_v4, %v6318_v2  ;;  %v8296_v11 = vpack.c.bf16 %v7246_v55, %v7245_v32 }
 0x799   :  { %v6666_v31 = vrot.slane %v6665_v19, 2  ;;  %v6397_v56 = vmax.f32 %v6317_v40, %v6319_v49 }
 0x79a   :  { %v6672_v27 = vrot.slane %v6671_v7, 2 }
 0x79b   :  { %v6667_v3 = vmax.f32 %v6665_v19, %v6666_v31 }
 0x79c   :  { %v6673_v10 = vmax.f32 %v6671_v7, %v6672_v27 }
 0x79d   :  { %v6668_v45 = vrot.slane %v6667_v3, 1 }
 0x79e   :  { %v6674_v20 = vrot.slane %v6673_v10, 1 }
 0x79f   :  { %v6669_v25 = vmax.f32 %v6667_v3, %v6668_v45 }
 0x7a0   :  { %v6675_v28 = vmax.f32 %v6673_v10, %v6674_v20 }
 0x7a1   :  { %v7090_v57 = vsel %vm7089_vm6, %v6669_v25, %v7088_v9  ;;  %v7244_v9 = vld [vmem:[%s12864_s9 + $0x28] sm:$0xff] }
 0x7a2   :  { %v5969_v18 = vpop.f32.mrb[234].mxu1  ;;  %v7098_v48 = vsel %vm7089_vm6, %v6675_v28, %v7097_v23  ;;  %v7092_v15 = vsel %vm7091_vm7, %v6681_v38, %v7090_v57  ;;  %v8292_v60 = vpack.c.bf16 %v7244_v9, %v7243_v42 }
 0x7a3   :  { %v5970_v22 = vadd.f32 %v5969_v18, %v10733_v5  ;;  %v5971_v44 = vpop.f32.mrb[235].mxu1  ;;  %v7099_v53 = vsel %vm7091_vm7, %v6687_v41, %v7098_v48 }
 0x7a4   :  { %v5972_v24 = vadd.f32 %v5971_v44, %v10742_v33  ;;  %7214 = vmatprep.mubr.f32.mxu0 %v7099_v53 }
 0x7a5   :  { %v6320_v23 = vmax.f32 %v5970_v22, 0.0  ;;  %7215 = vmatmul.mubr.f32.vlgmr.msra.gmra.mrb[230].mxu0 %v7092_v15 }
 0x7a6   :  { %v6321_v8 = vmax.f32 %v5972_v24, 0.0  ;;  %v5975_v29 = vpop.f32.mrb[236].mxu1  ;;  %7219 = vmatprep.mubr.f32.mxu0 %v11706_v21  ;;  %8287 = vmatpush3.bf16.msra.mxu0 %v12686_v50 }
 0x7a7   :  { %v6460_v1 = vmax.f32 %v6396_v47, %v6320_v23  ;;  %v5976_v35 = vadd.f32 %v5975_v29, %v10733_v5  ;;  %v5977_v54 = vpop.f32.mrb[237].mxu1  ;;  %8289 = vmatprep.subr.bf16.mxu0 %v8288_v14 }
 0x7a8   :  { %v6461_v59 = vmax.f32 %v6397_v56, %v6321_v8  ;;  %v5978_v0 = vadd.f32 %v5977_v54, %v10742_v33 }
 0x7a9   :  { %v6322_v21 = vmax.f32 %v5976_v35, 0.0  ;;  %7220 = vmatmul.mubr.f32.gmra.mrb[232].mxu0 %v11701_v58  ;;  %v8300_v58 = vpack.c.bf16 %v7248_v43, %v7247_v63 }
 0x7aa   :  { %v6323_v50 = vmax.f32 %v5978_v0, 0.0  ;;  %7224 = vmatprep.mubr.f32.mxu0 %v12313_v34  ;;  %8291 = vmatpush3.bf16.msra.mxu0 %v8288_v14 }
 0x7ab   :  { %v6524_v52 = vmax.f32 %v6460_v1, %v6322_v21  ;;  %8293 = vmatprep.subr.bf16.mxu0 %v8292_v60 }
 0x7ac   :  { %v6525_v6 = vmax.f32 %v6461_v59, %v6323_v50 }
 0x7ad   :  { %7225 = vmatmul.mubr.f32.gmra.mrb[234].mxu0 %v12308_v62 }
 0x7ae   :  { %8295 = vmatpush3.bf16.msra.mxu0 %v8292_v60 }
 0x7af   :  { %8297 = vmatprep.subr.bf16.mxu0 %v8296_v11 }
 0x7b2   :  { %8299 = vmatpush3.bf16.msra.mxu0 %v8296_v11 }
 0x7b3   :  { %8301 = vmatprep.subr.bf16.mxu0 %v8300_v58 }
 0x7b5   :  { %v5981_v34 = vpop.f32.mrb[238].mxu1 }
 0x7b6   :  { %v5982_v39 = vadd.f32 %v5981_v34, %v10733_v5  ;;  %v5983_v46 = vpop.f32.mrb[239].mxu1  ;;  %8303 = vmatpush3.bf16.msra.mxu0 %v8300_v58 }
 0x7b7   :  { %v5984_v30 = vadd.f32 %v5983_v46, %v10742_v33 }
 0x7b8   :  { %v6324_v26 = vmax.f32 %v5982_v39, 0.0 }
 0x7b9   :  { %v6325_v4 = vmax.f32 %v5984_v30, 0.0  ;;  %v5987_v2 = vpop.f32.mrb[240].mxu1 }
 0x7ba   :  { %v6588_v19 = vmax.f32 %v6524_v52, %v6324_v26  ;;  %v5989_v40 = vpop.f32.mrb[241].mxu1  ;;  %v5988_v45 = vadd.f32 %v5987_v2, %v10733_v5 }
 0x7bb   :  { %v6589_v49 = vmax.f32 %v6525_v6, %v6325_v4  ;;  %v5990_v20 = vadd.f32 %v5989_v40, %v10742_v33 }
 0x7bc   :  { %v6952_v61 = vrot.slane %v6588_v19, 4  ;;  %v6326_v57 = vmax.f32 %v5988_v45, 0.0 }
 0x7bd   :  { %v6958_v62 = vrot.slane %v6589_v49, 4  ;;  %v6327_v48 = vmax.f32 %v5990_v20, 0.0  ;;  %v7637_v20 = vld [vmem:[%s12866_s8] ss:$0 sm:$0xff] }
 0x7be   :  { %v6953_v7 = vmax.f32 %v6588_v19, %v6952_v61  ;;  %v7249_v61 = vld [vmem:[%s12864_s9 + $0x50] sm:$0xff] }
 0x7bf   :  { %v6959_v47 = vmax.f32 %v6589_v49, %v6958_v62  ;;  %v7250_v62 = vld [vmem:[%s12864_s9 + $0x58] sm:$0xff] }
 0x7c0   :  { %v6954_v37 = vrot.slane %v6953_v7, 2 }
 0x7c1   :  { %v6960_v31 = vrot.slane %v6959_v47, 2 }
 0x7c2   :  { %v6955_v56 = vmax.f32 %v6953_v7, %v6954_v37  ;;  %v8304_v7 = vpack.c.bf16 %v7250_v62, %v7249_v61  ;;  %v7252_v37 = vld [vmem:[%s12864_s9 + $0x68] sm:$0xff] }
 0x7c3   :  { %v6961_v27 = vmax.f32 %v6959_v47, %v6960_v31  ;;  %v7251_v47 = vld [vmem:[%s12864_s9 + $0x60] sm:$0xff] }
 0x7c4   :  { %v6956_v3 = vrot.slane %v6955_v56, 1  ;;  %8305 = vmatprep.subr.bf16.mxu0 %v8304_v7  ;;  %v8308_v31 = vpack.c.bf16 %v7252_v37, %v7251_v47 }
 0x7c5   :  { %v6962_v13 = vrot.slane %v6961_v27, 1  ;;  %8307 = vmatpush3.bf16.msra.mxu0 %v8304_v7 }
 0x7c6   :  { %v6957_v10 = vmax.f32 %v6955_v56, %v6956_v3  ;;  %8309 = vmatprep.subr.bf16.mxu0 %v8308_v31  ;;  %v7253_v56 = vld [vmem:[%s12864_s9 + $0x70] sm:$0xff] }
 0x7c7   :  { %v6963_v17 = vmax.f32 %v6961_v27, %v6962_v13  ;;  %v7254_v27 = vld [vmem:[%s12864_s9 + $0x78] sm:$0xff]  ;;  %v7351_v13 = vld [vmem:[%s12865_s11] sm:$0xff] }
 0x7c8   :  { %v5993_v25 = vpop.f32.mrb[242].mxu1  ;;  %v7133_v38 = vsel %vm7089_vm6, %v6957_v10, %v12726_v36  ;;  %v8312_v3 = vpack.c.bf16 %v7254_v27, %v7253_v56  ;;  %v7352_v10 = vld [vmem:[%s12865_s11 + $0x8] sm:$0xff] }
 0x7c9   :  { %v5994_v28 = vadd.f32 %v5993_v25, %v10733_v5  ;;  %v5995_v12 = vpop.f32.mrb[243].mxu1  ;;  %v7140_v16 = vsel %vm7089_vm6, %v6963_v17, %v12731_v51  ;;  %8311 = vmatpush3.bf16.msra.mxu0 %v8308_v31  ;;  %v8316_v45 = vpack.c.bf16 %v7352_v10, %v7351_v13 }
 0x7ca   :  { %v5996_v41 = vadd.f32 %v5995_v12, %v10742_v33  ;;  %8313 = vmatprep.subr.bf16.mxu0 %v8312_v3 }
 0x7cb   :  { %v6328_v18 = vmax.f32 %v5994_v28, 0.0 }
 0x7cc   :  { %v6329_v15 = vmax.f32 %v5996_v41, 0.0  ;;  %v5999_v22 = vpop.f32.mrb[244].mxu1 }
 0x7cd   :  { %v6398_v44 = vmax.f32 %v6326_v57, %v6328_v18  ;;  %v6000_v53 = vadd.f32 %v5999_v22, %v10733_v5  ;;  %v6001_v14 = vpop.f32.mrb[245].mxu1  ;;  %8315 = vmatpush3.bf16.msra.mxu0 %v8312_v3  ;;  %v7353_v18 = vld [vmem:[%s12865_s11 + $0x10] sm:$0xff] }
 0x7ce   :  { %v6399_v24 = vmax.f32 %v6327_v48, %v6329_v15  ;;  %v6002_v36 = vadd.f32 %v6001_v14, %v10742_v33  ;;  %8317 = vmatprep.subr.bf16.mxu0 %v8316_v45  ;;  %v7354_v48 = vld [vmem:[%s12865_s11 + $0x18] sm:$0xff] }
 0x7cf   :  { %v6330_v42 = vmax.f32 %v6000_v53, 0.0 }
 0x7d0   :  { %v6331_v9 = vmax.f32 %v6002_v36, 0.0  ;;  %v7355_v36 = vld [vmem:[%s12865_s11 + $0x20] sm:$0xff] }
 0x7d1   :  { %v6462_v23 = vmax.f32 %v6398_v44, %v6330_v42  ;;  %v7356_v42 = vld [vmem:[%s12865_s11 + $0x28] sm:$0xff] }
 0x7d2   :  { %v6463_v8 = vmax.f32 %v6399_v24, %v6331_v9  ;;  %v8320_v24 = vpack.c.bf16 %v7354_v48, %v7353_v18 }
 0x7db   :  { %v6005_v29 = vpop.f32.mrb[246].mxu1 }
 0x7dc   :  { %v6006_v51 = vadd.f32 %v6005_v29, %v10733_v5  ;;  %v6007_v1 = vpop.f32.mrb[247].mxu1 }
 0x7dd   :  { %v6008_v35 = vadd.f32 %v6007_v1, %v10742_v33 }
 0x7de   :  { %v6332_v54 = vmax.f32 %v6006_v51, 0.0 }
 0x7df   :  { %v6333_v60 = vmax.f32 %v6008_v35, 0.0  ;;  %v6011_v59 = vpop.f32.mrb[248].mxu1 }
 0x7e0   :  { %v6526_v0 = vmax.f32 %v6462_v23, %v6332_v54  ;;  %v6012_v32 = vadd.f32 %v6011_v59, %v10733_v5  ;;  %v6013_v55 = vpop.f32.mrb[249].mxu1  ;;  %v7358_v59 = vld [vmem:[%s12865_s11 + $0x38] sm:$0xff] }
 0x7e1   :  { %v6527_v21 = vmax.f32 %v6463_v8, %v6333_v60  ;;  %v6014_v50 = vadd.f32 %v6013_v55, %v10742_v33  ;;  %v8324_v8 = vpack.c.bf16 %v7356_v42, %v7355_v36  ;;  %v7357_v60 = vld [vmem:[%s12865_s11 + $0x30] sm:$0xff] }
 0x7e2   :  { %v6334_v52 = vmax.f32 %v6012_v32, 0.0  ;;  %v7638_v32 = vld [vmem:[%s12867_s10] ss:$0 sm:$0xff] }
 0x7e3   :  { %v6335_v11 = vmax.f32 %v6014_v50, 0.0 }
 0x7e4   :  { %v6590_v6 = vmax.f32 %v6526_v0, %v6334_v52  ;;  %v8328_v0 = vpack.c.bf16 %v7358_v59, %v7357_v60 }
 0x7e5   :  { %v6591_v63 = vmax.f32 %v6527_v21, %v6335_v11 }
 0x7e6   :  { %v6964_v43 = vrot.slane %v6590_v6, 4 }
 0x7e7   :  { %v6970_v58 = vrot.slane %v6591_v63, 4 }
 0x7e8   :  { %v6965_v34 = vmax.f32 %v6590_v6, %v6964_v43 }
 0x7e9   :  { %v6971_v39 = vmax.f32 %v6591_v63, %v6970_v58 }
 0x7ea   :  { %v6966_v46 = vrot.slane %v6965_v34, 2 }
 0x7eb   :  { %v6972_v30 = vrot.slane %v6971_v39, 2 }
 0x7ec   :  { %v6967_v26 = vmax.f32 %v6965_v34, %v6966_v46 }
 0x7ed   :  { %v6973_v4 = vmax.f32 %v6971_v39, %v6972_v30  ;;  %v7639_v30 = vld [vmem:[%s12868_s12] ss:$0 sm:$0xff] }
 0x7ee   :  { %v6968_v2 = vrot.slane %v6967_v26, 1 }
 0x7ef   :  { %v6974_v19 = vrot.slane %v6973_v4, 1 }
 0x7f0   :  { %v6969_v40 = vmax.f32 %v6967_v26, %v6968_v2 }
 0x7f1   :  { %v6975_v5 = vmax.f32 %v6973_v4, %v6974_v19 }
 0x7f2   :  { %v7134_v49 = vsel %vm7091_vm7, %v6969_v40, %v7133_v38 }
 0x7f3   :  { %v7141_v33 = vsel %vm7091_vm7, %v6975_v5, %v7140_v16 }
 0x7f4   :  { %7229 = vmatprep.mubr.f32.mxu0 %v7141_v33 }
 0x7f5   :  { %7230 = vmatmul.mubr.f32.gmra.mrb[236].mxu0 %v7134_v49 }
 0x878   :  { %v7844_v17 = vpop.f32.mrb[230].mxu0 }
 0x879   :  { %v7845_v25 = vpop.f32.mrb[231].mxu0 }
 0x87a   :  { %v7846_v38 = vadd.f32 %v7845_v25, %v7844_v17 }
 0x87c   :  { %v7217_v28 = vadd.f32 %v7846_v38, %v7637_v20  ;;  %v7847_v12 = vpop.f32.mrb[232].mxu0 }
 0x87d   :  { %v7848_v16 = vpop.f32.mrb[233].mxu0 }
 0x87e   :  { %v7235_v41 = vmax.f32 %v7217_v28, 0.0  ;;  %v7849_v57 = vadd.f32 %v7848_v16, %v7847_v12 }
 0x880   :  { %v7222_v15 = vadd.f32 %v7849_v57, %v7637_v20  ;;  %v7850_v22 = vpop.f32.mrb[234].mxu0  ;;  %8176 = vmatprep.mubr.f32.mxu0 %v7235_v41 }
 0x881   :  { %v7851_v44 = vpop.f32.mrb[235].mxu0 }
 0x882   :  { %v7236_v53 = vmax.f32 %v7222_v15, 0.0  ;;  %v7852_v14 = vadd.f32 %v7851_v44, %v7850_v22 }
 0x884   :  { %v7227_v9 = vadd.f32 %v7852_v14, %v7637_v20  ;;  %8177 = vmatmul.mubr.f32.vlgmr.msra.gmra.mrb[238].mxu0 %v7236_v53 }
 0x885   :  { %8319 = vmatpush3.bf16.msra.mxu0 %v8316_v45 }
 0x886   :  { %v7237_v23 = vmax.f32 %v7227_v9, 0.0  ;;  %8321 = vmatprep.subr.bf16.mxu0 %v8320_v24 }
 0x888   :  { %8179 = vmatprep.mubr.f32.mxu0 %v7237_v23 }
 0x889   :  { %8323 = vmatpush3.bf16.msra.mxu0 %v8320_v24 }
 0x88a   :  { %8325 = vmatprep.subr.bf16.mxu0 %v8324_v8 }
 0x88d   :  { %8327 = vmatpush3.bf16.msra.mxu0 %v8324_v8 }
 0x88e   :  { %8329 = vmatprep.subr.bf16.mxu0 %v8328_v0 }
 0x891   :  { %8331 = vmatpush3.bf16.msra.mxu0 %v8328_v0 }
 0x8c8   :  { %v7853_v29 = vpop.f32.mrb[236].mxu0 }
 0x8c9   :  { %v7854_v51 = vpop.f32.mrb[237].mxu0 }
 0x8ca   :  { %v7855_v1 = vadd.f32 %v7854_v51, %v7853_v29 }
 0x8cc   :  { %v7232_v35 = vadd.f32 %v7855_v1, %v7637_v20 }
 0x8ce   :  { %v7238_v54 = vmax.f32 %v7232_v35, 0.0 }
 0x8d0   :  { %8180 = vmatmul.mubr.f32.gmra.mrb[240].mxu0 %v7238_v54 }
 0x957   :  { %v8178_v55 = vpop.f32.mrb[238].mxu0 }
 0x958   :  { %v7334_v21 = vadd.f32 %v8178_v55, %v7638_v32  ;;  %v7328_v50 = vpop.f32.mrb[239].mxu0 }
 0x959   :  { %v7329_v52 = vadd.f32 %v7638_v32, %v7328_v50 }
 0x95a   :  { %v7348_v6 = vmax.f32 %v7334_v21, 0.0 }
 0x95b   :  { %v7347_v11 = vmax.f32 %v7329_v52, 0.0 }
 0x95d   :  { %8198 = vmatprep.mubr.msk.f32.mxu0 %vm3441_vm0, %v7347_v11 }
 0x95e   :  { %8199 = vmatmul.mubr.msk.f32.vlgmr.msra.gmra.mrb[242].mxu0 %vm3441_vm0, %v7348_v6 }
 0x9a3   :  { %v8181_v63 = vpop.f32.mrb[240].mxu0 }
 0x9a4   :  { %v7344_v43 = vadd.f32 %v8181_v63, %v7638_v32  ;;  %v7338_v58 = vpop.f32.mrb[241].mxu0 }
 0x9a5   :  { %v7339_v34 = vadd.f32 %v7638_v32, %v7338_v58 }
 0x9a6   :  { %v7350_v46 = vmax.f32 %v7344_v43, 0.0 }
 0x9a7   :  { %v7349_v39 = vmax.f32 %v7339_v34, 0.0 }
 0x9a9   :  { %8201 = vmatprep.mubr.msk.f32.mxu0 %vm3441_vm0, %v7349_v39 }
 0x9aa   :  { %8202 = vmatmul.mubr.msk.f32.gmra.mrb[244].mxu0 %vm3441_vm0, %v7350_v46 }
 0xa31   :  { %v8200_v26 = vpop.f32.mrb[242].mxu0 }
 0xa32   :  { %v7450_v4 = vadd.f32 %v8200_v26, %v7639_v30  ;;  %v7444_v2 = vpop.f32.mrb[243].mxu0 }
 0xa33   :  { %v7445_v19 = vadd.f32 %v7639_v30, %v7444_v2 }
 0xa34   :  { %7465 = vst.msk [vmem:[%s12869_s13 + $0x8] sm:$0xff] %vm7463_vm8, %v7450_v4 }
 0xa35   :  { %7464 = vst.msk [vmem:[%s12869_s13] sm:$0xff] %vm7463_vm8, %v7445_v19 }
 0xa7d   :  { %v8203_v40 = vpop.f32.mrb[244].mxu0 }
 0xa7e   :  { %v7460_v5 = vadd.f32 %v8203_v40, %v7639_v30  ;;  %v7454_v49 = vpop.f32.mrb[245].mxu0 }
 0xa7f   :  { %v7455_v33 = vadd.f32 %v7639_v30, %v7454_v49 }
 0xa80   :  { %7467 = vst.msk [vmem:[%s12869_s13 + $0x18] sm:$0xff] %vm7463_vm8, %v7460_v5 }
 0xa81   :  { %7466 = vst.msk [vmem:[%s12869_s13 + $0x10] sm:$0xff] %vm7463_vm8, %v7455_v33 }

</bundles_post_ra>
